<compile_context>
chip_gen: v6e
topology: v6e:2x2x1
jax: 0.10.0
libtpu: 0.0.40
codegen_flags: <defaults>
</compile_context>

<pallas_src>
import functools

import jax
import jax.numpy as jnp
import numpy as np
from jax.experimental import pallas as pl
from jax.experimental.pallas import tpu as pltpu


# ------------------------------ fused kernel --------------------------------

def _titans_attn_kernel(x_ref, gamma_ref, beta_ref, wqkv_ref, pmk_ref, pmv_ref,
                        wout_ref, bout_ref,
                        out_ref, kcache_ref, vcache_ref,
                        qkv_vmem,
                        *, eps, heads, dim_head, num_pm, q_tile):
    f32, bf16 = jnp.float32, jnp.bfloat16
    H, Dh, P, TQ = heads, dim_head, num_pm, q_tile
    HD = H * Dh
    S = x_ref.shape[1]

    # -------- phase 1: once per batch element (first q-tile) ----------------
    # Fused LayerNorm + QKV projection for the whole segment, stored into a
    # persistent VMEM scratch; also emit the k/v cache in head-major layout
    # ([B, H, S, Dh] is the module's output contract).  These 32-lane cache
    # stores are off the hot output path and happen once per batch element.
    @pl.when(pl.program_id(1) == 0)
    def _():
        x = x_ref[0].astype(f32)                                    # [S, D]
        mu = jnp.mean(x, axis=-1, keepdims=True)
        var = jnp.mean((x - mu) ** 2, axis=-1, keepdims=True)       # biased, as torch
        xn = (x - mu) * jax.lax.rsqrt(var + eps)
        xn = xn * gamma_ref[...] + beta_ref[...]
        # softmax scale is pre-folded into the Q columns of wqkv (bf16).
        qkv = jnp.dot(xn.astype(bf16), wqkv_ref[...],
                      preferred_element_type=f32).astype(bf16)      # [S, 3*HD]
        qkv_vmem[...] = qkv
        for h in range(H):
            kcache_ref[0, h, :, :] = qkv[:, HD + h * Dh:HD + (h + 1) * Dh]
            vcache_ref[0, h, :, :] = qkv[:, 2 * HD + h * Dh:2 * HD + (h + 1) * Dh]

    # -------- phase 2: every q-tile ------------------------------------------
    q_start = pl.multiple_of(pl.program_id(1) * TQ, TQ)
    q_rows = qkv_vmem[pl.ds(q_start, TQ), :]                        # [TQ, 3*HD]
    q_all = q_rows[:, :HD]                                          # scale pre-folded
    k_all = qkv_vmem[:, HD:2 * HD]                                  # [S, HD]
    v_all = qkv_vmem[:, 2 * HD:3 * HD]                              # [S, HD]

    # Causal additive bias for this q-tile, built in-register from iotas
    # (no mask DMA).  Persistent-memory columns are always visible.
    row = jax.lax.broadcasted_iota(jnp.int32, (TQ, S), 0) + pl.program_id(1) * TQ
    col = jax.lax.broadcasted_iota(jnp.int32, (TQ, S), 1)
    bias = jnp.where(col > row, jnp.float32(-1e30), jnp.float32(0.0))   # [TQ, S]

    outs = []
    for h in range(H):                                              # static unroll
        q_h = q_all[:, h * Dh:(h + 1) * Dh]                         # [TQ, Dh] bf16
        k_h = k_all[:, h * Dh:(h + 1) * Dh]                         # [S, Dh]
        v_h = v_all[:, h * Dh:(h + 1) * Dh]                         # [S, Dh]

        # Scores: contract over Dh directly (no k.T relayout before the MXU).
        s = jax.lax.dot_general(q_h, k_h, (((1,), (1,)), ((), ())),
                                preferred_element_type=f32) + bias  # [TQ, S]

        # Persistent-memory columns: P is tiny -> keep them on the VPU/XLU
        # (broadcast-mul + lane reduce) instead of an N=P MXU push.
        q_f = q_h.astype(f32)
        pmk_h = pmk_ref[h].astype(f32)                              # [P, Dh]
        pmv_h = pmv_ref[h].astype(f32)                              # [P, Dh]
        s_pm = [jnp.sum(q_f * pmk_h[p:p + 1, :], axis=-1, keepdims=True)
                for p in range(P)]                                  # P x [TQ, 1]

        # Softmax over [pm | seq] columns; stats in f32, reciprocal on the EUP.
        m = jnp.max(s, axis=-1, keepdims=True)
        for sp in s_pm:
            m = jnp.maximum(m, sp)
        p_seq = jnp.exp(s - m)
        p_pm = [jnp.exp(sp - m) for sp in s_pm]
        denom = jnp.sum(p_seq, axis=-1, keepdims=True)
        for pp in p_pm:
            denom = denom + pp
        inv = pl.reciprocal(denom, approx=True)                     # [TQ, 1]

        acc = jax.lax.dot_general(p_seq.astype(bf16), v_h,
                                  (((1,), (0,)), ((), ())),
                                  preferred_element_type=f32)       # [TQ, Dh]
        for p in range(P):
            acc = acc + p_pm[p] * pmv_h[p:p + 1, :]
        outs.append((acc * inv).astype(bf16))

    # Pack heads along lanes -> [TQ, HD]; one full-width MXU push for the
    # output projection and a single lane-dense [TQ, dim] store.
    attn = jnp.concatenate(outs, axis=-1)                           # [TQ, HD] bf16
    out = jnp.dot(attn, wout_ref[...], preferred_element_type=f32) + bout_ref[...]
    out_ref[0] = out.astype(out_ref.dtype)


# --------------------------- SegmentedAttention fwd -------------------------

def segmented_attention_forward(params, x, *, heads, dim_head,
                                num_persist_mem_tokens, segment_len=None,
                                output_gating=None, eps=1e-5, q_tile=128):
    """Equivalent of SegmentedAttention.forward (training/prefill path:
    cache=None, sliding=False, accept_value_residual=False, input_dim==dim)."""
    del segment_len  # unused in the non-sliding mask path (as in torch)
    b, s, dim = x.shape
    h, dh = heads, dim_head
    hd = h * dh
    npm = num_persist_mem_tokens
    scale = dim_head ** (-0.5)
    bf16 = jnp.bfloat16

    # Weight prep (tiny, once per call): fold the softmax scale into the Q
    # columns of the QKV weight in f32, then cast weights to bf16 for the MXU.
    w_qkv = params["w_qkv"].at[:, :hd].multiply(jnp.float32(scale)).astype(bf16)
    w_out = params["w_out"].astype(bf16)
    pm = params["persistent_memory"].astype(bf16)                   # [2, H, P, Dh]

    # q-row tile: 128 rows when S divides; otherwise fall back to a single
    # full-S tile.  TODO(synk): pad/mask a remainder q-tile for S % 128 != 0.
    tq = q_tile if (s >= q_tile and s % q_tile == 0) else s
    grid = (b, s // tq)

    kernel = functools.partial(
        _titans_attn_kernel, eps=eps, heads=h, dim_head=dh,
        num_pm=npm, q_tile=tq)

    out, k_cache, v_cache = pl.pallas_call(
        kernel,
        out_shape=(
            jax.ShapeDtypeStruct((b, s, dim), bf16),        # attention output
            jax.ShapeDtypeStruct((b, h, s, dh), bf16),      # k cache
            jax.ShapeDtypeStruct((b, h, s, dh), bf16),      # v cache / value residual
        ),
        grid=grid,
        in_specs=[
            pl.BlockSpec((1, s, dim), lambda bi, qi: (bi, 0, 0)),       # x (resident per b)
            pl.BlockSpec((1, dim), lambda bi, qi: (0, 0)),              # ln gamma
            pl.BlockSpec((1, dim), lambda bi, qi: (0, 0)),              # ln beta
            pl.BlockSpec((dim, 3 * hd), lambda bi, qi: (0, 0)),         # w_qkv (resident)
            pl.BlockSpec((h, npm, dh), lambda bi, qi: (0, 0, 0)),       # pm keys
            pl.BlockSpec((h, npm, dh), lambda bi, qi: (0, 0, 0)),       # pm values
            pl.BlockSpec((hd, dim), lambda bi, qi: (0, 0)),             # w_out (resident)
            pl.BlockSpec((1, dim), lambda bi, qi: (0, 0)),              # b_out
        ],
        out_specs=(
            pl.BlockSpec((1, tq, dim), lambda bi, qi: (bi, qi, 0)),     # lane-dense out
            pl.BlockSpec((1, h, s, dh), lambda bi, qi: (bi, 0, 0, 0)),  # resident per b
            pl.BlockSpec((1, h, s, dh), lambda bi, qi: (bi, 0, 0, 0)),  # resident per b
        ),
        scratch_shapes=[pltpu.VMEM((s, 3 * hd), bf16)],                 # qkv slab
        compiler_params=pltpu.CompilerParams(
            dimension_semantics=("parallel", "arbitrary"),
            vmem_limit_bytes=32 * 1024 * 1024,
        ),
    )(x, params["ln_gamma"], params["ln_beta"], w_qkv, pm[0], pm[1],
      w_out, params["b_out"])

    if output_gating is not None:
        out = out * output_gating

    orig_v = v_cache                       # no value-residual mixing in this path
    next_cache = (k_cache, v_cache)
    return out, (orig_v, next_cache)


# ------------------------------- pure-JAX ref -------------------------------
# Mirrors the torch math with bf16 MXU operands / f32 accumulation.  Intended
# deltas vs. the kernel: scale applied to q post-matmul (kernel folds it into
# the bf16 Q weight), exact division instead of the approximate EUP
# reciprocal, and accumulation order.

def reference_forward(params, x, *, heads, dim_head, num_persist_mem_tokens,
                      eps=1e-5):
    b, s, dim = x.shape
    h, dh, npm = heads, dim_head, num_persist_mem_tokens
    scale = dim_head ** (-0.5)
    f32, bf16 = jnp.float32, jnp.bfloat16

    mu = x.mean(-1, keepdims=True)
    var = ((x - mu) ** 2).mean(-1, keepdims=True)
    xn = (x - mu) * jax.lax.rsqrt(var + eps)
    xn = xn * params["ln_gamma"].reshape(dim) + params["ln_beta"].reshape(dim)
    qkv = jnp.dot(xn.astype(bf16), params["w_qkv"].astype(bf16),
                  preferred_element_type=f32).astype(bf16)
    q, k, v = jnp.split(qkv, 3, axis=-1)
    shp = lambda t: t.reshape(b, s, h, dh).transpose(0, 2, 1, 3)
    q, k, v = shp(q), shp(k), shp(v)
    q = (q.astype(f32) * scale).astype(bf16)

    pmk = jnp.broadcast_to(params["persistent_memory"][0].astype(bf16)[None],
                           (b, h, npm, dh))
    pmv = jnp.broadcast_to(params["persistent_memory"][1].astype(bf16)[None],
                           (b, h, npm, dh))
    kk = jnp.concatenate([pmk, k], axis=2)
    vv = jnp.concatenate([pmv, v], axis=2)

    sc = jnp.einsum("bhqd,bhkd->bhqk", q, kk, preferred_element_type=f32)
    causal = jnp.triu(jnp.ones((s, s), bool), k=1)
    msk = jnp.concatenate([jnp.zeros((s, npm), bool), causal], axis=1)
    sc = sc + jnp.where(msk, jnp.float32(-1e30), jnp.float32(0.0))[None, None]

    m = jnp.max(sc, axis=-1, keepdims=True)
    p = jnp.exp(sc - m)
    denom = jnp.sum(p, axis=-1, keepdims=True)
    acc = jnp.einsum("bhqk,bhkd->bhqd", p.astype(bf16), vv,
                     preferred_element_type=f32)
    o = (acc / denom).astype(bf16)
    o = o.transpose(0, 2, 1, 3).reshape(b, s, h * dh)
    out = jnp.dot(o, params["w_out"].astype(bf16),
                  preferred_element_type=f32) + params["b_out"].reshape(dim)
    return out, k, v


# ---------------------------------- main ------------------------------------

if __name__ == "__main__":
    B, S = 2, 256
    DIM, HEADS, DIM_HEAD = 128, 4, 32
    SEGMENT_LEN = 64            # unused in the non-sliding mask path (as in torch)
    NUM_PERSIST = 2

    key = jax.random.PRNGKey(0)
    k_g, k_b, k_qkv, k_wo, k_bo, k_pm, k_x = jax.random.split(key, 7)

    params = dict(
        ln_gamma=(1.0 + 0.1 * jax.random.normal(k_g, (1, DIM), jnp.float32)),
        ln_beta=(0.1 * jax.random.normal(k_b, (1, DIM), jnp.float32)),
        w_qkv=(jax.random.normal(k_qkv, (DIM, 3 * HEADS * DIM_HEAD), jnp.float32)
               / jnp.sqrt(DIM)),
        w_out=(jax.random.normal(k_wo, (HEADS * DIM_HEAD, DIM), jnp.float32)
               / jnp.sqrt(HEADS * DIM_HEAD)),
        b_out=(0.01 * jax.random.normal(k_bo, (1, DIM), jnp.float32)),
        # nn.Parameter(torch.zeros(2, heads, npm, dim_head)); random here so the
        # persistent-memory path actually contributes to the output.
        persistent_memory=(0.02 * jax.random.normal(
            k_pm, (2, HEADS, NUM_PERSIST, DIM_HEAD), jnp.float32)),
    )

    x = jax.random.normal(k_x, (B, S, DIM), jnp.float32)

    fwd = jax.jit(functools.partial(
        segmented_attention_forward, heads=HEADS, dim_head=DIM_HEAD,
        num_persist_mem_tokens=NUM_PERSIST, segment_len=SEGMENT_LEN))

    out, (orig_v, cache) = fwd(params, x)
    out = jax.block_until_ready(out)

    ref_out, ref_k, ref_v = reference_forward(
        params, x, heads=HEADS, dim_head=DIM_HEAD,
        num_persist_mem_tokens=NUM_PERSIST)

    np.testing.assert_allclose(np.asarray(out.astype(jnp.float32)),
                               np.asarray(ref_out, dtype=np.float32),
                               rtol=2e-2, atol=2e-2)
    np.testing.assert_allclose(np.asarray(cache[0].astype(jnp.float32)),
                               np.asarray(ref_k.astype(jnp.float32)),
                               rtol=2e-2, atol=2e-2)
    np.testing.assert_allclose(np.asarray(cache[1].astype(jnp.float32)),
                               np.asarray(ref_v.astype(jnp.float32)),
                               rtol=2e-2, atol=2e-2)

    assert out.shape == (B, S, DIM)
    assert orig_v.shape == (B, HEADS, S, DIM_HEAD)
    assert cache[0].shape == (B, HEADS, S, DIM_HEAD)
    assert cache[1].shape == (B, HEADS, S, DIM_HEAD)

    print("KERNEL_OK")
</pallas_src>

<mosaic_0001>
module attributes {stable_mosaic.version = 11 : i64} {
  func.func @_titans_attn_kernel(%arg0: i32, %arg1: i32, %arg2: memref<1x256x128xf32, #tpu.memory_space<vmem>>, %arg3: memref<1x128xf32, #tpu.memory_space<vmem>>, %arg4: memref<1x128xf32, #tpu.memory_space<vmem>>, %arg5: memref<128x384xbf16, #tpu.memory_space<vmem>>, %arg6: memref<4x2x32xbf16, #tpu.memory_space<vmem>>, %arg7: memref<4x2x32xbf16, #tpu.memory_space<vmem>>, %arg8: memref<128x128xbf16, #tpu.memory_space<vmem>>, %arg9: memref<1x128xf32, #tpu.memory_space<vmem>>, %arg10: memref<1x128x128xbf16, #tpu.memory_space<vmem>>, %arg11: memref<1x4x256x32xbf16, #tpu.memory_space<vmem>>, %arg12: memref<1x4x256x32xbf16, #tpu.memory_space<vmem>>, %arg13: memref<256x384xbf16, #tpu.memory_space<vmem>>) attributes {dimension_semantics = [#tpu.dimension_semantics<parallel>, #tpu.dimension_semantics<arbitrary>], iteration_bounds = array<i64: 2, 2>, scalar_prefetch = 0 : i64, scratch_operands = 1 : i64, tpu.core_type = #tpu.core_type<tc>, window_params = [{transform_indices = @transform_0, window_bounds = array<i64: 1, 256, 128>}, {pipeline_mode = #tpu.pipeline_mode<synchronous>, transform_indices = @transform_1, window_bounds = array<i64: 1, 128>}, {pipeline_mode = #tpu.pipeline_mode<synchronous>, transform_indices = @transform_2, window_bounds = array<i64: 1, 128>}, {pipeline_mode = #tpu.pipeline_mode<synchronous>, transform_indices = @transform_3, window_bounds = array<i64: 128, 384>}, {pipeline_mode = #tpu.pipeline_mode<synchronous>, transform_indices = @transform_4, window_bounds = array<i64: 4, 2, 32>}, {pipeline_mode = #tpu.pipeline_mode<synchronous>, transform_indices = @transform_5, window_bounds = array<i64: 4, 2, 32>}, {pipeline_mode = #tpu.pipeline_mode<synchronous>, transform_indices = @transform_6, window_bounds = array<i64: 128, 128>}, {pipeline_mode = #tpu.pipeline_mode<synchronous>, transform_indices = @transform_7, window_bounds = array<i64: 1, 128>}, {transform_indices = @transform_8, window_bounds = array<i64: 1, 128, 128>}, {transform_indices = @transform_9, window_bounds = array<i64: 1, 4, 256, 32>}, {transform_indices = @transform_10, window_bounds = array<i64: 1, 4, 256, 32>}]} {
    %c0_i32 = arith.constant 0 : i32
    %0 = arith.cmpi eq, %arg1, %c0_i32 : i32
    %1 = arith.extui %0 : i1 to i32
    %c0_i32_0 = arith.constant 0 : i32
    %2 = arith.cmpi ne, %1, %c0_i32_0 : i32
    scf.if %2 {
      %c0_58 = arith.constant 0 : index
      %c0_59 = arith.constant 0 : index
      %c0_60 = arith.constant 0 : index
      %241 = vector.load %arg2[%c0_58, %c0_59, %c0_60] : memref<1x256x128xf32, #tpu.memory_space<vmem>>, vector<1x256x128xf32>
      %242 = vector.shape_cast %241 : vector<1x256x128xf32> to vector<256x128xf32>
      %cst_61 = arith.constant dense<0.000000e+00> : vector<256xf32>
      %243 = vector.multi_reduction <add>, %242, %cst_61 [1] : vector<256x128xf32> to vector<256xf32>
      %244 = vector.shape_cast %243 : vector<256xf32> to vector<256x1xf32>
      %cst_62 = arith.constant 1.280000e+02 : f32
      %245 = vector.broadcast %cst_62 : f32 to vector<256x1xf32>
      %246 = arith.divf %244, %245 : vector<256x1xf32>
      %247 = vector.broadcast %246 : vector<256x1xf32> to vector<256x128xf32>
      %248 = arith.subf %242, %247 : vector<256x128xf32>
      %249 = arith.mulf %248, %248 : vector<256x128xf32>
      %cst_63 = arith.constant dense<0.000000e+00> : vector<256xf32>
      %250 = vector.multi_reduction <add>, %249, %cst_63 [1] : vector<256x128xf32> to vector<256xf32>
      %251 = vector.shape_cast %250 : vector<256xf32> to vector<256x1xf32>
      %cst_64 = arith.constant 1.280000e+02 : f32
      %252 = vector.broadcast %cst_64 : f32 to vector<256x1xf32>
      %253 = arith.divf %251, %252 : vector<256x1xf32>
      %254 = vector.broadcast %246 : vector<256x1xf32> to vector<256x128xf32>
      %255 = arith.subf %242, %254 : vector<256x128xf32>
      %cst_65 = arith.constant 9.99999974E-6 : f32
      %256 = vector.broadcast %cst_65 : f32 to vector<256x1xf32>
      %257 = arith.addf %253, %256 : vector<256x1xf32>
      %258 = math.rsqrt %257 : vector<256x1xf32>
      %259 = vector.broadcast %258 : vector<256x1xf32> to vector<256x128xf32>
      %260 = arith.mulf %255, %259 : vector<256x128xf32>
      %c0_66 = arith.constant 0 : index
      %c0_67 = arith.constant 0 : index
      %261 = vector.load %arg3[%c0_66, %c0_67] : memref<1x128xf32, #tpu.memory_space<vmem>>, vector<1x128xf32>
      %262 = vector.broadcast %261 : vector<1x128xf32> to vector<256x128xf32>
      %263 = arith.mulf %260, %262 : vector<256x128xf32>
      %c0_68 = arith.constant 0 : index
      %c0_69 = arith.constant 0 : index
      %264 = vector.load %arg4[%c0_68, %c0_69] : memref<1x128xf32, #tpu.memory_space<vmem>>, vector<1x128xf32>
      %265 = vector.broadcast %264 : vector<1x128xf32> to vector<256x128xf32>
      %266 = arith.addf %263, %265 : vector<256x128xf32>
      %267 = arith.truncf %266 : vector<256x128xf32> to vector<256x128xbf16>
      %c0_70 = arith.constant 0 : index
      %c0_71 = arith.constant 0 : index
      %268 = vector.load %arg5[%c0_70, %c0_71] : memref<128x384xbf16, #tpu.memory_space<vmem>>, vector<128x384xbf16>
      %cst_72 = arith.constant dense<0.000000e+00> : vector<256x384xf32>
      %269 = tpu.matmul %267, %268, %cst_72 {dimension_numbers = #tpu.dot_dimension_numbers<[1], [0], [0], [1], [0, 0, 1, 1], [], []>} : vector<256x128xbf16>, vector<128x384xbf16>, vector<256x384xf32> -> vector<256x384xf32>
      %270 = arith.truncf %269 : vector<256x384xf32> to vector<256x384xbf16>
      %c0_73 = arith.constant 0 : index
      %c0_74 = arith.constant 0 : index
      %271 = vector.load %arg13[%c0_73, %c0_74] : memref<256x384xbf16, #tpu.memory_space<vmem>>, vector<256x384xbf16>
      tpu.vector_store %arg13[%c0_73, %c0_74], %270 {strides = array<i32>} : memref<256x384xbf16, #tpu.memory_space<vmem>>, vector<256x384xbf16>,
      %272 = vector.extract_strided_slice %270 {offsets = [0, 128], sizes = [256, 32], strides = [1, 1]} : vector<256x384xbf16> to vector<256x32xbf16>
      %c0_75 = arith.constant 0 : index
      %c0_76 = arith.constant 0 : index
      %c0_77 = arith.constant 0 : index
      %c0_78 = arith.constant 0 : index
      %273 = vector.load %arg11[%c0_75, %c0_76, %c0_77, %c0_78] : memref<1x4x256x32xbf16, #tpu.memory_space<vmem>>, vector<1x1x256x32xbf16>
      %274 = vector.shape_cast %273 : vector<1x1x256x32xbf16> to vector<256x32xbf16>
      %275 = vector.shape_cast %272 : vector<256x32xbf16> to vector<1x1x256x32xbf16>
      tpu.vector_store %arg11[%c0_75, %c0_76, %c0_77, %c0_78], %275 {strides = array<i32>} : memref<1x4x256x32xbf16, #tpu.memory_space<vmem>>, vector<1x1x256x32xbf16>,
      %276 = vector.extract_strided_slice %270 {offsets = [0, 256], sizes = [256, 32], strides = [1, 1]} : vector<256x384xbf16> to vector<256x32xbf16>
      %c0_79 = arith.constant 0 : index
      %c0_80 = arith.constant 0 : index
      %c0_81 = arith.constant 0 : index
      %c0_82 = arith.constant 0 : index
      %277 = vector.load %arg12[%c0_79, %c0_80, %c0_81, %c0_82] : memref<1x4x256x32xbf16, #tpu.memory_space<vmem>>, vector<1x1x256x32xbf16>
      %278 = vector.shape_cast %277 : vector<1x1x256x32xbf16> to vector<256x32xbf16>
      %279 = vector.shape_cast %276 : vector<256x32xbf16> to vector<1x1x256x32xbf16>
      tpu.vector_store %arg12[%c0_79, %c0_80, %c0_81, %c0_82], %279 {strides = array<i32>} : memref<1x4x256x32xbf16, #tpu.memory_space<vmem>>, vector<1x1x256x32xbf16>,
      %280 = vector.extract_strided_slice %270 {offsets = [0, 160], sizes = [256, 32], strides = [1, 1]} : vector<256x384xbf16> to vector<256x32xbf16>
      %c0_83 = arith.constant 0 : index
      %c1_84 = arith.constant 1 : index
      %c0_85 = arith.constant 0 : index
      %c0_86 = arith.constant 0 : index
      %281 = vector.load %arg11[%c0_83, %c1_84, %c0_85, %c0_86] : memref<1x4x256x32xbf16, #tpu.memory_space<vmem>>, vector<1x1x256x32xbf16>
      %282 = vector.shape_cast %281 : vector<1x1x256x32xbf16> to vector<256x32xbf16>
      %283 = vector.shape_cast %280 : vector<256x32xbf16> to vector<1x1x256x32xbf16>
      tpu.vector_store %arg11[%c0_83, %c1_84, %c0_85, %c0_86], %283 {strides = array<i32>} : memref<1x4x256x32xbf16, #tpu.memory_space<vmem>>, vector<1x1x256x32xbf16>,
      %284 = vector.extract_strided_slice %270 {offsets = [0, 288], sizes = [256, 32], strides = [1, 1]} : vector<256x384xbf16> to vector<256x32xbf16>
      %c0_87 = arith.constant 0 : index
      %c1_88 = arith.constant 1 : index
      %c0_89 = arith.constant 0 : index
      %c0_90 = arith.constant 0 : index
      %285 = vector.load %arg12[%c0_87, %c1_88, %c0_89, %c0_90] : memref<1x4x256x32xbf16, #tpu.memory_space<vmem>>, vector<1x1x256x32xbf16>
      %286 = vector.shape_cast %285 : vector<1x1x256x32xbf16> to vector<256x32xbf16>
      %287 = vector.shape_cast %284 : vector<256x32xbf16> to vector<1x1x256x32xbf16>
      tpu.vector_store %arg12[%c0_87, %c1_88, %c0_89, %c0_90], %287 {strides = array<i32>} : memref<1x4x256x32xbf16, #tpu.memory_space<vmem>>, vector<1x1x256x32xbf16>,
      %288 = vector.extract_strided_slice %270 {offsets = [0, 192], sizes = [256, 32], strides = [1, 1]} : vector<256x384xbf16> to vector<256x32xbf16>
      %c0_91 = arith.constant 0 : index
      %c2_92 = arith.constant 2 : index
      %c0_93 = arith.constant 0 : index
      %c0_94 = arith.constant 0 : index
      %289 = vector.load %arg11[%c0_91, %c2_92, %c0_93, %c0_94] : memref<1x4x256x32xbf16, #tpu.memory_space<vmem>>, vector<1x1x256x32xbf16>
      %290 = vector.shape_cast %289 : vector<1x1x256x32xbf16> to vector<256x32xbf16>
      %291 = vector.shape_cast %288 : vector<256x32xbf16> to vector<1x1x256x32xbf16>
      tpu.vector_store %arg11[%c0_91, %c2_92, %c0_93, %c0_94], %291 {strides = array<i32>} : memref<1x4x256x32xbf16, #tpu.memory_space<vmem>>, vector<1x1x256x32xbf16>,
      %292 = vector.extract_strided_slice %270 {offsets = [0, 320], sizes = [256, 32], strides = [1, 1]} : vector<256x384xbf16> to vector<256x32xbf16>
      %c0_95 = arith.constant 0 : index
      %c2_96 = arith.constant 2 : index
      %c0_97 = arith.constant 0 : index
      %c0_98 = arith.constant 0 : index
      %293 = vector.load %arg12[%c0_95, %c2_96, %c0_97, %c0_98] : memref<1x4x256x32xbf16, #tpu.memory_space<vmem>>, vector<1x1x256x32xbf16>
      %294 = vector.shape_cast %293 : vector<1x1x256x32xbf16> to vector<256x32xbf16>
      %295 = vector.shape_cast %292 : vector<256x32xbf16> to vector<1x1x256x32xbf16>
      tpu.vector_store %arg12[%c0_95, %c2_96, %c0_97, %c0_98], %295 {strides = array<i32>} : memref<1x4x256x32xbf16, #tpu.memory_space<vmem>>, vector<1x1x256x32xbf16>,
      %296 = vector.extract_strided_slice %270 {offsets = [0, 224], sizes = [256, 32], strides = [1, 1]} : vector<256x384xbf16> to vector<256x32xbf16>
      %c0_99 = arith.constant 0 : index
      %c3_100 = arith.constant 3 : index
      %c0_101 = arith.constant 0 : index
      %c0_102 = arith.constant 0 : index
      %297 = vector.load %arg11[%c0_99, %c3_100, %c0_101, %c0_102] : memref<1x4x256x32xbf16, #tpu.memory_space<vmem>>, vector<1x1x256x32xbf16>
      %298 = vector.shape_cast %297 : vector<1x1x256x32xbf16> to vector<256x32xbf16>
      %299 = vector.shape_cast %296 : vector<256x32xbf16> to vector<1x1x256x32xbf16>
      tpu.vector_store %arg11[%c0_99, %c3_100, %c0_101, %c0_102], %299 {strides = array<i32>} : memref<1x4x256x32xbf16, #tpu.memory_space<vmem>>, vector<1x1x256x32xbf16>,
      %300 = vector.extract_strided_slice %270 {offsets = [0, 352], sizes = [256, 32], strides = [1, 1]} : vector<256x384xbf16> to vector<256x32xbf16>
      %c0_103 = arith.constant 0 : index
      %c3_104 = arith.constant 3 : index
      %c0_105 = arith.constant 0 : index
      %c0_106 = arith.constant 0 : index
      %301 = vector.load %arg12[%c0_103, %c3_104, %c0_105, %c0_106] : memref<1x4x256x32xbf16, #tpu.memory_space<vmem>>, vector<1x1x256x32xbf16>
      %302 = vector.shape_cast %301 : vector<1x1x256x32xbf16> to vector<256x32xbf16>
      %303 = vector.shape_cast %300 : vector<256x32xbf16> to vector<1x1x256x32xbf16>
      tpu.vector_store %arg12[%c0_103, %c3_104, %c0_105, %c0_106], %303 {strides = array<i32>} : memref<1x4x256x32xbf16, #tpu.memory_space<vmem>>, vector<1x1x256x32xbf16>,
    } else {
    }
    %c128_i32 = arith.constant 128 : i32
    %3 = arith.muli %arg1, %c128_i32 : i32
    %4 = tpu.assume_multiple %3, 128 : i32
    %5 = arith.index_cast %4 : i32 to index
    %c0 = arith.constant 0 : index
    %6 = vector.load %arg13[%5, %c0] : memref<256x384xbf16, #tpu.memory_space<vmem>>, vector<128x384xbf16>
    %7 = vector.extract_strided_slice %6 {offsets = [0, 0], sizes = [128, 128], strides = [1, 1]} : vector<128x384xbf16> to vector<128x128xbf16>
    %c0_1 = arith.constant 0 : index
    %c128 = arith.constant 128 : index
    %8 = vector.load %arg13[%c0_1, %c128] : memref<256x384xbf16, #tpu.memory_space<vmem>>, vector<256x128xbf16>
    %c0_2 = arith.constant 0 : index
    %c256 = arith.constant 256 : index
    %9 = vector.load %arg13[%c0_2, %c256] : memref<256x384xbf16, #tpu.memory_space<vmem>>, vector<256x128xbf16>
    %10 = tpu.iota {dimensions = array<i32: 0>} : vector<128x256xi32>
    %c128_i32_3 = arith.constant 128 : i32
    %11 = arith.muli %arg1, %c128_i32_3 : i32
    %12 = vector.broadcast %11 : i32 to vector<128x256xi32>
    %13 = arith.addi %10, %12 : vector<128x256xi32>
    %14 = tpu.iota {dimensions = array<i32: 1>} : vector<128x256xi32>
    %15 = arith.cmpi sgt, %14, %13 : vector<128x256xi32>
    %cst = arith.constant -1.000000e+30 : f32
    %cst_4 = arith.constant 0.000000e+00 : f32
    %16 = vector.broadcast %cst : f32 to vector<128x256xf32>
    %17 = vector.broadcast %cst_4 : f32 to vector<128x256xf32>
    %18 = arith.select %15, %16, %17 : vector<128x256xi1>, vector<128x256xf32>
    %19 = vector.extract_strided_slice %7 {offsets = [0, 0], sizes = [128, 32], strides = [1, 1]} : vector<128x128xbf16> to vector<128x32xbf16>
    %20 = vector.extract_strided_slice %8 {offsets = [0, 0], sizes = [256, 32], strides = [1, 1]} : vector<256x128xbf16> to vector<256x32xbf16>
    %21 = vector.extract_strided_slice %9 {offsets = [0, 0], sizes = [256, 32], strides = [1, 1]} : vector<256x128xbf16> to vector<256x32xbf16>
    %cst_5 = arith.constant dense<0.000000e+00> : vector<128x256xf32>
    %22 = tpu.matmul %19, %20, %cst_5 {dimension_numbers = #tpu.dot_dimension_numbers<[1], [1], [0], [0], [0, 0, 1, 0], [], []>} : vector<128x32xbf16>, vector<256x32xbf16>, vector<128x256xf32> -> vector<128x256xf32>
    %23 = arith.addf %22, %18 : vector<128x256xf32>
    %24 = arith.extf %19 : vector<128x32xbf16> to vector<128x32xf32>
    %c0_6 = arith.constant 0 : index
    %c0_7 = arith.constant 0 : index
    %c0_8 = arith.constant 0 : index
    %25 = vector.load %arg6[%c0_6, %c0_7, %c0_8] : memref<4x2x32xbf16, #tpu.memory_space<vmem>>, vector<1x2x32xbf16>
    %26 = vector.shape_cast %25 : vector<1x2x32xbf16> to vector<2x32xbf16>
    %27 = arith.extf %26 : vector<2x32xbf16> to vector<2x32xf32>
    %c0_9 = arith.constant 0 : index
    %c0_10 = arith.constant 0 : index
    %c0_11 = arith.constant 0 : index
    %28 = vector.load %arg7[%c0_9, %c0_10, %c0_11] : memref<4x2x32xbf16, #tpu.memory_space<vmem>>, vector<1x2x32xbf16>
    %29 = vector.shape_cast %28 : vector<1x2x32xbf16> to vector<2x32xbf16>
    %30 = arith.extf %29 : vector<2x32xbf16> to vector<2x32xf32>
    %31 = vector.extract_strided_slice %27 {offsets = [0, 0], sizes = [1, 32], strides = [1, 1]} : vector<2x32xf32> to vector<1x32xf32>
    %32 = vector.broadcast %31 : vector<1x32xf32> to vector<128x32xf32>
    %33 = arith.mulf %24, %32 : vector<128x32xf32>
    %cst_12 = arith.constant dense<0.000000e+00> : vector<128xf32>
    %34 = vector.multi_reduction <add>, %33, %cst_12 [1] : vector<128x32xf32> to vector<128xf32>
    %35 = vector.shape_cast %34 : vector<128xf32> to vector<128x1xf32>
    %36 = vector.extract_strided_slice %27 {offsets = [1, 0], sizes = [1, 32], strides = [1, 1]} : vector<2x32xf32> to vector<1x32xf32>
    %37 = vector.broadcast %36 : vector<1x32xf32> to vector<128x32xf32>
    %38 = arith.mulf %24, %37 : vector<128x32xf32>
    %cst_13 = arith.constant dense<0.000000e+00> : vector<128xf32>
    %39 = vector.multi_reduction <add>, %38, %cst_13 [1] : vector<128x32xf32> to vector<128xf32>
    %40 = vector.shape_cast %39 : vector<128xf32> to vector<128x1xf32>
    %cst_14 = arith.constant dense<0xFF800000> : vector<128xf32>
    %41 = vector.multi_reduction <maximumf>, %23, %cst_14 [1] : vector<128x256xf32> to vector<128xf32>
    %42 = vector.shape_cast %41 : vector<128xf32> to vector<128x1xf32>
    %43 = arith.maximumf %42, %35 : vector<128x1xf32>
    %44 = arith.maximumf %43, %40 : vector<128x1xf32>
    %45 = vector.broadcast %44 : vector<128x1xf32> to vector<128x256xf32>
    %46 = arith.subf %23, %45 : vector<128x256xf32>
    %47 = math.exp %46 : vector<128x256xf32>
    %48 = arith.subf %35, %44 : vector<128x1xf32>
    %49 = math.exp %48 : vector<128x1xf32>
    %50 = arith.subf %40, %44 : vector<128x1xf32>
    %51 = math.exp %50 : vector<128x1xf32>
    %cst_15 = arith.constant dense<0.000000e+00> : vector<128xf32>
    %52 = vector.multi_reduction <add>, %47, %cst_15 [1] : vector<128x256xf32> to vector<128xf32>
    %53 = vector.shape_cast %52 : vector<128xf32> to vector<128x1xf32>
    %54 = arith.addf %53, %49 : vector<128x1xf32>
    %55 = arith.addf %54, %51 : vector<128x1xf32>
    %56 = tpu.reciprocal %55 {approx = true} : vector<128x1xf32> -> vector<128x1xf32>
    %57 = arith.truncf %47 : vector<128x256xf32> to vector<128x256xbf16>
    %cst_16 = arith.constant dense<0.000000e+00> : vector<128x32xf32>
    %58 = tpu.matmul %57, %21, %cst_16 {dimension_numbers = #tpu.dot_dimension_numbers<[1], [0], [0], [1], [0, 0, 1, 1], [], []>} : vector<128x256xbf16>, vector<256x32xbf16>, vector<128x32xf32> -> vector<128x32xf32>
    %59 = vector.extract_strided_slice %30 {offsets = [0, 0], sizes = [1, 32], strides = [1, 1]} : vector<2x32xf32> to vector<1x32xf32>
    %60 = vector.broadcast %49 : vector<128x1xf32> to vector<128x32xf32>
    %61 = vector.broadcast %59 : vector<1x32xf32> to vector<128x32xf32>
    %62 = arith.mulf %60, %61 : vector<128x32xf32>
    %63 = arith.addf %58, %62 : vector<128x32xf32>
    %64 = vector.extract_strided_slice %30 {offsets = [1, 0], sizes = [1, 32], strides = [1, 1]} : vector<2x32xf32> to vector<1x32xf32>
    %65 = vector.broadcast %51 : vector<128x1xf32> to vector<128x32xf32>
    %66 = vector.broadcast %64 : vector<1x32xf32> to vector<128x32xf32>
    %67 = arith.mulf %65, %66 : vector<128x32xf32>
    %68 = arith.addf %63, %67 : vector<128x32xf32>
    %69 = vector.broadcast %56 : vector<128x1xf32> to vector<128x32xf32>
    %70 = arith.mulf %68, %69 : vector<128x32xf32>
    %71 = arith.truncf %70 : vector<128x32xf32> to vector<128x32xbf16>
    %72 = vector.extract_strided_slice %7 {offsets = [0, 32], sizes = [128, 32], strides = [1, 1]} : vector<128x128xbf16> to vector<128x32xbf16>
    %73 = vector.extract_strided_slice %8 {offsets = [0, 32], sizes = [256, 32], strides = [1, 1]} : vector<256x128xbf16> to vector<256x32xbf16>
    %74 = vector.extract_strided_slice %9 {offsets = [0, 32], sizes = [256, 32], strides = [1, 1]} : vector<256x128xbf16> to vector<256x32xbf16>
    %cst_17 = arith.constant dense<0.000000e+00> : vector<128x256xf32>
    %75 = tpu.matmul %72, %73, %cst_17 {dimension_numbers = #tpu.dot_dimension_numbers<[1], [1], [0], [0], [0, 0, 1, 0], [], []>} : vector<128x32xbf16>, vector<256x32xbf16>, vector<128x256xf32> -> vector<128x256xf32>
    %76 = arith.addf %75, %18 : vector<128x256xf32>
    %77 = arith.extf %72 : vector<128x32xbf16> to vector<128x32xf32>
    %c1 = arith.constant 1 : index
    %c0_18 = arith.constant 0 : index
    %c0_19 = arith.constant 0 : index
    %78 = vector.load %arg6[%c1, %c0_18, %c0_19] : memref<4x2x32xbf16, #tpu.memory_space<vmem>>, vector<1x2x32xbf16>
    %79 = vector.shape_cast %78 : vector<1x2x32xbf16> to vector<2x32xbf16>
    %80 = arith.extf %79 : vector<2x32xbf16> to vector<2x32xf32>
    %c1_20 = arith.constant 1 : index
    %c0_21 = arith.constant 0 : index
    %c0_22 = arith.constant 0 : index
    %81 = vector.load %arg7[%c1_20, %c0_21, %c0_22] : memref<4x2x32xbf16, #tpu.memory_space<vmem>>, vector<1x2x32xbf16>
    %82 = vector.shape_cast %81 : vector<1x2x32xbf16> to vector<2x32xbf16>
    %83 = arith.extf %82 : vector<2x32xbf16> to vector<2x32xf32>
    %84 = vector.extract_strided_slice %80 {offsets = [0, 0], sizes = [1, 32], strides = [1, 1]} : vector<2x32xf32> to vector<1x32xf32>
    %85 = vector.broadcast %84 : vector<1x32xf32> to vector<128x32xf32>
    %86 = arith.mulf %77, %85 : vector<128x32xf32>
    %cst_23 = arith.constant dense<0.000000e+00> : vector<128xf32>
    %87 = vector.multi_reduction <add>, %86, %cst_23 [1] : vector<128x32xf32> to vector<128xf32>
    %88 = vector.shape_cast %87 : vector<128xf32> to vector<128x1xf32>
    %89 = vector.extract_strided_slice %80 {offsets = [1, 0], sizes = [1, 32], strides = [1, 1]} : vector<2x32xf32> to vector<1x32xf32>
    %90 = vector.broadcast %89 : vector<1x32xf32> to vector<128x32xf32>
    %91 = arith.mulf %77, %90 : vector<128x32xf32>
    %cst_24 = arith.constant dense<0.000000e+00> : vector<128xf32>
    %92 = vector.multi_reduction <add>, %91, %cst_24 [1] : vector<128x32xf32> to vector<128xf32>
    %93 = vector.shape_cast %92 : vector<128xf32> to vector<128x1xf32>
    %cst_25 = arith.constant dense<0xFF800000> : vector<128xf32>
    %94 = vector.multi_reduction <maximumf>, %76, %cst_25 [1] : vector<128x256xf32> to vector<128xf32>
    %95 = vector.shape_cast %94 : vector<128xf32> to vector<128x1xf32>
    %96 = arith.maximumf %95, %88 : vector<128x1xf32>
    %97 = arith.maximumf %96, %93 : vector<128x1xf32>
    %98 = vector.broadcast %97 : vector<128x1xf32> to vector<128x256xf32>
    %99 = arith.subf %76, %98 : vector<128x256xf32>
    %100 = math.exp %99 : vector<128x256xf32>
    %101 = arith.subf %88, %97 : vector<128x1xf32>
    %102 = math.exp %101 : vector<128x1xf32>
    %103 = arith.subf %93, %97 : vector<128x1xf32>
    %104 = math.exp %103 : vector<128x1xf32>
    %cst_26 = arith.constant dense<0.000000e+00> : vector<128xf32>
    %105 = vector.multi_reduction <add>, %100, %cst_26 [1] : vector<128x256xf32> to vector<128xf32>
    %106 = vector.shape_cast %105 : vector<128xf32> to vector<128x1xf32>
    %107 = arith.addf %106, %102 : vector<128x1xf32>
    %108 = arith.addf %107, %104 : vector<128x1xf32>
    %109 = tpu.reciprocal %108 {approx = true} : vector<128x1xf32> -> vector<128x1xf32>
    %110 = arith.truncf %100 : vector<128x256xf32> to vector<128x256xbf16>
    %cst_27 = arith.constant dense<0.000000e+00> : vector<128x32xf32>
    %111 = tpu.matmul %110, %74, %cst_27 {dimension_numbers = #tpu.dot_dimension_numbers<[1], [0], [0], [1], [0, 0, 1, 1], [], []>} : vector<128x256xbf16>, vector<256x32xbf16>, vector<128x32xf32> -> vector<128x32xf32>
    %112 = vector.extract_strided_slice %83 {offsets = [0, 0], sizes = [1, 32], strides = [1, 1]} : vector<2x32xf32> to vector<1x32xf32>
    %113 = vector.broadcast %102 : vector<128x1xf32> to vector<128x32xf32>
    %114 = vector.broadcast %112 : vector<1x32xf32> to vector<128x32xf32>
    %115 = arith.mulf %113, %114 : vector<128x32xf32>
    %116 = arith.addf %111, %115 : vector<128x32xf32>
    %117 = vector.extract_strided_slice %83 {offsets = [1, 0], sizes = [1, 32], strides = [1, 1]} : vector<2x32xf32> to vector<1x32xf32>
    %118 = vector.broadcast %104 : vector<128x1xf32> to vector<128x32xf32>
    %119 = vector.broadcast %117 : vector<1x32xf32> to vector<128x32xf32>
    %120 = arith.mulf %118, %119 : vector<128x32xf32>
    %121 = arith.addf %116, %120 : vector<128x32xf32>
    %122 = vector.broadcast %109 : vector<128x1xf32> to vector<128x32xf32>
    %123 = arith.mulf %121, %122 : vector<128x32xf32>
    %124 = arith.truncf %123 : vector<128x32xf32> to vector<128x32xbf16>
    %125 = vector.extract_strided_slice %7 {offsets = [0, 64], sizes = [128, 32], strides = [1, 1]} : vector<128x128xbf16> to vector<128x32xbf16>
    %126 = vector.extract_strided_slice %8 {offsets = [0, 64], sizes = [256, 32], strides = [1, 1]} : vector<256x128xbf16> to vector<256x32xbf16>
    %127 = vector.extract_strided_slice %9 {offsets = [0, 64], sizes = [256, 32], strides = [1, 1]} : vector<256x128xbf16> to vector<256x32xbf16>
    %cst_28 = arith.constant dense<0.000000e+00> : vector<128x256xf32>
    %128 = tpu.matmul %125, %126, %cst_28 {dimension_numbers = #tpu.dot_dimension_numbers<[1], [1], [0], [0], [0, 0, 1, 0], [], []>} : vector<128x32xbf16>, vector<256x32xbf16>, vector<128x256xf32> -> vector<128x256xf32>
    %129 = arith.addf %128, %18 : vector<128x256xf32>
    %130 = arith.extf %125 : vector<128x32xbf16> to vector<128x32xf32>
    %c2 = arith.constant 2 : index
    %c0_29 = arith.constant 0 : index
    %c0_30 = arith.constant 0 : index
    %131 = vector.load %arg6[%c2, %c0_29, %c0_30] : memref<4x2x32xbf16, #tpu.memory_space<vmem>>, vector<1x2x32xbf16>
    %132 = vector.shape_cast %131 : vector<1x2x32xbf16> to vector<2x32xbf16>
    %133 = arith.extf %132 : vector<2x32xbf16> to vector<2x32xf32>
    %c2_31 = arith.constant 2 : index
    %c0_32 = arith.constant 0 : index
    %c0_33 = arith.constant 0 : index
    %134 = vector.load %arg7[%c2_31, %c0_32, %c0_33] : memref<4x2x32xbf16, #tpu.memory_space<vmem>>, vector<1x2x32xbf16>
    %135 = vector.shape_cast %134 : vector<1x2x32xbf16> to vector<2x32xbf16>
    %136 = arith.extf %135 : vector<2x32xbf16> to vector<2x32xf32>
    %137 = vector.extract_strided_slice %133 {offsets = [0, 0], sizes = [1, 32], strides = [1, 1]} : vector<2x32xf32> to vector<1x32xf32>
    %138 = vector.broadcast %137 : vector<1x32xf32> to vector<128x32xf32>
    %139 = arith.mulf %130, %138 : vector<128x32xf32>
    %cst_34 = arith.constant dense<0.000000e+00> : vector<128xf32>
    %140 = vector.multi_reduction <add>, %139, %cst_34 [1] : vector<128x32xf32> to vector<128xf32>
    %141 = vector.shape_cast %140 : vector<128xf32> to vector<128x1xf32>
    %142 = vector.extract_strided_slice %133 {offsets = [1, 0], sizes = [1, 32], strides = [1, 1]} : vector<2x32xf32> to vector<1x32xf32>
    %143 = vector.broadcast %142 : vector<1x32xf32> to vector<128x32xf32>
    %144 = arith.mulf %130, %143 : vector<128x32xf32>
    %cst_35 = arith.constant dense<0.000000e+00> : vector<128xf32>
    %145 = vector.multi_reduction <add>, %144, %cst_35 [1] : vector<128x32xf32> to vector<128xf32>
    %146 = vector.shape_cast %145 : vector<128xf32> to vector<128x1xf32>
    %cst_36 = arith.constant dense<0xFF800000> : vector<128xf32>
    %147 = vector.multi_reduction <maximumf>, %129, %cst_36 [1] : vector<128x256xf32> to vector<128xf32>
    %148 = vector.shape_cast %147 : vector<128xf32> to vector<128x1xf32>
    %149 = arith.maximumf %148, %141 : vector<128x1xf32>
    %150 = arith.maximumf %149, %146 : vector<128x1xf32>
    %151 = vector.broadcast %150 : vector<128x1xf32> to vector<128x256xf32>
    %152 = arith.subf %129, %151 : vector<128x256xf32>
    %153 = math.exp %152 : vector<128x256xf32>
    %154 = arith.subf %141, %150 : vector<128x1xf32>
    %155 = math.exp %154 : vector<128x1xf32>
    %156 = arith.subf %146, %150 : vector<128x1xf32>
    %157 = math.exp %156 : vector<128x1xf32>
    %cst_37 = arith.constant dense<0.000000e+00> : vector<128xf32>
    %158 = vector.multi_reduction <add>, %153, %cst_37 [1] : vector<128x256xf32> to vector<128xf32>
    %159 = vector.shape_cast %158 : vector<128xf32> to vector<128x1xf32>
    %160 = arith.addf %159, %155 : vector<128x1xf32>
    %161 = arith.addf %160, %157 : vector<128x1xf32>
    %162 = tpu.reciprocal %161 {approx = true} : vector<128x1xf32> -> vector<128x1xf32>
    %163 = arith.truncf %153 : vector<128x256xf32> to vector<128x256xbf16>
    %cst_38 = arith.constant dense<0.000000e+00> : vector<128x32xf32>
    %164 = tpu.matmul %163, %127, %cst_38 {dimension_numbers = #tpu.dot_dimension_numbers<[1], [0], [0], [1], [0, 0, 1, 1], [], []>} : vector<128x256xbf16>, vector<256x32xbf16>, vector<128x32xf32> -> vector<128x32xf32>
    %165 = vector.extract_strided_slice %136 {offsets = [0, 0], sizes = [1, 32], strides = [1, 1]} : vector<2x32xf32> to vector<1x32xf32>
    %166 = vector.broadcast %155 : vector<128x1xf32> to vector<128x32xf32>
    %167 = vector.broadcast %165 : vector<1x32xf32> to vector<128x32xf32>
    %168 = arith.mulf %166, %167 : vector<128x32xf32>
    %169 = arith.addf %164, %168 : vector<128x32xf32>
    %170 = vector.extract_strided_slice %136 {offsets = [1, 0], sizes = [1, 32], strides = [1, 1]} : vector<2x32xf32> to vector<1x32xf32>
    %171 = vector.broadcast %157 : vector<128x1xf32> to vector<128x32xf32>
    %172 = vector.broadcast %170 : vector<1x32xf32> to vector<128x32xf32>
    %173 = arith.mulf %171, %172 : vector<128x32xf32>
    %174 = arith.addf %169, %173 : vector<128x32xf32>
    %175 = vector.broadcast %162 : vector<128x1xf32> to vector<128x32xf32>
    %176 = arith.mulf %174, %175 : vector<128x32xf32>
    %177 = arith.truncf %176 : vector<128x32xf32> to vector<128x32xbf16>
    %178 = vector.extract_strided_slice %7 {offsets = [0, 96], sizes = [128, 32], strides = [1, 1]} : vector<128x128xbf16> to vector<128x32xbf16>
    %179 = vector.extract_strided_slice %8 {offsets = [0, 96], sizes = [256, 32], strides = [1, 1]} : vector<256x128xbf16> to vector<256x32xbf16>
    %180 = vector.extract_strided_slice %9 {offsets = [0, 96], sizes = [256, 32], strides = [1, 1]} : vector<256x128xbf16> to vector<256x32xbf16>
    %cst_39 = arith.constant dense<0.000000e+00> : vector<128x256xf32>
    %181 = tpu.matmul %178, %179, %cst_39 {dimension_numbers = #tpu.dot_dimension_numbers<[1], [1], [0], [0], [0, 0, 1, 0], [], []>} : vector<128x32xbf16>, vector<256x32xbf16>, vector<128x256xf32> -> vector<128x256xf32>
    %182 = arith.addf %181, %18 : vector<128x256xf32>
    %183 = arith.extf %178 : vector<128x32xbf16> to vector<128x32xf32>
    %c3 = arith.constant 3 : index
    %c0_40 = arith.constant 0 : index
    %c0_41 = arith.constant 0 : index
    %184 = vector.load %arg6[%c3, %c0_40, %c0_41] : memref<4x2x32xbf16, #tpu.memory_space<vmem>>, vector<1x2x32xbf16>
    %185 = vector.shape_cast %184 : vector<1x2x32xbf16> to vector<2x32xbf16>
    %186 = arith.extf %185 : vector<2x32xbf16> to vector<2x32xf32>
    %c3_42 = arith.constant 3 : index
    %c0_43 = arith.constant 0 : index
    %c0_44 = arith.constant 0 : index
    %187 = vector.load %arg7[%c3_42, %c0_43, %c0_44] : memref<4x2x32xbf16, #tpu.memory_space<vmem>>, vector<1x2x32xbf16>
    %188 = vector.shape_cast %187 : vector<1x2x32xbf16> to vector<2x32xbf16>
    %189 = arith.extf %188 : vector<2x32xbf16> to vector<2x32xf32>
    %190 = vector.extract_strided_slice %186 {offsets = [0, 0], sizes = [1, 32], strides = [1, 1]} : vector<2x32xf32> to vector<1x32xf32>
    %191 = vector.broadcast %190 : vector<1x32xf32> to vector<128x32xf32>
    %192 = arith.mulf %183, %191 : vector<128x32xf32>
    %cst_45 = arith.constant dense<0.000000e+00> : vector<128xf32>
    %193 = vector.multi_reduction <add>, %192, %cst_45 [1] : vector<128x32xf32> to vector<128xf32>
    %194 = vector.shape_cast %193 : vector<128xf32> to vector<128x1xf32>
    %195 = vector.extract_strided_slice %186 {offsets = [1, 0], sizes = [1, 32], strides = [1, 1]} : vector<2x32xf32> to vector<1x32xf32>
    %196 = vector.broadcast %195 : vector<1x32xf32> to vector<128x32xf32>
    %197 = arith.mulf %183, %196 : vector<128x32xf32>
    %cst_46 = arith.constant dense<0.000000e+00> : vector<128xf32>
    %198 = vector.multi_reduction <add>, %197, %cst_46 [1] : vector<128x32xf32> to vector<128xf32>
    %199 = vector.shape_cast %198 : vector<128xf32> to vector<128x1xf32>
    %cst_47 = arith.constant dense<0xFF800000> : vector<128xf32>
    %200 = vector.multi_reduction <maximumf>, %182, %cst_47 [1] : vector<128x256xf32> to vector<128xf32>
    %201 = vector.shape_cast %200 : vector<128xf32> to vector<128x1xf32>
    %202 = arith.maximumf %201, %194 : vector<128x1xf32>
    %203 = arith.maximumf %202, %199 : vector<128x1xf32>
    %204 = vector.broadcast %203 : vector<128x1xf32> to vector<128x256xf32>
    %205 = arith.subf %182, %204 : vector<128x256xf32>
    %206 = math.exp %205 : vector<128x256xf32>
    %207 = arith.subf %194, %203 : vector<128x1xf32>
    %208 = math.exp %207 : vector<128x1xf32>
    %209 = arith.subf %199, %203 : vector<128x1xf32>
    %210 = math.exp %209 : vector<128x1xf32>
    %cst_48 = arith.constant dense<0.000000e+00> : vector<128xf32>
    %211 = vector.multi_reduction <add>, %206, %cst_48 [1] : vector<128x256xf32> to vector<128xf32>
    %212 = vector.shape_cast %211 : vector<128xf32> to vector<128x1xf32>
    %213 = arith.addf %212, %208 : vector<128x1xf32>
    %214 = arith.addf %213, %210 : vector<128x1xf32>
    %215 = tpu.reciprocal %214 {approx = true} : vector<128x1xf32> -> vector<128x1xf32>
    %216 = arith.truncf %206 : vector<128x256xf32> to vector<128x256xbf16>
    %cst_49 = arith.constant dense<0.000000e+00> : vector<128x32xf32>
    %217 = tpu.matmul %216, %180, %cst_49 {dimension_numbers = #tpu.dot_dimension_numbers<[1], [0], [0], [1], [0, 0, 1, 1], [], []>} : vector<128x256xbf16>, vector<256x32xbf16>, vector<128x32xf32> -> vector<128x32xf32>
    %218 = vector.extract_strided_slice %189 {offsets = [0, 0], sizes = [1, 32], strides = [1, 1]} : vector<2x32xf32> to vector<1x32xf32>
    %219 = vector.broadcast %208 : vector<128x1xf32> to vector<128x32xf32>
    %220 = vector.broadcast %218 : vector<1x32xf32> to vector<128x32xf32>
    %221 = arith.mulf %219, %220 : vector<128x32xf32>
    %222 = arith.addf %217, %221 : vector<128x32xf32>
    %223 = vector.extract_strided_slice %189 {offsets = [1, 0], sizes = [1, 32], strides = [1, 1]} : vector<2x32xf32> to vector<1x32xf32>
    %224 = vector.broadcast %210 : vector<128x1xf32> to vector<128x32xf32>
    %225 = vector.broadcast %223 : vector<1x32xf32> to vector<128x32xf32>
    %226 = arith.mulf %224, %225 : vector<128x32xf32>
    %227 = arith.addf %222, %226 : vector<128x32xf32>
    %228 = vector.broadcast %215 : vector<128x1xf32> to vector<128x32xf32>
    %229 = arith.mulf %227, %228 : vector<128x32xf32>
    %230 = arith.truncf %229 : vector<128x32xf32> to vector<128x32xbf16>
    %231 = tpu.concatenate %71, %124, %177, %230 in 1 : vector<128x32xbf16>, vector<128x32xbf16>, vector<128x32xbf16>, vector<128x32xbf16> -> vector<128x128xbf16>
    %c0_50 = arith.constant 0 : index
    %c0_51 = arith.constant 0 : index
    %232 = vector.load %arg8[%c0_50, %c0_51] : memref<128x128xbf16, #tpu.memory_space<vmem>>, vector<128x128xbf16>
    %cst_52 = arith.constant dense<0.000000e+00> : vector<128x128xf32>
    %233 = tpu.matmul %231, %232, %cst_52 {dimension_numbers = #tpu.dot_dimension_numbers<[1], [0], [0], [1], [0, 0, 1, 1], [], []>} : vector<128x128xbf16>, vector<128x128xbf16>, vector<128x128xf32> -> vector<128x128xf32>
    %c0_53 = arith.constant 0 : index
    %c0_54 = arith.constant 0 : index
    %234 = vector.load %arg9[%c0_53, %c0_54] : memref<1x128xf32, #tpu.memory_space<vmem>>, vector<1x128xf32>
    %235 = vector.broadcast %234 : vector<1x128xf32> to vector<128x128xf32>
    %236 = arith.addf %233, %235 : vector<128x128xf32>
    %237 = arith.truncf %236 : vector<128x128xf32> to vector<128x128xbf16>
    %c0_55 = arith.constant 0 : index
    %c0_56 = arith.constant 0 : index
    %c0_57 = arith.constant 0 : index
    %238 = vector.load %arg10[%c0_55, %c0_56, %c0_57] : memref<1x128x128xbf16, #tpu.memory_space<vmem>>, vector<1x128x128xbf16>
    %239 = vector.shape_cast %238 : vector<1x128x128xbf16> to vector<128x128xbf16>
    %240 = vector.shape_cast %237 : vector<128x128xbf16> to vector<1x128x128xbf16>
    tpu.vector_store %arg10[%c0_55, %c0_56, %c0_57], %240 {strides = array<i32>} : memref<1x128x128xbf16, #tpu.memory_space<vmem>>, vector<1x128x128xbf16>,
    return
  }
  func.func @transform_0(%arg0: i32, %arg1: i32) -> (i32, i32, i32) {
    %c0_i32 = arith.constant 0 : i32
    %c0_i32_0 = arith.constant 0 : i32
    %c0_i32_1 = arith.constant 0 : i32
    return %arg0, %c0_i32, %c0_i32_0 : i32, i32, i32
  }
  func.func @transform_1(%arg0: i32, %arg1: i32) -> (i32, i32) {
    %c0_i32 = arith.constant 0 : i32
    %c0_i32_0 = arith.constant 0 : i32
    %c0_i32_1 = arith.constant 0 : i32
    return %c0_i32, %c0_i32_0 : i32, i32
  }
  func.func @transform_2(%arg0: i32, %arg1: i32) -> (i32, i32) {
    %c0_i32 = arith.constant 0 : i32
    %c0_i32_0 = arith.constant 0 : i32
    %c0_i32_1 = arith.constant 0 : i32
    return %c0_i32, %c0_i32_0 : i32, i32
  }
  func.func @transform_3(%arg0: i32, %arg1: i32) -> (i32, i32) {
    %c0_i32 = arith.constant 0 : i32
    %c0_i32_0 = arith.constant 0 : i32
    %c0_i32_1 = arith.constant 0 : i32
    return %c0_i32, %c0_i32_0 : i32, i32
  }
  func.func @transform_4(%arg0: i32, %arg1: i32) -> (i32, i32, i32) {
    %c0_i32 = arith.constant 0 : i32
    %c0_i32_0 = arith.constant 0 : i32
    %c0_i32_1 = arith.constant 0 : i32
    %c0_i32_2 = arith.constant 0 : i32
    return %c0_i32, %c0_i32_0, %c0_i32_1 : i32, i32, i32
  }
  func.func @transform_5(%arg0: i32, %arg1: i32) -> (i32, i32, i32) {
    %c0_i32 = arith.constant 0 : i32
    %c0_i32_0 = arith.constant 0 : i32
    %c0_i32_1 = arith.constant 0 : i32
    %c0_i32_2 = arith.constant 0 : i32
    return %c0_i32, %c0_i32_0, %c0_i32_1 : i32, i32, i32
  }
  func.func @transform_6(%arg0: i32, %arg1: i32) -> (i32, i32) {
    %c0_i32 = arith.constant 0 : i32
    %c0_i32_0 = arith.constant 0 : i32
    %c0_i32_1 = arith.constant 0 : i32
    return %c0_i32, %c0_i32_0 : i32, i32
  }
  func.func @transform_7(%arg0: i32, %arg1: i32) -> (i32, i32) {
    %c0_i32 = arith.constant 0 : i32
    %c0_i32_0 = arith.constant 0 : i32
    %c0_i32_1 = arith.constant 0 : i32
    return %c0_i32, %c0_i32_0 : i32, i32
  }
  func.func @transform_8(%arg0: i32, %arg1: i32) -> (i32, i32, i32) {
    %c0_i32 = arith.constant 0 : i32
    %c0_i32_0 = arith.constant 0 : i32
    return %arg0, %arg1, %c0_i32 : i32, i32, i32
  }
  func.func @transform_9(%arg0: i32, %arg1: i32) -> (i32, i32, i32, i32) {
    %c0_i32 = arith.constant 0 : i32
    %c0_i32_0 = arith.constant 0 : i32
    %c0_i32_1 = arith.constant 0 : i32
    %c0_i32_2 = arith.constant 0 : i32
    return %arg0, %c0_i32, %c0_i32_0, %c0_i32_1 : i32, i32, i32, i32
  }
  func.func @transform_10(%arg0: i32, %arg1: i32) -> (i32, i32, i32, i32) {
    %c0_i32 = arith.constant 0 : i32
    %c0_i32_0 = arith.constant 0 : i32
    %c0_i32_1 = arith.constant 0 : i32
    %c0_i32_2 = arith.constant 0 : i32
    return %arg0, %c0_i32, %c0_i32_0, %c0_i32_1 : i32, i32, i32, i32
  }
}

</mosaic_0001>

<bundles_post_ra>
// kernel: segmented_attention_forward.1
= control target key start
LH: loop header
LB: loop body
LE: loop exit
PB: predicated region body
PF: predicated region fallthrough
CT: control target
= control target key end

     0   :  { %16 = vsyncpa [#allocation4], 0  ;;  %s16674_s0 = inlined_call_operand.vmem [shape: f32[2,256,128], index: 0, kind: input, shape index: {}]   ;;  %s16675_s1 = inlined_call_operand.vmem [shape: f32[1,128], index: 1, kind: input, shape index: {}]   ;;  %s16676_s2 = inlined_call_operand.vmem [shape: f32[1,128], index: 2, kind: input, shape index: {}]   ;;  %s16677_s3 = inlined_call_operand.vmem [shape: bf16[128,384], index: 3, kind: input, shape index: {}]   ;;  %s16678_s4 = inlined_call_operand.vmem [shape: bf16[4,2,32], index: 4, kind: input, shape index: {}]   ;;  %s16679_s5 = inlined_call_operand.vmem [shape: bf16[4,2,32], index: 5, kind: input, shape index: {}]   ;;  %s16680_s6 = inlined_call_operand.vmem [shape: bf16[128,128], index: 6, kind: input, shape index: {}]   ;;  %s16681_s7 = inlined_call_operand.vmem [shape: f32[1,128], index: 7, kind: input, shape index: {}]   ;;  %s16682_s8 = inlined_call_operand.hbm [shape: bf16[2,256,128], index: 8, kind: output, shape index: {0}]   ;;  %s16683_s9 = inlined_call_operand.vmem [shape: bf16[2,4,256,32], index: 9, kind: output, shape index: {1}]   ;;  %s16684_s10 = inlined_call_operand.vmem [shape: bf16[2,4,256,32], index: 10, kind: output, shape index: {2}]  }
   0x1   :  { %18 = vsyncpa [#allocation4 + $0x1], 0  ;;  %s10144_s13 = smov 0   ;;  %s10146_s14 = smov 0  }
   0x2   :  { %s10148_s15 = smov 0   ;;  %s10150_s16 = smov 0  }
   0x3   :  { %s10152_s17 = smov 0   ;;  %s10154_s18 = smov 0  }
   0x4   :  { %s10156_s19 = smov 0   ;;  %s10158_s20 = smov 0  }
   0x5 LB: > { %17053 = sst [smem:[#allocation6_spill]] %s10049_s13  ;;  %s7895_s21 = sadd.s32 4294967295, %s10077_s20   ;;  %s10077_s20 = sphi %s10158_s20, %s24_s20   ;;  %s10073_s19 = sphi %s10156_s19, %s18013_s19   ;;  %s10069_s18 = sphi %s10154_s18, %s18012_s18   ;;  %s10065_s17 = sphi %s10152_s17, %s18011_s17   ;;  %s10061_s16 = sphi %s10150_s16, %s18010_s16   ;;  %s10057_s15 = sphi %s10148_s15, %s18009_s15   ;;  %s10053_s14 = sphi %s10146_s14, %s18015_s14   ;;  %s10049_s13 = sphi %s10144_s13, %s18014_s13  }
   0x6   : > { %17054 = sst [smem:[#allocation7_spill]] %s10057_s15  ;;  %s7896_s22 = sadd.s32 4294967294, %s10077_s20  }
   0x7   : > { %17055 = sst [smem:[#allocation8_spill]] %s10069_s18  ;;  %s33_s23 = sadd.s32 1, %s10069_s18 }
   0x8   : > { %17056 = sst [smem:[#allocation9_spill]] %s10073_s19  ;;  %p34_p0 = scmp.ge.s32.totalorder %s33_s23, 2 }
   0x9   : > { %s36_s24 = sadd.s32 1, %s10073_s19  ;;  %p228_p1 = scmp.ne.s32.totalorder %s10057_s15, %s10053_s14 }
   0xa   : > { %p229_p2 = scmp.eq.s32.totalorder %s7895_s21, 3  ;;  %s18017_s23 = smov (%p34_p0, %s33_s23), 0 }
   0xb   : > { %17057 = sst [smem:[#allocation10_spill]] %s18017_s23  ;;  %s18019_s24 = smov (!%p34_p0, %s36_s24), %s10073_s19 }
   0xc   : > { %s214_s25 = ssub.s32 %s10069_s18, %s18017_s23  ;;  %p10195_p3 = por %p229_p2, %p228_p1 }
   0xd   : > { %p38_p4 = scmp.ge.s32.totalorder %s18019_s24, 2  ;;  %p234_p5 = scmp.ne.s32.totalorder %s10053_s14, %s10049_s13 }
   0xe   : > { %p235_p6 = scmp.eq.s32.totalorder %s7896_s22, 3  ;;  %p7899_p7 = scmp.ge.s32.totalorder %s10077_s20, 1 }
   0xf   : > { %s18021_s24 = smov (%p38_p4, %s18019_s24), 0  ;;  %p334_p9 = scmp.lt.s32.totalorder %s10077_s20, 5 }
  0x10   : > { %17059 = sst [smem:[#allocation11_spill]] %s18021_s24  ;;  %p10204_p8 = por %p235_p6, %p234_p5 }
  0x11   : > { %s213_s28 = ssub.s32 %s10073_s19, %s18021_s24  ;;  %s218_s29 = sadd.s32 1, %s10057_s15 }
  0x12   : > { %s17060_s27 = scalar_select %p10204_p8, 1, 0 }
  0x13   : > { %s215_s30 = sor.u32 %s214_s25, %s213_s28  ;;  %p335_p10 = pnand %p7899_p7, %p334_p9 }
  0x14   : > { %17061 = sst [smem:[#allocation12_spill]] %s17060_s27  ;;  %p216_p11 = scmp.eq.s32.totalorder %s215_s30, 0 }
  0x15   : > { %338 = sbr.rel (%p335_p10) target bundleno = 3964 (0xf7c), region = 52 }
  0x16   : > { %s10213_s11 = scalar_select %p216_p11, %s10057_s15, %s218_s29  }
  0x18   : > { %17062 = sst [smem:[#allocation13_spill]] %s10213_s11 }
  0x1a   : > { %s365_s12 = sand.u32 1, %s10053_s14   ;;  %p382_p12 = scmp.lt.s32.totalorder %s10065_s17, 1 }
  0x1b   : > { %s7900_s21 = sshll.u32 %s365_s12, 6  ;;  %p7907_p13 = scmp.ne.s32.totalorder %s10061_s16, 0 }
  0x1c   : > { %s383_s22 = scalar_select %p382_p12, %s10065_s17, 1 }
  0x1d   : > { %s10235_s13 = scalar_lea.vmem [#allocation3], %s7900_s21  ;;  %402 = sbr.rel (%p7907_p13) target bundleno = 1069 (0x42d), region = 56 }
  0x1e   : > { %s8333_s23 = sshll.u32 %s383_s22, 8  ;;  %s8334_s18 = sshll.u32 %s383_s22, 9 }
  0x1f   : > { %s10223_s25 = scalar_lea.vmem %s16674_s0, %s8333_s23  ;;  %s10228_s30 = scalar_lea.vmem %s16683_s9, %s8334_s18 }
  0x20   : > { %s10233_s15 = scalar_lea.vmem %s16684_s10, %s8334_s18  ;;  %s10081_s28 = smov (!%p7907_p13), 64  }
  0x21   : > { %s10082_s29 = smov (!%p7907_p13), 32  }
  0x22   : > { %v10239_v0 = vld [vmem:[%s10223_s25 + $0xc0] sm:$0xff]  ;;  %v10247_v2 = vld [vmem:[%s10223_s25 + $0xc8] sm:$0xff]  ;;  %v10255_v4 = vld [vmem:[%s10223_s25 + $0x18] sm:$0xff]  ;;  %vm1844_vm0 = vcmask 257024  }
  0x23   : > { %v10242_v1 = vld [vmem:[%s10223_s25] sm:$0xff]  ;;  %483 = vadd.xlane.f32.xlu1 %v10239_v0  ;;  %v10250_v3 = vld [vmem:[%s10223_s25 + $0x8] sm:$0xff]  ;;  %v10258_v5 = vld [vmem:[%s10223_s25 + $0x10] sm:$0xff] }
  0x24   : > { %435 = vadd.xlane.f32.xlu0 %v10242_v1  ;;  %v10263_v6 = vld [vmem:[%s10223_s25 + $0xd8] sm:$0xff]  ;;  %v10266_v7 = vld [vmem:[%s10223_s25 + $0xd0] sm:$0xff]  ;;  %v10269_v8 = vld [vmem:[%s10223_s25 + $0x28] sm:$0xff] }
  0x25   : > { %v10272_v9 = vld [vmem:[%s10223_s25 + $0x20] sm:$0xff]  ;;  %v10277_v10 = vld [vmem:[%s10223_s25 + $0xe8] sm:$0xff]  ;;  %v10287_v12 = vld [vmem:[%s10223_s25 + $0x38] sm:$0xff] }
  0x26   : > { %v10280_v11 = vld [vmem:[%s10223_s25 + $0xe0] sm:$0xff]  ;;  %v10290_v13 = vld [vmem:[%s10223_s25 + $0x30] sm:$0xff]  ;;  %v10295_v14 = vld [vmem:[%s10223_s25 + $0xf8] sm:$0xff] }
  0x27   : > { %485 = vadd.xlane.f32.xlu1 %v10247_v2  ;;  %v10298_v15 = vld [vmem:[%s10223_s25 + $0xf0] sm:$0xff]  ;;  %v10303_v16 = vld [vmem:[%s10223_s25 + $0x48] sm:$0xff]  ;;  %v10306_v17 = vld [vmem:[%s10223_s25 + $0x40] sm:$0xff] }
  0x28   : > { %437 = vadd.xlane.f32.xlu0 %v10250_v3  ;;  %v10311_v18 = vld [vmem:[%s10223_s25 + $0x58] sm:$0xff]  ;;  %v10314_v19 = vld [vmem:[%s10223_s25 + $0x50] sm:$0xff]  ;;  %v10319_v20 = vld [vmem:[%s10223_s25 + $0x68] sm:$0xff] }
  0x29   : > { %v10322_v21 = vld [vmem:[%s10223_s25 + $0x60] sm:$0xff]  ;;  %v10327_v22 = vld [vmem:[%s10223_s25 + $0x78] sm:$0xff]  ;;  %v10330_v23 = vld [vmem:[%s10223_s25 + $0x70] sm:$0xff] }
  0x2a   : > { %v10335_v24 = vld [vmem:[%s10223_s25 + $0x88] sm:$0xff]  ;;  %v10338_v25 = vld [vmem:[%s10223_s25 + $0x80] sm:$0xff]  ;;  %v10343_v26 = vld [vmem:[%s10223_s25 + $0x98] sm:$0xff] }
  0x2b   : > { %441 = vadd.xlane.f32.xlu1 %v10255_v4  ;;  %v10346_v27 = vld [vmem:[%s10223_s25 + $0x90] sm:$0xff]  ;;  %v10351_v28 = vld [vmem:[%s10223_s25 + $0xa8] sm:$0xff]  ;;  %v10354_v29 = vld [vmem:[%s10223_s25 + $0xa0] sm:$0xff] }
  0x2c   : > { %439 = vadd.xlane.f32.xlu0 %v10258_v5  ;;  %v10359_v30 = vld [vmem:[%s10223_s25 + $0xb8] sm:$0xff]  ;;  %v10362_v31 = vld [vmem:[%s10223_s25 + $0xb0] sm:$0xff]  ;;  %s10080_s25 = smov 96  }
  0x2d   : > { %v9128_v32 = vld [vmem:[%s16677_s3 + $0xac] ss:$12 sps:$4 sm:$0xff]   ;;  %v9130_v33 = vld [vmem:[%s16677_s3 + $0xa8] ss:$12 sps:$4 sm:$0xff]   ;;  %v9133_v60 = vld [vmem:[%s16677_s3 + $0x90] ss:$12 sps:$4 sm:$0xff]  }
  0x2e   : > { %1042 = vmatprep.subr.bf16.mxu0 %v9128_v32  ;;  %9000 = vmatprep.subr.bf16.mxu1 %v9128_v32  ;;  %v9131_v59 = vld [vmem:[%s16677_s3 + $0x94] ss:$12 sps:$4 sm:$0xff]  }
  0x2f   : > { %489 = vadd.xlane.f32.xlu1 %v10263_v6  ;;  %1043 = vmatpush1.bf16.msra.mxu0 %v9130_v33 }
  0x30   : > { %487 = vadd.xlane.f32.xlu0 %v10266_v7  ;;  %9008 = vmatpush1.bf16.msra.mxu1 %v9130_v33 }
  0x31   : > { %1044 = vmatprep.subr.bf16.mxu0 %v9131_v59  ;;  %9001 = vmatprep.subr.bf16.mxu1 %v9131_v59  ;;  %v9143_v59 = vld [vmem:[%s16677_s3 + $0x34] ss:$12 sps:$4 sm:$0xff]  }
  0x33   : > { %445 = vadd.xlane.f32.xlu1 %v10269_v8  ;;  %1045 = vmatpush1.bf16.msra.mxu0 %v9133_v60 }
  0x34   : > { %443 = vadd.xlane.f32.xlu0 %v10272_v9  ;;  %9009 = vmatpush1.bf16.msra.mxu1 %v9133_v60 }
  0x37   : > { %493 = vadd.xlane.f32.xlu1 %v10277_v10 }
  0x38   : > { %491 = vadd.xlane.f32.xlu0 %v10280_v11 }
  0x3b   : > { %449 = vadd.xlane.f32.xlu1 %v10287_v12 }
  0x3c   : > { %447 = vadd.xlane.f32.xlu0 %v10290_v13 }
  0x3f   : > { %497 = vadd.xlane.f32.xlu1 %v10295_v14 }
  0x40   : > { %495 = vadd.xlane.f32.xlu0 %v10298_v15 }
  0x43   : > { %453 = vadd.xlane.f32.xlu1 %v10303_v16 }
  0x44   : > { %451 = vadd.xlane.f32.xlu0 %v10306_v17 }
  0x47   : > { %457 = vadd.xlane.f32.xlu1 %v10311_v18 }
  0x48   : > { %455 = vadd.xlane.f32.xlu0 %v10314_v19 }
  0x4b   : > { %461 = vadd.xlane.f32.xlu1 %v10319_v20 }
  0x4c   : > { %459 = vadd.xlane.f32.xlu0 %v10322_v21 }
  0x4f   : > { %465 = vadd.xlane.f32.xlu1 %v10327_v22 }
  0x50   : > { %463 = vadd.xlane.f32.xlu0 %v10330_v23 }
  0x53   : > { %469 = vadd.xlane.f32.xlu1 %v10335_v24 }
  0x54   : > { %467 = vadd.xlane.f32.xlu0 %v10338_v25 }
  0x57   : > { %473 = vadd.xlane.f32.xlu1 %v10343_v26 }
  0x58   : > { %471 = vadd.xlane.f32.xlu0 %v10346_v27 }
  0x5b   : > { %477 = vadd.xlane.f32.xlu1 %v10351_v28 }
  0x5c   : > { %475 = vadd.xlane.f32.xlu0 %v10354_v29 }
  0x5f   : > { %481 = vadd.xlane.f32.xlu1 %v10359_v30 }
  0x60   : > { %479 = vadd.xlane.f32.xlu0 %v10362_v31 }
  0xac   : > { %v484_v34 = vpop.xlane.xlu1 %483 }
  0xad   : > { %v436_v35 = vpop.xlane.xlu0 %435  ;;  %v524_v56 = vmul.f32 0.0078125, %v484_v34 }
  0xae   : > { %v500_v36 = vmul.f32 0.0078125, %v436_v35 }
  0xb0   : > { %v10373_v37 = vsub.f32 %v10242_v1, %v500_v36  ;;  %v486_v38 = vpop.xlane.xlu1 %485 }
  0xb1   : > { %v438_v39 = vpop.xlane.xlu0 %437  ;;  %v525_v32 = vmul.f32 0.0078125, %v486_v38 }
  0xb2   : > { %v501_v40 = vmul.f32 0.0078125, %v438_v39  ;;  %v564_v41 = vmul.f32 %v10373_v37, %v10373_v37 }
  0xb4   : > { %596 = vadd.xlane.f32.xlu0 %v564_v41  ;;  %v10378_v42 = vsub.f32 %v10250_v3, %v501_v40  ;;  %v442_v43 = vpop.xlane.xlu1 %441  ;;  %v9137_v40 = vld [vmem:[%s16677_s3 + $0x64] ss:$12 sps:$4 sm:$0xff]  }
  0xb5   : > { %v440_v44 = vpop.xlane.xlu0 %439  ;;  %v503_v45 = vmul.f32 0.0078125, %v442_v43  ;;  %v9139_v43 = vld [vmem:[%s16677_s3 + $0x60] ss:$12 sps:$4 sm:$0xff]  }
  0xb6   : > { %v502_v46 = vmul.f32 0.0078125, %v440_v44  ;;  %v565_v47 = vmul.f32 %v10378_v42, %v10378_v42 }
  0xb7   : > { %v10383_v48 = vsub.f32 %v10255_v4, %v503_v45 }
  0xb8   : > { %598 = vadd.xlane.f32.xlu1 %v565_v47  ;;  %v10386_v49 = vsub.f32 %v10258_v5, %v502_v46  ;;  %v490_v50 = vpop.xlane.xlu1 %489  ;;  %v10411_v5 = vsub.f32 %v10239_v0, %v524_v56  ;;  %v10436_v46 = vsub.f32 %v10247_v2, %v525_v32  ;;  %v9142_v2 = vld [vmem:[%s16677_s3 + $0x48] ss:$12 sps:$4 sm:$0xff]  }
  0xb9   : > { %v488_v51 = vpop.xlane.xlu0 %487  ;;  %v567_v52 = vmul.f32 %v10383_v48, %v10383_v48 }
  0xba   : > { %v566_v53 = vmul.f32 %v10386_v49, %v10386_v49  ;;  %v526_v35 = vmul.f32 0.0078125, %v488_v51  ;;  %v588_v0 = vmul.f32 %v10411_v5, %v10411_v5  ;;  %v9140_v51 = vld [vmem:[%s16677_s3 + $0x4c] ss:$12 sps:$4 sm:$0xff]  }
  0xbc   : > { %602 = vadd.xlane.f32.xlu1 %v567_v52  ;;  %600 = vadd.xlane.f32.xlu0 %v566_v53  ;;  %v446_v54 = vpop.xlane.xlu1 %445  ;;  %v527_v52 = vmul.f32 0.0078125, %v490_v50 }
  0xbd   : > { %v444_v55 = vpop.xlane.xlu0 %443  ;;  %v505_v57 = vmul.f32 0.0078125, %v446_v54 }
  0xbe   : > { %v504_v58 = vmul.f32 0.0078125, %v444_v55 }
  0xbf   : > { %v10399_v61 = vsub.f32 %v10269_v8, %v505_v57  ;;  %v9134_v8 = vld [vmem:[%s16677_s3 + $0x7c] ss:$12 sps:$4 sm:$0xff]  }
  0xc0   : > { %v10402_v62 = vsub.f32 %v10272_v9, %v504_v58  ;;  %v10404_v63 = vpop.xlane.xlu1 %493  ;;  %v9136_v9 = vld [vmem:[%s16677_s3 + $0x78] ss:$12 sps:$4 sm:$0xff]   ;;  %1046 = vmatprep.subr.bf16.mxu0 %v9134_v8  ;;  %9002 = vmatprep.subr.bf16.mxu1 %v9134_v8  ;;  %v589_v58 = vmul.f32 %v10436_v46, %v10436_v46 }
  0xc1   : > { %v492_v1 = vpop.xlane.xlu0 %491  ;;  %v569_v3 = vmul.f32 %v10399_v61, %v10399_v61  ;;  %1047 = vmatpush1.bf16.msra.mxu0 %v9136_v9  ;;  %9010 = vmatpush1.bf16.msra.mxu1 %v9136_v9  ;;  %v10471_v9 = vsub.f32 %v10263_v6, %v527_v52 }
  0xc2   : > { %v568_v4 = vmul.f32 %v10402_v62, %v10402_v62  ;;  %1048 = vmatprep.subr.bf16.mxu0 %v9137_v40  ;;  %9003 = vmatprep.subr.bf16.mxu1 %v9137_v40  ;;  %v528_v53 = vmul.f32 0.0078125, %v492_v1  ;;  %v9145_v1 = vld [vmem:[%s16677_s3 + $0x30] ss:$12 sps:$4 sm:$0xff]  }
  0xc3   : > { %606 = vadd.xlane.f32.xlu1 %v569_v3 }
  0xc4   : > { %604 = vadd.xlane.f32.xlu0 %v568_v4  ;;  %v450_v33 = vpop.xlane.xlu1 %449  ;;  %v10468_v8 = vsub.f32 %v10280_v11, %v528_v53  ;;  %v9146_v11 = vld [vmem:[%s16677_s3 + $0x1c] ss:$12 sps:$4 sm:$0xff]  }
  0xc5   : > { %v448_v34 = vpop.xlane.xlu0 %447  ;;  %v507_v36 = vmul.f32 0.0078125, %v450_v33  ;;  %1049 = vmatpush1.bf16.msra.mxu0 %v9139_v43  ;;  %9011 = vmatpush1.bf16.msra.mxu1 %v9139_v43  ;;  %v591_v43 = vmul.f32 %v10471_v9, %v10471_v9 }
  0xc6   : > { %v506_v39 = vmul.f32 0.0078125, %v448_v34  ;;  %1050 = vmatprep.subr.bf16.mxu0 %v9140_v51  ;;  %9004 = vmatprep.subr.bf16.mxu1 %v9140_v51  ;;  %v529_v34 = vmul.f32 0.0078125, %v10404_v63  ;;  %v592_v63 = vmul.f32 %v10468_v8, %v10468_v8 }
  0xc7   : > { %644 = vadd.xlane.f32.xlu1 %v588_v0  ;;  %v10425_v41 = vsub.f32 %v10287_v12, %v507_v36 }
  0xc8   : > { %v10428_v38 = vsub.f32 %v10290_v13, %v506_v39  ;;  %v10433_v44 = vpop.xlane.xlu1 %497  ;;  %v10443_v13 = vsub.f32 %v10266_v7, %v526_v35  ;;  %v9148_v39 = vld [vmem:[%s16677_s3 + $0x18] ss:$12 sps:$4 sm:$0xff]  }
  0xc9   : > { %v496_v45 = vpop.xlane.xlu0 %495  ;;  %v571_v47 = vmul.f32 %v10425_v41, %v10425_v41  ;;  %1051 = vmatpush1.bf16.msra.mxu0 %v9142_v2  ;;  %9012 = vmatpush1.bf16.msra.mxu1 %v9142_v2 }
  0xca   : > { %v570_v12 = vmul.f32 %v10428_v38, %v10428_v38  ;;  %v590_v57 = vmul.f32 %v10443_v13, %v10443_v13  ;;  %1052 = vmatprep.subr.bf16.mxu0 %v9143_v59  ;;  %9005 = vmatprep.subr.bf16.mxu1 %v9143_v59  ;;  %v530_v6 = vmul.f32 0.0078125, %v496_v45  ;;  %v9149_v45 = vld [vmem:[%s16677_s3 + $0x4] ss:$12 sps:$4 sm:$0xff]  }
  0xcb   : > { %610 = vadd.xlane.f32.xlu1 %v571_v47 }
  0xcc   : > { %608 = vadd.xlane.f32.xlu0 %v570_v12  ;;  %v454_v54 = vpop.xlane.xlu1 %453  ;;  %v10505_v2 = vsub.f32 %v10298_v15, %v530_v6 }
  0xcd   : > { %v452_v55 = vpop.xlane.xlu0 %451  ;;  %v509_v7 = vmul.f32 0.0078125, %v454_v54  ;;  %1053 = vmatpush1.bf16.msra.mxu0 %v9145_v1  ;;  %9013 = vmatpush1.bf16.msra.mxu1 %v9145_v1  ;;  %v531_v54 = vmul.f32 0.0078125, %v10433_v44  ;;  %v10079_v1 = vmov 0  }
  0xce   : > { %v508_v56 = vmul.f32 0.0078125, %v452_v55  ;;  %1054 = vmatprep.subr.bf16.mxu0 %v9146_v11  ;;  %9006 = vmatprep.subr.bf16.mxu1 %v9146_v11  ;;  %v594_v15 = vmul.f32 %v10505_v2, %v10505_v2 }
  0xcf   : > { %648 = vadd.xlane.f32.xlu1 %v590_v57  ;;  %v10459_v50 = vsub.f32 %v10303_v16, %v509_v7  ;;  %1074 = vmatprep.mubr.bf16.mxu0 %v10079_v1  ;;  %v10526_v44 = vsub.f32 %v10295_v14, %v531_v54 }
  0xd0   : > { %646 = vadd.xlane.f32.xlu0 %v589_v58  ;;  %v10462_v60 = vsub.f32 %v10306_v17, %v508_v56  ;;  %v458_v3 = vpop.xlane.xlu1 %457  ;;  %1194 = vmatprep.mubr.bf16.mxu1 %v10079_v1 }
  0xd1   : > { %v456_v4 = vpop.xlane.xlu0 %455  ;;  %v573_v16 = vmul.f32 %v10459_v50, %v10459_v50  ;;  %v511_v32 = vmul.f32 0.0078125, %v458_v3  ;;  %1055 = vmatpush1.bf16.msra.mxu0 %v9148_v39  ;;  %9014 = vmatpush1.bf16.msra.mxu1 %v9148_v39 }
  0xd2   : > { %v572_v17 = vmul.f32 %v10462_v60, %v10462_v60  ;;  %v510_v33 = vmul.f32 0.0078125, %v456_v4  ;;  %1056 = vmatprep.subr.bf16.mxu0 %v9149_v45  ;;  %9007 = vmatprep.subr.bf16.mxu1 %v9149_v45 }
  0xd3   : > { %614 = vadd.xlane.f32.xlu1 %v573_v16  ;;  %v10482_v35 = vsub.f32 %v10311_v18, %v511_v32 }
  0xd4   : > { %612 = vadd.xlane.f32.xlu0 %v572_v17  ;;  %v10485_v36 = vsub.f32 %v10314_v19, %v510_v33  ;;  %v462_v0 = vpop.xlane.xlu1 %461  ;;  %v10495_v19 = vsub.f32 %v10277_v10, %v529_v34  ;;  %v9151_v10 = vld [vmem:[%s16677_s3] ss:$12 sps:$4 sm:$0xff]   ;;  %v595_v33 = vmul.f32 %v10526_v44, %v10526_v44 }
  0xd5   : > { %v460_v40 = vpop.xlane.xlu0 %459  ;;  %v513_v18 = vmul.f32 0.0078125, %v462_v0  ;;  %v575_v47 = vmul.f32 %v10482_v35, %v10482_v35  ;;  %1057 = vmatpush1.bf16.msra.mxu0 %v9151_v10  ;;  %9015 = vmatpush1.bf16.msra.mxu1 %v9151_v10 }
  0xd6   : > { %v574_v12 = vmul.f32 %v10485_v36, %v10485_v36  ;;  %v512_v51 = vmul.f32 0.0078125, %v460_v40  ;;  %v593_v7 = vmul.f32 %v10495_v19, %v10495_v19 }
  0xd7   : > { %652 = vadd.xlane.f32.xlu1 %v592_v63  ;;  %v10512_v55 = vsub.f32 %v10319_v20, %v513_v18 }
  0xd8   : > { %650 = vadd.xlane.f32.xlu0 %v591_v43  ;;  %v466_v52 = vpop.xlane.xlu1 %465  ;;  %v10519_v57 = vsub.f32 %v10322_v21, %v512_v51 }
  0xd9   : > { %v464_v53 = vpop.xlane.xlu0 %463  ;;  %v515_v56 = vmul.f32 0.0078125, %v466_v52  ;;  %v577_v20 = vmul.f32 %v10512_v55, %v10512_v55 }
  0xda   : > { %v576_v3 = vmul.f32 %v10519_v57, %v10519_v57  ;;  %v514_v4 = vmul.f32 0.0078125, %v464_v53 }
  0xdb   : > { %618 = vadd.xlane.f32.xlu1 %v575_v47  ;;  %v10531_v16 = vsub.f32 %v10327_v22, %v515_v56 }
  0xdc   : > { %616 = vadd.xlane.f32.xlu0 %v574_v12  ;;  %v470_v58 = vpop.xlane.xlu1 %469  ;;  %v10541_v39 = vsub.f32 %v10330_v23, %v514_v4 }
  0xdd   : > { %v468_v59 = vpop.xlane.xlu0 %467  ;;  %v517_v21 = vmul.f32 0.0078125, %v470_v58  ;;  %v579_v14 = vmul.f32 %v10531_v16, %v10531_v16 }
  0xde   : > { %v516_v34 = vmul.f32 0.0078125, %v468_v59  ;;  %v578_v18 = vmul.f32 %v10541_v39, %v10541_v39 }
  0xdf   : > { %656 = vadd.xlane.f32.xlu1 %v594_v15  ;;  %v10538_v6 = vsub.f32 %v10335_v24, %v517_v21 }
  0xe0   : > { %654 = vadd.xlane.f32.xlu0 %v593_v7  ;;  %v474_v17 = vpop.xlane.xlu1 %473  ;;  %v10544_v40 = vsub.f32 %v10338_v25, %v516_v34 }
  0xe1   : > { %v472_v32 = vpop.xlane.xlu0 %471  ;;  %v519_v11 = vmul.f32 0.0078125, %v474_v17  ;;  %v581_v43 = vmul.f32 %v10538_v6, %v10538_v6 }
  0xe2   : > { %v518_v0 = vmul.f32 0.0078125, %v472_v32  ;;  %v580_v47 = vmul.f32 %v10544_v40, %v10544_v40 }
  0xe3   : > { %622 = vadd.xlane.f32.xlu1 %v577_v20  ;;  %v10551_v24 = vsub.f32 %v10343_v26, %v519_v11 }
  0xe4   : > { %620 = vadd.xlane.f32.xlu0 %v576_v3  ;;  %v478_v22 = vpop.xlane.xlu1 %477  ;;  %v10556_v25 = vsub.f32 %v10346_v27, %v518_v0 }
  0xe5   : > { %v476_v63 = vpop.xlane.xlu0 %475  ;;  %v521_v45 = vmul.f32 0.0078125, %v478_v22  ;;  %v583_v12 = vmul.f32 %v10551_v24, %v10551_v24 }
  0xe6   : > { %v520_v10 = vmul.f32 0.0078125, %v476_v63  ;;  %v582_v26 = vmul.f32 %v10556_v25, %v10556_v25 }
  0xe7   : > { %626 = vadd.xlane.f32.xlu1 %v579_v14  ;;  %v10561_v52 = vsub.f32 %v10351_v28, %v521_v45  ;;  %v10576_v28 = vld [vmem:[%s16677_s3 + $0xb0] ss:$12 sps:$4 sm:$0xff]  }
  0xe8   : > { %658 = vadd.xlane.f32.xlu0 %v595_v33  ;;  %v482_v23 = vpop.xlane.xlu1 %481  ;;  %v10571_v7 = vsub.f32 %v10354_v29, %v520_v10  ;;  %8920 = vmatprep.subr.bf16.mxu1 %v10576_v28 }
  0xe9   : > { %v523_v51 = vmul.f32 0.0078125, %v482_v23  ;;  %v480_v53 = vpop.xlane.xlu0 %479  ;;  %v585_v27 = vmul.f32 %v10561_v52, %v10561_v52 }
  0xea   : > { %v522_v54 = vmul.f32 0.0078125, %v480_v53  ;;  %v584_v58 = vmul.f32 %v10571_v7, %v10571_v7 }
  0xeb   : > { %630 = vadd.xlane.f32.xlu1 %v581_v43  ;;  %v10568_v15 = vsub.f32 %v10359_v30, %v523_v51 }
  0xec   : > { %624 = vadd.xlane.f32.xlu0 %v578_v18  ;;  %v10583_v59 = vsub.f32 %v10362_v31, %v522_v54 }
  0xed   : > { %v587_v56 = vmul.f32 %v10568_v15, %v10568_v15 }
  0xee   : > { %v586_v29 = vmul.f32 %v10583_v59, %v10583_v59 }
  0xef   : > { %634 = vadd.xlane.f32.xlu1 %v583_v12  ;;  %v10592_v12 = vld [vmem:[%s16675_s1] ss:$0 sm:$0xff] }
  0xf0   : > { %628 = vadd.xlane.f32.xlu0 %v580_v47 }
  0xf3   : > { %638 = vadd.xlane.f32.xlu1 %v585_v27 }
  0xf4   : > { %632 = vadd.xlane.f32.xlu0 %v582_v26 }
  0xf7   : > { %642 = vadd.xlane.f32.xlu1 %v587_v56  ;;  %v10599_v56 = vld [vmem:[%s16676_s2] ss:$0 sm:$0xff] }
  0xf8   : > { %636 = vadd.xlane.f32.xlu0 %v584_v58 }
  0xfc   : > { %640 = vadd.xlane.f32.xlu0 %v586_v29 }
 0x13d   : > { %v597_v30 = vpop.xlane.xlu0 %596 }
 0x13e   : > { %v660_v20 = vmul.f32 0.0078125, %v597_v30 }
 0x140   : > { %v692_v3 = vadd.f32 1e-05, %v660_v20 }
 0x141   : > { %v599_v21 = vpop.xlane.xlu1 %598 }
 0x142   : > { %9160 = vrsqrt.f32 %v692_v3  ;;  %v661_v4 = vmul.f32 0.0078125, %v599_v21 }
 0x144   : > { %v693_v17 = vadd.f32 1e-05, %v661_v4 }
 0x145   : > { %v603_v32 = vpop.xlane.xlu1 %602  ;;  %v601_v33 = vpop.xlane.xlu0 %600 }
 0x146   : > { %9162 = vrsqrt.f32 %v693_v17  ;;  %v663_v31 = vmul.f32 0.0078125, %v603_v32  ;;  %v662_v34 = vmul.f32 0.0078125, %v601_v33 }
 0x148   : > { %v695_v14 = vadd.f32 1e-05, %v663_v31  ;;  %v694_v11 = vadd.f32 1e-05, %v662_v34 }
 0x14a   : > { %9164 = vrsqrt.f32 %v695_v14 }
 0x14b   : > { %9166 = vrsqrt.f32 %v694_v11 }
 0x14c   : > { %v607_v22 = vpop.xlane.xlu1 %606 }
 0x14d   : > { %v605_v0 = vpop.xlane.xlu0 %604  ;;  %v665_v63 = vmul.f32 0.0078125, %v607_v22 }
 0x14e   : > { %v664_v43 = vmul.f32 0.0078125, %v605_v0 }
 0x14f   : > { %v9161_v18 = vpop.eup %9160  ;;  %v697_v45 = vadd.f32 1e-05, %v665_v63 }
 0x150   : > { %v696_v23 = vadd.f32 1e-05, %v664_v43  ;;  %v756_v47 = vmul.f32 %v9161_v18, %v10373_v37  ;;  %v645_v51 = vpop.xlane.xlu1 %644 }
 0x151   : > { %9168 = vrsqrt.f32 %v697_v45  ;;  %v684_v10 = vmul.f32 0.0078125, %v645_v51 }
 0x152   : > { %9170 = vrsqrt.f32 %v696_v23  ;;  %v795_v26 = vmul.f32 %v10592_v12, %v756_v47 }
 0x153   : > { %v9163_v53 = vpop.eup %9162  ;;  %v716_v27 = vadd.f32 1e-05, %v684_v10 }
 0x154   : > { %v757_v54 = vmul.f32 %v9163_v53, %v10378_v42  ;;  %v611_v37 = vpop.xlane.xlu1 %610  ;;  %v834_v21 = vadd.f32 %v10599_v56, %v795_v26 }
 0x155   : > { %v609_v58 = vpop.xlane.xlu0 %608  ;;  %v667_v29 = vmul.f32 0.0078125, %v611_v37  ;;  %9172 = vrsqrt.f32 %v716_v27 }
 0x156   : > { %v666_v30 = vmul.f32 0.0078125, %v609_v58  ;;  %v796_v20 = vmul.f32 %v10592_v12, %v757_v54 }
 0x157   : > { %v9165_v3 = vpop.eup %9164  ;;  %v699_v17 = vadd.f32 1e-05, %v667_v29 }
 0x158   : > { %v9167_v4 = vpop.eup %9166  ;;  %v698_v32 = vadd.f32 1e-05, %v666_v30  ;;  %v835_v42 = vadd.f32 %v10599_v56, %v796_v20  ;;  %v759_v33 = vmul.f32 %v9165_v3, %v10383_v48  ;;  %v649_v31 = vpop.xlane.xlu1 %648 }
 0x159   : > { %v647_v34 = vpop.xlane.xlu0 %646  ;;  %v758_v14 = vmul.f32 %v9167_v4, %v10386_v49  ;;  %9174 = vrsqrt.f32 %v699_v17  ;;  %v686_v11 = vmul.f32 0.0078125, %v649_v31 }
 0x15a   : > { %v685_v22 = vmul.f32 0.0078125, %v647_v34  ;;  %v10606_v0 = vpack.c.bf16 %v835_v42, %v834_v21  ;;  %9176 = vrsqrt.f32 %v698_v32  ;;  %v798_v43 = vmul.f32 %v10592_v12, %v759_v33 }
 0x15b   : > { %v797_v63 = vmul.f32 %v10592_v12, %v758_v14  ;;  %v718_v18 = vadd.f32 1e-05, %v686_v11 }
 0x15c   : > { %v717_v45 = vadd.f32 1e-05, %v685_v22  ;;  %1075 = vmatmul.mubr.bf16.vlgmr.msra.gmra.mxu0 %v10606_v0  ;;  %v615_v23 = vpop.xlane.xlu1 %614  ;;  %v837_v47 = vadd.f32 %v10599_v56, %v798_v43 }
 0x15d   : > { %v613_v48 = vpop.xlane.xlu0 %612  ;;  %1084 = vmatprep.mubr.bf16.mxu0 %v10079_v1  ;;  %v836_v49 = vadd.f32 %v10599_v56, %v797_v63  ;;  %v669_v51 = vmul.f32 0.0078125, %v615_v23 }
 0x15e   : > { %v668_v10 = vmul.f32 0.0078125, %v613_v48  ;;  %v9169_v53 = vpop.eup %9168  ;;  %9178 = vrsqrt.f32 %v717_v45 }
 0x15f   : > { %v9171_v26 = vpop.eup %9170  ;;  %9180 = vrsqrt.f32 %v718_v18  ;;  %v701_v27 = vadd.f32 1e-05, %v669_v51  ;;  %v761_v37 = vmul.f32 %v9169_v53, %v10399_v61  ;;  %v10615_v30 = vpack.c.bf16 %v837_v47, %v836_v49 }
 0x160   : > { %v700_v54 = vadd.f32 1e-05, %v668_v10  ;;  %v653_v58 = vpop.xlane.xlu1 %652  ;;  %v760_v20 = vmul.f32 %v9171_v26, %v10402_v62 }
 0x161   : > { %v651_v29 = vpop.xlane.xlu0 %650  ;;  %9182 = vrsqrt.f32 %v701_v27  ;;  %v688_v3 = vmul.f32 0.0078125, %v653_v58  ;;  %v800_v4 = vmul.f32 %v10592_v12, %v761_v37 }
 0x162   : > { %v687_v21 = vmul.f32 0.0078125, %v651_v29  ;;  %9184 = vrsqrt.f32 %v700_v54  ;;  %v799_v17 = vmul.f32 %v10592_v12, %v760_v20  ;;  %v9173_v32 = vpop.eup %9172 }
 0x163   : > { %v720_v33 = vadd.f32 1e-05, %v688_v3  ;;  %v839_v62 = vadd.f32 %v10599_v56, %v800_v4  ;;  %v780_v63 = vmul.f32 %v9173_v32, %v10411_v5 }
 0x164   : > { %v719_v42 = vadd.f32 1e-05, %v687_v21  ;;  %1085 = vmatmul.mubr.bf16.gmra.mxu0 %v10615_v30  ;;  %v619_v61 = vpop.xlane.xlu1 %618  ;;  %v838_v34 = vadd.f32 %v10599_v56, %v799_v17 }
 0x165   : > { %v617_v31 = vpop.xlane.xlu0 %616  ;;  %1094 = vmatprep.mubr.bf16.mxu0 %v10079_v1  ;;  %v671_v14 = vmul.f32 0.0078125, %v619_v61  ;;  %v819_v27 = vmul.f32 %v10592_v12, %v780_v63 }
 0x166   : > { %v670_v11 = vmul.f32 0.0078125, %v617_v31  ;;  %v9175_v22 = vpop.eup %9174  ;;  %9186 = vrsqrt.f32 %v719_v42  ;;  %v10626_v47 = vpack.c.bf16 %v839_v62, %v838_v34 }
 0x167   : > { %v9177_v43 = vpop.eup %9176  ;;  %v703_v18 = vadd.f32 1e-05, %v671_v14  ;;  %v763_v23 = vmul.f32 %v9175_v22, %v10425_v41  ;;  %9188 = vrsqrt.f32 %v720_v33  ;;  %v858_v33 = vadd.f32 %v10599_v56, %v819_v27 }
 0x168   : > { %v702_v45 = vadd.f32 1e-05, %v670_v11  ;;  %v657_v48 = vpop.xlane.xlu1 %656  ;;  %v762_v51 = vmul.f32 %v9177_v43, %v10428_v38 }
 0x169   : > { %v655_v49 = vpop.xlane.xlu0 %654  ;;  %9190 = vrsqrt.f32 %v703_v18  ;;  %v690_v10 = vmul.f32 0.0078125, %v657_v48  ;;  %v802_v26 = vmul.f32 %v10592_v12, %v763_v23 }
 0x16a   : > { %v689_v53 = vmul.f32 0.0078125, %v655_v49  ;;  %9192 = vrsqrt.f32 %v702_v45  ;;  %v801_v5 = vmul.f32 %v10592_v12, %v762_v51 }
 0x16b   : > { %v9179_v54 = vpop.eup %9178  ;;  %v722_v58 = vadd.f32 1e-05, %v690_v10  ;;  %v841_v3 = vadd.f32 %v10599_v56, %v802_v26 }
 0x16c   : > { %v721_v37 = vadd.f32 1e-05, %v689_v53  ;;  %1095 = vmatmul.mubr.bf16.gmra.mxu0 %v10626_v47  ;;  %v9181_v41 = vpop.eup %9180  ;;  %v623_v29 = vpop.xlane.xlu1 %622  ;;  %v840_v38 = vadd.f32 %v10599_v56, %v801_v5  ;;  %v781_v21 = vmul.f32 %v9179_v54, %v10436_v46 }
 0x16d   : > { %v621_v20 = vpop.xlane.xlu0 %620  ;;  %1104 = vmatprep.mubr.bf16.mxu0 %v10079_v1  ;;  %v673_v4 = vmul.f32 0.0078125, %v623_v29  ;;  %v782_v14 = vmul.f32 %v9181_v41, %v10443_v13  ;;  %v9153_v13 = vld [vmem:[%s16677_s3 + $0x98] ss:$12 sps:$4 sm:$0xff]  }
 0x16e   : > { %v672_v17 = vmul.f32 0.0078125, %v621_v20  ;;  %v9183_v32 = vpop.eup %9182  ;;  %9194 = vrsqrt.f32 %v721_v37  ;;  %v820_v42 = vmul.f32 %v10592_v12, %v781_v21  ;;  %v10641_v63 = vpack.c.bf16 %v841_v3, %v840_v38 }
 0x16f   : > { %v9185_v61 = vpop.eup %9184  ;;  %v705_v31 = vadd.f32 1e-05, %v673_v4  ;;  %v765_v62 = vmul.f32 %v9183_v32, %v10459_v50  ;;  %9196 = vrsqrt.f32 %v722_v58  ;;  %v821_v5 = vmul.f32 %v10592_v12, %v782_v14 }
 0x170   : > { %v704_v34 = vadd.f32 1e-05, %v672_v17  ;;  %v627_v11 = vpop.xlane.xlu1 %626  ;;  %v859_v46 = vadd.f32 %v10599_v56, %v820_v42  ;;  %v764_v43 = vmul.f32 %v9185_v61, %v10462_v60 }
 0x171   : > { %v659_v22 = vpop.xlane.xlu0 %658  ;;  %9198 = vrsqrt.f32 %v705_v31  ;;  %v675_v18 = vmul.f32 0.0078125, %v627_v11  ;;  %v804_v23 = vmul.f32 %v10592_v12, %v765_v62  ;;  %v860_v4 = vadd.f32 %v10599_v56, %v821_v5 }
 0x172   : > { %v691_v45 = vmul.f32 0.0078125, %v659_v22  ;;  %9200 = vrsqrt.f32 %v704_v34  ;;  %v10646_v48 = vpack.c.bf16 %v859_v46, %v858_v33  ;;  %v803_v50 = vmul.f32 %v10592_v12, %v764_v43 }
 0x173   : > { %v9187_v49 = vpop.eup %9186  ;;  %v707_v51 = vadd.f32 1e-05, %v675_v18  ;;  %v843_v41 = vadd.f32 %v10599_v56, %v804_v23 }
 0x174   : > { %v723_v10 = vadd.f32 1e-05, %v691_v45  ;;  %1105 = vmatmul.mubr.bf16.gmra.mxu0 %v10641_v63  ;;  %1195 = vmatmul.mubr.bf16.vlgmr.msra.gmra.mxu1 %v10646_v48  ;;  %v631_v60 = vpop.xlane.xlu1 %630  ;;  %v783_v26 = vmul.f32 %v9187_v49, %v10471_v9  ;;  %v9189_v27 = vpop.eup %9188  ;;  %v842_v37 = vadd.f32 %v10599_v56, %v803_v50  ;;  %v9154_v9 = vld [vmem:[%s16677_s3 + $0x80] ss:$12 sps:$4 sm:$0xff]  }
 0x175   : > { %v625_v53 = vpop.xlane.xlu0 %624  ;;  %1114 = vmatprep.mubr.bf16.mxu0 %v10079_v1  ;;  %8921 = vmatpush3.bf16.msra.mxu1 %v10576_v28  ;;  %v677_v38 = vmul.f32 0.0078125, %v631_v60  ;;  %v784_v42 = vmul.f32 %v9189_v27, %v10468_v8 }
 0x176   : > { %v674_v54 = vmul.f32 0.0078125, %v625_v53  ;;  %1204 = vmatprep.mubr.bf16.mxu1 %v10079_v1  ;;  %v9191_v58 = vpop.eup %9190  ;;  %9202 = vrsqrt.f32 %v723_v10  ;;  %8922 = vmatprep.subr.bf16.mxu1 %v9153_v13  ;;  %v822_v29 = vmul.f32 %v10592_v12, %v783_v26  ;;  %v10670_v61 = vpack.c.bf16 %v843_v41, %v842_v37 }
 0x177   : > { %v9193_v20 = vpop.eup %9192  ;;  %9204 = vrsqrt.f32 %v707_v51  ;;  %v767_v3 = vmul.f32 %v9191_v58, %v10482_v35  ;;  %v9155_v35 = vld [vmem:[%s16677_s3 + $0x68] ss:$12 sps:$4 sm:$0xff]   ;;  %v823_v43 = vmul.f32 %v10592_v12, %v784_v42  ;;  %v9158_v42 = vld [vmem:[%s16677_s3 + $0x20] ss:$12 sps:$4 sm:$0xff]  }
 0x178   : > { %v706_v28 = vadd.f32 1e-05, %v674_v54  ;;  %v861_v17 = vadd.f32 %v10599_v56, %v822_v29  ;;  %v766_v32 = vmul.f32 %v9193_v20, %v10485_v36  ;;  %v709_v36 = vadd.f32 1e-05, %v677_v38  ;;  %v635_v8 = vpop.xlane.xlu1 %634 }
 0x179   : > { %v629_v21 = vpop.xlane.xlu0 %628  ;;  %8923 = vmatpush3.bf16.msra.mxu1 %v9153_v13  ;;  %v806_v31 = vmul.f32 %v10592_v12, %v767_v3  ;;  %v679_v10 = vmul.f32 0.0078125, %v635_v8  ;;  %v862_v53 = vadd.f32 %v10599_v56, %v823_v43 }
 0x17a   : > { %v676_v33 = vmul.f32 0.0078125, %v629_v21  ;;  %9206 = vrsqrt.f32 %v706_v28  ;;  %v10673_v34 = vpack.c.bf16 %v861_v17, %v860_v4  ;;  %8924 = vmatprep.subr.bf16.mxu1 %v9154_v9  ;;  %v805_v62 = vmul.f32 %v10592_v12, %v766_v32 }
 0x17b   : > { %v9195_v14 = vpop.eup %9194  ;;  %v845_v13 = vadd.f32 %v10599_v56, %v806_v31 }
 0x17c   : > { %v708_v11 = vadd.f32 1e-05, %v676_v33  ;;  %1115 = vmatmul.mubr.bf16.gmra.mxu0 %v10670_v61  ;;  %1205 = vmatmul.mubr.bf16.gmra.mxu1 %v10673_v34  ;;  %v785_v46 = vmul.f32 %v9195_v14, %v10495_v19  ;;  %v9197_v18 = vpop.eup %9196  ;;  %v844_v23 = vadd.f32 %v10599_v56, %v805_v62  ;;  %v9156_v19 = vld [vmem:[%s16677_s3 + $0x50] ss:$12 sps:$4 sm:$0xff]   ;;  %v639_v38 = vpop.xlane.xlu1 %638 }
 0x17d   : > { %v633_v22 = vpop.xlane.xlu0 %632  ;;  %1124 = vmatprep.mubr.bf16.mxu0 %v10079_v1  ;;  %8925 = vmatpush3.bf16.msra.mxu1 %v9154_v9  ;;  %v786_v27 = vmul.f32 %v9197_v18, %v10505_v2 }
 0x17e   : > { %v678_v45 = vmul.f32 0.0078125, %v633_v22  ;;  %1214 = vmatprep.mubr.bf16.mxu1 %v10079_v1  ;;  %v9199_v50 = vpop.eup %9198  ;;  %9208 = vrsqrt.f32 %v708_v11  ;;  %8926 = vmatprep.subr.bf16.mxu1 %v9155_v35  ;;  %v824_v49 = vmul.f32 %v10592_v12, %v785_v46  ;;  %v10696_v37 = vpack.c.bf16 %v845_v13, %v844_v23  ;;  %v9159_v46 = vld [vmem:[%s16677_s3 + $0x8] ss:$12 sps:$4 sm:$0xff]  }
 0x17f   : > { %v9201_v51 = vpop.eup %9200  ;;  %9210 = vrsqrt.f32 %v709_v36  ;;  %v769_v60 = vmul.f32 %v9199_v50, %v10512_v55  ;;  %v9157_v55 = vld [vmem:[%s16677_s3 + $0x38] ss:$12 sps:$4 sm:$0xff]   ;;  %v825_v3 = vmul.f32 %v10592_v12, %v786_v27 }
 0x180   : > { %v863_v26 = vadd.f32 %v10599_v56, %v824_v49  ;;  %v768_v5 = vmul.f32 %v9201_v51, %v10519_v57  ;;  %v710_v54 = vadd.f32 1e-05, %v678_v45  ;;  %v711_v57 = vadd.f32 1e-05, %v679_v10  ;;  %v643_v23 = vpop.xlane.xlu1 %642 }
 0x181   : > { %8927 = vmatpush3.bf16.msra.mxu1 %v9155_v35  ;;  %v808_v41 = vmul.f32 %v10592_v12, %v769_v60  ;;  %v637_v58 = vpop.xlane.xlu0 %636  ;;  %v864_v35 = vadd.f32 %v10599_v56, %v825_v3 }
 0x182   : > { %v10699_v29 = vpack.c.bf16 %v863_v26, %v862_v53  ;;  %8928 = vmatprep.subr.bf16.mxu1 %v9156_v19  ;;  %v807_v9 = vmul.f32 %v10592_v12, %v768_v5  ;;  %9212 = vrsqrt.f32 %v710_v54  ;;  %v680_v21 = vmul.f32 0.0078125, %v637_v58 }
 0x183   : > { %v9203_v20 = vpop.eup %9202  ;;  %v847_v17 = vadd.f32 %v10599_v56, %v808_v41  ;;  %9214 = vrsqrt.f32 %v711_v57 }
 0x184   : > { %1125 = vmatmul.mubr.bf16.gmra.mxu0 %v10696_v37  ;;  %v9205_v2 = vpop.eup %9204  ;;  %1215 = vmatmul.mubr.bf16.gmra.mxu1 %v10699_v29  ;;  %v787_v28 = vmul.f32 %v9203_v20, %v10526_v44  ;;  %v846_v4 = vadd.f32 %v10599_v56, %v807_v9  ;;  %v681_v44 = vmul.f32 0.0078125, %v639_v38  ;;  %v712_v36 = vadd.f32 1e-05, %v680_v21 }
 0x185   : > { %1134 = vmatprep.mubr.bf16.mxu0 %v10079_v1  ;;  %8929 = vmatpush3.bf16.msra.mxu1 %v9156_v19  ;;  %v771_v31 = vmul.f32 %v9205_v2, %v10531_v16  ;;  %v641_v8 = vpop.xlane.xlu0 %640  ;;  %v683_v19 = vmul.f32 0.0078125, %v643_v23 }
 0x186   : > { %1224 = vmatprep.mubr.bf16.mxu1 %v10079_v1  ;;  %8930 = vmatprep.subr.bf16.mxu1 %v9157_v55  ;;  %v826_v32 = vmul.f32 %v10592_v12, %v787_v28  ;;  %v10721_v11 = vpack.c.bf16 %v847_v17, %v846_v4  ;;  %v713_v18 = vadd.f32 1e-05, %v681_v44  ;;  %9216 = vrsqrt.f32 %v712_v36 }
 0x187   : > { %v9207_v33 = vpop.eup %9206  ;;  %v682_v13 = vmul.f32 0.0078125, %v641_v8  ;;  %v715_v27 = vadd.f32 1e-05, %v683_v19 }
 0x188   : > { %v865_v62 = vadd.f32 %v10599_v56, %v826_v32  ;;  %v770_v14 = vmul.f32 %v9207_v33, %v10541_v39  ;;  %v810_v39 = vmul.f32 %v10592_v12, %v771_v31  ;;  %9218 = vrsqrt.f32 %v713_v18 }
 0x189   : > { %8931 = vmatpush3.bf16.msra.mxu1 %v9157_v55  ;;  %v714_v60 = vadd.f32 1e-05, %v682_v13 }
 0x18a   : > { %v10723_v22 = vpack.c.bf16 %v865_v62, %v864_v35  ;;  %8932 = vmatprep.subr.bf16.mxu1 %v9158_v42  ;;  %v809_v16 = vmul.f32 %v10592_v12, %v770_v14  ;;  %v849_v51 = vadd.f32 %v10599_v56, %v810_v39 }
 0x18b   : > { %v9209_v43 = vpop.eup %9208  ;;  %9220 = vrsqrt.f32 %v714_v60 }
 0x18c   : > { %1135 = vmatmul.mubr.bf16.gmra.mxu0 %v10721_v11  ;;  %v9211_v45 = vpop.eup %9210  ;;  %1225 = vmatmul.mubr.bf16.gmra.mxu1 %v10723_v22  ;;  %v848_v50 = vadd.f32 %v10599_v56, %v809_v16  ;;  %v772_v49 = vmul.f32 %v9209_v43, %v10544_v40  ;;  %9222 = vrsqrt.f32 %v715_v27 }
 0x18d   : > { %1144 = vmatprep.mubr.bf16.mxu0 %v10079_v1  ;;  %8933 = vmatpush3.bf16.msra.mxu1 %v9158_v42  ;;  %v773_v10 = vmul.f32 %v9211_v45, %v10538_v6 }
 0x18e   : > { %8936 = vmatprep.mubr.bf16.mxu1 %v10606_v0  ;;  %8934 = vmatprep.subr.bf16.mxu1 %v9159_v46  ;;  %v873_v53 = vpack.c.bf16 %v849_v51, %v848_v50  ;;  %v811_v26 = vmul.f32 %v10592_v12, %v772_v49 }
 0x18f   : > { %v9213_v5 = vpop.eup %9212  ;;  %v812_v0 = vmul.f32 %v10592_v12, %v773_v10 }
 0x190   : > { %v9215_v54 = vpop.eup %9214  ;;  %v850_v6 = vadd.f32 %v10599_v56, %v811_v26  ;;  %v774_v40 = vmul.f32 %v9213_v5, %v10556_v25 }
 0x191   : > { %8935 = vmatpush3.bf16.msra.mxu1 %v9159_v46  ;;  %v851_v41 = vadd.f32 %v10599_v56, %v812_v0  ;;  %v775_v58 = vmul.f32 %v9215_v54, %v10551_v24 }
 0x192   : > { %v813_v9 = vmul.f32 %v10592_v12, %v774_v40 }
 0x193   : > { %v874_v55 = vpack.c.bf16 %v851_v41, %v850_v6  ;;  %v9217_v20 = vpop.eup %9216 }
 0x194   : > { %1145 = vmatmul.mubr.bf16.gmra.mxu0 %v873_v53  ;;  %8937 = vmatmul.mubr.bf16.vlgmr.msra.gmra.mxu1 %v10615_v30  ;;  %v814_v30 = vmul.f32 %v10592_v12, %v775_v58  ;;  %v852_v25 = vadd.f32 %v10599_v56, %v813_v9 }
 0x195   : > { %1154 = vmatprep.mubr.bf16.mxu0 %v10079_v1  ;;  %8940 = vmatprep.mubr.bf16.mxu1 %v10626_v47  ;;  %v9219_v57 = vpop.eup %9218  ;;  %v776_v47 = vmul.f32 %v9217_v20, %v10571_v7 }
 0x196   : > { %v853_v24 = vadd.f32 %v10599_v56, %v814_v30  ;;  %v777_v2 = vmul.f32 %v9219_v57, %v10561_v52 }
 0x197   : > { %v815_v28 = vmul.f32 %v10592_v12, %v776_v47 }
 0x198   : > { %v875_v38 = vpack.c.bf16 %v853_v24, %v852_v25  ;;  %v9221_v3 = vpop.eup %9220  ;;  %v816_v21 = vmul.f32 %v10592_v12, %v777_v2 }
 0x199   : > { %v854_v7 = vadd.f32 %v10599_v56, %v815_v28 }
 0x19a   : > { %v855_v52 = vadd.f32 %v10599_v56, %v816_v21 }
 0x19c   : > { %1155 = vmatmul.mubr.bf16.gmra.mxu0 %v874_v55  ;;  %8941 = vmatmul.mubr.bf16.gmra.mxu1 %v10641_v63  ;;  %v9223_v63 = vpop.eup %9222  ;;  %v876_v17 = vpack.c.bf16 %v855_v52, %v854_v7 }
 0x19d   : > { %1164 = vmatprep.mubr.bf16.mxu0 %v10079_v1  ;;  %8944 = vmatprep.mubr.bf16.mxu1 %v10670_v61  ;;  %v778_v61 = vmul.f32 %v9221_v3, %v10583_v59  ;;  %v779_v4 = vmul.f32 %v9223_v63, %v10568_v15 }
 0x19f   : > { %v817_v32 = vmul.f32 %v10592_v12, %v778_v61  ;;  %v818_v42 = vmul.f32 %v10592_v12, %v779_v4 }
 0x1a1   : > { %v857_v33 = vadd.f32 %v10599_v56, %v818_v42 }
 0x1a4   : > { %1165 = vmatmul.mubr.bf16.gmra.mxu0 %v875_v38  ;;  %8945 = vmatmul.mubr.bf16.gmra.mxu1 %v10696_v37  ;;  %v856_v37 = vadd.f32 %v10599_v56, %v817_v32 }
 0x1a5   : > { %1174 = vmatprep.mubr.bf16.mxu0 %v10079_v1  ;;  %8948 = vmatprep.mubr.bf16.mxu1 %v10721_v11 }
 0x1a6   : > { %v877_v44 = vpack.c.bf16 %v857_v33, %v856_v37 }
 0x1ac   : > { %1175 = vmatmul.mubr.bf16.gmra.mxu0 %v876_v17  ;;  %8949 = vmatmul.mubr.bf16.gmra.mxu1 %v873_v53 }
 0x1ad   : > { %1184 = vmatprep.mubr.bf16.mxu0 %v10079_v1  ;;  %8952 = vmatprep.mubr.bf16.mxu1 %v874_v55 }
 0x1b4   : > { %1185 = vmatmul.mubr.bf16.gmra.mxu0 %v877_v44  ;;  %8953 = vmatmul.mubr.bf16.gmra.mxu1 %v875_v38 }
 0x1b5   : > { %8956 = vmatprep.mubr.bf16.mxu1 %v876_v17 }
 0x1bc   : > { %8957 = vmatmul.mubr.bf16.gmra.mxu1 %v877_v44 }
 0x1bd   : > { %8960 = vmatprep.mubr.bf16.mxu1 %v10646_v48 }
 0x1c4   : > { %8961 = vmatmul.mubr.bf16.gmra.mxu1 %v10673_v34 }
 0x1c5   : > { %8964 = vmatprep.mubr.bf16.mxu1 %v10699_v29 }
 0x1cc   : > { %8965 = vmatmul.mubr.bf16.gmra.mxu1 %v10723_v22 }
 0x21c   : > { %v1076_v1 = vpop.f32.mrf.mxu0 }
 0x21e   : > { %v1078_v15 = vpop.f32.mrf.mxu0 }
 0x21f   : > { %v8336_v59 = vpack.c.bf16 %v1078_v15, %v1076_v1  ;;  %v10774_v12 = vpack.c.bf16 %v1078_v15, %v1078_v15 }
 0x220   : > { %v1080_v56 = vpop.f32.mrf.mxu0 }
 0x221   : > { %1716 = vst [vmem:[#allocation2] sm:$0xff] %v8336_v59  ;;  %1845 = vst.msk [vmem:[%s10228_s30] sm:$0xf] %vm1844_vm0, %v10774_v12  ;;  %1909 = vrot.lane.b32.xlu0 %v10774_v12, %s10080_s25 }
 0x222   : > { %v1082_v48 = vpop.f32.mrf.mxu0 }
 0x223   : > { %v8338_v34 = vpack.c.bf16 %v1082_v48, %v1080_v56  ;;  %v10781_v29 = vpack.c.bf16 %v1082_v48, %v1082_v48 }
 0x224   : > { %v1086_v31 = vpop.f32.mrf.mxu0 }
 0x225   : > { %1718 = vst [vmem:[#allocation2 + $0xc] sm:$0xff] %v8338_v34  ;;  %1846 = vst.msk [vmem:[%s10228_s30 + $0x4] sm:$0xf] %vm1844_vm0, %v10781_v29  ;;  %1911 = vrot.lane.b32.xlu1 %v10781_v29, %s10080_s25 }
 0x226   : > { %v1088_v35 = vpop.f32.mrf.mxu0 }
 0x227   : > { %v8340_v62 = vpack.c.bf16 %v1088_v35, %v1086_v31  ;;  %v10788_v14 = vpack.c.bf16 %v1088_v35, %v1088_v35 }
 0x228   : > { %v1090_v36 = vpop.f32.mrf.mxu0 }
 0x229   : > { %1720 = vst [vmem:[#allocation2 + $0x18] sm:$0xff] %v8340_v62  ;;  %1847 = vst.msk [vmem:[%s10228_s30 + $0x8] sm:$0xf] %vm1844_vm0, %v10788_v14 }
 0x22a   : > { %v1092_v11 = vpop.f32.mrf.mxu0 }
 0x22b   : > { %v8342_v8 = vpack.c.bf16 %v1092_v11, %v1090_v36  ;;  %v10793_v22 = vpack.c.bf16 %v1092_v11, %v1092_v11 }
 0x22c   : > { %v1096_v46 = vpop.f32.mrf.mxu0 }
 0x22d   : > { %1722 = vst [vmem:[#allocation2 + $0x24] sm:$0xff] %v8342_v8  ;;  %1848 = vst.msk [vmem:[%s10228_s30 + $0xc] sm:$0xf] %vm1844_vm0, %v10793_v22 }
 0x22e   : > { %v1098_v16 = vpop.f32.mrf.mxu0 }
 0x22f   : > { %v8344_v43 = vpack.c.bf16 %v1098_v16, %v1096_v46  ;;  %v10798_v18 = vpack.c.bf16 %v1098_v16, %v1098_v16 }
 0x230   : > { %v1100_v39 = vpop.f32.mrf.mxu0 }
 0x231   : > { %1724 = vst [vmem:[#allocation2 + $0x30] sm:$0xff] %v8344_v43  ;;  %1849 = vst.msk [vmem:[%s10228_s30 + $0x10] sm:$0xf] %vm1844_vm0, %v10798_v18 }
 0x232   : > { %v1102_v45 = vpop.f32.mrf.mxu0 }
 0x233   : > { %v8346_v23 = vpack.c.bf16 %v1102_v45, %v1100_v39  ;;  %v10803_v13 = vpack.c.bf16 %v1102_v45, %v1102_v45 }
 0x234   : > { %v1106_v50 = vpop.f32.mrf.mxu0  ;;  %v1196_v49 = vpop.f32.mrf.mxu1 }
 0x235   : > { %1726 = vst [vmem:[#allocation2 + $0x3c] sm:$0xff] %v8346_v23  ;;  %1850 = vst.msk [vmem:[%s10228_s30 + $0x14] sm:$0xf] %vm1844_vm0, %v10803_v13 }
 0x236   : > { %v1108_v19 = vpop.f32.mrf.mxu0  ;;  %v1198_v60 = vpop.f32.mrf.mxu1 }
 0x237   : > { %v8348_v51 = vpack.c.bf16 %v1108_v19, %v1106_v50  ;;  %v10808_v10 = vpack.c.bf16 %v1108_v19, %v1108_v19  ;;  %v8384_v53 = vpack.c.bf16 %v1198_v60, %v1196_v49  ;;  %v10810_v26 = vpack.c.bf16 %v1198_v60, %v1198_v60 }
 0x238   : > { %v1110_v5 = vpop.f32.mrf.mxu0  ;;  %v1200_v27 = vpop.f32.mrf.mxu1 }
 0x239   : > { %1728 = vst [vmem:[#allocation2 + $0x48] sm:$0xff] %v8348_v51  ;;  %1851 = vst.msk [vmem:[%s10228_s30 + $0x18] sm:$0xf] %vm1844_vm0, %v10808_v10  ;;  %1957 = vrot.lane.b32.xlu0 %v10810_v26, %s10080_s25 }
 0x23a   : > { %1764 = vst [vmem:[#allocation2 + $0x120] sm:$0xff] %v8384_v53  ;;  %1869 = vst.msk [vmem:[%s10228_s30 + $0x60] sm:$0xf] %vm1844_vm0, %v10810_v26  ;;  %v1112_v0 = vpop.f32.mrf.mxu0  ;;  %v1202_v40 = vpop.f32.mrf.mxu1 }
 0x23b   : > { %v8350_v54 = vpack.c.bf16 %v1112_v0, %v1110_v5  ;;  %v10820_v6 = vpack.c.bf16 %v1112_v0, %v1112_v0  ;;  %v8386_v41 = vpack.c.bf16 %v1202_v40, %v1200_v27  ;;  %v10822_v58 = vpack.c.bf16 %v1202_v40, %v1202_v40 }
 0x23c   : > { %v1116_v55 = vpop.f32.mrf.mxu0  ;;  %v1206_v9 = vpop.f32.mrf.mxu1 }
 0x23d   : > { %1730 = vst [vmem:[#allocation2 + $0x54] sm:$0xff] %v8350_v54  ;;  %1852 = vst.msk [vmem:[%s10228_s30 + $0x1c] sm:$0xf] %vm1844_vm0, %v10820_v6  ;;  %2167 = vrot.lane.b32.xlu0 %v10774_v12, %s10081_s28  ;;  %1959 = vrot.lane.b32.xlu1 %v10822_v58, %s10080_s25 }
 0x23e   : > { %1766 = vst [vmem:[#allocation2 + $0x12c] sm:$0xff] %v8386_v41  ;;  %1870 = vst.msk [vmem:[%s10228_s30 + $0x64] sm:$0xf] %vm1844_vm0, %v10822_v58  ;;  %v1118_v20 = vpop.f32.mrf.mxu0  ;;  %v1208_v25 = vpop.f32.mrf.mxu1 }
 0x23f   : > { %v8352_v30 = vpack.c.bf16 %v1118_v20, %v1116_v55  ;;  %v10834_v57 = vpack.c.bf16 %v1118_v20, %v1118_v20  ;;  %v8388_v47 = vpack.c.bf16 %v1208_v25, %v1206_v9  ;;  %v10836_v24 = vpack.c.bf16 %v1208_v25, %v1208_v25 }
 0x240   : > { %v1120_v2 = vpop.f32.mrf.mxu0  ;;  %v1210_v38 = vpop.f32.mrf.mxu1 }
 0x241   : > { %1732 = vst [vmem:[#allocation2 + $0x60] sm:$0xff] %v8352_v30  ;;  %1853 = vst.msk [vmem:[%s10228_s30 + $0x20] sm:$0xf] %vm1844_vm0, %v10834_v57  ;;  %2215 = vrot.lane.b32.xlu0 %v10810_v26, %s10081_s28  ;;  %2169 = vrot.lane.b32.xlu1 %v10781_v29, %s10081_s28 }
 0x242   : > { %1768 = vst [vmem:[#allocation2 + $0x138] sm:$0xff] %v8388_v47  ;;  %1871 = vst.msk [vmem:[%s10228_s30 + $0x68] sm:$0xf] %vm1844_vm0, %v10836_v24  ;;  %v1122_v28 = vpop.f32.mrf.mxu0  ;;  %v1212_v63 = vpop.f32.mrf.mxu1 }
 0x243   : > { %v8354_v3 = vpack.c.bf16 %v1122_v28, %v1120_v2  ;;  %v10848_v21 = vpack.c.bf16 %v1122_v28, %v1122_v28  ;;  %v8390_v7 = vpack.c.bf16 %v1212_v63, %v1210_v38  ;;  %v10850_v61 = vpack.c.bf16 %v1212_v63, %v1212_v63 }
 0x244   : > { %v1126_v52 = vpop.f32.mrf.mxu0  ;;  %v1216_v4 = vpop.f32.mrf.mxu1 }
 0x245   : > { %1734 = vst [vmem:[#allocation2 + $0x6c] sm:$0xff] %v8354_v3  ;;  %1854 = vst.msk [vmem:[%s10228_s30 + $0x24] sm:$0xf] %vm1844_vm0, %v10848_v21  ;;  %2425 = vrot.lane.b32.xlu0 %v10774_v12, %s10082_s29  ;;  %2217 = vrot.lane.b32.xlu1 %v10822_v58, %s10081_s28 }
 0x246   : > { %1770 = vst [vmem:[#allocation2 + $0x144] sm:$0xff] %v8390_v7  ;;  %1872 = vst.msk [vmem:[%s10228_s30 + $0x6c] sm:$0xf] %vm1844_vm0, %v10850_v61  ;;  %v1128_v17 = vpop.f32.mrf.mxu0  ;;  %v1218_v37 = vpop.f32.mrf.mxu1 }
 0x247   : > { %v8356_v32 = vpack.c.bf16 %v1128_v17, %v1126_v52  ;;  %v10862_v42 = vpack.c.bf16 %v1128_v17, %v1128_v17  ;;  %v8392_v33 = vpack.c.bf16 %v1218_v37, %v1216_v4  ;;  %v10864_v44 = vpack.c.bf16 %v1218_v37, %v1218_v37 }
 0x248   : > { %v1130_v1 = vpop.f32.mrf.mxu0  ;;  %v1220_v15 = vpop.f32.mrf.mxu1 }
 0x249   : > { %1736 = vst [vmem:[#allocation2 + $0x78] sm:$0xff] %v8356_v32  ;;  %1855 = vst.msk [vmem:[%s10228_s30 + $0x28] sm:$0xf] %vm1844_vm0, %v10862_v42  ;;  %2473 = vrot.lane.b32.xlu0 %v10810_v26, %s10082_s29  ;;  %2427 = vrot.lane.b32.xlu1 %v10781_v29, %s10082_s29 }
 0x24a   : > { %1772 = vst [vmem:[#allocation2 + $0x150] sm:$0xff] %v8392_v33  ;;  %1873 = vst.msk [vmem:[%s10228_s30 + $0x70] sm:$0xf] %vm1844_vm0, %v10864_v44  ;;  %v1132_v59 = vpop.f32.mrf.mxu0  ;;  %v1222_v48 = vpop.f32.mrf.mxu1 }
 0x24b   : > { %v8358_v12 = vpack.c.bf16 %v1132_v59, %v1130_v1  ;;  %v10876_v56 = vpack.c.bf16 %v1132_v59, %v1132_v59  ;;  %v8394_v34 = vpack.c.bf16 %v1222_v48, %v1220_v15  ;;  %v10878_v31 = vpack.c.bf16 %v1222_v48, %v1222_v48 }
 0x24c   : > { %v1136_v35 = vpop.f32.mrf.mxu0  ;;  %v1226_v62 = vpop.f32.mrf.mxu1 }
 0x24d   : > { %1738 = vst [vmem:[#allocation2 + $0x84] sm:$0xff] %v8358_v12  ;;  %1856 = vst.msk [vmem:[%s10228_s30 + $0x2c] sm:$0xf] %vm1844_vm0, %v10876_v56  ;;  %2475 = vrot.lane.b32.xlu1 %v10822_v58, %s10082_s29  ;;  %1961 = vrot.lane.b32.xlu0 %v10836_v24, %s10080_s25 }
 0x24e   : > { %1774 = vst [vmem:[#allocation2 + $0x15c] sm:$0xff] %v8394_v34  ;;  %1874 = vst.msk [vmem:[%s10228_s30 + $0x74] sm:$0xf] %vm1844_vm0, %v10878_v31  ;;  %v1138_v29 = vpop.f32.mrf.mxu0  ;;  %v1228_v8 = vpop.f32.mrf.mxu1 }
 0x24f   : > { %v8360_v36 = vpack.c.bf16 %v1138_v29, %v1136_v35  ;;  %v10890_v11 = vpack.c.bf16 %v1138_v29, %v1138_v29  ;;  %v8396_v46 = vpack.c.bf16 %v1228_v8, %v1226_v62  ;;  %v10892_v16 = vpack.c.bf16 %v1228_v8, %v1228_v8 }
 0x250   : > { %v1140_v43 = vpop.f32.mrf.mxu0  ;;  %v1230_v39 = vpop.f32.mrf.mxu1 }
 0x251   : > { %1740 = vst [vmem:[#allocation2 + $0x90] sm:$0xff] %v8360_v36  ;;  %1857 = vst.msk [vmem:[%s10228_s30 + $0x30] sm:$0xf] %vm1844_vm0, %v10890_v11  ;;  %1913 = vrot.lane.b32.xlu1 %v10788_v14, %s10080_s25  ;;  %2171 = vrot.lane.b32.xlu0 %v10788_v14, %s10081_s28 }
 0x252   : > { %1776 = vst [vmem:[#allocation2 + $0x168] sm:$0xff] %v8396_v46  ;;  %1875 = vst.msk [vmem:[%s10228_s30 + $0x78] sm:$0xf] %vm1844_vm0, %v10892_v16  ;;  %v1142_v45 = vpop.f32.mrf.mxu0  ;;  %v1232_v49 = vpop.f32.mrf.mxu1 }
 0x253   : > { %v8362_v23 = vpack.c.bf16 %v1142_v45, %v1140_v43  ;;  %v10904_v50 = vpack.c.bf16 %v1142_v45, %v1142_v45  ;;  %v8398_v19 = vpack.c.bf16 %v1232_v49, %v1230_v39  ;;  %v10906_v51 = vpack.c.bf16 %v1232_v49, %v1232_v49 }
 0x254   : > { %v1146_v60 = vpop.f32.mrf.mxu0  ;;  %v8938_v53 = vpop.f32.mrf.mxu1 }
 0x255   : > { %1742 = vst [vmem:[#allocation2 + $0x9c] sm:$0xff] %v8362_v23  ;;  %1858 = vst.msk [vmem:[%s10228_s30 + $0x34] sm:$0xf] %vm1844_vm0, %v10904_v50  ;;  %v10914_v26 = vpack.c.bf16 %v8938_v53, %v8938_v53  ;;  %1915 = vrot.lane.b32.xlu1 %v10793_v22, %s10080_s25  ;;  %2219 = vrot.lane.b32.xlu0 %v10836_v24, %s10081_s28 }
 0x256   : > { %1778 = vst [vmem:[#allocation2 + $0x174] sm:$0xff] %v8398_v19  ;;  %1876 = vst.msk [vmem:[%s10228_s30 + $0x7c] sm:$0xf] %vm1844_vm0, %v10906_v51  ;;  %v1148_v5 = vpop.f32.mrf.mxu0  ;;  %v1269_v54 = vpop.f32.mrf.mxu1 }
 0x257   : > { %v8364_v27 = vpack.c.bf16 %v1148_v5, %v1146_v60  ;;  %v10920_v0 = vpack.c.bf16 %v1148_v5, %v1148_v5  ;;  %1721 = vst [vmem:[#allocation2 + $0x20] sm:$0xf] %v10914_v26  ;;  %1879 = vst.msk [vmem:[%s10233_s15 + $0x8] sm:$0xf] %vm1844_vm0, %v10914_v26  ;;  %v10926_v40 = vpack.c.bf16 %v1269_v54, %v1269_v54 }
 0x258   : > { %v1150_v41 = vpop.f32.mrf.mxu0  ;;  %v8939_v58 = vpop.f32.mrf.mxu1 }
 0x259   : > { %1744 = vst [vmem:[#allocation2 + $0xa8] sm:$0xff] %v8364_v27  ;;  %1859 = vst.msk [vmem:[%s10228_s30 + $0x38] sm:$0xf] %vm1844_vm0, %v10920_v0  ;;  %v10935_v55 = vpack.c.bf16 %v8939_v58, %v8939_v58  ;;  %2429 = vrot.lane.b32.xlu0 %v10788_v14, %s10082_s29  ;;  %1963 = vrot.lane.b32.xlu1 %v10850_v61, %s10080_s25 }
 0x25a   : > { %1717 = vst [vmem:[#allocation2 + $0x8] sm:$0xf] %v10926_v40  ;;  %1877 = vst.msk [vmem:[%s10233_s15] sm:$0xf] %vm1844_vm0, %v10926_v40  ;;  %v1152_v9 = vpop.f32.mrf.mxu0  ;;  %v1272_v25 = vpop.f32.mrf.mxu1 }
 0x25b   : > { %v8366_v20 = vpack.c.bf16 %v1152_v9, %v1150_v41  ;;  %v10941_v30 = vpack.c.bf16 %v1152_v9, %v1152_v9  ;;  %1723 = vst [vmem:[#allocation2 + $0x2c] sm:$0xf] %v10935_v55  ;;  %1880 = vst.msk [vmem:[%s10233_s15 + $0xc] sm:$0xf] %vm1844_vm0, %v10935_v55  ;;  %v10947_v47 = vpack.c.bf16 %v1272_v25, %v1272_v25 }
 0x25c   : > { %v1156_v2 = vpop.f32.mrf.mxu0  ;;  %v8942_v14 = vpop.f32.mrf.mxu1 }
 0x25d   : > { %1746 = vst [vmem:[#allocation2 + $0xb4] sm:$0xff] %v8366_v20  ;;  %1860 = vst.msk [vmem:[%s10228_s30 + $0x3c] sm:$0xf] %vm1844_vm0, %v10941_v30  ;;  %v10956_v38 = vpack.c.bf16 %v8942_v14, %v8942_v14  ;;  %2477 = vrot.lane.b32.xlu0 %v10836_v24, %s10082_s29  ;;  %2173 = vrot.lane.b32.xlu1 %v10793_v22, %s10081_s28 }
 0x25e   : > { %1719 = vst [vmem:[#allocation2 + $0x14] sm:$0xf] %v10947_v47  ;;  %1878 = vst.msk [vmem:[%s10233_s15 + $0x4] sm:$0xf] %vm1844_vm0, %v10947_v47  ;;  %v1158_v28 = vpop.f32.mrf.mxu0  ;;  %v1285_v7 = vpop.f32.mrf.mxu1 }
 0x25f   : > { %v8368_v3 = vpack.c.bf16 %v1158_v28, %v1156_v2  ;;  %v10962_v63 = vpack.c.bf16 %v1158_v28, %v1158_v28  ;;  %1729 = vst [vmem:[#allocation2 + $0x50] sm:$0xf] %v10956_v38  ;;  %1883 = vst.msk [vmem:[%s10233_s15 + $0x18] sm:$0xf] %vm1844_vm0, %v10956_v38  ;;  %v10968_v52 = vpack.c.bf16 %v1285_v7, %v1285_v7 }
 0x260   : > { %v1160_v4 = vpop.f32.mrf.mxu0  ;;  %v8943_v24 = vpop.f32.mrf.mxu1 }
 0x261   : > { %1748 = vst [vmem:[#allocation2 + $0xc0] sm:$0xff] %v8368_v3  ;;  %1861 = vst.msk [vmem:[%s10228_s30 + $0x40] sm:$0xf] %vm1844_vm0, %v10962_v63  ;;  %v10977_v17 = vpack.c.bf16 %v8943_v24, %v8943_v24  ;;  %1917 = vrot.lane.b32.xlu0 %v10798_v18, %s10080_s25  ;;  %2221 = vrot.lane.b32.xlu1 %v10850_v61, %s10081_s28 }
 0x262   : > { %1725 = vst [vmem:[#allocation2 + $0x38] sm:$0xf] %v10968_v52  ;;  %1881 = vst.msk [vmem:[%s10233_s15 + $0x10] sm:$0xf] %vm1844_vm0, %v10968_v52  ;;  %v1162_v32 = vpop.f32.mrf.mxu0  ;;  %v1288_v1 = vpop.f32.mrf.mxu1 }
 0x263   : > { %v8370_v37 = vpack.c.bf16 %v1162_v32, %v1160_v4  ;;  %v10983_v33 = vpack.c.bf16 %v1162_v32, %v1162_v32  ;;  %1731 = vst [vmem:[#allocation2 + $0x5c] sm:$0xf] %v10977_v17  ;;  %1884 = vst.msk [vmem:[%s10233_s15 + $0x1c] sm:$0xf] %vm1844_vm0, %v10977_v17  ;;  %v10989_v15 = vpack.c.bf16 %v1288_v1, %v1288_v1 }
 0x264   : > { %v1166_v59 = vpop.f32.mrf.mxu0  ;;  %v8946_v12 = vpop.f32.mrf.mxu1 }
 0x265   : > { %1750 = vst [vmem:[#allocation2 + $0xcc] sm:$0xff] %v8370_v37  ;;  %1862 = vst.msk [vmem:[%s10228_s30 + $0x44] sm:$0xf] %vm1844_vm0, %v10983_v33  ;;  %v10998_v48 = vpack.c.bf16 %v8946_v12, %v8946_v12  ;;  %2431 = vrot.lane.b32.xlu1 %v10793_v22, %s10082_s29  ;;  %1965 = vrot.lane.b32.xlu0 %v10864_v44, %s10080_s25 }
 0x266   : > { %1727 = vst [vmem:[#allocation2 + $0x44] sm:$0xf] %v10989_v15  ;;  %1882 = vst.msk [vmem:[%s10233_s15 + $0x14] sm:$0xf] %vm1844_vm0, %v10989_v15  ;;  %v1168_v34 = vpop.f32.mrf.mxu0  ;;  %v1301_v29 = vpop.f32.mrf.mxu1 }
 0x267   : > { %v8372_v35 = vpack.c.bf16 %v1168_v34, %v1166_v59  ;;  %v11004_v62 = vpack.c.bf16 %v1168_v34, %v1168_v34  ;;  %1737 = vst [vmem:[#allocation2 + $0x80] sm:$0xf] %v10998_v48  ;;  %1887 = vst.msk [vmem:[%s10233_s15 + $0x28] sm:$0xf] %vm1844_vm0, %v10998_v48  ;;  %v11010_v36 = vpack.c.bf16 %v1301_v29, %v1301_v29 }
 0x268   : > { %v1170_v8 = vpop.f32.mrf.mxu0  ;;  %v8947_v22 = vpop.f32.mrf.mxu1 }
 0x269   : > { %1752 = vst [vmem:[#allocation2 + $0xd8] sm:$0xff] %v8372_v35  ;;  %1863 = vst.msk [vmem:[%s10228_s30 + $0x48] sm:$0xf] %vm1844_vm0, %v11004_v62  ;;  %v11019_v46 = vpack.c.bf16 %v8947_v22, %v8947_v22  ;;  %2479 = vrot.lane.b32.xlu1 %v10850_v61, %s10082_s29  ;;  %2175 = vrot.lane.b32.xlu0 %v10798_v18, %s10081_s28 }
 0x26a   : > { %1733 = vst [vmem:[#allocation2 + $0x68] sm:$0xf] %v11010_v36  ;;  %1885 = vst.msk [vmem:[%s10233_s15 + $0x20] sm:$0xf] %vm1844_vm0, %v11010_v36  ;;  %v1172_v43 = vpop.f32.mrf.mxu0  ;;  %v1304_v23 = vpop.f32.mrf.mxu1 }
 0x26b   : > { %v8374_v39 = vpack.c.bf16 %v1172_v43, %v1170_v8  ;;  %v11025_v45 = vpack.c.bf16 %v1172_v43, %v1172_v43  ;;  %1739 = vst [vmem:[#allocation2 + $0x8c] sm:$0xf] %v11019_v46  ;;  %1888 = vst.msk [vmem:[%s10233_s15 + $0x2c] sm:$0xf] %vm1844_vm0, %v11019_v46  ;;  %v11031_v49 = vpack.c.bf16 %v1304_v23, %v1304_v23 }
 0x26c   : > { %v1176_v19 = vpop.f32.mrf.mxu0  ;;  %v8950_v61 = vpop.f32.mrf.mxu1 }
 0x26d   : > { %1754 = vst [vmem:[#allocation2 + $0xe4] sm:$0xff] %v8374_v39  ;;  %1864 = vst.msk [vmem:[%s10228_s30 + $0x4c] sm:$0xf] %vm1844_vm0, %v11025_v45  ;;  %v11040_v60 = vpack.c.bf16 %v8950_v61, %v8950_v61  ;;  %1919 = vrot.lane.b32.xlu1 %v10803_v13, %s10080_s25  ;;  %2223 = vrot.lane.b32.xlu0 %v10864_v44, %s10081_s28 }
 0x26e   : > { %1735 = vst [vmem:[#allocation2 + $0x74] sm:$0xf] %v11031_v49  ;;  %1886 = vst.msk [vmem:[%s10233_s15 + $0x24] sm:$0xf] %vm1844_vm0, %v11031_v49  ;;  %v1178_v53 = vpop.f32.mrf.mxu0  ;;  %v1317_v54 = vpop.f32.mrf.mxu1 }
 0x26f   : > { %v8376_v5 = vpack.c.bf16 %v1178_v53, %v1176_v19  ;;  %v11046_v27 = vpack.c.bf16 %v1178_v53, %v1178_v53  ;;  %1745 = vst [vmem:[#allocation2 + $0xb0] sm:$0xf] %v11040_v60  ;;  %1891 = vst.msk [vmem:[%s10233_s15 + $0x38] sm:$0xf] %vm1844_vm0, %v11040_v60  ;;  %v11052_v41 = vpack.c.bf16 %v1317_v54, %v1317_v54 }
 0x270   : > { %v1180_v58 = vpop.f32.mrf.mxu0  ;;  %v8951_v9 = vpop.f32.mrf.mxu1 }
 0x271   : > { %1756 = vst [vmem:[#allocation2 + $0xf0] sm:$0xff] %v8376_v5  ;;  %1865 = vst.msk [vmem:[%s10228_s30 + $0x50] sm:$0xf] %vm1844_vm0, %v11046_v27  ;;  %v11061_v20 = vpack.c.bf16 %v8951_v9, %v8951_v9  ;;  %2433 = vrot.lane.b32.xlu0 %v10798_v18, %s10082_s29  ;;  %1967 = vrot.lane.b32.xlu1 %v10878_v31, %s10080_s25 }
 0x272   : > { %1741 = vst [vmem:[#allocation2 + $0x98] sm:$0xf] %v11052_v41  ;;  %1889 = vst.msk [vmem:[%s10233_s15 + $0x30] sm:$0xf] %vm1844_vm0, %v11052_v41  ;;  %v1182_v25 = vpop.f32.mrf.mxu0  ;;  %v1320_v28 = vpop.f32.mrf.mxu1 }
 0x273   : > { %v8378_v2 = vpack.c.bf16 %v1182_v25, %v1180_v58  ;;  %v11067_v14 = vpack.c.bf16 %v1182_v25, %v1182_v25  ;;  %1747 = vst [vmem:[#allocation2 + $0xbc] sm:$0xf] %v11061_v20  ;;  %1892 = vst.msk [vmem:[%s10233_s15 + $0x3c] sm:$0xf] %vm1844_vm0, %v11061_v20  ;;  %v11073_v3 = vpack.c.bf16 %v1320_v28, %v1320_v28 }
 0x274   : > { %v1186_v7 = vpop.f32.mrf.mxu0  ;;  %v8954_v18 = vpop.f32.mrf.mxu1 }
 0x275   : > { %1758 = vst [vmem:[#allocation2 + $0xfc] sm:$0xff] %v8378_v2  ;;  %1866 = vst.msk [vmem:[%s10228_s30 + $0x54] sm:$0xf] %vm1844_vm0, %v11067_v14  ;;  %v11082_v4 = vpack.c.bf16 %v8954_v18, %v8954_v18  ;;  %2481 = vrot.lane.b32.xlu0 %v10864_v44, %s10082_s29  ;;  %2177 = vrot.lane.b32.xlu1 %v10803_v13, %s10081_s28 }
 0x276   : > { %1743 = vst [vmem:[#allocation2 + $0xa4] sm:$0xf] %v11073_v3  ;;  %1890 = vst.msk [vmem:[%s10233_s15 + $0x34] sm:$0xf] %vm1844_vm0, %v11073_v3  ;;  %v1188_v24 = vpop.f32.mrf.mxu0  ;;  %v1333_v1 = vpop.f32.mrf.mxu1 }
 0x277   : > { %v8380_v32 = vpack.c.bf16 %v1188_v24, %v1186_v7  ;;  %v11088_v37 = vpack.c.bf16 %v1188_v24, %v1188_v24  ;;  %1753 = vst [vmem:[#allocation2 + $0xe0] sm:$0xf] %v11082_v4  ;;  %1895 = vst.msk [vmem:[%s10233_s15 + $0x48] sm:$0xf] %vm1844_vm0, %v11082_v4  ;;  %v11094_v59 = vpack.c.bf16 %v1333_v1, %v1333_v1 }
 0x278   : > { %v1190_v12 = vpop.f32.mrf.mxu0  ;;  %v8955_v44 = vpop.f32.mrf.mxu1 }
 0x279   : > { %1760 = vst [vmem:[#allocation2 + $0x108] sm:$0xff] %v8380_v32  ;;  %1867 = vst.msk [vmem:[%s10228_s30 + $0x58] sm:$0xf] %vm1844_vm0, %v11088_v37  ;;  %v11103_v34 = vpack.c.bf16 %v8955_v44, %v8955_v44  ;;  %1921 = vrot.lane.b32.xlu0 %v10808_v10, %s10080_s25  ;;  %2225 = vrot.lane.b32.xlu1 %v10878_v31, %s10081_s28 }
 0x27a   : > { %1749 = vst [vmem:[#allocation2 + $0xc8] sm:$0xf] %v11094_v59  ;;  %1893 = vst.msk [vmem:[%s10233_s15 + $0x40] sm:$0xf] %vm1844_vm0, %v11094_v59  ;;  %v1192_v35 = vpop.f32.mrf.mxu0  ;;  %v1336_v22 = vpop.f32.mrf.mxu1 }
 0x27b   : > { %v8382_v29 = vpack.c.bf16 %v1192_v35, %v1190_v12  ;;  %v11109_v8 = vpack.c.bf16 %v1192_v35, %v1192_v35  ;;  %1755 = vst [vmem:[#allocation2 + $0xec] sm:$0xf] %v11103_v34  ;;  %1896 = vst.msk [vmem:[%s10233_s15 + $0x4c] sm:$0xf] %vm1844_vm0, %v11103_v34  ;;  %v11115_v43 = vpack.c.bf16 %v1336_v22, %v1336_v22 }
 0x27c   : > { %v8958_v39 = vpop.f32.mrf.mxu1 }
 0x27d   : > { %1762 = vst [vmem:[#allocation2 + $0x114] sm:$0xff] %v8382_v29  ;;  %1868 = vst.msk [vmem:[%s10228_s30 + $0x5c] sm:$0xf] %vm1844_vm0, %v11109_v8  ;;  %v11124_v23 = vpack.c.bf16 %v8958_v39, %v8958_v39  ;;  %2435 = vrot.lane.b32.xlu1 %v10803_v13, %s10082_s29  ;;  %1969 = vrot.lane.b32.xlu0 %v10892_v16, %s10080_s25 }
 0x27e   : > { %1751 = vst [vmem:[#allocation2 + $0xd4] sm:$0xf] %v11115_v43  ;;  %1894 = vst.msk [vmem:[%s10233_s15 + $0x44] sm:$0xf] %vm1844_vm0, %v11115_v43  ;;  %v1349_v19 = vpop.f32.mrf.mxu1 }
 0x27f   : > { %1761 = vst [vmem:[#allocation2 + $0x110] sm:$0xf] %v11124_v23  ;;  %1899 = vst.msk [vmem:[%s10233_s15 + $0x58] sm:$0xf] %vm1844_vm0, %v11124_v23  ;;  %v11134_v61 = vpack.c.bf16 %v1349_v19, %v1349_v19 }
 0x280   : > { %v8959_v53 = vpop.f32.mrf.mxu1 }
 0x281   : > { %1757 = vst [vmem:[#allocation2 + $0xf8] sm:$0xf] %v11134_v61  ;;  %1897 = vst.msk [vmem:[%s10233_s15 + $0x50] sm:$0xf] %vm1844_vm0, %v11134_v61  ;;  %v11140_v13 = vpack.c.bf16 %v8959_v53, %v8959_v53  ;;  %2483 = vrot.lane.b32.xlu1 %v10878_v31, %s10082_s29  ;;  %2179 = vrot.lane.b32.xlu0 %v10808_v10, %s10081_s28 }
 0x282   : > { %v1352_v5 = vpop.f32.mrf.mxu1 }
 0x283   : > { %1763 = vst [vmem:[#allocation2 + $0x11c] sm:$0xf] %v11140_v13  ;;  %1900 = vst.msk [vmem:[%s10233_s15 + $0x5c] sm:$0xf] %vm1844_vm0, %v11140_v13  ;;  %v11150_v54 = vpack.c.bf16 %v1352_v5, %v1352_v5 }
 0x284   : > { %v8962_v58 = vpop.f32.mrf.mxu1 }
 0x285   : > { %1759 = vst [vmem:[#allocation2 + $0x104] sm:$0xf] %v11150_v54  ;;  %1898 = vst.msk [vmem:[%s10233_s15 + $0x54] sm:$0xf] %vm1844_vm0, %v11150_v54  ;;  %v11156_v31 = vpack.c.bf16 %v8962_v58, %v8962_v58  ;;  %1923 = vrot.lane.b32.xlu1 %v10820_v6, %s10080_s25  ;;  %2227 = vrot.lane.b32.xlu0 %v10892_v16, %s10081_s28 }
 0x286   : > { %v1365_v9 = vpop.f32.mrf.mxu1 }
 0x287   : > { %1769 = vst [vmem:[#allocation2 + $0x140] sm:$0xf] %v11156_v31  ;;  %1903 = vst.msk [vmem:[%s10233_s15 + $0x68] sm:$0xf] %vm1844_vm0, %v11156_v31  ;;  %v11166_v25 = vpack.c.bf16 %v1365_v9, %v1365_v9 }
 0x288   : > { %v8963_v2 = vpop.f32.mrf.mxu1 }
 0x289   : > { %1765 = vst [vmem:[#allocation2 + $0x128] sm:$0xf] %v11166_v25  ;;  %1901 = vst.msk [vmem:[%s10233_s15 + $0x60] sm:$0xf] %vm1844_vm0, %v11166_v25  ;;  %v11172_v28 = vpack.c.bf16 %v8963_v2, %v8963_v2  ;;  %2437 = vrot.lane.b32.xlu0 %v10808_v10, %s10082_s29  ;;  %1971 = vrot.lane.b32.xlu1 %v10906_v51, %s10080_s25 }
 0x28a   : > { %v1368_v7 = vpop.f32.mrf.mxu1 }
 0x28b   : > { %1771 = vst [vmem:[#allocation2 + $0x14c] sm:$0xf] %v11172_v28  ;;  %1904 = vst.msk [vmem:[%s10233_s15 + $0x6c] sm:$0xf] %vm1844_vm0, %v11172_v28  ;;  %v11182_v18 = vpack.c.bf16 %v1368_v7, %v1368_v7 }
 0x28c   : > { %v8966_v24 = vpop.f32.mrf.mxu1 }
 0x28d   : > { %1767 = vst [vmem:[#allocation2 + $0x134] sm:$0xf] %v11182_v18  ;;  %1902 = vst.msk [vmem:[%s10233_s15 + $0x64] sm:$0xf] %vm1844_vm0, %v11182_v18  ;;  %v11188_v32 = vpack.c.bf16 %v8966_v24, %v8966_v24  ;;  %2485 = vrot.lane.b32.xlu0 %v10892_v16, %s10082_s29  ;;  %2181 = vrot.lane.b32.xlu1 %v10820_v6, %s10081_s28 }
 0x28e   : > { %v1381_v10 = vpop.f32.mrf.mxu1 }
 0x28f   : > { %1777 = vst [vmem:[#allocation2 + $0x170] sm:$0xf] %v11188_v32  ;;  %1907 = vst.msk [vmem:[%s10233_s15 + $0x78] sm:$0xf] %vm1844_vm0, %v11188_v32  ;;  %v11198_v1 = vpack.c.bf16 %v1381_v10, %v1381_v10 }
 0x290   : > { %v8967_v12 = vpop.f32.mrf.mxu1 }
 0x291   : > { %1773 = vst [vmem:[#allocation2 + $0x158] sm:$0xf] %v11198_v1  ;;  %1905 = vst.msk [vmem:[%s10233_s15 + $0x70] sm:$0xf] %vm1844_vm0, %v11198_v1  ;;  %v11204_v16 = vpack.c.bf16 %v8967_v12, %v8967_v12  ;;  %2229 = vrot.lane.b32.xlu1 %v10906_v51, %s10081_s28  ;;  %2042 = vrot.lane.b32.xlu0 %v10914_v26, %s10080_s25 }
 0x292   : > { %v1384_v44 = vpop.f32.mrf.mxu1 }
 0x293   : > { %v1910_v35 = vpop.permute.xlu0 %1909  ;;  %1779 = vst [vmem:[#allocation2 + $0x17c] sm:$0xf] %v11204_v16  ;;  %1908 = vst.msk [vmem:[%s10233_s15 + $0x7c] sm:$0xf] %vm1844_vm0, %v11204_v16  ;;  %v11214_v29 = vpack.c.bf16 %v1384_v44, %v1384_v44 }
 0x294   : > { %8030 = vst.msk [vmem:[%s10228_s30 + $0x80] sm:$0xf] %vm1844_vm0, %v1910_v35 }
 0x295   : > { %1775 = vst [vmem:[#allocation2 + $0x164] sm:$0xf] %v11214_v29  ;;  %1906 = vst.msk [vmem:[%s10233_s15 + $0x74] sm:$0xf] %vm1844_vm0, %v11214_v29  ;;  %2439 = vrot.lane.b32.xlu1 %v10820_v6, %s10082_s29  ;;  %2300 = vrot.lane.b32.xlu0 %v10914_v26, %s10081_s28 }
 0x297   : > { %v1912_v22 = vpop.permute.xlu1 %1911 }
 0x298   : > { %8031 = vst.msk [vmem:[%s10228_s30 + $0x84] sm:$0xf] %vm1844_vm0, %v1912_v22 }
 0x299   : > { %2487 = vrot.lane.b32.xlu1 %v10906_v51, %s10082_s29  ;;  %2558 = vrot.lane.b32.xlu0 %v10914_v26, %s10082_s29 }
 0x29d   : > { %1925 = vrot.lane.b32.xlu0 %v10834_v57, %s10080_s25  ;;  %2044 = vrot.lane.b32.xlu1 %v10935_v55, %s10080_s25 }
 0x2a1   : > { %2038 = vrot.lane.b32.xlu0 %v10926_v40, %s10080_s25  ;;  %2302 = vrot.lane.b32.xlu1 %v10935_v55, %s10081_s28 }
 0x2a5   : > { %2183 = vrot.lane.b32.xlu0 %v10834_v57, %s10081_s28  ;;  %2560 = vrot.lane.b32.xlu1 %v10935_v55, %s10082_s29 }
 0x2a9   : > { %2296 = vrot.lane.b32.xlu0 %v10926_v40, %s10081_s28  ;;  %1927 = vrot.lane.b32.xlu1 %v10848_v21, %s10080_s25 }
 0x2ab   : > { %v1958_v6 = vpop.permute.xlu0 %1957 }
 0x2ac   : > { %8054 = vst.msk [vmem:[%s10228_s30 + $0xe0] sm:$0xf] %vm1844_vm0, %v1958_v6 }
 0x2ad   : > { %2441 = vrot.lane.b32.xlu0 %v10834_v57, %s10082_s29  ;;  %2040 = vrot.lane.b32.xlu1 %v10947_v47, %s10080_s25 }
 0x2af   : > { %v1960_v51 = vpop.permute.xlu1 %1959  ;;  %v2168_v26 = vpop.permute.xlu0 %2167 }
 0x2b0   : > { %8055 = vst.msk [vmem:[%s10228_s30 + $0xe4] sm:$0xf] %vm1844_vm0, %v1960_v51  ;;  %8094 = vst.msk [vmem:[%s10228_s30 + $0x100] sm:$0xf] %vm1844_vm0, %v2168_v26 }
 0x2b1   : > { %2554 = vrot.lane.b32.xlu0 %v10926_v40, %s10082_s29  ;;  %2185 = vrot.lane.b32.xlu1 %v10848_v21, %s10081_s28 }
 0x2b3   : > { %v2170_v57 = vpop.permute.xlu1 %2169  ;;  %v2216_v55 = vpop.permute.xlu0 %2215 }
 0x2b4   : > { %8095 = vst.msk [vmem:[%s10228_s30 + $0x104] sm:$0xf] %vm1844_vm0, %v2170_v57  ;;  %8118 = vst.msk [vmem:[%s10228_s30 + $0x160] sm:$0xf] %vm1844_vm0, %v2216_v55 }
 0x2b5   : > { %2298 = vrot.lane.b32.xlu1 %v10947_v47, %s10081_s28  ;;  %2050 = vrot.lane.b32.xlu0 %v10956_v38, %s10080_s25 }
 0x2b7   : > { %v2218_v40 = vpop.permute.xlu1 %2217  ;;  %v2426_v39 = vpop.permute.xlu0 %2425 }
 0x2b8   : > { %8119 = vst.msk [vmem:[%s10228_s30 + $0x164] sm:$0xf] %vm1844_vm0, %v2218_v40  ;;  %8158 = vst.msk [vmem:[%s10228_s30 + $0x180] sm:$0xf] %vm1844_vm0, %v2426_v39 }
 0x2b9   : > { %2443 = vrot.lane.b32.xlu1 %v10848_v21, %s10082_s29  ;;  %2308 = vrot.lane.b32.xlu0 %v10956_v38, %s10081_s28 }
 0x2bb   : > { %v2428_v19 = vpop.permute.xlu1 %2427  ;;  %v2474_v53 = vpop.permute.xlu0 %2473 }
 0x2bc   : > { %8159 = vst.msk [vmem:[%s10228_s30 + $0x184] sm:$0xf] %vm1844_vm0, %v2428_v19  ;;  %8182 = vst.msk [vmem:[%s10228_s30 + $0x1e0] sm:$0xf] %vm1844_vm0, %v2474_v53 }
 0x2bd   : > { %2556 = vrot.lane.b32.xlu1 %v10947_v47, %s10082_s29  ;;  %2566 = vrot.lane.b32.xlu0 %v10956_v38, %s10082_s29 }
 0x2bf   : > { %v2476_v21 = vpop.permute.xlu1 %2475  ;;  %v1962_v5 = vpop.permute.xlu0 %1961 }
 0x2c0   : > { %8183 = vst.msk [vmem:[%s10228_s30 + $0x1e4] sm:$0xf] %vm1844_vm0, %v2476_v21  ;;  %8056 = vst.msk [vmem:[%s10228_s30 + $0xe8] sm:$0xf] %vm1844_vm0, %v1962_v5 }
 0x2c1   : > { %1929 = vrot.lane.b32.xlu0 %v10862_v42, %s10080_s25  ;;  %2052 = vrot.lane.b32.xlu1 %v10977_v17, %s10080_s25 }
 0x2c3   : > { %v1914_v47 = vpop.permute.xlu1 %1913  ;;  %v2172_v58 = vpop.permute.xlu0 %2171 }
 0x2c4   : > { %8032 = vst.msk [vmem:[%s10228_s30 + $0x88] sm:$0xf] %vm1844_vm0, %v1914_v47  ;;  %8096 = vst.msk [vmem:[%s10228_s30 + $0x108] sm:$0xf] %vm1844_vm0, %v2172_v58 }
 0x2c5   : > { %2046 = vrot.lane.b32.xlu0 %v10968_v52, %s10080_s25  ;;  %2310 = vrot.lane.b32.xlu1 %v10977_v17, %s10081_s28 }
 0x2c7   : > { %v1916_v38 = vpop.permute.xlu1 %1915  ;;  %v2220_v9 = vpop.permute.xlu0 %2219 }
 0x2c8   : > { %8033 = vst.msk [vmem:[%s10228_s30 + $0x8c] sm:$0xf] %vm1844_vm0, %v1916_v38  ;;  %8120 = vst.msk [vmem:[%s10228_s30 + $0x168] sm:$0xf] %vm1844_vm0, %v2220_v9 }
 0x2c9   : > { %2187 = vrot.lane.b32.xlu0 %v10862_v42, %s10081_s28  ;;  %2568 = vrot.lane.b32.xlu1 %v10977_v17, %s10082_s29 }
 0x2cb   : > { %v1964_v2 = vpop.permute.xlu1 %1963  ;;  %v2430_v7 = vpop.permute.xlu0 %2429 }
 0x2cc   : > { %8057 = vst.msk [vmem:[%s10228_s30 + $0xec] sm:$0xf] %vm1844_vm0, %v1964_v2  ;;  %8160 = vst.msk [vmem:[%s10228_s30 + $0x188] sm:$0xf] %vm1844_vm0, %v2430_v7 }
 0x2cd   : > { %2304 = vrot.lane.b32.xlu0 %v10968_v52, %s10081_s28  ;;  %1931 = vrot.lane.b32.xlu1 %v10876_v56, %s10080_s25 }
 0x2cf   : > { %v2174_v24 = vpop.permute.xlu1 %2173  ;;  %v2478_v10 = vpop.permute.xlu0 %2477 }
 0x2d0   : > { %8097 = vst.msk [vmem:[%s10228_s30 + $0x10c] sm:$0xf] %vm1844_vm0, %v2174_v24  ;;  %8184 = vst.msk [vmem:[%s10228_s30 + $0x1e8] sm:$0xf] %vm1844_vm0, %v2478_v10 }
 0x2d1   : > { %2445 = vrot.lane.b32.xlu0 %v10862_v42, %s10082_s29  ;;  %2048 = vrot.lane.b32.xlu1 %v10989_v15, %s10080_s25 }
 0x2d3   : > { %v2222_v17 = vpop.permute.xlu1 %2221  ;;  %v1918_v12 = vpop.permute.xlu0 %1917 }
 0x2d4   : > { %8121 = vst.msk [vmem:[%s10228_s30 + $0x16c] sm:$0xf] %vm1844_vm0, %v2222_v17  ;;  %8034 = vst.msk [vmem:[%s10228_s30 + $0x90] sm:$0xf] %vm1844_vm0, %v1918_v12 }
 0x2d5   : > { %2562 = vrot.lane.b32.xlu0 %v10968_v52, %s10082_s29  ;;  %2189 = vrot.lane.b32.xlu1 %v10876_v56, %s10081_s28 }
 0x2d7   : > { %v2432_v42 = vpop.permute.xlu1 %2431  ;;  %v1966_v44 = vpop.permute.xlu0 %1965 }
 0x2d8   : > { %8161 = vst.msk [vmem:[%s10228_s30 + $0x18c] sm:$0xf] %vm1844_vm0, %v2432_v42  ;;  %8058 = vst.msk [vmem:[%s10228_s30 + $0xf0] sm:$0xf] %vm1844_vm0, %v1966_v44 }
 0x2d9   : > { %2306 = vrot.lane.b32.xlu1 %v10989_v15, %s10081_s28  ;;  %2058 = vrot.lane.b32.xlu0 %v10998_v48, %s10080_s25 }
 0x2db   : > { %v2480_v52 = vpop.permute.xlu1 %2479  ;;  %v2176_v35 = vpop.permute.xlu0 %2175 }
 0x2dc   : > { %8185 = vst.msk [vmem:[%s10228_s30 + $0x1ec] sm:$0xf] %vm1844_vm0, %v2480_v52  ;;  %8098 = vst.msk [vmem:[%s10228_s30 + $0x110] sm:$0xf] %vm1844_vm0, %v2176_v35 }
 0x2dd   : > { %2447 = vrot.lane.b32.xlu1 %v10876_v56, %s10082_s29  ;;  %2316 = vrot.lane.b32.xlu0 %v10998_v48, %s10081_s28 }
 0x2df   : > { %v1920_v22 = vpop.permute.xlu1 %1919  ;;  %v2224_v6 = vpop.permute.xlu0 %2223 }
 0x2e0   : > { %8035 = vst.msk [vmem:[%s10228_s30 + $0x94] sm:$0xf] %vm1844_vm0, %v1920_v22  ;;  %8122 = vst.msk [vmem:[%s10228_s30 + $0x170] sm:$0xf] %vm1844_vm0, %v2224_v6 }
 0x2e1   : > { %2564 = vrot.lane.b32.xlu1 %v10989_v15, %s10082_s29  ;;  %2574 = vrot.lane.b32.xlu0 %v10998_v48, %s10082_s29 }
 0x2e3   : > { %v1968_v56 = vpop.permute.xlu1 %1967  ;;  %v2434_v51 = vpop.permute.xlu0 %2433 }
 0x2e4   : > { %8059 = vst.msk [vmem:[%s10228_s30 + $0xf4] sm:$0xf] %vm1844_vm0, %v1968_v56  ;;  %8162 = vst.msk [vmem:[%s10228_s30 + $0x190] sm:$0xf] %vm1844_vm0, %v2434_v51 }
 0x2e5   : > { %2060 = vrot.lane.b32.xlu1 %v11019_v46, %s10080_s25  ;;  %1933 = vrot.lane.b32.xlu0 %v10890_v11, %s10080_s25 }
 0x2e7   : > { %v2178_v15 = vpop.permute.xlu1 %2177  ;;  %v2482_v26 = vpop.permute.xlu0 %2481 }
 0x2e8   : > { %8099 = vst.msk [vmem:[%s10228_s30 + $0x114] sm:$0xf] %vm1844_vm0, %v2178_v15  ;;  %8186 = vst.msk [vmem:[%s10228_s30 + $0x1f0] sm:$0xf] %vm1844_vm0, %v2482_v26 }
 0x2e9   : > { %2318 = vrot.lane.b32.xlu1 %v11019_v46, %s10081_s28  ;;  %2054 = vrot.lane.b32.xlu0 %v11010_v36, %s10080_s25 }
 0x2eb   : > { %v2226_v48 = vpop.permute.xlu1 %2225  ;;  %v1922_v57 = vpop.permute.xlu0 %1921 }
 0x2ec   : > { %8123 = vst.msk [vmem:[%s10228_s30 + $0x174] sm:$0xf] %vm1844_vm0, %v2226_v48  ;;  %8036 = vst.msk [vmem:[%s10228_s30 + $0x98] sm:$0xf] %vm1844_vm0, %v1922_v57 }
 0x2ed   : > { %2576 = vrot.lane.b32.xlu1 %v11019_v46, %s10082_s29  ;;  %2191 = vrot.lane.b32.xlu0 %v10890_v11, %s10081_s28 }
 0x2ef   : > { %v2436_v55 = vpop.permute.xlu1 %2435  ;;  %v1970_v40 = vpop.permute.xlu0 %1969 }
 0x2f0   : > { %8163 = vst.msk [vmem:[%s10228_s30 + $0x194] sm:$0xf] %vm1844_vm0, %v2436_v55  ;;  %8060 = vst.msk [vmem:[%s10228_s30 + $0xf8] sm:$0xf] %vm1844_vm0, %v1970_v40 }
 0x2f1   : > { %1935 = vrot.lane.b32.xlu1 %v10904_v50, %s10080_s25  ;;  %2312 = vrot.lane.b32.xlu0 %v11010_v36, %s10081_s28 }
 0x2f3   : > { %v2484_v46 = vpop.permute.xlu1 %2483  ;;  %v2180_v39 = vpop.permute.xlu0 %2179 }
 0x2f4   : > { %8187 = vst.msk [vmem:[%s10228_s30 + $0x1f4] sm:$0xf] %vm1844_vm0, %v2484_v46  ;;  %8100 = vst.msk [vmem:[%s10228_s30 + $0x118] sm:$0xf] %vm1844_vm0, %v2180_v39 }
 0x2f5   : > { %2056 = vrot.lane.b32.xlu1 %v11031_v49, %s10080_s25  ;;  %2449 = vrot.lane.b32.xlu0 %v10890_v11, %s10082_s29 }
 0x2f7   : > { %v1924_v19 = vpop.permute.xlu1 %1923  ;;  %v2228_v53 = vpop.permute.xlu0 %2227 }
 0x2f8   : > { %8037 = vst.msk [vmem:[%s10228_s30 + $0x9c] sm:$0xf] %vm1844_vm0, %v1924_v19  ;;  %8124 = vst.msk [vmem:[%s10228_s30 + $0x178] sm:$0xf] %vm1844_vm0, %v2228_v53 }
 0x2f9   : > { %2193 = vrot.lane.b32.xlu1 %v10904_v50, %s10081_s28  ;;  %2570 = vrot.lane.b32.xlu0 %v11010_v36, %s10082_s29 }
 0x2fb   : > { %v1972_v21 = vpop.permute.xlu1 %1971  ;;  %v2438_v5 = vpop.permute.xlu0 %2437 }
 0x2fc   : > { %8061 = vst.msk [vmem:[%s10228_s30 + $0xfc] sm:$0xf] %vm1844_vm0, %v1972_v21  ;;  %8164 = vst.msk [vmem:[%s10228_s30 + $0x198] sm:$0xf] %vm1844_vm0, %v2438_v5 }
 0x2fd   : > { %2314 = vrot.lane.b32.xlu1 %v11031_v49, %s10081_s28  ;;  %2066 = vrot.lane.b32.xlu0 %v11040_v60, %s10080_s25 }
 0x2ff   : > { %v2182_v11 = vpop.permute.xlu1 %2181  ;;  %v2486_v47 = vpop.permute.xlu0 %2485 }
 0x300   : > { %8101 = vst.msk [vmem:[%s10228_s30 + $0x11c] sm:$0xf] %vm1844_vm0, %v2182_v11  ;;  %8188 = vst.msk [vmem:[%s10228_s30 + $0x1f8] sm:$0xf] %vm1844_vm0, %v2486_v47 }
 0x301   : > { %2451 = vrot.lane.b32.xlu1 %v10904_v50, %s10082_s29  ;;  %2324 = vrot.lane.b32.xlu0 %v11040_v60, %s10081_s28 }
 0x303   : > { %v2230_v36 = vpop.permute.xlu1 %2229  ;;  %v2043_v58 = vpop.permute.xlu0 %2042 }
 0x304   : > { %8125 = vst.msk [vmem:[%s10228_s30 + $0x17c] sm:$0xf] %vm1844_vm0, %v2230_v36  ;;  %8064 = vst.msk [vmem:[%s10233_s15 + $0x88] sm:$0xf] %vm1844_vm0, %v2043_v58 }
 0x305   : > { %2572 = vrot.lane.b32.xlu1 %v11031_v49, %s10082_s29  ;;  %2582 = vrot.lane.b32.xlu0 %v11040_v60, %s10082_s29 }
 0x307   : > { %v2440_v50 = vpop.permute.xlu1 %2439  ;;  %v2301_v38 = vpop.permute.xlu0 %2300 }
 0x308   : > { %8165 = vst.msk [vmem:[%s10228_s30 + $0x19c] sm:$0xf] %vm1844_vm0, %v2440_v50  ;;  %8128 = vst.msk [vmem:[%s10233_s15 + $0x108] sm:$0xf] %vm1844_vm0, %v2301_v38 }
 0x309   : > { %2068 = vrot.lane.b32.xlu1 %v11061_v20, %s10080_s25  ;;  %1937 = vrot.lane.b32.xlu0 %v10920_v0, %s10080_s25 }
 0x30b   : > { %v2488_v49 = vpop.permute.xlu1 %2487  ;;  %v2559_v9 = vpop.permute.xlu0 %2558 }
 0x30c   : > { %8189 = vst.msk [vmem:[%s10228_s30 + $0x1fc] sm:$0xf] %vm1844_vm0, %v2488_v49  ;;  %8192 = vst.msk [vmem:[%s10233_s15 + $0x188] sm:$0xf] %vm1844_vm0, %v2559_v9 }
 0x30d   : > { %2326 = vrot.lane.b32.xlu1 %v11061_v20, %s10081_s28  ;;  %2062 = vrot.lane.b32.xlu0 %v11052_v41, %s10080_s25 }
 0x30f   : > { %v2045_v60 = vpop.permute.xlu1 %2044  ;;  %v1926_v2 = vpop.permute.xlu0 %1925 }
 0x310   : > { %8065 = vst.msk [vmem:[%s10233_s15 + $0x8c] sm:$0xf] %vm1844_vm0, %v2045_v60  ;;  %8038 = vst.msk [vmem:[%s10228_s30 + $0xa0] sm:$0xf] %vm1844_vm0, %v1926_v2 }
 0x311   : > { %2584 = vrot.lane.b32.xlu1 %v11061_v20, %s10082_s29  ;;  %2195 = vrot.lane.b32.xlu0 %v10920_v0, %s10081_s28 }
 0x313   : > { %v2303_v7 = vpop.permute.xlu1 %2302  ;;  %v2039_v24 = vpop.permute.xlu0 %2038 }
 0x314   : > { %8129 = vst.msk [vmem:[%s10233_s15 + $0x10c] sm:$0xf] %vm1844_vm0, %v2303_v7  ;;  %8062 = vst.msk [vmem:[%s10233_s15 + $0x80] sm:$0xf] %vm1844_vm0, %v2039_v24 }
 0x315   : > { %1939 = vrot.lane.b32.xlu1 %v10941_v30, %s10080_s25  ;;  %2320 = vrot.lane.b32.xlu0 %v11052_v41, %s10081_s28 }
 0x317   : > { %v2561_v20 = vpop.permute.xlu1 %2560  ;;  %v2184_v10 = vpop.permute.xlu0 %2183 }
 0x318   : > { %8193 = vst.msk [vmem:[%s10233_s15 + $0x18c] sm:$0xf] %vm1844_vm0, %v2561_v20  ;;  %8102 = vst.msk [vmem:[%s10228_s30 + $0x120] sm:$0xf] %vm1844_vm0, %v2184_v10 }
 0x319   : > { %2064 = vrot.lane.b32.xlu1 %v11073_v3, %s10080_s25  ;;  %2453 = vrot.lane.b32.xlu0 %v10920_v0, %s10082_s29 }
 0x31b   : > { %v1928_v17 = vpop.permute.xlu1 %1927  ;;  %v2297_v12 = vpop.permute.xlu0 %2296 }
 0x31c   : > { %8039 = vst.msk [vmem:[%s10228_s30 + $0xa4] sm:$0xf] %vm1844_vm0, %v1928_v17  ;;  %8126 = vst.msk [vmem:[%s10233_s15 + $0x100] sm:$0xf] %vm1844_vm0, %v2297_v12 }
 0x31d   : > { %2197 = vrot.lane.b32.xlu1 %v10941_v30, %s10081_s28  ;;  %2578 = vrot.lane.b32.xlu0 %v11052_v41, %s10082_s29 }
 0x31f   : > { %v2041_v42 = vpop.permute.xlu1 %2040  ;;  %v2442_v44 = vpop.permute.xlu0 %2441 }
 0x320   : > { %8063 = vst.msk [vmem:[%s10233_s15 + $0x84] sm:$0xf] %vm1844_vm0, %v2041_v42  ;;  %8166 = vst.msk [vmem:[%s10228_s30 + $0x1a0] sm:$0xf] %vm1844_vm0, %v2442_v44 }
 0x321   : > { %2322 = vrot.lane.b32.xlu1 %v11073_v3, %s10081_s28  ;;  %2074 = vrot.lane.b32.xlu0 %v11082_v4, %s10080_s25 }
 0x323   : > { %v2186_v0 = vpop.permute.xlu1 %2185  ;;  %v2555_v52 = vpop.permute.xlu0 %2554 }
 0x324   : > { %8103 = vst.msk [vmem:[%s10228_s30 + $0x124] sm:$0xf] %vm1844_vm0, %v2186_v0  ;;  %8190 = vst.msk [vmem:[%s10233_s15 + $0x180] sm:$0xf] %vm1844_vm0, %v2555_v52 }
 0x325   : > { %2455 = vrot.lane.b32.xlu1 %v10941_v30, %s10082_s29  ;;  %2332 = vrot.lane.b32.xlu0 %v11082_v4, %s10081_s28 }
 0x327   : > { %v2299_v41 = vpop.permute.xlu1 %2298  ;;  %v2051_v35 = vpop.permute.xlu0 %2050 }
 0x328   : > { %8127 = vst.msk [vmem:[%s10233_s15 + $0x104] sm:$0xf] %vm1844_vm0, %v2299_v41  ;;  %8068 = vst.msk [vmem:[%s10233_s15 + $0x98] sm:$0xf] %vm1844_vm0, %v2051_v35 }
 0x329   : > { %2580 = vrot.lane.b32.xlu1 %v11073_v3, %s10082_s29  ;;  %2590 = vrot.lane.b32.xlu0 %v11082_v4, %s10082_s29 }
 0x32b   : > { %v2444_v30 = vpop.permute.xlu1 %2443  ;;  %v2309_v22 = vpop.permute.xlu0 %2308 }
 0x32c   : > { %8167 = vst.msk [vmem:[%s10228_s30 + $0x1a4] sm:$0xf] %vm1844_vm0, %v2444_v30  ;;  %8132 = vst.msk [vmem:[%s10233_s15 + $0x118] sm:$0xf] %vm1844_vm0, %v2309_v22 }
 0x32d   : > { %2076 = vrot.lane.b32.xlu1 %v11103_v34, %s10080_s25  ;;  %1941 = vrot.lane.b32.xlu0 %v10962_v63, %s10080_s25 }
 0x32f   : > { %v2557_v3 = vpop.permute.xlu1 %2556  ;;  %v2567_v6 = vpop.permute.xlu0 %2566 }
 0x330   : > { %8191 = vst.msk [vmem:[%s10233_s15 + $0x184] sm:$0xf] %vm1844_vm0, %v2557_v3  ;;  %8196 = vst.msk [vmem:[%s10233_s15 + $0x198] sm:$0xf] %vm1844_vm0, %v2567_v6 }
 0x331   : > { %2334 = vrot.lane.b32.xlu1 %v11103_v34, %s10081_s28  ;;  %2070 = vrot.lane.b32.xlu0 %v11094_v59, %s10080_s25 }
 0x333   : > { %v2053_v4 = vpop.permute.xlu1 %2052  ;;  %v1930_v56 = vpop.permute.xlu0 %1929 }
 0x334   : > { %8069 = vst.msk [vmem:[%s10233_s15 + $0x9c] sm:$0xf] %vm1844_vm0, %v2053_v4  ;;  %8040 = vst.msk [vmem:[%s10228_s30 + $0xa8] sm:$0xf] %vm1844_vm0, %v1930_v56 }
 0x335   : > { %2592 = vrot.lane.b32.xlu1 %v11103_v34, %s10082_s29  ;;  %2199 = vrot.lane.b32.xlu0 %v10962_v63, %s10081_s28 }
 0x337   : > { %v2311_v51 = vpop.permute.xlu1 %2310  ;;  %v2047_v15 = vpop.permute.xlu0 %2046 }
 0x338   : > { %8133 = vst.msk [vmem:[%s10233_s15 + $0x11c] sm:$0xf] %vm1844_vm0, %v2311_v51  ;;  %8066 = vst.msk [vmem:[%s10233_s15 + $0x90] sm:$0xf] %vm1844_vm0, %v2047_v15 }
 0x339   : > { %1943 = vrot.lane.b32.xlu1 %v10983_v33, %s10080_s25  ;;  %2328 = vrot.lane.b32.xlu0 %v11094_v59, %s10081_s28 }
 0x33b   : > { %v2569_v34 = vpop.permute.xlu1 %2568  ;;  %v2188_v26 = vpop.permute.xlu0 %2187 }
 0x33c   : > { %8197 = vst.msk [vmem:[%s10233_s15 + $0x19c] sm:$0xf] %vm1844_vm0, %v2569_v34  ;;  %8104 = vst.msk [vmem:[%s10228_s30 + $0x128] sm:$0xf] %vm1844_vm0, %v2188_v26 }
 0x33d   : > { %2072 = vrot.lane.b32.xlu1 %v11115_v43, %s10080_s25  ;;  %2457 = vrot.lane.b32.xlu0 %v10962_v63, %s10082_s29 }
 0x33f   : > { %v1932_v48 = vpop.permute.xlu1 %1931  ;;  %v2305_v57 = vpop.permute.xlu0 %2304 }
 0x340   : > { %8041 = vst.msk [vmem:[%s10228_s30 + $0xac] sm:$0xf] %vm1844_vm0, %v1932_v48  ;;  %8130 = vst.msk [vmem:[%s10233_s15 + $0x110] sm:$0xf] %vm1844_vm0, %v2305_v57 }
 0x341   : > { %2201 = vrot.lane.b32.xlu1 %v10983_v33, %s10081_s28  ;;  %2586 = vrot.lane.b32.xlu0 %v11094_v59, %s10082_s29 }
 0x343   : > { %v2049_v55 = vpop.permute.xlu1 %2048  ;;  %v2446_v40 = vpop.permute.xlu0 %2445 }
 0x344   : > { %8067 = vst.msk [vmem:[%s10233_s15 + $0x94] sm:$0xf] %vm1844_vm0, %v2049_v55  ;;  %8168 = vst.msk [vmem:[%s10228_s30 + $0x1a8] sm:$0xf] %vm1844_vm0, %v2446_v40 }
 0x345   : > { %2330 = vrot.lane.b32.xlu1 %v11115_v43, %s10081_s28  ;;  %2082 = vrot.lane.b32.xlu0 %v11124_v23, %s10080_s25 }
 0x347   : > { %v2190_v63 = vpop.permute.xlu1 %2189  ;;  %v2563_v46 = vpop.permute.xlu0 %2562 }
 0x348   : > { %8105 = vst.msk [vmem:[%s10228_s30 + $0x12c] sm:$0xf] %vm1844_vm0, %v2190_v63  ;;  %8194 = vst.msk [vmem:[%s10233_s15 + $0x190] sm:$0xf] %vm1844_vm0, %v2563_v46 }
 0x349   : > { %2459 = vrot.lane.b32.xlu1 %v10983_v33, %s10082_s29  ;;  %2340 = vrot.lane.b32.xlu0 %v11124_v23, %s10081_s28 }
 0x34b   : > { %v2307_v59 = vpop.permute.xlu1 %2306  ;;  %v2059_v39 = vpop.permute.xlu0 %2058 }
 0x34c   : > { %8131 = vst.msk [vmem:[%s10233_s15 + $0x114] sm:$0xf] %vm1844_vm0, %v2307_v59  ;;  %8072 = vst.msk [vmem:[%s10233_s15 + $0xa8] sm:$0xf] %vm1844_vm0, %v2059_v39 }
 0x34d   : > { %2588 = vrot.lane.b32.xlu1 %v11115_v43, %s10082_s29  ;;  %2598 = vrot.lane.b32.xlu0 %v11124_v23, %s10082_s29 }
 0x34f   : > { %v2448_v33 = vpop.permute.xlu1 %2447  ;;  %v2317_v19 = vpop.permute.xlu0 %2316 }
 0x350   : > { %8169 = vst.msk [vmem:[%s10228_s30 + $0x1ac] sm:$0xf] %vm1844_vm0, %v2448_v33  ;;  %8136 = vst.msk [vmem:[%s10233_s15 + $0x128] sm:$0xf] %vm1844_vm0, %v2317_v19 }
 0x351   : > { %2084 = vrot.lane.b32.xlu1 %v11140_v13, %s10080_s25  ;;  %1945 = vrot.lane.b32.xlu0 %v11004_v62, %s10080_s25 }
 0x353   : > { %v2565_v43 = vpop.permute.xlu1 %2564  ;;  %v2575_v53 = vpop.permute.xlu0 %2574 }
 0x354   : > { %8195 = vst.msk [vmem:[%s10233_s15 + $0x194] sm:$0xf] %vm1844_vm0, %v2565_v43  ;;  %8200 = vst.msk [vmem:[%s10233_s15 + $0x1a8] sm:$0xf] %vm1844_vm0, %v2575_v53 }
 0x355   : > { %2342 = vrot.lane.b32.xlu1 %v11140_v13, %s10081_s28  ;;  %2078 = vrot.lane.b32.xlu0 %v11134_v61, %s10080_s25 }
 0x357   : > { %v2061_v23 = vpop.permute.xlu1 %2060  ;;  %v1934_v21 = vpop.permute.xlu0 %1933 }
 0x358   : > { %8073 = vst.msk [vmem:[%s10233_s15 + $0xac] sm:$0xf] %vm1844_vm0, %v2061_v23  ;;  %8042 = vst.msk [vmem:[%s10228_s30 + $0xb0] sm:$0xf] %vm1844_vm0, %v1934_v21 }
 0x359   : > { %2600 = vrot.lane.b32.xlu1 %v11140_v13, %s10082_s29  ;;  %2203 = vrot.lane.b32.xlu0 %v11004_v62, %s10081_s28 }
 0x35b   : > { %v2319_v5 = vpop.permute.xlu1 %2318  ;;  %v2055_v11 = vpop.permute.xlu0 %2054 }
 0x35c   : > { %8137 = vst.msk [vmem:[%s10233_s15 + $0x12c] sm:$0xf] %vm1844_vm0, %v2319_v5  ;;  %8070 = vst.msk [vmem:[%s10233_s15 + $0xa0] sm:$0xf] %vm1844_vm0, %v2055_v11 }
 0x35d   : > { %1947 = vrot.lane.b32.xlu1 %v11025_v45, %s10080_s25  ;;  %2336 = vrot.lane.b32.xlu0 %v11134_v61, %s10081_s28 }
 0x35f   : > { %v2577_v13 = vpop.permute.xlu1 %2576  ;;  %v2192_v47 = vpop.permute.xlu0 %2191 }
 0x360   : > { %8201 = vst.msk [vmem:[%s10233_s15 + $0x1ac] sm:$0xf] %vm1844_vm0, %v2577_v13  ;;  %8106 = vst.msk [vmem:[%s10228_s30 + $0x130] sm:$0xf] %vm1844_vm0, %v2192_v47 }
 0x361   : > { %2080 = vrot.lane.b32.xlu1 %v11150_v54, %s10080_s25  ;;  %2461 = vrot.lane.b32.xlu0 %v11004_v62, %s10082_s29 }
 0x363   : > { %v1936_v36 = vpop.permute.xlu1 %1935  ;;  %v2313_v58 = vpop.permute.xlu0 %2312 }
 0x364   : > { %8043 = vst.msk [vmem:[%s10228_s30 + $0xb4] sm:$0xf] %vm1844_vm0, %v1936_v36  ;;  %8134 = vst.msk [vmem:[%s10233_s15 + $0x120] sm:$0xf] %vm1844_vm0, %v2313_v58 }
 0x365   : > { %2205 = vrot.lane.b32.xlu1 %v11025_v45, %s10081_s28  ;;  %2594 = vrot.lane.b32.xlu0 %v11134_v61, %s10082_s29 }
 0x367   : > { %v2057_v50 = vpop.permute.xlu1 %2056  ;;  %v2450_v38 = vpop.permute.xlu0 %2449 }
 0x368   : > { %8071 = vst.msk [vmem:[%s10233_s15 + $0xa4] sm:$0xf] %vm1844_vm0, %v2057_v50  ;;  %8170 = vst.msk [vmem:[%s10228_s30 + $0x1b0] sm:$0xf] %vm1844_vm0, %v2450_v38 }
 0x369   : > { %2338 = vrot.lane.b32.xlu1 %v11150_v54, %s10081_s28  ;;  %2090 = vrot.lane.b32.xlu0 %v11156_v31, %s10080_s25 }
 0x36b   : > { %v2194_v62 = vpop.permute.xlu1 %2193  ;;  %v2571_v49 = vpop.permute.xlu0 %2570 }
 0x36c   : > { %8107 = vst.msk [vmem:[%s10228_s30 + $0x134] sm:$0xf] %vm1844_vm0, %v2194_v62  ;;  %8198 = vst.msk [vmem:[%s10233_s15 + $0x1a0] sm:$0xf] %vm1844_vm0, %v2571_v49 }
 0x36d   : > { %2463 = vrot.lane.b32.xlu1 %v11025_v45, %s10082_s29  ;;  %2348 = vrot.lane.b32.xlu0 %v11156_v31, %s10081_s28 }
 0x36f   : > { %v2315_v61 = vpop.permute.xlu1 %2314  ;;  %v2067_v9 = vpop.permute.xlu0 %2066 }
 0x370   : > { %8135 = vst.msk [vmem:[%s10233_s15 + $0x124] sm:$0xf] %vm1844_vm0, %v2315_v61  ;;  %8076 = vst.msk [vmem:[%s10233_s15 + $0xb8] sm:$0xf] %vm1844_vm0, %v2067_v9 }
 0x371   : > { %2596 = vrot.lane.b32.xlu1 %v11150_v54, %s10082_s29  ;;  %2606 = vrot.lane.b32.xlu0 %v11156_v31, %s10082_s29 }
 0x373   : > { %v2452_v45 = vpop.permute.xlu1 %2451  ;;  %v2325_v60 = vpop.permute.xlu0 %2324 }
 0x374   : > { %8171 = vst.msk [vmem:[%s10228_s30 + $0x1b4] sm:$0xf] %vm1844_vm0, %v2452_v45  ;;  %8140 = vst.msk [vmem:[%s10233_s15 + $0x138] sm:$0xf] %vm1844_vm0, %v2325_v60 }
 0x375   : > { %2092 = vrot.lane.b32.xlu1 %v11172_v28, %s10080_s25  ;;  %1949 = vrot.lane.b32.xlu0 %v11046_v27, %s10080_s25 }
 0x377   : > { %v2573_v54 = vpop.permute.xlu1 %2572  ;;  %v2583_v2 = vpop.permute.xlu0 %2582 }
 0x378   : > { %8199 = vst.msk [vmem:[%s10233_s15 + $0x1a4] sm:$0xf] %vm1844_vm0, %v2573_v54  ;;  %8204 = vst.msk [vmem:[%s10233_s15 + $0x1b8] sm:$0xf] %vm1844_vm0, %v2583_v2 }
 0x379   : > { %2350 = vrot.lane.b32.xlu1 %v11172_v28, %s10081_s28  ;;  %2086 = vrot.lane.b32.xlu0 %v11166_v25, %s10080_s25 }
 0x37b   : > { %v2069_v31 = vpop.permute.xlu1 %2068  ;;  %v1938_v7 = vpop.permute.xlu0 %1937 }
 0x37c   : > { %8077 = vst.msk [vmem:[%s10233_s15 + $0xbc] sm:$0xf] %vm1844_vm0, %v2069_v31  ;;  %8044 = vst.msk [vmem:[%s10228_s30 + $0xb8] sm:$0xf] %vm1844_vm0, %v1938_v7 }
 0x37d   : > { %2608 = vrot.lane.b32.xlu1 %v11172_v28, %s10082_s29  ;;  %2207 = vrot.lane.b32.xlu0 %v11046_v27, %s10081_s28 }
 0x37f   : > { %v2327_v24 = vpop.permute.xlu1 %2326  ;;  %v2063_v20 = vpop.permute.xlu0 %2062 }
 0x380   : > { %8141 = vst.msk [vmem:[%s10233_s15 + $0x13c] sm:$0xf] %vm1844_vm0, %v2327_v24  ;;  %8074 = vst.msk [vmem:[%s10233_s15 + $0xb0] sm:$0xf] %vm1844_vm0, %v2063_v20 }
 0x381   : > { %1951 = vrot.lane.b32.xlu1 %v11067_v14, %s10080_s25  ;;  %2344 = vrot.lane.b32.xlu0 %v11166_v25, %s10081_s28 }
 0x383   : > { %v2585_v28 = vpop.permute.xlu1 %2584  ;;  %v2196_v10 = vpop.permute.xlu0 %2195 }
 0x384   : > { %8205 = vst.msk [vmem:[%s10233_s15 + $0x1bc] sm:$0xf] %vm1844_vm0, %v2585_v28  ;;  %8108 = vst.msk [vmem:[%s10228_s30 + $0x138] sm:$0xf] %vm1844_vm0, %v2196_v10 }
 0x385   : > { %2088 = vrot.lane.b32.xlu1 %v11182_v18, %s10080_s25  ;;  %2465 = vrot.lane.b32.xlu0 %v11046_v27, %s10082_s29 }
 0x387   : > { %v1940_v17 = vpop.permute.xlu1 %1939  ;;  %v2321_v12 = vpop.permute.xlu0 %2320 }
 0x388   : > { %8045 = vst.msk [vmem:[%s10228_s30 + $0xbc] sm:$0xf] %vm1844_vm0, %v1940_v17  ;;  %8138 = vst.msk [vmem:[%s10233_s15 + $0x130] sm:$0xf] %vm1844_vm0, %v2321_v12 }
 0x389   : > { %2209 = vrot.lane.b32.xlu1 %v11067_v14, %s10081_s28  ;;  %2602 = vrot.lane.b32.xlu0 %v11166_v25, %s10082_s29 }
 0x38b   : > { %v2065_v42 = vpop.permute.xlu1 %2064  ;;  %v2454_v44 = vpop.permute.xlu0 %2453 }
 0x38c   : > { %8075 = vst.msk [vmem:[%s10233_s15 + $0xb4] sm:$0xf] %vm1844_vm0, %v2065_v42  ;;  %8172 = vst.msk [vmem:[%s10228_s30 + $0x1b8] sm:$0xf] %vm1844_vm0, %v2454_v44 }
 0x38d   : > { %2346 = vrot.lane.b32.xlu1 %v11182_v18, %s10081_s28  ;;  %2098 = vrot.lane.b32.xlu0 %v11188_v32, %s10080_s25 }
 0x38f   : > { %v2198_v27 = vpop.permute.xlu1 %2197  ;;  %v2579_v0 = vpop.permute.xlu0 %2578 }
 0x390   : > { %8109 = vst.msk [vmem:[%s10228_s30 + $0x13c] sm:$0xf] %vm1844_vm0, %v2198_v27  ;;  %8202 = vst.msk [vmem:[%s10233_s15 + $0x1b0] sm:$0xf] %vm1844_vm0, %v2579_v0 }
 0x391   : > { %2467 = vrot.lane.b32.xlu1 %v11067_v14, %s10082_s29  ;;  %2356 = vrot.lane.b32.xlu0 %v11188_v32, %s10081_s28 }
 0x393   : > { %v2323_v25 = vpop.permute.xlu1 %2322  ;;  %v2075_v52 = vpop.permute.xlu0 %2074 }
 0x394   : > { %8139 = vst.msk [vmem:[%s10233_s15 + $0x134] sm:$0xf] %vm1844_vm0, %v2323_v25  ;;  %8080 = vst.msk [vmem:[%s10233_s15 + $0xc8] sm:$0xf] %vm1844_vm0, %v2075_v52 }
 0x395   : > { %2604 = vrot.lane.b32.xlu1 %v11182_v18, %s10082_s29  ;;  %1953 = vrot.lane.b32.xlu0 %v11088_v37, %s10080_s25 }
 0x397   : > { %v2456_v14 = vpop.permute.xlu1 %2455  ;;  %v2333_v41 = vpop.permute.xlu0 %2332 }
 0x398   : > { %8173 = vst.msk [vmem:[%s10228_s30 + $0x1bc] sm:$0xf] %vm1844_vm0, %v2456_v14  ;;  %8144 = vst.msk [vmem:[%s10233_s15 + $0x148] sm:$0xf] %vm1844_vm0, %v2333_v41 }
 0x399   : > { %2100 = vrot.lane.b32.xlu1 %v11204_v16, %s10080_s25  ;;  %2094 = vrot.lane.b32.xlu0 %v11198_v1, %s10080_s25 }
 0x39b   : > { %v2581_v18 = vpop.permute.xlu1 %2580  ;;  %v2591_v35 = vpop.permute.xlu0 %2590 }
 0x39c   : > { %8203 = vst.msk [vmem:[%s10233_s15 + $0x1b4] sm:$0xf] %vm1844_vm0, %v2581_v18  ;;  %8208 = vst.msk [vmem:[%s10233_s15 + $0x1c8] sm:$0xf] %vm1844_vm0, %v2591_v35 }
 0x39d   : > { %2358 = vrot.lane.b32.xlu1 %v11204_v16, %s10081_s28  ;;  %2211 = vrot.lane.b32.xlu0 %v11088_v37, %s10081_s28 }
 0x39f   : > { %v2077_v30 = vpop.permute.xlu1 %2076  ;;  %v1942_v22 = vpop.permute.xlu0 %1941 }
 0x3a0   : > { %8081 = vst.msk [vmem:[%s10233_s15 + $0xcc] sm:$0xf] %vm1844_vm0, %v2077_v30  ;;  %8046 = vst.msk [vmem:[%s10228_s30 + $0xc0] sm:$0xf] %vm1844_vm0, %v1942_v22 }
 0x3a1   : > { %1955 = vrot.lane.b32.xlu1 %v11109_v8, %s10080_s25  ;;  %2352 = vrot.lane.b32.xlu0 %v11198_v1, %s10081_s28 }
 0x3a3   : > { %v2335_v3 = vpop.permute.xlu1 %2334  ;;  %v2071_v6 = vpop.permute.xlu0 %2070 }
 0x3a4   : > { %8145 = vst.msk [vmem:[%s10233_s15 + $0x14c] sm:$0xf] %vm1844_vm0, %v2335_v3  ;;  %8078 = vst.msk [vmem:[%s10233_s15 + $0xc0] sm:$0xf] %vm1844_vm0, %v2071_v6 }
 0x3a5   : > { %2096 = vrot.lane.b32.xlu1 %v11214_v29, %s10080_s25  ;;  %2469 = vrot.lane.b32.xlu0 %v11088_v37, %s10082_s29 }
 0x3a7   : > { %v2593_v4 = vpop.permute.xlu1 %2592  ;;  %v2200_v56 = vpop.permute.xlu0 %2199 }
 0x3a8   : > { %8209 = vst.msk [vmem:[%s10233_s15 + $0x1cc] sm:$0xf] %vm1844_vm0, %v2593_v4  ;;  %8110 = vst.msk [vmem:[%s10228_s30 + $0x140] sm:$0xf] %vm1844_vm0, %v2200_v56 }
 0x3a9   : > { %2213 = vrot.lane.b32.xlu1 %v11109_v8, %s10081_s28  ;;  %2610 = vrot.lane.b32.xlu0 %v11198_v1, %s10082_s29 }
 0x3ab   : > { %v1944_v51 = vpop.permute.xlu1 %1943  ;;  %v2329_v15 = vpop.permute.xlu0 %2328 }
 0x3ac   : > { %8047 = vst.msk [vmem:[%s10228_s30 + $0xc4] sm:$0xf] %vm1844_vm0, %v1944_v51  ;;  %8142 = vst.msk [vmem:[%s10233_s15 + $0x140] sm:$0xf] %vm1844_vm0, %v2329_v15 }
 0x3ad   : > { %2354 = vrot.lane.b32.xlu1 %v11214_v29, %s10081_s28  ;;  %2614 = vrot.lane.b32.xlu0 %v11188_v32, %s10082_s29 }
 0x3af   : > { %v2073_v37 = vpop.permute.xlu1 %2072  ;;  %v2458_v34 = vpop.permute.xlu0 %2457 }
 0x3b0   : > { %8079 = vst.msk [vmem:[%s10233_s15 + $0xc4] sm:$0xf] %vm1844_vm0, %v2073_v37  ;;  %8174 = vst.msk [vmem:[%s10228_s30 + $0x1c0] sm:$0xf] %vm1844_vm0, %v2458_v34 }
 0x3b1   : > { %2471 = vrot.lane.b32.xlu1 %v11109_v8, %s10082_s29 }
 0x3b3   : > { %v2202_v1 = vpop.permute.xlu1 %2201  ;;  %v2587_v26 = vpop.permute.xlu0 %2586 }
 0x3b4   : > { %8111 = vst.msk [vmem:[%s10228_s30 + $0x144] sm:$0xf] %vm1844_vm0, %v2202_v1  ;;  %8206 = vst.msk [vmem:[%s10233_s15 + $0x1c0] sm:$0xf] %vm1844_vm0, %v2587_v26 }
 0x3b5   : > { %2612 = vrot.lane.b32.xlu1 %v11214_v29, %s10082_s29 }
 0x3b7   : > { %v2331_v32 = vpop.permute.xlu1 %2330  ;;  %v2083_v48 = vpop.permute.xlu0 %2082 }
 0x3b8   : > { %8143 = vst.msk [vmem:[%s10233_s15 + $0x144] sm:$0xf] %vm1844_vm0, %v2331_v32  ;;  %8084 = vst.msk [vmem:[%s10233_s15 + $0xd8] sm:$0xf] %vm1844_vm0, %v2083_v48 }
 0x3b9   : > { %2616 = vrot.lane.b32.xlu1 %v11204_v16, %s10082_s29 }
 0x3bb   : > { %v2460_v8 = vpop.permute.xlu1 %2459  ;;  %v2341_v57 = vpop.permute.xlu0 %2340 }
 0x3bc   : > { %8175 = vst.msk [vmem:[%s10228_s30 + $0x1c4] sm:$0xf] %vm1844_vm0, %v2460_v8  ;;  %8148 = vst.msk [vmem:[%s10233_s15 + $0x158] sm:$0xf] %vm1844_vm0, %v2341_v57 }
 0x3bf   : > { %v2589_v29 = vpop.permute.xlu1 %2588  ;;  %v2599_v55 = vpop.permute.xlu0 %2598 }
 0x3c0   : > { %8207 = vst.msk [vmem:[%s10233_s15 + $0x1c4] sm:$0xf] %vm1844_vm0, %v2589_v29  ;;  %8212 = vst.msk [vmem:[%s10233_s15 + $0x1d8] sm:$0xf] %vm1844_vm0, %v2599_v55 }
 0x3c3   : > { %v2085_v40 = vpop.permute.xlu1 %2084  ;;  %v1946_v63 = vpop.permute.xlu0 %1945 }
 0x3c4   : > { %8085 = vst.msk [vmem:[%s10233_s15 + $0xdc] sm:$0xf] %vm1844_vm0, %v2085_v40  ;;  %8048 = vst.msk [vmem:[%s10228_s30 + $0xc8] sm:$0xf] %vm1844_vm0, %v1946_v63 }
 0x3c7   : > { %v2343_v16 = vpop.permute.xlu1 %2342  ;;  %v2079_v46 = vpop.permute.xlu0 %2078 }
 0x3c8   : > { %8149 = vst.msk [vmem:[%s10233_s15 + $0x15c] sm:$0xf] %vm1844_vm0, %v2343_v16  ;;  %8082 = vst.msk [vmem:[%s10233_s15 + $0xd0] sm:$0xf] %vm1844_vm0, %v2079_v46 }
 0x3cb   : > { %v2601_v59 = vpop.permute.xlu1 %2600  ;;  %v2204_v39 = vpop.permute.xlu0 %2203 }
 0x3cc   : > { %8213 = vst.msk [vmem:[%s10233_s15 + $0x1dc] sm:$0xf] %vm1844_vm0, %v2601_v59  ;;  %8112 = vst.msk [vmem:[%s10228_s30 + $0x148] sm:$0xf] %vm1844_vm0, %v2204_v39 }
 0x3cf   : > { %v1948_v33 = vpop.permute.xlu1 %1947  ;;  %v2337_v19 = vpop.permute.xlu0 %2336 }
 0x3d0   : > { %8049 = vst.msk [vmem:[%s10228_s30 + $0xcc] sm:$0xf] %vm1844_vm0, %v1948_v33  ;;  %8146 = vst.msk [vmem:[%s10233_s15 + $0x150] sm:$0xf] %vm1844_vm0, %v2337_v19 }
 0x3d3   : > { %v2081_v43 = vpop.permute.xlu1 %2080  ;;  %v2462_v53 = vpop.permute.xlu0 %2461 }
 0x3d4   : > { %8083 = vst.msk [vmem:[%s10233_s15 + $0xd4] sm:$0xf] %vm1844_vm0, %v2081_v43  ;;  %8176 = vst.msk [vmem:[%s10228_s30 + $0x1c8] sm:$0xf] %vm1844_vm0, %v2462_v53 }
 0x3d7   : > { %v2206_v23 = vpop.permute.xlu1 %2205  ;;  %v2595_v21 = vpop.permute.xlu0 %2594 }
 0x3d8   : > { %8113 = vst.msk [vmem:[%s10228_s30 + $0x14c] sm:$0xf] %vm1844_vm0, %v2206_v23  ;;  %8210 = vst.msk [vmem:[%s10233_s15 + $0x1d0] sm:$0xf] %vm1844_vm0, %v2595_v21 }
 0x3db   : > { %v2339_v5 = vpop.permute.xlu1 %2338  ;;  %v2091_v11 = vpop.permute.xlu0 %2090 }
 0x3dc   : > { %8147 = vst.msk [vmem:[%s10233_s15 + $0x154] sm:$0xf] %vm1844_vm0, %v2339_v5  ;;  %8088 = vst.msk [vmem:[%s10233_s15 + $0xe8] sm:$0xf] %vm1844_vm0, %v2091_v11 }
 0x3df   : > { %v2464_v13 = vpop.permute.xlu1 %2463  ;;  %v2349_v47 = vpop.permute.xlu0 %2348 }
 0x3e0   : > { %8177 = vst.msk [vmem:[%s10228_s30 + $0x1cc] sm:$0xf] %vm1844_vm0, %v2464_v13  ;;  %8152 = vst.msk [vmem:[%s10233_s15 + $0x168] sm:$0xf] %vm1844_vm0, %v2349_v47 }
 0x3e3   : > { %v2597_v36 = vpop.permute.xlu1 %2596  ;;  %v2607_v58 = vpop.permute.xlu0 %2606 }
 0x3e4   : > { %8211 = vst.msk [vmem:[%s10233_s15 + $0x1d4] sm:$0xf] %vm1844_vm0, %v2597_v36  ;;  %8216 = vst.msk [vmem:[%s10233_s15 + $0x1e8] sm:$0xf] %vm1844_vm0, %v2607_v58 }
 0x3e7   : > { %v2093_v50 = vpop.permute.xlu1 %2092  ;;  %v1950_v38 = vpop.permute.xlu0 %1949 }
 0x3e8   : > { %8089 = vst.msk [vmem:[%s10233_s15 + $0xec] sm:$0xf] %vm1844_vm0, %v2093_v50  ;;  %8050 = vst.msk [vmem:[%s10228_s30 + $0xd0] sm:$0xf] %vm1844_vm0, %v1950_v38 }
 0x3eb   : > { %v2351_v62 = vpop.permute.xlu1 %2350  ;;  %v2087_v49 = vpop.permute.xlu0 %2086 }
 0x3ec   : > { %8153 = vst.msk [vmem:[%s10233_s15 + $0x16c] sm:$0xf] %vm1844_vm0, %v2351_v62  ;;  %8086 = vst.msk [vmem:[%s10233_s15 + $0xe0] sm:$0xf] %vm1844_vm0, %v2087_v49 }
 0x3ef   : > { %v2609_v61 = vpop.permute.xlu1 %2608  ;;  %v2208_v9 = vpop.permute.xlu0 %2207 }
 0x3f0   : > { %8217 = vst.msk [vmem:[%s10233_s15 + $0x1ec] sm:$0xf] %vm1844_vm0, %v2609_v61  ;;  %8114 = vst.msk [vmem:[%s10228_s30 + $0x150] sm:$0xf] %vm1844_vm0, %v2208_v9 }
 0x3f3   : > { %v1952_v45 = vpop.permute.xlu1 %1951  ;;  %v2345_v60 = vpop.permute.xlu0 %2344 }
 0x3f4   : > { %8051 = vst.msk [vmem:[%s10228_s30 + $0xd4] sm:$0xf] %vm1844_vm0, %v1952_v45  ;;  %8150 = vst.msk [vmem:[%s10233_s15 + $0x160] sm:$0xf] %vm1844_vm0, %v2345_v60 }
 0x3f7   : > { %v2089_v54 = vpop.permute.xlu1 %2088  ;;  %v2466_v2 = vpop.permute.xlu0 %2465 }
 0x3f8   : > { %8087 = vst.msk [vmem:[%s10233_s15 + $0xe4] sm:$0xf] %vm1844_vm0, %v2089_v54  ;;  %8178 = vst.msk [vmem:[%s10228_s30 + $0x1d0] sm:$0xf] %vm1844_vm0, %v2466_v2 }
 0x3fb   : > { %v2210_v31 = vpop.permute.xlu1 %2209  ;;  %v2603_v7 = vpop.permute.xlu0 %2602 }
 0x3fc   : > { %8115 = vst.msk [vmem:[%s10228_s30 + $0x154] sm:$0xf] %vm1844_vm0, %v2210_v31  ;;  %8214 = vst.msk [vmem:[%s10233_s15 + $0x1e0] sm:$0xf] %vm1844_vm0, %v2603_v7 }
 0x3ff   : > { %v2347_v24 = vpop.permute.xlu1 %2346  ;;  %v2099_v20 = vpop.permute.xlu0 %2098 }
 0x400   : > { %8151 = vst.msk [vmem:[%s10233_s15 + $0x164] sm:$0xf] %vm1844_vm0, %v2347_v24  ;;  %8092 = vst.msk [vmem:[%s10233_s15 + $0xf8] sm:$0xf] %vm1844_vm0, %v2099_v20 }
 0x403   : > { %v2468_v28 = vpop.permute.xlu1 %2467  ;;  %v2357_v10 = vpop.permute.xlu0 %2356 }
 0x404   : > { %8179 = vst.msk [vmem:[%s10228_s30 + $0x1d4] sm:$0xf] %vm1844_vm0, %v2468_v28  ;;  %8156 = vst.msk [vmem:[%s10233_s15 + $0x178] sm:$0xf] %vm1844_vm0, %v2357_v10 }
 0x407   : > { %v2605_v17 = vpop.permute.xlu1 %2604  ;;  %v1954_v12 = vpop.permute.xlu0 %1953 }
 0x408   : > { %8215 = vst.msk [vmem:[%s10233_s15 + $0x1e4] sm:$0xf] %vm1844_vm0, %v2605_v17  ;;  %8052 = vst.msk [vmem:[%s10228_s30 + $0xd8] sm:$0xf] %vm1844_vm0, %v1954_v12 }
 0x40b   : > { %v2101_v42 = vpop.permute.xlu1 %2100  ;;  %v2095_v44 = vpop.permute.xlu0 %2094 }
 0x40c   : > { %8093 = vst.msk [vmem:[%s10233_s15 + $0xfc] sm:$0xf] %vm1844_vm0, %v2101_v42  ;;  %8090 = vst.msk [vmem:[%s10233_s15 + $0xf0] sm:$0xf] %vm1844_vm0, %v2095_v44 }
 0x40f   : > { %v2359_v27 = vpop.permute.xlu1 %2358  ;;  %v2212_v0 = vpop.permute.xlu0 %2211 }
 0x410   : > { %8157 = vst.msk [vmem:[%s10233_s15 + $0x17c] sm:$0xf] %vm1844_vm0, %v2359_v27  ;;  %8116 = vst.msk [vmem:[%s10228_s30 + $0x158] sm:$0xf] %vm1844_vm0, %v2212_v0 }
 0x413   : > { %v1956_v25 = vpop.permute.xlu1 %1955  ;;  %v2353_v52 = vpop.permute.xlu0 %2352 }
 0x414   : > { %8053 = vst.msk [vmem:[%s10228_s30 + $0xdc] sm:$0xf] %vm1844_vm0, %v1956_v25  ;;  %8154 = vst.msk [vmem:[%s10233_s15 + $0x170] sm:$0xf] %vm1844_vm0, %v2353_v52 }
 0x417   : > { %v2097_v14 = vpop.permute.xlu1 %2096  ;;  %v2470_v41 = vpop.permute.xlu0 %2469 }
 0x418   : > { %8091 = vst.msk [vmem:[%s10233_s15 + $0xf4] sm:$0xf] %vm1844_vm0, %v2097_v14  ;;  %8180 = vst.msk [vmem:[%s10228_s30 + $0x1d8] sm:$0xf] %vm1844_vm0, %v2470_v41 }
 0x41b   : > { %v2214_v18 = vpop.permute.xlu1 %2213  ;;  %v2611_v35 = vpop.permute.xlu0 %2610 }
 0x41c   : > { %8117 = vst.msk [vmem:[%s10228_s30 + $0x15c] sm:$0xf] %vm1844_vm0, %v2214_v18  ;;  %8218 = vst.msk [vmem:[%s10233_s15 + $0x1f0] sm:$0xf] %vm1844_vm0, %v2611_v35 }
 0x41f   : > { %v2355_v30 = vpop.permute.xlu1 %2354  ;;  %v2615_v22 = vpop.permute.xlu0 %2614 }
 0x420   : > { %8155 = vst.msk [vmem:[%s10233_s15 + $0x174] sm:$0xf] %vm1844_vm0, %v2355_v30  ;;  %8220 = vst.msk [vmem:[%s10233_s15 + $0x1f8] sm:$0xf] %vm1844_vm0, %v2615_v22 }
 0x423   : > { %v2472_v3 = vpop.permute.xlu1 %2471 }
 0x424   : > { %8181 = vst.msk [vmem:[%s10228_s30 + $0x1dc] sm:$0xf] %vm1844_vm0, %v2472_v3 }
 0x427   : > { %v2613_v6 = vpop.permute.xlu1 %2612 }
 0x428   : > { %8219 = vst.msk [vmem:[%s10233_s15 + $0x1f4] sm:$0xf] %vm1844_vm0, %v2613_v6 }
 0x42b   : > { %v2617_v4 = vpop.permute.xlu1 %2616 }
 0x42c   : > { %8221 = vst.msk [vmem:[%s10233_s15 + $0x1fc] sm:$0xf] %vm1844_vm0, %v2617_v4 }
 0x42d PF: > { %v11894_v56 = vld [vmem:[#allocation2 + $0x16c] ss:$12 sps:$4 sm:$0xff]   ;;  %v16692_v51 = vlaneseq  ;;  %vm2990_vm1 = vcmask 261120   ;;  %s8222_s18 = sshll.u32 %s10061_s16, 7  ;;  %v11901_v37 = vld [vmem:[#allocation2 + $0x154] ss:$12 sps:$4 sm:$0xff]  }
 0x42e   : > { %9016 = vmatprep.subr.msk.bf16.mxu0 %vm2990_vm1, %v11894_v56  ;;  %v11899_v15 = vld [vmem:[#allocation2 + $0xac] ss:$12 sps:$4 sm:$0xff]   ;;  %s2684_s30 = sshra.s32 %s8222_s18, 3  ;;  %v3192_v1 = vld [vmem:[%s16678_s4] sm:$0x1]  ;;  %s10083_s27 = smov 96  }
 0x42f   : > { %v11906_v34 = vshrl.u32 %v16692_v51, 7  ;;  %v3037_v26 = vsel %vm2990_vm1, %v11899_v15, 0  ;;  %s8432_s23 = smul.u32 12, %s2684_s30  ;;  %v3193_v32 = vunpack.c.l.bf16 %v3192_v1  ;;  %v11918_v8 = vld [vmem:[#allocation2 + $0x94] ss:$12 sps:$4 sm:$0xff]   ;;  %s10084_s11 = smov 64  }
 0x430   : > { %8521 = vmatpush3.bf16.xpose.msra.mxu0 %v3037_v26  ;;  %v3034_v47 = vsel %vm2990_vm1, %v11918_v8, 0  ;;  %v11970_v58 = vld [vmem:[#allocation2 + $0x13c] ss:$12 sps:$4 sm:$0xff]   ;;  %v12022_v35 = vld [vmem:[#allocation2 + $0x124] ss:$12 sps:$4 sm:$0xff]   ;;  %s10086_s21 = smov 32  }
 0x431   : > { %v11914_v48 = vsub.s32 0, %v11906_v34  ;;  %9017 = vmatprep.subr.msk.bf16.mxu0 %vm2990_vm1, %v11901_v37  ;;  %s11920_s24 = scalar_lea.vmem [#allocation2], %s8432_s23  ;;  %v11983_v9 = vld [vmem:[#allocation2 + $0x7c] ss:$12 sps:$4 sm:$0xff]   ;;  %v11989_v60 = vsub.s32 1, %v11906_v34  ;;  %s8328_s22 = sshll.u32 %s10061_s16, 4 }
 0x432   : > { %v11923_v57 = vld [vmem:[%s11920_s24 + $0x18] sm:$0xff]  ;;  %v2689_v55 = vld [vmem:[%s11920_s24] sm:$0xff]  ;;  %v2690_v59 = vld [vmem:[%s11920_s24 + $0xc] sm:$0xff]  ;;  %v3031_v18 = vsel %vm2990_vm1, %v11983_v9, 0  ;;  %s8329_s25 = sshll.u32 %s10065_s17, 5  ;;  %s7761_s29 = sshll.u32 %s10235_s13, 4  ;;  %s16610_s29 = int_to_ptr.vmem [resolvable:$true] %s7761_s29 }
 0x433   : > { %17063 = vst [vmem:[#allocation14_spill] sm:$0xff] %v11914_v48  ;;  %v11926_v29 = vrot.slane %v3193_v32, %v11914_v48  ;;  %v11930_v40 = vld [vmem:[%s11920_s24 + $0x24] sm:$0xff]  ;;  %v11933_v63 = vunpack.c.l.bf16 %v11923_v57  ;;  %v11935_v16 = vunpack.c.l.bf16 %v2689_v55  ;;  %v11942_v39 = vld [vmem:[%s11920_s24 + $0x3c] sm:$0xff]  ;;  %v11945_v33 = vld [vmem:[%s11920_s24 + $0x30] sm:$0xff]  ;;  %v11947_v19 = vunpack.c.l.bf16 %v2690_v59  ;;  %s7758_s28 = sadd.s32 %s8329_s25, %s8328_s22  ;;  %s16621_s15 = scalar_lea.sflag [#allocation4], %s365_s12 }
 0x434   : > { %v11938_v46 = vunpack.c.l.bf16 %v11930_v40  ;;  %v11950_v43 = vunpack.c.l.bf16 %v11942_v39  ;;  %v11953_v53 = vunpack.c.l.bf16 %v11945_v33  ;;  %v11955_v23 = vcombine.low %v2689_v55, %v2690_v59  ;;  %v11964_v13 = vld [vmem:[%s11920_s24 + $0x54] sm:$0xff]  ;;  %v11973_v50 = vld [vmem:[%s11920_s24 + $0x48] sm:$0xff]  ;;  %17071 = vst [vmem:[#allocation22_spill] sm:$0xff] %v11989_v60  ;;  %v2697_v24 = vld [vmem:[%s11920_s24 + $0x60] sm:$0xff]  ;;  %s9985_s19 = scalar_lea.vmem %s16610_s29, 1024  ;;  %s10087_s23 = smov [#allocation3]  }
 0x435   : > { %17064 = vst [vmem:[#allocation15_spill] sm:$0xff] %v11933_v63  ;;  %17065 = vst [vmem:[#allocation16_spill] sm:$0xff] %v11935_v16  ;;  %v3202_v21 = vmul.f32 %v11926_v29, %v11933_v63  ;;  %v3200_v5 = vmul.f32 %v11926_v29, %v11935_v16  ;;  %v3201_v36 = vmul.f32 %v11926_v29, %v11947_v19  ;;  %v11986_v45 = vunpack.c.l.bf16 %v11964_v13  ;;  %v2698_v7 = vld [vmem:[%s11920_s24 + $0x6c] sm:$0xff]  ;;  %v2700_v20 = vld [vmem:[%s11920_s24 + $0x84] sm:$0xff]  ;;  %p9986_p0 = scmp.ne.s32.totalorder %s16610_s29, %s9985_s19 }
 0x436   : > { %17066 = vst [vmem:[#allocation17_spill] sm:$0xff] %v11938_v46  ;;  %17067 = vst [vmem:[#allocation18_spill] sm:$0xff] %v11947_v19  ;;  %v3203_v11 = vmul.f32 %v11926_v29, %v11938_v46  ;;  %8536 = vmatprep.mubr.msk.bf16.mxu0 %vm2990_vm1, %v11955_v23  ;;  %v3205_v49 = vmul.f32 %v11926_v29, %v11950_v43  ;;  %v3204_v61 = vmul.f32 %v11926_v29, %v11953_v53  ;;  %v2699_v28 = vld [vmem:[%s11920_s24 + $0x78] sm:$0xff]  ;;  %v2701_v44 = vld [vmem:[%s11920_s24 + $0x90] sm:$0xff] }
 0x437   : > { %17068 = vst [vmem:[#allocation19_spill] sm:$0xff] %v11950_v43  ;;  %17069 = vst [vmem:[#allocation20_spill] sm:$0xff] %v11953_v53  ;;  %v3222_v38 = vsel %vm2990_vm1, %v3202_v21, 0.0  ;;  %v3216_v62 = vsel %vm2990_vm1, %v3200_v5, 0.0  ;;  %v3219_v2 = vsel %vm2990_vm1, %v3201_v36, 0.0  ;;  %v11994_v31 = vunpack.c.l.bf16 %v11973_v50  ;;  %v2702_v42 = vld [vmem:[%s11920_s24 + $0x9c] sm:$0xff]  ;;  %p9987_p1 = pnand %p9986_p0, %p10195_p3 }
 0x438   : > { %3223 = vadd.xlane.f32.xlu1 %v3222_v38  ;;  %3217 = vadd.xlane.f32.xlu0 %v3216_v62  ;;  %17070 = vst [vmem:[#allocation21_spill] sm:$0xff] %v11986_v45  ;;  %v3225_v54 = vsel %vm2990_vm1, %v3203_v11, 0.0  ;;  %v3231_v10 = vsel %vm2990_vm1, %v3205_v49, 0.0  ;;  %v3228_v17 = vsel %vm2990_vm1, %v3204_v61, 0.0  ;;  %v3207_v12 = vmul.f32 %v11926_v29, %v11986_v45  ;;  %v2704_v41 = vld [vmem:[%s11920_s24 + $0xb4] sm:$0xff]  ;;  %v2703_v3 = vld [vmem:[%s11920_s24 + $0xa8] sm:$0xff] }
 0x439   : > { %8523 = vmatpush3.bf16.xpose.msra.mxu0 %v3034_v47  ;;  %17072 = vst [vmem:[#allocation23_spill] sm:$0xff] %v11994_v31  ;;  %v12009_v27 = vrot.slane %v3193_v32, %v11989_v60  ;;  %v3206_v0 = vmul.f32 %v11926_v29, %v11994_v31  ;;  %v12013_v25 = vunpack.c.l.bf16 %v2698_v7  ;;  %v12015_v52 = vunpack.c.l.bf16 %v2697_v24  ;;  %v12041_v21 = vld [vmem:[#allocation2 + $0x64] ss:$12 sps:$4 sm:$0xff]   ;;  %v12049_v47 = vld [vmem:[#allocation2 + $0x4c] ss:$12 sps:$4 sm:$0xff]   ;;  %p9988_p2 = pneg %p9987_p1  ;;  %s9989_s24 = sshll.u32 %s10087_s23, 4  ;;  %s9990_s24 = int_to_ptr.vmem [resolvable:$false] %s9989_s24 }
 0x43a   : > { %9018 = vmatprep.subr.msk.bf16.mxu0 %vm2990_vm1, %v11970_v58  ;;  %v12017_v14 = vunpack.c.l.bf16 %v2700_v20  ;;  %v12024_v30 = vunpack.c.l.bf16 %v2699_v28  ;;  %v12026_v22 = vunpack.c.l.bf16 %v2702_v42  ;;  %v3237_v6 = vsel %vm2990_vm1, %v3207_v12, 0.0  ;;  %v12057_v49 = vld [vmem:[#allocation2 + $0x10c] ss:$12 sps:$4 sm:$0xff]   ;;  %v12074_v51 = vld [vmem:[#allocation2 + $0x34] ss:$12 sps:$4 sm:$0xff]   ;;  %p9992_p4 = scmp.lt.s32.totalorder %s16610_s29, %s9990_s24 }
 0x43b   : > { %17073 = vst [vmem:[#allocation24_spill] sm:$0xff] %v12013_v25  ;;  %17074 = vst [vmem:[#allocation25_spill] sm:$0xff] %v12015_v52  ;;  %v12030_v4 = vunpack.c.l.bf16 %v2701_v44  ;;  %v12032_v1 = vunpack.c.l.bf16 %v2704_v41  ;;  %v3268_v26 = vmul.f32 %v12009_v27, %v11935_v16  ;;  %v3234_v32 = vsel %vm2990_vm1, %v3206_v0, 0.0 }
 0x43c   : > { %3226 = vadd.xlane.f32.xlu1 %v3225_v54  ;;  %3220 = vadd.xlane.f32.xlu0 %v3219_v2  ;;  %17075 = vst [vmem:[#allocation26_spill] sm:$0xff] %v12017_v14  ;;  %17076 = vst [vmem:[#allocation27_spill] sm:$0xff] %v12024_v30  ;;  %v3209_v55 = vmul.f32 %v11926_v29, %v12013_v25  ;;  %v3208_v59 = vmul.f32 %v11926_v29, %v12015_v52  ;;  %v12051_v36 = vunpack.c.l.bf16 %v2703_v3 }
 0x43d   : > { %17077 = vst [vmem:[#allocation28_spill] sm:$0xff] %v12026_v22  ;;  %17078 = vst [vmem:[#allocation29_spill] sm:$0xff] %v12030_v4  ;;  %v3211_v5 = vmul.f32 %v11926_v29, %v12017_v14  ;;  %v3210_v11 = vmul.f32 %v11926_v29, %v12024_v30  ;;  %v3213_v38 = vmul.f32 %v11926_v29, %v12026_v22  ;;  %v3284_v2 = vsel %vm2990_vm1, %v3268_v26, 0.0 }
 0x43e   : > { %17079 = vst [vmem:[#allocation30_spill] sm:$0xff] %v12032_v1  ;;  %17080 = vst [vmem:[#allocation31_spill] sm:$0xff] %v12051_v36  ;;  %v3269_v62 = vmul.f32 %v12009_v27, %v11947_v19  ;;  %v3212_v61 = vmul.f32 %v11926_v29, %v12030_v4  ;;  %v3215_v54 = vmul.f32 %v11926_v29, %v12032_v1  ;;  %v3028_v12 = vsel %vm2990_vm1, %v12041_v21, 0 }
 0x43f   : > { %v3249_v0 = vsel %vm2990_vm1, %v3211_v5, 0.0  ;;  %v12078_v26 = vcombine.low %v11973_v50, %v11964_v13  ;;  %v12082_v19 = vcombine.low %v2697_v24, %v2698_v7  ;;  %v12084_v5 = vcombine.low %v2699_v28, %v2700_v20  ;;  %v12097_v7 = vld [vmem:[#allocation2 + $0xf4] ss:$12 sps:$4 sm:$0xff]   ;;  %v12101_v24 = vld [vmem:[#allocation2 + $0xdc] ss:$12 sps:$4 sm:$0xff]  }
 0x440   : > { %3232 = vadd.xlane.f32.xlu1 %v3231_v10  ;;  %3229 = vadd.xlane.f32.xlu0 %v3228_v17  ;;  %v3243_v10 = vsel %vm2990_vm1, %v3209_v55, 0.0  ;;  %v3240_v17 = vsel %vm2990_vm1, %v3208_v59, 0.0  ;;  %v3255_v55 = vsel %vm2990_vm1, %v3213_v38, 0.0  ;;  %v3287_v59 = vsel %vm2990_vm1, %v3269_v62, 0.0  ;;  %v12115_v38 = vld [vmem:[#allocation2 + $0x1c] ss:$12 sps:$4 sm:$0xff]  }
 0x441   : > { %8525 = vmatpush3.bf16.xpose.msra.mxu0 %v3031_v18  ;;  %v3246_v18 = vsel %vm2990_vm1, %v3210_v11, 0.0  ;;  %v3252_v11 = vsel %vm2990_vm1, %v3212_v61, 0.0  ;;  %v12088_v16 = vcombine.low %v2701_v44, %v2702_v42  ;;  %v12090_v60 = vcombine.low %v2703_v3, %v2704_v41 }
 0x442   : > { %9019 = vmatprep.subr.msk.bf16.mxu0 %vm2990_vm1, %v12022_v35  ;;  %v3022_v50 = vsel %vm2990_vm1, %v12074_v51, 0  ;;  %v3271_v20 = vmul.f32 %v12009_v27, %v11938_v46  ;;  %v3270_v28 = vmul.f32 %v12009_v27, %v11933_v63  ;;  %v3273_v41 = vmul.f32 %v12009_v27, %v11950_v43 }
 0x443   : > { %v3272_v3 = vmul.f32 %v12009_v27, %v11953_v53  ;;  %v2774_v53 = vadd.s32 32, %v11906_v34  ;;  %v16758_v63 = vmov 0.0   ;;  %v2777_v46 = vadd.s32 56, %v11906_v34 }
 0x444   : > { %3238 = vadd.xlane.f32.xlu1 %v3237_v6  ;;  %3235 = vadd.xlane.f32.xlu0 %v3234_v32  ;;  %v3025_v6 = vsel %vm2990_vm1, %v12049_v47, 0  ;;  %v3214_v32 = vmul.f32 %v11926_v29, %v12051_v36  ;;  %v3261_v29 = vsel %vm2990_vm1, %v3215_v54, 0.0  ;;  %v3293_v42 = vsel %vm2990_vm1, %v3271_v20, 0.0 }
 0x445   : > { %v3290_v44 = vsel %vm2990_vm1, %v3270_v28, 0.0  ;;  %v3299_v62 = vsel %vm2990_vm1, %v3273_v41, 0.0  ;;  %v3296_v61 = vsel %vm2990_vm1, %v3272_v3, 0.0  ;;  %v3275_v54 = vmul.f32 %v12009_v27, %v11986_v45 }
 0x446   : > { %v3258_v13 = vsel %vm2990_vm1, %v3214_v32, 0.0  ;;  %v12135_v32 = vld [vmem:[#allocation2 + $0x4] ss:$12 sps:$4 sm:$0xff]   ;;  %v12149_v28 = vcombine.low %v11923_v57, %v11930_v40  ;;  %v3281_v57 = vmul.f32 %v12009_v27, %v12026_v22  ;;  %v3280_v40 = vmul.f32 %v12009_v27, %v12030_v4 }
 0x448   : > { %3244 = vadd.xlane.f32.xlu1 %v3243_v10  ;;  %3241 = vadd.xlane.f32.xlu0 %v3240_v17  ;;  %v3019_v10 = vsel %vm2990_vm1, %v12115_v38, 0  ;;  %v12125_v17 = vld [vmem:[#allocation2 + $0xc4] ss:$12 sps:$4 sm:$0xff]  }
 0x449   : > { %8527 = vmatpush3.bf16.xpose.msra.mxu0 %v3028_v12  ;;  %v3305_v12 = vsel %vm2990_vm1, %v3275_v54, 0.0 }
 0x44a   : > { %9020 = vmatprep.subr.msk.bf16.mxu0 %vm2990_vm1, %v12057_v49 }
 0x44c   : > { %3250 = vadd.xlane.f32.xlu1 %v3249_v0  ;;  %3247 = vadd.xlane.f32.xlu0 %v3246_v18  ;;  %v3277_v18 = vmul.f32 %v12009_v27, %v12013_v25  ;;  %v2773_v25 = vadd.s32 24, %v11906_v34 }
 0x450   : > { %3256 = vadd.xlane.f32.xlu1 %v3255_v55  ;;  %3253 = vadd.xlane.f32.xlu0 %v3252_v11  ;;  %v3311_v55 = vsel %vm2990_vm1, %v3277_v18, 0.0  ;;  %v3279_v11 = vmul.f32 %v12009_v27, %v12017_v14 }
 0x451   : > { %8529 = vmatpush3.bf16.xpose.msra.mxu0 %v3025_v6  ;;  %v3276_v6 = vmul.f32 %v12009_v27, %v12015_v52 }
 0x452   : > { %9021 = vmatprep.subr.msk.bf16.mxu0 %vm2990_vm1, %v12097_v7 }
 0x454   : > { %3262 = vadd.xlane.f32.xlu1 %v3261_v29  ;;  %3259 = vadd.xlane.f32.xlu0 %v3258_v13  ;;  %v3278_v29 = vmul.f32 %v12009_v27, %v12024_v30  ;;  %v3016_v13 = vsel %vm2990_vm1, %v12135_v32, 0  ;;  %v2775_v30 = vadd.s32 40, %v11906_v34 }
 0x456   : > { %v3314_v20 = vsel %vm2990_vm1, %v3278_v29, 0.0 }
 0x458   : > { %3288 = vadd.xlane.f32.xlu1 %v3287_v59  ;;  %3285 = vadd.xlane.f32.xlu0 %v3284_v2  ;;  %v3274_v2 = vmul.f32 %v12009_v27, %v11994_v31  ;;  %v3308_v59 = vsel %vm2990_vm1, %v3276_v6, 0.0  ;;  %v9263_v6 = vld [vmem:[#allocation2 + $0x170] ss:$12 sps:$4 sm:$0xff]  }
 0x459   : > { %8531 = vmatpush3.bf16.xpose.msra.mxu0 %v3022_v50  ;;  %v3317_v50 = vsel %vm2990_vm1, %v3279_v11, 0.0  ;;  %8552 = vmatprep.subr.bf16.mxu1 %v9263_v6  ;;  %v9266_v11 = vld [vmem:[#allocation2 + $0x98] ss:$12 sps:$4 sm:$0xff]   ;;  %v9275_v6 = vld [vmem:[#allocation2 + $0xe0] ss:$12 sps:$4 sm:$0xff]  }
 0x45a   : > { %9022 = vmatprep.subr.msk.bf16.mxu0 %vm2990_vm1, %v12101_v24  ;;  %v3302_v0 = vsel %vm2990_vm1, %v3274_v2, 0.0 }
 0x45c   : > { %3294 = vadd.xlane.f32.xlu1 %v3293_v42  ;;  %3291 = vadd.xlane.f32.xlu0 %v3290_v44  ;;  %v12157_v42 = vcombine.low %v11945_v33, %v11942_v39  ;;  %v3323_v39 = vsel %vm2990_vm1, %v3281_v57, 0.0  ;;  %v3320_v33 = vsel %vm2990_vm1, %v3280_v40, 0.0  ;;  %v9269_v57 = vld [vmem:[#allocation2 + $0x128] ss:$12 sps:$4 sm:$0xff]  }
 0x45d   : > { %v9270_v40 = vld [vmem:[#allocation2 + $0x68] ss:$12 sps:$4 sm:$0xff]  }
 0x460   : > { %3300 = vadd.xlane.f32.xlu1 %v3299_v62  ;;  %3297 = vadd.xlane.f32.xlu0 %v3296_v61  ;;  %v3283_v62 = vmul.f32 %v12009_v27, %v12032_v1  ;;  %v3282_v61 = vmul.f32 %v12009_v27, %v12051_v36  ;;  %v9265_v27 = vld [vmem:[#allocation2 + $0x158] ss:$12 sps:$4 sm:$0xff]  }
 0x461   : > { %8533 = vmatpush3.bf16.xpose.msra.mxu0 %v3019_v10 }
 0x462   : > { %9023 = vmatprep.subr.msk.bf16.mxu0 %vm2990_vm1, %v12125_v17  ;;  %v3329_v2 = vsel %vm2990_vm1, %v3283_v62, 0.0  ;;  %v3326_v10 = vsel %vm2990_vm1, %v3282_v61, 0.0  ;;  %v9272_v62 = vld [vmem:[#allocation2 + $0x50] ss:$12 sps:$4 sm:$0xff]   ;;  %v9273_v61 = vld [vmem:[#allocation2 + $0xf8] ss:$12 sps:$4 sm:$0xff]  }
 0x464   : > { %3306 = vadd.xlane.f32.xlu1 %v3305_v12  ;;  %3303 = vadd.xlane.f32.xlu0 %v3302_v0 }
 0x468   : > { %3312 = vadd.xlane.f32.xlu1 %v3311_v55  ;;  %3309 = vadd.xlane.f32.xlu0 %v3308_v59  ;;  %v9264_v55 = vld [vmem:[#allocation2 + $0xb0] ss:$12 sps:$4 sm:$0xff]  }
 0x469   : > { %8535 = vmatpush3.bf16.xpose.msra.mxu0 %v3016_v13  ;;  %8553 = vmatpush3.bf16.msra.mxu1 %v9264_v55  ;;  %v9267_v13 = vld [vmem:[#allocation2 + $0x140] ss:$12 sps:$4 sm:$0xff]  }
 0x46a   : > { %8554 = vmatprep.subr.bf16.mxu1 %v9265_v27  ;;  %v9276_v27 = vld [vmem:[#allocation2 + $0x20] ss:$12 sps:$4 sm:$0xff]  }
 0x46c   : > { %3318 = vadd.xlane.f32.xlu1 %v3317_v50  ;;  %3315 = vadd.xlane.f32.xlu0 %v3314_v20  ;;  %v9268_v50 = vld [vmem:[#allocation2 + $0x80] ss:$12 sps:$4 sm:$0xff]  }
 0x46d   : > { %8555 = vmatpush3.bf16.msra.mxu1 %v9266_v11  ;;  %v9277_v11 = vld [vmem:[#allocation2 + $0xc8] ss:$12 sps:$4 sm:$0xff]  }
 0x46e   : > { %8556 = vmatprep.subr.bf16.mxu1 %v9267_v13 }
 0x470   : > { %8537 = vmatmul.mubr.msk.bf16.vlgmr.msra.gmra.mxu0 %vm2990_vm1, %v11955_v23 }
 0x471   : > { %8538 = vmatprep.mubr.msk.bf16.mxu0 %vm2990_vm1, %v12149_v28  ;;  %8557 = vmatpush3.bf16.msra.mxu1 %v9268_v50  ;;  %v9278_v50 = vld [vmem:[#allocation2 + $0x8] ss:$12 sps:$4 sm:$0xff]  }
 0x472   : > { %8558 = vmatprep.subr.bf16.mxu1 %v9269_v57 }
 0x475   : > { %8559 = vmatpush3.bf16.msra.mxu1 %v9270_v40 }
 0x478   : > { %8539 = vmatmul.mubr.msk.bf16.gmra.mxu0 %vm2990_vm1, %v12149_v28 }
 0x479   : > { %8540 = vmatprep.mubr.msk.bf16.mxu0 %vm2990_vm1, %v12157_v42 }
 0x47d   : > { %4035 = vrot.lane.b32.xlu1 %v11894_v56, %s10083_s27 }
 0x480   : > { %8541 = vmatmul.mubr.msk.bf16.gmra.mxu0 %vm2990_vm1, %v12157_v42 }
 0x481   : > { %4033 = vrot.lane.b32.xlu1 %v11901_v37, %s10083_s27  ;;  %8542 = vmatprep.mubr.msk.bf16.mxu0 %vm2990_vm1, %v12078_v26 }
 0x482   : > { %4019 = vrot.lane.b32.xlu0 %v11899_v15, %s10083_s27 }
 0x486   : > { %4017 = vrot.lane.b32.xlu0 %v11918_v8, %s10083_s27 }
 0x488   : > { %8543 = vmatmul.mubr.msk.bf16.gmra.mxu0 %vm2990_vm1, %v12078_v26 }
 0x489   : > { %8544 = vmatprep.mubr.msk.bf16.mxu0 %vm2990_vm1, %v12082_v19 }
 0x490   : > { %8545 = vmatmul.mubr.msk.bf16.gmra.mxu0 %vm2990_vm1, %v12082_v19 }
 0x491   : > { %8546 = vmatprep.mubr.msk.bf16.mxu0 %vm2990_vm1, %v12084_v5 }
 0x498   : > { %8547 = vmatmul.mubr.msk.bf16.gmra.mxu0 %vm2990_vm1, %v12084_v5 }
 0x499   : > { %8548 = vmatprep.mubr.msk.bf16.mxu0 %vm2990_vm1, %v12088_v16 }
 0x4a0   : > { %8549 = vmatmul.mubr.msk.bf16.gmra.mxu0 %vm2990_vm1, %v12088_v16 }
 0x4a1   : > { %8550 = vmatprep.mubr.msk.bf16.mxu0 %vm2990_vm1, %v12090_v60 }
 0x4a5   : > { %3324 = vadd.xlane.f32.xlu1 %v3323_v39  ;;  %3321 = vadd.xlane.f32.xlu0 %v3320_v33  ;;  %v9271_v33 = vld [vmem:[#allocation2 + $0x110] ss:$12 sps:$4 sm:$0xff]  }
 0x4a6   : > { %8560 = vmatprep.subr.bf16.mxu1 %v9271_v33 }
 0x4a7   : > { %8561 = vmatpush3.bf16.msra.mxu1 %v9272_v62 }
 0x4a8   : > { %8551 = vmatmul.mubr.msk.bf16.gmra.mxu0 %vm2990_vm1, %v12090_v60  ;;  %8562 = vmatprep.subr.bf16.mxu1 %v9273_v61 }
 0x4b6   : > { %4031 = vrot.lane.b32.xlu1 %v11970_v58, %s10083_s27 }
 0x4bb   : > { %4015 = vrot.lane.b32.xlu0 %v11983_v9, %s10083_s27 }
 0x4c1   : > { %v12203_v44 = vpop.xlane.xlu1 %3223  ;;  %v12268_v40 = vpop.xlane.xlu0 %3217 }
 0x4c5   : > { %v12205_v41 = vpop.xlane.xlu1 %3226  ;;  %v12274_v33 = vpop.xlane.xlu0 %3220 }
 0x4c6   : > { %17081 = vst [vmem:[#allocation32_spill] sm:$0xff] %v12205_v41 }
 0x4c9   : > { %v12207_v3 = vpop.xlane.xlu1 %3232 }
 0x4ca   : > { %17082 = vst [vmem:[#allocation33_spill] sm:$0xff] %v12207_v3 }
 0x4cd   : > { %v12213_v54 = vpop.xlane.xlu1 %3238 }
 0x4ce   : > { %17083 = vst [vmem:[#allocation34_spill] sm:$0xff] %v12213_v54 }
 0x4d1   : > { %v12217_v12 = vpop.xlane.xlu1 %3244 }
 0x4d2   : > { %17084 = vst [vmem:[#allocation35_spill] sm:$0xff] %v12217_v12 }
 0x4d5   : > { %v12219_v0 = vpop.xlane.xlu1 %3250 }
 0x4d6   : > { %17085 = vst [vmem:[#allocation36_spill] sm:$0xff] %v12219_v0 }
 0x4d9   : > { %v12221_v18 = vpop.xlane.xlu1 %3256 }
 0x4da   : > { %3330 = vadd.xlane.f32.xlu1 %v3329_v2  ;;  %3327 = vadd.xlane.f32.xlu0 %v3326_v10  ;;  %17086 = vst [vmem:[#allocation37_spill] sm:$0xff] %v12221_v18  ;;  %v9274_v10 = vld [vmem:[#allocation2 + $0x38] ss:$12 sps:$4 sm:$0xff]  }
 0x4db   : > { %8563 = vmatpush3.bf16.msra.mxu1 %v9274_v10  ;;  %v17099_v10 = vlaneseq }
 0x4dc   : > { %8564 = vmatprep.subr.bf16.mxu1 %v9275_v6 }
 0x4dd   : > { %v12223_v59 = vpop.xlane.xlu1 %3262  ;;  %v12327_v6 = vand.u32 127, %v17099_v10 }
 0x4de   : > { %17087 = vst [vmem:[#allocation38_spill] sm:$0xff] %v12223_v59 }
 0x4df   : > { %8565 = vmatpush3.bf16.msra.mxu1 %v9276_v27  ;;  %v2771_v27 = vadd.s32 8, %v11906_v34  ;;  %v12338_v22 = vadd.s32 128, %v12327_v6 }
 0x4e0   : > { %8566 = vmatprep.subr.bf16.mxu1 %v9277_v11 }
 0x4e1   : > { %v12225_v29 = vpop.xlane.xlu1 %3288 }
 0x4e3   : > { %8567 = vmatpush3.bf16.msra.mxu1 %v9278_v50  ;;  %v12334_v50 = vstv %s8222_s18  ;;  %s8330_s18 = sshll.u32 %s7758_s28, 6 }
 0x4e4   : > { %v2788_v14 = vadd.s32 %v12334_v50, %v2771_v27  ;;  %v2787_v10 = vadd.s32 %v12334_v50, %v11906_v34  ;;  %v2790_v27 = vadd.s32 %v12334_v50, %v2773_v25  ;;  %v2791_v25 = vadd.s32 %v12334_v50, %v2774_v53  ;;  %s16616_s30 = scalar_lea.hbm %s16682_s8, %s8330_s18 }
 0x4e5   : > { %v12229_v20 = vpop.xlane.xlu1 %3294 }
 0x4e6   : > { %17088 = vst [vmem:[#allocation39_spill] sm:$0xff] %v12229_v20  ;;  %vm2809_vm2 = vcmp.gt.s32.totalorder %v12338_v22, %v2788_v14  ;;  %vm2808_vm3 = vcmp.gt.s32.totalorder %v12327_v6, %v2788_v14  ;;  %vm2806_vm4 = vcmp.gt.s32.totalorder %v12327_v6, %v2787_v10  ;;  %vm2807_vm5 = vcmp.gt.s32.totalorder %v12338_v22, %v2787_v10 }
 0x4e7   : > { %v12356_v52 = vsel %vm2809_vm2, -1e+30, %v16758_v63  ;;  %vm2813_vm6 = vcmp.gt.s32.totalorder %v12338_v22, %v2790_v27  ;;  %vm2812_vm8 = vcmp.gt.s32.totalorder %v12327_v6, %v2790_v27  ;;  %v2792_v10 = vadd.s32 %v12334_v50, %v2775_v30 }
 0x4e8   : > { %17100 = vst [vmem:[#allocation50_spill] sm:$0xff] %v12356_v52  ;;  %v12382_v53 = vsel %vm2813_vm6, -1e+30, %v16758_v63  ;;  %v12394_v30 = vsel %vm2812_vm8, -1e+30, %v16758_v63  ;;  %vm2814_vm11 = vcmp.gt.s32.totalorder %v12327_v6, %v2791_v25  ;;  %v2794_v27 = vadd.s32 %v12334_v50, %v2777_v46 }
 0x4e9   : > { %v12233_v39 = vpop.xlane.xlu1 %3300  ;;  %17105 = vst [vmem:[#allocation55_spill] sm:$0xff] %v12382_v53  ;;  %vm2817_vm10 = vcmp.gt.s32.totalorder %v12338_v22, %v2792_v10  ;;  %17107 = vst [vmem:[#allocation57_spill] sm:$0xff] %v12394_v30  ;;  %vm2816_vm12 = vcmp.gt.s32.totalorder %v12327_v6, %v2792_v10  ;;  %vm2815_vm13 = vcmp.gt.s32.totalorder %v12338_v22, %v2791_v25 }
 0x4ea   : > { %17089 = vst [vmem:[#allocation40_spill] sm:$0xff] %v12233_v39  ;;  %v12414_v12 = vsel %vm2817_vm10, -1e+30, %v16758_v63  ;;  %vm2821_vm14 = vcmp.gt.s32.totalorder %v12338_v22, %v2794_v27  ;;  %vm2820_vm15 = vcmp.gt.s32.totalorder %v12327_v6, %v2794_v27 }
 0x4eb   : > { %4029 = vrot.lane.b32.xlu1 %v12022_v35, %s10083_s27  ;;  %17109 = vst [vmem:[#allocation59_spill] sm:$0xff] %v12414_v12 }
 0x4ed   : > { %v12239_v2 = vpop.xlane.xlu1 %3306 }
 0x4ee   : > { %17090 = vst [vmem:[#allocation41_spill] sm:$0xff] %v12239_v2 }
 0x4ef   : > { %4011 = vrot.lane.b32.xlu1 %v12049_v47, %s10083_s27 }
 0x4f0   : > { %4013 = vrot.lane.b32.xlu0 %v12041_v21, %s10083_s27 }
 0x4f1   : > { %v12245_v55 = vpop.xlane.xlu1 %3312 }
 0x4f2   : > { %17091 = vst [vmem:[#allocation42_spill] sm:$0xff] %v12245_v55 }
 0x4f3   : > { %4027 = vrot.lane.b32.xlu1 %v12057_v49, %s10083_s27 }
 0x4f4   : > { %4009 = vrot.lane.b32.xlu0 %v12074_v51, %s10083_s27 }
 0x4f5   : > { %v12251_v13 = vpop.xlane.xlu1 %3318 }
 0x4f6   : > { %17092 = vst [vmem:[#allocation43_spill] sm:$0xff] %v12251_v13 }
 0x4f7   : > { %4025 = vrot.lane.b32.xlu1 %v12097_v7, %s10083_s27 }
 0x4f8   : > { %4007 = vrot.lane.b32.xlu0 %v12115_v38, %s10083_s27 }
 0x4f9   : > { %v4036_v57 = vpop.permute.xlu1 %4035 }
 0x4fa   : > { %9024 = vmatprep.subr.msk.bf16.mxu1 %vm2990_vm1, %v4036_v57  ;;  %v2772_v57 = vadd.s32 16, %v11906_v34 }
 0x4fb   : > { %4023 = vrot.lane.b32.xlu1 %v12101_v24, %s10083_s27 }
 0x4fc   : > { %4005 = vrot.lane.b32.xlu0 %v12135_v32, %s10083_s27  ;;  %v2789_v43 = vadd.s32 %v12334_v50, %v2772_v57  ;;  %v12363_v57 = vsel %vm2808_vm3, -1e+30, %v16758_v63 }
 0x4fd   : > { %17101 = vst [vmem:[#allocation51_spill] sm:$0xff] %v12363_v57 }
 0x4fe   : > { %vm2810_vm7 = vcmp.gt.s32.totalorder %v12327_v6, %v2789_v43  ;;  %vm2811_vm9 = vcmp.gt.s32.totalorder %v12338_v22, %v2789_v43 }
 0x4ff   : > { %4021 = vrot.lane.b32.xlu1 %v12125_v17, %s10083_s27  ;;  %v12411_v55 = vsel %vm2811_vm9, -1e+30, %v16758_v63 }
 0x500   : > { %3989 = vrot.lane.b32.xlu0 %v11955_v23, %s10083_s27  ;;  %17108 = vst [vmem:[#allocation58_spill] sm:$0xff] %v12411_v55 }
 0x503   : > { %5139 = vrot.lane.b32.xlu1 %v11899_v15, %s10084_s11 }
 0x504   : > { %5155 = vrot.lane.b32.xlu0 %v11894_v56, %s10084_s11  ;;  %v12284_v56 = vpop.xlane.xlu0 %3229 }
 0x505   : > { %17093 = vst [vmem:[#allocation44_spill] sm:$0xff] %v12284_v56 }
 0x507   : > { %3991 = vrot.lane.b32.xlu1 %v12149_v28, %s10083_s27 }
 0x508   : > { %5137 = vrot.lane.b32.xlu0 %v11918_v8, %s10084_s11  ;;  %v12290_v15 = vpop.xlane.xlu0 %3235 }
 0x509   : > { %17094 = vst [vmem:[#allocation45_spill] sm:$0xff] %v12290_v15 }
 0x50b   : > { %5153 = vrot.lane.b32.xlu1 %v11901_v37, %s10084_s11 }
 0x50c   : > { %3993 = vrot.lane.b32.xlu0 %v12157_v42, %s10083_s27  ;;  %v12300_v37 = vpop.xlane.xlu0 %3241 }
 0x50d   : > { %17095 = vst [vmem:[#allocation46_spill] sm:$0xff] %v12300_v37  ;;  %v12389_v37 = vsel %vm2810_vm7, -1e+30, %v16758_v63 }
 0x50e   : > { %17106 = vst [vmem:[#allocation56_spill] sm:$0xff] %v12389_v37 }
 0x50f   : > { %5135 = vrot.lane.b32.xlu1 %v11983_v9, %s10084_s11 }
 0x510   : > { %5151 = vrot.lane.b32.xlu0 %v11970_v58, %s10084_s11  ;;  %v12306_v8 = vpop.xlane.xlu0 %3247 }
 0x511   : > { %17096 = vst [vmem:[#allocation47_spill] sm:$0xff] %v12306_v8  ;;  %v2776_v8 = vadd.s32 48, %v11906_v34 }
 0x513   : > { %3995 = vrot.lane.b32.xlu1 %v12078_v26, %s10083_s27  ;;  %v2793_v46 = vadd.s32 %v12334_v50, %v2776_v8  ;;  %v12432_v8 = vsel %vm2814_vm11, -1e+30, %v16758_v63 }
 0x514   : > { %5133 = vrot.lane.b32.xlu0 %v12041_v21, %s10084_s11  ;;  %17111 = vst [vmem:[#allocation61_spill] sm:$0xff] %v12432_v8 }
 0x515   : > { %vm2818_vm0 = vcmp.gt.s32.totalorder %v12327_v6, %v2793_v46  ;;  %vm2819_vm2 = vcmp.gt.s32.totalorder %v12338_v22, %v2793_v46 }
 0x517   : > { %5149 = vrot.lane.b32.xlu1 %v12022_v35, %s10084_s11 }
 0x518   : > { %3997 = vrot.lane.b32.xlu0 %v12082_v19, %s10083_s27 }
 0x51b   : > { %5131 = vrot.lane.b32.xlu1 %v12049_v47, %s10084_s11 }
 0x51c   : > { %5147 = vrot.lane.b32.xlu0 %v12057_v49, %s10084_s11 }
 0x51f   : > { %3999 = vrot.lane.b32.xlu1 %v12084_v5, %s10083_s27 }
 0x520   : > { %5129 = vrot.lane.b32.xlu0 %v12074_v51, %s10084_s11  ;;  %v12316_v51 = vpop.xlane.xlu0 %3253 }
 0x521   : > { %17097 = vst [vmem:[#allocation48_spill] sm:$0xff] %v12316_v51  ;;  %v12379_v51 = vsel %vm2807_vm5, -1e+30, %v16758_v63 }
 0x522   : > { %17104 = vst [vmem:[#allocation54_spill] sm:$0xff] %v12379_v51 }
 0x523   : > { %5145 = vrot.lane.b32.xlu1 %v12097_v7, %s10084_s11 }
 0x524   : > { %4001 = vrot.lane.b32.xlu0 %v12088_v16, %s10083_s27  ;;  %v12320_v35 = vpop.xlane.xlu0 %3259 }
 0x525   : > { %17098 = vst [vmem:[#allocation49_spill] sm:$0xff] %v12320_v35  ;;  %v12371_v35 = vsel %vm2806_vm4, -1e+30, %v16758_v63 }
 0x526   : > { %17103 = vst [vmem:[#allocation53_spill] sm:$0xff] %v12371_v35 }
 0x527   : > { %5127 = vrot.lane.b32.xlu1 %v12115_v38, %s10084_s11 }
 0x528   : > { %5143 = vrot.lane.b32.xlu0 %v12101_v24, %s10084_s11  ;;  %v12324_v61 = vpop.xlane.xlu0 %3285 }
 0x52b   : > { %4003 = vrot.lane.b32.xlu1 %v12090_v60, %s10083_s27 }
 0x52c   : > { %5125 = vrot.lane.b32.xlu0 %v12135_v32, %s10084_s11  ;;  %v12344_v36 = vpop.xlane.xlu0 %3291 }
 0x530   : > { %v12318_v58 = vpop.f32.mrf.mxu0  ;;  %v12368_v59 = vpop.xlane.xlu0 %3297 }
 0x531   : > { %17102 = vst [vmem:[#allocation52_spill] sm:$0xff] %v12368_v59 }
 0x532   : > { %v3099_v9 = vpop.f32.mrf.mxu0 }
 0x534   : > { %v3101_v21 = vpop.f32.mrf.mxu0 }
 0x535   : > { %v12386_v0 = vadd.f32 %v3101_v21, %v12363_v57  ;;  %v12402_v21 = vadd.f32 %v3099_v9, %v12379_v51  ;;  %v2778_v9 = vadd.s32 64, %v11906_v34  ;;  %v12418_v51 = vpop.xlane.xlu0 %3303 }
 0x536   : > { %v3103_v49 = vpop.f32.mrf.mxu0  ;;  %17110 = vst [vmem:[#allocation60_spill] sm:$0xff] %v12418_v51  ;;  %v12451_v51 = vsel %vm2815_vm13, -1e+30, %v16758_v63 }
 0x537   : > { %v12374_v18 = vadd.f32 %v3103_v49, %v12356_v52  ;;  %v2779_v52 = vadd.s32 72, %v11906_v34  ;;  %17114 = vst [vmem:[#allocation64_spill] sm:$0xff] %v12451_v51 }
 0x538   : > { %v12322_v62 = vpop.f32.mrf.mxu0 }
 0x539   : > { %v3335_v43 = vmax.f32 %v12386_v0, %v12374_v18 }
 0x53a   : > { %v12330_v11 = vpop.f32.mrf.mxu0 }
 0x53c   : > { %v3111_v1 = vpop.f32.mrf.mxu0 }
 0x53d   : > { %v12425_v10 = vadd.f32 %v3111_v1, %v12394_v30  ;;  %v12441_v1 = vadd.f32 %v12330_v11, %v12411_v55  ;;  %v2795_v11 = vadd.s32 %v12334_v50, %v2778_v9  ;;  %v12467_v55 = vsel %vm2820_vm15, -1e+30, %v16758_v63 }
 0x53e   : > { %v3113_v45 = vpop.f32.mrf.mxu0  ;;  %17117 = vst [vmem:[#allocation67_spill] sm:$0xff] %v12467_v55  ;;  %v2780_v9 = vadd.s32 80, %v11906_v34 }
 0x53f   : > { %v12405_v57 = vadd.f32 %v3113_v45, %v12382_v53  ;;  %v12422_v45 = vadd.f32 %v12318_v58, %v12371_v35  ;;  %v12435_v53 = vsel %vm2816_vm12, -1e+30, %v16758_v63  ;;  %v2796_v35 = vadd.s32 %v12334_v50, %v2779_v52 }
 0x540   : > { %v12349_v4 = vpop.f32.mrf.mxu0  ;;  %17112 = vst [vmem:[#allocation62_spill] sm:$0xff] %v12435_v53  ;;  %v12455_v52 = vsel %vm2821_vm14, -1e+30, %v16758_v63  ;;  %vm2822_vm5 = vcmp.gt.s32.totalorder %v12327_v6, %v2795_v11  ;;  %vm2823_vm6 = vcmp.gt.s32.totalorder %v12338_v22, %v2795_v11 }
 0x541   : > { %v3341_v25 = vmax.f32 %v12425_v10, %v12405_v57  ;;  %v3332_v30 = vmax.f32 %v12422_v45, %v12402_v21  ;;  %17115 = vst [vmem:[#allocation65_spill] sm:$0xff] %v12455_v52  ;;  %vm2824_vm3 = vcmp.gt.s32.totalorder %v12327_v6, %v2796_v35  ;;  %vm2825_vm4 = vcmp.gt.s32.totalorder %v12338_v22, %v2796_v35 }
 0x542   : > { %v12358_v31 = vpop.f32.mrf.mxu0 }
 0x544   : > { %v3121_v14 = vpop.f32.mrf.mxu0 }
 0x546   : > { %v3123_v13 = vpop.f32.mrf.mxu0 }
 0x548   : > { %v12397_v49 = vpop.f32.mrf.mxu0 }
 0x54a   : > { %v3129_v2 = vpop.f32.mrf.mxu0 }
 0x54b   : > { %3336 = vmax.xlane.f32.xlu0 %v3335_v43  ;;  %v12444_v43 = vadd.f32 %v3123_v13, %v12414_v12  ;;  %v12460_v13 = vadd.f32 %v12322_v62, %v12389_v37  ;;  %v12463_v12 = vadd.f32 %v3121_v14, %v12435_v53  ;;  %v2781_v62 = vadd.s32 88, %v11906_v34  ;;  %v12473_v37 = vpop.xlane.xlu0 %3309 }
 0x54c   : > { %v3131_v58 = vpop.f32.mrf.mxu0  ;;  %17118 = vst [vmem:[#allocation68_spill] sm:$0xff] %v12473_v37  ;;  %v12477_v14 = vadd.f32 %v12358_v31, %v12451_v51  ;;  %v17120_v53 = vmov 0.0  }
 0x54d   : > { %17113 = vst [vmem:[#allocation63_spill] sm:$0xff] %v12444_v43  ;;  %17116 = vst [vmem:[#allocation66_spill] sm:$0xff] %v12463_v12  ;;  %v12489_v39 = vsel %vm2818_vm0, -1e+30, %v17120_v53  ;;  %v12492_v37 = vsel %vm2819_vm2, -1e+30, %v17120_v53 }
 0x54e   : > { %v3133_v27 = vpop.f32.mrf.mxu0  ;;  %17121 = vst [vmem:[#allocation70_spill] sm:$0xff] %v12489_v39  ;;  %17122 = vst [vmem:[#allocation71_spill] sm:$0xff] %v12492_v37  ;;  %v12506_v46 = vsel %vm2824_vm3, -1e+30, %v17120_v53 }
 0x54f   : > { %3342 = vmax.xlane.f32.xlu0 %v3341_v25  ;;  %3333 = vmax.xlane.f32.xlu1 %v3332_v30  ;;  %v12480_v63 = vadd.f32 %v3133_v27, %v12455_v52  ;;  %v3347_v30 = vmax.f32 %v12463_v12, %v12444_v43  ;;  %v3338_v25 = vmax.f32 %v12460_v13, %v12441_v1  ;;  %v12511_v12 = vsel %vm2825_vm4, -1e+30, %v17120_v53 }
 0x550   : > { %v3137_v15 = vpop.f32.mrf.mxu0  ;;  %v12497_v27 = vadd.f32 %v12349_v4, %v12432_v8  ;;  %v12500_v52 = vadd.f32 %v3131_v58, %v12467_v55  ;;  %17123 = vst [vmem:[#allocation72_spill] sm:$0xff] %v12506_v46  ;;  %17124 = vst [vmem:[#allocation73_spill] sm:$0xff] %v12511_v12  ;;  %v2797_v4 = vadd.s32 %v12334_v50, %v2780_v9  ;;  %v2782_v55 = vadd.s32 96, %v11906_v34  ;;  %v12527_v9 = vpop.xlane.xlu0 %3315 }
 0x551   : > { %17119 = vst [vmem:[#allocation69_spill] sm:$0xff] %v12480_v63  ;;  %v2798_v58 = vadd.s32 %v12334_v50, %v2781_v62  ;;  %v12524_v43 = vsel %vm2823_vm6, -1e+30, %v17120_v53  ;;  %17126 = vst [vmem:[#allocation75_spill] sm:$0xff] %v12527_v9  ;;  %v12531_v62 = vadd.f32 %v12397_v49, %v12489_v39  ;;  %vm7445_vm4 = vcmask 523264  }
 0x552   : > { %v3139_v31 = vpop.f32.mrf.mxu0  ;;  %v3344_v8 = vmax.f32 %v12497_v27, %v12477_v14  ;;  %17125 = vst [vmem:[#allocation74_spill] sm:$0xff] %v12524_v43  ;;  %vm2827_vm7 = vcmp.gt.s32.totalorder %v12338_v22, %v2797_v4  ;;  %vm2826_vm8 = vcmp.gt.s32.totalorder %v12327_v6, %v2797_v4  ;;  %v2799_v49 = vadd.s32 %v12334_v50, %v2782_v55  ;;  %v12575_v4 = vpop.permute.xlu1 %4033 }
 0x553   : > { %3348 = vmax.xlane.f32.xlu0 %v3347_v30  ;;  %3339 = vmax.xlane.f32.xlu1 %v3338_v25  ;;  %v12517_v30 = vadd.f32 %v3129_v2, %v12492_v37  ;;  %v3353_v25 = vmax.f32 %v12500_v52, %v12480_v63  ;;  %17127 = vst [vmem:[#allocation76_spill] sm:$0xff] %v12531_v62  ;;  %v12536_v2 = vsel %vm2822_vm5, -1e+30, %v17120_v53  ;;  %v2784_v55 = vadd.s32 112, %v11906_v34 }
 0x554   : > { %v3141_v51 = vpop.f32.mrf.mxu0  ;;  %17128 = vst [vmem:[#allocation77_spill] sm:$0xff] %v12536_v2  ;;  %vm2828_vm9 = vcmp.gt.s32.totalorder %v12327_v6, %v2798_v58  ;;  %vm2829_vm10 = vcmp.gt.s32.totalorder %v12338_v22, %v2798_v58  ;;  %v12549_v11 = vadd.f32 %v3139_v31, %v12524_v43  ;;  %v12562_v58 = vadd.f32 %v3137_v15, %v12536_v2  ;;  %v12577_v15 = vpop.permute.xlu0 %4019 }
 0x555   : > { %v12539_v37 = vadd.f32 %v3141_v51, %v12506_v46  ;;  %v12566_v31 = vsel %vm2826_vm8, -1e+30, %v17120_v53  ;;  %v12569_v43 = vsel %vm2828_vm9, -1e+30, %v17120_v53  ;;  %v12572_v39 = vsel %vm2829_vm10, -1e+30, %v17120_v53 }
 0x556   : > { %v3143_v35 = vpop.f32.mrf.mxu0  ;;  %17132 = vst [vmem:[#allocation81_spill] sm:$0xff] %v12566_v31  ;;  %17133 = vst [vmem:[#allocation82_spill] sm:$0xff] %v12569_v43  ;;  %vm2830_vm11 = vcmp.gt.s32.totalorder %v12327_v6, %v2799_v49  ;;  %vm2831_vm12 = vcmp.gt.s32.totalorder %v12338_v22, %v2799_v49  ;;  %vm7462_vm5 = vcmask 785408  }
 0x557   : > { %17129 = vst [vmem:[#allocation78_spill] sm:$0xff] %v12539_v37  ;;  %v12542_v63 = vadd.f32 %v3143_v35, %v12511_v12  ;;  %3354 = vmax.xlane.f32.xlu0 %v3353_v25  ;;  %3345 = vmax.xlane.f32.xlu1 %v3344_v8  ;;  %v3350_v35 = vmax.f32 %v12531_v62, %v12517_v30  ;;  %v2783_v8 = vadd.s32 104, %v11906_v34  ;;  %v12559_v25 = vsel %vm2827_vm7, -1e+30, %v17120_v53 }
 0x558   : > { %v3147_v9 = vpop.f32.mrf.mxu0  ;;  %17131 = vst [vmem:[#allocation80_spill] sm:$0xff] %v12559_v25  ;;  %17134 = vst [vmem:[#allocation83_spill] sm:$0xff] %v12572_v39  ;;  %v12600_v49 = vsel %vm2831_vm12, -1e+30, %v17120_v53 }
 0x559   : > { %17130 = vst [vmem:[#allocation79_spill] sm:$0xff] %v12542_v63  ;;  %v3359_v51 = vmax.f32 %v12539_v37, %v12542_v63  ;;  %17135 = vst [vmem:[#allocation84_spill] sm:$0xff] %v12575_v4  ;;  %v2800_v2 = vadd.s32 %v12334_v50, %v2783_v8  ;;  %v12587_v63 = vadd.f32 %v3147_v9, %v12566_v31  ;;  %v12602_v8 = vpop.xlane.xlu1 %3324 }
 0x55a   : > { %v3149_v46 = vpop.f32.mrf.mxu0  ;;  %17136 = vst [vmem:[#allocation85_spill] sm:$0xff] %v12577_v15  ;;  %17139 = vst [vmem:[#allocation88_spill] sm:$0xff] %v12600_v49 }
 0x55b   : > { %3360 = vmax.xlane.f32.xlu0 %v3359_v51  ;;  %3351 = vmax.xlane.f32.xlu1 %v3350_v35  ;;  %v12580_v51 = vadd.f32 %v3149_v46, %v12559_v25  ;;  %v3356_v35 = vmax.f32 %v12562_v58, %v12549_v11  ;;  %v2801_v46 = vadd.s32 %v12334_v50, %v2784_v55  ;;  %v12597_v25 = vsel %vm2830_vm11, -1e+30, %v17120_v53  ;;  %v12610_v55 = vpop.permute.xlu0 %4017 }
 0x55c   : > { %v3151_v12 = vpop.f32.mrf.mxu0  ;;  %17138 = vst [vmem:[#allocation87_spill] sm:$0xff] %v12597_v25  ;;  %17140 = vst [vmem:[#allocation89_spill] sm:$0xff] %v12602_v8  ;;  %vm2832_vm13 = vcmp.gt.s32.totalorder %v12327_v6, %v2800_v2  ;;  %vm2833_vm14 = vcmp.gt.s32.totalorder %v12338_v22, %v2800_v2 }
 0x55d   : > { %17137 = vst [vmem:[#allocation86_spill] sm:$0xff] %v12580_v51  ;;  %v12590_v37 = vadd.f32 %v3151_v12, %v12569_v43  ;;  %v3362_v12 = vmax.f32 %v12587_v63, %v12580_v51  ;;  %17141 = vst [vmem:[#allocation90_spill] sm:$0xff] %v12610_v55  ;;  %vm2834_vm15 = vcmp.gt.s32.totalorder %v12327_v6, %v2801_v46  ;;  %v12620_v43 = vsel %vm2832_vm13, -1e+30, %v17120_v53 }
 0x55e   : > { %v3153_v62 = vpop.f32.mrf.mxu0  ;;  %17144 = vst [vmem:[#allocation93_spill] sm:$0xff] %v12620_v43  ;;  %v12623_v8 = vsel %vm2833_vm14, -1e+30, %v17120_v53  ;;  %vm2835_vm0 = vcmp.gt.s32.totalorder %v12338_v22, %v2801_v46 }
 0x55f   : > { %v12593_v4 = vadd.f32 %v3153_v62, %v12572_v39  ;;  %3357 = vmax.xlane.f32.xlu1 %v3356_v35  ;;  %17145 = vst [vmem:[#allocation94_spill] sm:$0xff] %v12623_v8 }
 0x560   : > { %v3157_v15 = vpop.f32.mrf.mxu0 }
 0x561   : > { %v3365_v9 = vmax.f32 %v12590_v37, %v12593_v4  ;;  %v12613_v35 = vadd.f32 %v3157_v15, %v12597_v25 }
 0x562   : > { %v3159_v62 = vpop.f32.mrf.mxu0 }
 0x563   : > { %17142 = vst [vmem:[#allocation91_spill] sm:$0xff] %v12613_v35  ;;  %v12616_v31 = vadd.f32 %v3159_v62, %v12600_v49  ;;  %3366 = vmax.xlane.f32.xlu0 %v3365_v9  ;;  %3363 = vmax.xlane.f32.xlu1 %v3362_v12  ;;  %v12629_v62 = vsel %vm2834_vm15, -1e+30, %v17120_v53  ;;  %v12631_v9 = vpop.permute.xlu1 %4031  ;;  %v12633_v12 = vpop.xlane.xlu0 %3321 }
 0x564   : > { %v3161_v39 = vpop.f32.mrf.mxu0  ;;  %17146 = vst [vmem:[#allocation95_spill] sm:$0xff] %v12629_v62  ;;  %17147 = vst [vmem:[#allocation96_spill] sm:$0xff] %v12631_v9 }
 0x565   : > { %17143 = vst [vmem:[#allocation92_spill] sm:$0xff] %v12616_v31  ;;  %v3368_v2 = vmax.f32 %v12613_v35, %v12616_v31  ;;  %v12636_v25 = vadd.f32 %v3161_v39, %v12620_v43  ;;  %v12642_v31 = vsel %vm2835_vm0, -1e+30, %v17120_v53 }
 0x566   : > { %v3163_v15 = vpop.f32.mrf.mxu0  ;;  %17149 = vst [vmem:[#allocation98_spill] sm:$0xff] %v12642_v31 }
 0x567   : > { %v12639_v49 = vadd.f32 %v3163_v15, %v12623_v8  ;;  %3369 = vmax.xlane.f32.xlu1 %v3368_v2  ;;  %v12652_v39 = vpop.xlane.xlu1 %3330  ;;  %v12654_v15 = vpop.permute.xlu0 %4015 }
 0x568   : > { %v3167_v55 = vpop.f32.mrf.mxu0  ;;  %17150 = vst [vmem:[#allocation99_spill] sm:$0xff] %v12652_v39 }
 0x569   : > { %17148 = vst [vmem:[#allocation97_spill] sm:$0xff] %v12639_v49  ;;  %v12645_v46 = vadd.f32 %v3167_v55, %v12629_v62  ;;  %v3371_v35 = vmax.f32 %v12636_v25, %v12639_v49 }
 0x56a   : > { %v3169_v9 = vpop.f32.mrf.mxu0 }
 0x56b   : > { %v12650_v51 = vadd.f32 %v3169_v9, %v12642_v31  ;;  %3372 = vmax.xlane.f32.xlu0 %v3371_v35  ;;  %v12658_v43 = vpop.xlane.xlu0 %3327  ;;  %v12660_v55 = vpop.permute.xlu1 %4029  ;;  %v9927_v31 = vld [vmem:[#allocation2 + $0xac] ss:$12 sps:$4 sm:$0xff]  }
 0x56c   : > { %17151 = vst [vmem:[#allocation100_spill] sm:$0xff] %v12660_v55  ;;  %v9929_v55 = vld [vmem:[#allocation2 + $0x7c] ss:$12 sps:$4 sm:$0xff]  }
 0x56d   : > { %v3374_v2 = vmax.f32 %v12645_v46, %v12650_v51 }
 0x56f   : > { %3375 = vmax.xlane.f32.xlu1 %v3374_v2  ;;  %v12662_v62 = vpop.permute.xlu0 %4013  ;;  %v12664_v8 = vpop.permute.xlu1 %4011 }
 0x570   : > { %17152 = vst [vmem:[#allocation101_spill] sm:$0xff] %v12662_v62  ;;  %17153 = vst [vmem:[#allocation102_spill] sm:$0xff] %v12664_v8  ;;  %v2785_v8 = vadd.s32 120, %v11906_v34 }
 0x573   : > { %v12666_v49 = vpop.permute.xlu0 %4009  ;;  %v12668_v9 = vpop.permute.xlu1 %4027 }
 0x574   : > { %17154 = vst [vmem:[#allocation103_spill] sm:$0xff] %v12666_v49  ;;  %17155 = vst [vmem:[#allocation104_spill] sm:$0xff] %v12668_v9  ;;  %v9928_v9 = vld [vmem:[#allocation2 + $0x154] ss:$12 sps:$4 sm:$0xff]  }
 0x577   : > { %v12674_v35 = vpop.permute.xlu0 %4007  ;;  %v12676_v2 = vpop.permute.xlu1 %4025 }
 0x578   : > { %17156 = vst [vmem:[#allocation105_spill] sm:$0xff] %v12674_v35  ;;  %17157 = vst [vmem:[#allocation106_spill] sm:$0xff] %v12676_v2  ;;  %v2802_v35 = vadd.s32 %v12334_v50, %v2785_v8 }
 0x57a   : > { %vm2836_vm2 = vcmp.gt.s32.totalorder %v12327_v6, %v2802_v35  ;;  %vm2837_vm3 = vcmp.gt.s32.totalorder %v12338_v22, %v2802_v35 }
 0x57b   : > { %v12681_v39 = vpop.permute.xlu0 %4005  ;;  %v12683_v49 = vpop.permute.xlu1 %4023  ;;  %v12705_v50 = vsel %vm2837_vm3, -1e+30, %v17120_v53 }
 0x57c   : > { %17161 = vst [vmem:[#allocation110_spill] sm:$0xff] %v12705_v50 }
 0x57f   : > { %v12687_v62 = vpop.permute.xlu0 %3989  ;;  %v12690_v2 = vpop.permute.xlu1 %4021 }
 0x580   : > { %5141 = vrot.lane.b32.xlu1 %v12125_v17, %s10084_s11  ;;  %17158 = vst [vmem:[#allocation107_spill] sm:$0xff] %v12687_v62  ;;  %v12702_v62 = vsel %vm2836_vm2, -1e+30, %v17120_v53 }
 0x581   : > { %5109 = vrot.lane.b32.xlu0 %v11955_v23, %s10084_s11  ;;  %17160 = vst [vmem:[#allocation109_spill] sm:$0xff] %v12702_v62 }
 0x583   : > { %v12697_v34 = vpop.permute.xlu0 %5155 }
 0x584   : > { %6259 = vrot.lane.b32.xlu1 %v9927_v31, %s10086_s21  ;;  %v3171_v31 = vpop.f32.mrf.mxu0  ;;  %17159 = vst [vmem:[#allocation108_spill] sm:$0xff] %v12697_v34 }
 0x585   : > { %v12709_v6 = vadd.f32 %v3171_v31, %v12702_v62 }
 0x586   : > { %v3173_v8 = vpop.f32.mrf.mxu0 }
 0x587   : > { %v12712_v22 = vadd.f32 %v3173_v8, %v12705_v50  ;;  %v12714_v35 = vpop.permute.xlu0 %5137 }
 0x588   : > { %5111 = vrot.lane.b32.xlu1 %v12149_v28, %s10084_s11 }
 0x589   : > { %v3377_v53 = vmax.f32 %v12709_v6, %v12712_v22 }
 0x58c   : > { %6273 = vrot.lane.b32.xlu1 %v9928_v9, %s10086_s21  ;;  %v12699_v9 = vpop.permute.xlu1 %5139 }
 0x590   : > { %6255 = vrot.lane.b32.xlu1 %v9929_v55, %s10086_s21  ;;  %v9930_v55 = vld [vmem:[#allocation2 + $0x124] ss:$12 sps:$4 sm:$0xff]   ;;  %v12716_v34 = vpop.permute.xlu1 %3991 }
 0x594   : > { %5115 = vrot.lane.b32.xlu1 %v12078_v26, %s10084_s11  ;;  %v12726_v31 = vpop.permute.xlu1 %5153 }
 0x598   : > { %6269 = vrot.lane.b32.xlu1 %v9930_v55, %s10086_s21  ;;  %v12724_v55 = vpop.permute.xlu0 %3993  ;;  %v12732_v62 = vpop.permute.xlu1 %5135 }
 0x599   : > { %17162 = vst [vmem:[#allocation111_spill] sm:$0xff] %v12724_v55  ;;  %17164 = vst [vmem:[#allocation113_spill] sm:$0xff] %v12732_v62  ;;  %v9931_v62 = vld [vmem:[#allocation2 + $0x16c] ss:$12 sps:$4 sm:$0xff]  }
 0x59c   : > { %6251 = vrot.lane.b32.xlu1 %v12049_v47, %s10086_s21  ;;  %v12730_v8 = vpop.permute.xlu0 %5151 }
 0x59d   : > { %17163 = vst [vmem:[#allocation112_spill] sm:$0xff] %v12730_v8 }
 0x5a0   : > { %3378 = vmax.xlane.f32.xlu0 %v3377_v53  ;;  %5119 = vrot.lane.b32.xlu1 %v12084_v5, %s10084_s11  ;;  %v12738_v47 = vpop.permute.xlu0 %5133  ;;  %v12740_v53 = vpop.permute.xlu1 %3995 }
 0x5a1   : > { %17165 = vst [vmem:[#allocation114_spill] sm:$0xff] %v12738_v47  ;;  %17166 = vst [vmem:[#allocation115_spill] sm:$0xff] %v12740_v53  ;;  %v9932_v47 = vld [vmem:[#allocation2 + $0x94] ss:$12 sps:$4 sm:$0xff]  }
 0x5a4   : > { %6265 = vrot.lane.b32.xlu1 %v12097_v7, %s10086_s21  ;;  %v12744_v50 = vpop.permute.xlu0 %3997  ;;  %v12746_v7 = vpop.permute.xlu1 %5149 }
 0x5a5   : > { %17167 = vst [vmem:[#allocation116_spill] sm:$0xff] %v12744_v50  ;;  %17168 = vst [vmem:[#allocation117_spill] sm:$0xff] %v12746_v7 }
 0x5a8   : > { %6247 = vrot.lane.b32.xlu1 %v12115_v38, %s10086_s21  ;;  %v12753_v38 = vpop.permute.xlu0 %5147  ;;  %v12756_v53 = vpop.permute.xlu1 %5131 }
 0x5a9   : > { %17169 = vst [vmem:[#allocation118_spill] sm:$0xff] %v12753_v38  ;;  %17170 = vst [vmem:[#allocation119_spill] sm:$0xff] %v12756_v53  ;;  %v9934_v53 = vld [vmem:[#allocation2 + $0x64] ss:$12 sps:$4 sm:$0xff]  }
 0x5ac   : > { %5123 = vrot.lane.b32.xlu1 %v12090_v60, %s10084_s11 }
 0x5b0   : > { %6261 = vrot.lane.b32.xlu1 %v12125_v17, %s10086_s21  ;;  %v12762_v17 = vpop.permute.xlu0 %5129 }
 0x5b1   : > { %17171 = vst [vmem:[#allocation120_spill] sm:$0xff] %v12762_v17 }
 0x5b4   : > { %6231 = vrot.lane.b32.xlu1 %v12149_v28, %s10086_s21  ;;  %v12764_v28 = vpop.permute.xlu1 %3999 }
 0x5b5   : > { %17172 = vst [vmem:[#allocation121_spill] sm:$0xff] %v12764_v28  ;;  %v9935_v28 = vld [vmem:[#allocation2 + $0x10c] ss:$12 sps:$4 sm:$0xff]  }
 0x5b6   : > { %6275 = vrot.lane.b32.xlu0 %v9931_v62, %s10086_s21  ;;  %v9933_v62 = vld [vmem:[#allocation2 + $0x13c] ss:$12 sps:$4 sm:$0xff]  }
 0x5b8   : > { %6233 = vrot.lane.b32.xlu1 %v12157_v42, %s10086_s21  ;;  %v12774_v38 = vpop.permute.xlu1 %5145 }
 0x5b9   : > { %17174 = vst [vmem:[#allocation123_spill] sm:$0xff] %v12774_v38 }
 0x5ba   : > { %6257 = vrot.lane.b32.xlu0 %v9932_v47, %s10086_s21  ;;  %v12771_v47 = vpop.permute.xlu0 %4001 }
 0x5bb   : > { %17173 = vst [vmem:[#allocation122_spill] sm:$0xff] %v12771_v47 }
 0x5bc   : > { %6237 = vrot.lane.b32.xlu1 %v12082_v19, %s10086_s21  ;;  %v12780_v17 = vpop.permute.xlu1 %5127 }
 0x5bd   : > { %17176 = vst [vmem:[#allocation125_spill] sm:$0xff] %v12780_v17 }
 0x5be   : > { %5113 = vrot.lane.b32.xlu0 %v12157_v42, %s10084_s11  ;;  %v12778_v42 = vpop.permute.xlu0 %5143 }
 0x5bf   : > { %17175 = vst [vmem:[#allocation124_spill] sm:$0xff] %v12778_v42 }
 0x5c0   : > { %6241 = vrot.lane.b32.xlu1 %v12088_v16, %s10086_s21  ;;  %v12786_v47 = vpop.permute.xlu1 %4003 }
 0x5c1   : > { %17178 = vst [vmem:[#allocation127_spill] sm:$0xff] %v12786_v47  ;;  %v17179_v47 = vld [vmem:[#allocation22_spill] sm:$0xff] }
 0x5c2   : > { %6271 = vrot.lane.b32.xlu0 %v9933_v62, %s10086_s21  ;;  %v12783_v62 = vpop.permute.xlu0 %5125 }
 0x5c3   : > { %17177 = vst [vmem:[#allocation126_spill] sm:$0xff] %v12783_v62 }
 0x5c4   : > { %6243 = vrot.lane.b32.xlu1 %v12090_v60, %s10086_s21  ;;  %v9936_v60 = vld [vmem:[#allocation2 + $0x34] ss:$12 sps:$4 sm:$0xff]  }
 0x5c6   : > { %6253 = vrot.lane.b32.xlu0 %v9934_v53, %s10086_s21 }
 0x5ca   : > { %5117 = vrot.lane.b32.xlu0 %v12082_v19, %s10084_s11  ;;  %v8280_v19 = vld [vmem:[%s16678_s4 + $0x1] sm:$0x1] }
 0x5ce   : > { %6267 = vrot.lane.b32.xlu0 %v9935_v28, %s10086_s21  ;;  %v4224_v28 = vunpack.c.l.bf16 %v8280_v19 }
 0x5d2   : > { %6249 = vrot.lane.b32.xlu0 %v9936_v60, %s10086_s21  ;;  %v4231_v60 = vrot.slane %v4224_v28, %v11914_v48 }
 0x5d4   : > { %v3337_v53 = vpop.xlane.xlu0 %3336 }
 0x5d5   : > { %v3381_v50 = vmax.f32 %v3337_v53, %v12274_v33 }
 0x5d6   : > { %5121 = vrot.lane.b32.xlu0 %v12088_v16, %s10084_s11  ;;  %v4367_v16 = vrot.slane %v4224_v28, %v17179_v47 }
 0x5d8   : > { %v3334_v42 = vpop.xlane.xlu1 %3333  ;;  %v3343_v17 = vpop.xlane.xlu0 %3342 }
 0x5d9   : > { %v3380_v38 = vmax.f32 %v3334_v42, %v12268_v40  ;;  %v12807_v42 = vmax.f32 %v3381_v50, %v12225_v29 }
 0x5da   : > { %6263 = vrot.lane.b32.xlu0 %v12101_v24, %s10086_s21  ;;  %v9224_v24 = vpack.i.bf16 %v4367_v16, %v4231_v60 }
 0x5db   : > { %v12802_v7 = vmax.f32 %v3380_v38, %v12324_v61  ;;  %v3415_v53 = vsub.f32 %v12374_v18, %v12807_v42 }
 0x5dc   : > { %v3340_v62 = vpop.xlane.xlu1 %3339  ;;  %v3349_v8 = vpop.xlane.xlu0 %3348 }
 0x5dd   : > { %v3382_v19 = vmax.f32 %v3340_v62, %v12203_v44  ;;  %v3413_v28 = vsub.f32 %v12402_v21, %v12802_v7  ;;  %v3412_v38 = vsub.f32 %v12422_v45, %v12802_v7  ;;  %v3385_v45 = vmax.f32 %v3349_v8, %v12207_v3 }
 0x5de   : > { %6245 = vrot.lane.b32.xlu0 %v12135_v32, %s10086_s21  ;;  %v3383_v32 = vmax.f32 %v3343_v17, %v12205_v41  ;;  %v3414_v17 = vsub.f32 %v12386_v0, %v12807_v42  ;;  %v3450_v18 = vmul.f32 1.442695, %v3415_v53  ;;  %v17213_v41 = vld [vmem:[#allocation92_spill] sm:$0xff] }
 0x5df   : > { %v12825_v62 = vmax.f32 %v3382_v19, %v12344_v36  ;;  %v3446_v16 = vmul.f32 1.442695, %v3413_v28  ;;  %v17182_v28 = vld [vmem:[#allocation40_spill] sm:$0xff] }
 0x5e0   : > { %v3346_v55 = vpop.xlane.xlu1 %3345  ;;  %v3355_v50 = vpop.xlane.xlu0 %3354 }
 0x5e1   : > { %v3384_v60 = vmax.f32 %v3346_v55, %v12284_v56  ;;  %v3448_v56 = vmul.f32 1.442695, %v3414_v17  ;;  %v3417_v0 = vsub.f32 %v12441_v1, %v12825_v62  ;;  %v3387_v19 = vmax.f32 %v3355_v50, %v12213_v54 }
 0x5e2   : > { %6229 = vrot.lane.b32.xlu0 %v11955_v23, %s10086_s21  ;;  %v12819_v23 = vmax.f32 %v3383_v32, %v12229_v20  ;;  %9287 = vpow2.f32 %v3446_v16  ;;  %v17185_v16 = vld [vmem:[#allocation41_spill] sm:$0xff] }
 0x5e3   : > { %v12833_v55 = vmax.f32 %v3384_v60, %v12368_v59  ;;  %v17184_v60 = vld [vmem:[#allocation45_spill] sm:$0xff]  ;;  %v3454_v17 = vmul.f32 1.442695, %v3417_v0  ;;  %v17192_v0 = vld [vmem:[#allocation42_spill] sm:$0xff] }
 0x5e4   : > { %17180 = vst [vmem:[#allocation128_spill] sm:$0xff] %v12819_v23  ;;  %v3352_v21 = vpop.xlane.xlu1 %3351  ;;  %v3418_v32 = vsub.f32 %v12425_v10, %v12819_v23  ;;  %v3419_v8 = vsub.f32 %v12405_v57, %v12819_v23  ;;  %v3416_v10 = vsub.f32 %v12460_v13, %v12825_v62  ;;  %v17188_v13 = vld [vmem:[#allocation63_spill] sm:$0xff] }
 0x5e5   : > { %17181 = vst [vmem:[#allocation129_spill] sm:$0xff] %v12833_v55  ;;  %v3421_v50 = vsub.f32 %v12477_v14, %v12833_v55  ;;  %v3386_v57 = vmax.f32 %v3352_v21, %v17184_v60  ;;  %v17190_v14 = vld [vmem:[#allocation60_spill] sm:$0xff] }
 0x5e6   : > { %9225 = vrot.lane.b32.xlu0 %v9224_v24, %s10086_s21  ;;  %v3444_v24 = vmul.f32 1.442695, %v3412_v38  ;;  %v12841_v38 = vmax.f32 %v3385_v45, %v17182_v28  ;;  %v3456_v1 = vmul.f32 1.442695, %v3418_v32  ;;  %v12851_v45 = vmax.f32 %v3387_v19, %v17185_v16 }
 0x5e7   : > { %v3458_v28 = vmul.f32 1.442695, %v3419_v8  ;;  %v3452_v59 = vmul.f32 1.442695, %v3416_v10  ;;  %v3462_v32 = vmul.f32 1.442695, %v3421_v50  ;;  %v12859_v20 = vmax.f32 %v3386_v57, %v17190_v14 }
 0x5e8   : > { %17183 = vst [vmem:[#allocation130_spill] sm:$0xff] %v12841_v38  ;;  %9289 = vpow2.f32 %v3444_v24  ;;  %v3358_v53 = vpop.xlane.xlu1 %3357  ;;  %17186 = vst [vmem:[#allocation131_spill] sm:$0xff] %v12851_v45  ;;  %v17187_v24 = vld [vmem:[#allocation35_spill] sm:$0xff]  ;;  %v3423_v3 = vsub.f32 %v17188_v13, %v12841_v38  ;;  %v3426_v21 = vsub.f32 %v12500_v52, %v12851_v45  ;;  %v17194_v8 = vld [vmem:[#allocation46_spill] sm:$0xff] }
 0x5e9   : > { %9291 = vpow2.f32 %v3450_v18  ;;  %17191 = vst [vmem:[#allocation63_spill] sm:$0xff] %v12859_v20  ;;  %v17195_v50 = vld [vmem:[#allocation36_spill] sm:$0xff] }
 0x5ea   : > { %6235 = vrot.lane.b32.xlu0 %v12078_v26, %s10086_s21  ;;  %v3361_v26 = vpop.xlane.xlu0 %3360  ;;  %9293 = vpow2.f32 %v3448_v56  ;;  %v3466_v10 = vmul.f32 1.442695, %v3423_v3  ;;  %v3472_v52 = vmul.f32 1.442695, %v3426_v21  ;;  %v17198_v3 = vld [vmem:[#allocation79_spill] sm:$0xff] }
 0x5eb   : > { %v3389_v54 = vmax.f32 %v3361_v26, %v17187_v24  ;;  %9295 = vpow2.f32 %v3456_v1  ;;  %v3388_v26 = vmax.f32 %v3358_v53, %v17194_v8  ;;  %v3420_v1 = vsub.f32 %v12497_v27, %v12833_v55  ;;  %v17197_v53 = vld [vmem:[#allocation78_spill] sm:$0xff]  ;;  %v17201_v27 = vld [vmem:[#allocation47_spill] sm:$0xff]  ;;  %v17212_v55 = vld [vmem:[#allocation49_spill] sm:$0xff] }
 0x5ec   : > { %9297 = vpow2.f32 %v3454_v17  ;;  %v3364_v13 = vpop.xlane.xlu1 %3363  ;;  %v17196_v17 = vld [vmem:[#allocation69_spill] sm:$0xff] }
 0x5ed   : > { %v12864_v19 = vmax.f32 %v3389_v54, %v17192_v0  ;;  %9299 = vpow2.f32 %v3458_v28  ;;  %v3427_v24 = vsub.f32 %v17196_v17, %v12851_v45  ;;  %v3425_v54 = vsub.f32 %v12517_v30, %v12859_v20  ;;  %v17199_v28 = vld [vmem:[#allocation68_spill] sm:$0xff] }
 0x5ee   : > { %6239 = vrot.lane.b32.xlu0 %v12084_v5, %s10086_s21  ;;  %v17189_v5 = vld [vmem:[#allocation66_spill] sm:$0xff]  ;;  %v3367_v56 = vpop.xlane.xlu0 %3366  ;;  %9301 = vpow2.f32 %v3452_v59  ;;  %v12879_v8 = vmax.f32 %v3388_v26, %v17199_v28  ;;  %v3460_v17 = vmul.f32 1.442695, %v3420_v1  ;;  %v17204_v28 = vld [vmem:[#allocation75_spill] sm:$0xff] }
 0x5ef   : > { %v3422_v18 = vsub.f32 %v17189_v5, %v12841_v38  ;;  %17193 = vst [vmem:[#allocation66_spill] sm:$0xff] %v12864_v19  ;;  %v3391_v57 = vmax.f32 %v3367_v56, %v17195_v50  ;;  %9303 = vpow2.f32 %v3462_v32  ;;  %v3430_v0 = vsub.f32 %v17197_v53, %v12864_v19  ;;  %v12882_v56 = vpop.eup %9287  ;;  %v17202_v32 = vld [vmem:[#allocation43_spill] sm:$0xff]  ;;  %v17203_v53 = vld [vmem:[#allocation76_spill] sm:$0xff] }
 0x5f0   : > { %v3431_v59 = vsub.f32 %v17198_v3, %v12864_v19  ;;  %17200 = vst [vmem:[#allocation36_spill] sm:$0xff] %v12879_v8  ;;  %9305 = vpow2.f32 %v3466_v10  ;;  %v3370_v45 = vpop.xlane.xlu1 %3369  ;;  %v3474_v21 = vmul.f32 1.442695, %v3427_v24  ;;  %v3424_v14 = vsub.f32 %v17203_v53, %v12859_v20  ;;  %v17205_v24 = vld [vmem:[#allocation48_spill] sm:$0xff] }
 0x5f1   : > { %v3464_v5 = vmul.f32 1.442695, %v3422_v18  ;;  %v3390_v18 = vmax.f32 %v3364_v13, %v17201_v27  ;;  %v3407_v16 = vmax.f32 %v3391_v57, %v17202_v32  ;;  %v3470_v3 = vmul.f32 1.442695, %v3425_v54 }
 0x5f2   : > { %v3480_v26 = vmul.f32 1.442695, %v3430_v0  ;;  %v3482_v10 = vmul.f32 1.442695, %v3431_v59  ;;  %v3428_v13 = vsub.f32 %v12562_v58, %v12879_v8  ;;  %v3429_v57 = vsub.f32 %v12549_v11, %v12879_v8 }
 0x5f3   : > { %9307 = vpow2.f32 %v3464_v5  ;;  %v3406_v5 = vmax.f32 %v3390_v18, %v17204_v28  ;;  %v3392_v60 = vmax.f32 %v3370_v45, %v17205_v24  ;;  %v3435_v0 = vsub.f32 %v12593_v4, %v3407_v16  ;;  %v17206_v18 = vld [vmem:[#allocation85_spill] sm:$0xff] }
 0x5f4   : > { %9309 = vpow2.f32 %v3472_v52  ;;  %v3434_v52 = vsub.f32 %v12590_v37, %v3407_v16  ;;  %v3468_v59 = vmul.f32 1.442695, %v3424_v14  ;;  %v3519_v53 = vsub.f32 %v17195_v50, %v3407_v16  ;;  %v3373_v37 = vpop.xlane.xlu0 %3372 }
 0x5f5   : > { %v12885_v30 = vpop.eup %9289  ;;  %9311 = vpow2.f32 %v3460_v17  ;;  %v4083_v45 = vsel %vm2990_vm1, %v17206_v18, 0  ;;  %v3476_v8 = vmul.f32 1.442695, %v3428_v13  ;;  %v3567_v17 = vsub.f32 %v17202_v32, %v3407_v16  ;;  %v17208_v13 = vld [vmem:[#allocation86_spill] sm:$0xff] }
 0x5f6   : > { %v12889_v19 = vpop.eup %9291  ;;  %9313 = vpow2.f32 %v3470_v3  ;;  %v3478_v20 = vmul.f32 1.442695, %v3429_v57  ;;  %v3432_v14 = vsub.f32 %v12587_v63, %v3406_v5  ;;  %v3408_v50 = vmax.f32 %v3392_v60, %v12633_v12  ;;  %v17209_v57 = vld [vmem:[#allocation37_spill] sm:$0xff] }
 0x5f7   : > { %v12893_v1 = vpop.eup %9293  ;;  %v3701_v54 = vpack.c.bf16 %v12889_v19, %v12882_v56  ;;  %9315 = vpow2.f32 %v3474_v21  ;;  %v3490_v18 = vmul.f32 1.442695, %v3435_v0  ;;  %v17207_v21 = vld [vmem:[#allocation84_spill] sm:$0xff]  ;;  %v3546_v32 = vmul.f32 1.442695, %v3519_v53 }
 0x5f8   : > { %v3700_v58 = vpack.c.bf16 %v12893_v1, %v12885_v30  ;;  %v12906_v11 = vpop.eup %9295  ;;  %9317 = vpow2.f32 %v3480_v26  ;;  %v3433_v26 = vsub.f32 %v17208_v13, %v3406_v5  ;;  %v3376_v63 = vpop.xlane.xlu1 %3375  ;;  %v3594_v60 = vmul.f32 1.442695, %v3567_v17 }
 0x5f9   : > { %3864 = vmatprep.mubr.bf16.mxu1 %v3701_v54  ;;  %v12911_v4 = vpop.eup %9297  ;;  %9319 = vpow2.f32 %v3482_v10  ;;  %v3488_v54 = vmul.f32 1.442695, %v3434_v52  ;;  %v3518_v10 = vsub.f32 %v17201_v27, %v3406_v5  ;;  %v3484_v0 = vmul.f32 1.442695, %v3432_v14  ;;  %v17214_v14 = vld [vmem:[#allocation90_spill] sm:$0xff] }
 0x5fa   : > { %3865 = vmatmul.mubr.bf16.vlgmr.msra.gmra.mxu1 %v3700_v58  ;;  %v12915_v3 = vpop.eup %9299  ;;  %9321 = vpow2.f32 %v3468_v59  ;;  %v3393_v58 = vmax.f32 %v3373_v37, %v17209_v57  ;;  %v17210_v59 = vld [vmem:[#allocation91_spill] sm:$0xff]  ;;  %v17211_v37 = vld [vmem:[#allocation89_spill] sm:$0xff]  ;;  %v3486_v17 = vmul.f32 1.442695, %v3433_v26  ;;  %v3568_v26 = vsub.f32 %v12633_v12, %v3408_v50 }
 0x5fb   : > { %8617 = vmatpush3.bf16.xpose.msra.mxu1 %v4083_v45  ;;  %v12919_v16 = vpop.eup %9301  ;;  %9323 = vpow2.f32 %v3476_v8  ;;  %v3703_v52 = vpack.c.bf16 %v12915_v3, %v12911_v4  ;;  %v3566_v45 = vsub.f32 %v17204_v28, %v3406_v5  ;;  %v3436_v53 = vsub.f32 %v17210_v59, %v3408_v50 }
 0x5fc   : > { %9025 = vmatprep.subr.msk.bf16.mxu1 %vm2990_vm1, %v17207_v21  ;;  %v12923_v38 = vpop.eup %9303  ;;  %9325 = vpow2.f32 %v3478_v20  ;;  %v3409_v13 = vmax.f32 %v3393_v58, %v17211_v37  ;;  %v3394_v8 = vmax.f32 %v3376_v63, %v17212_v55  ;;  %v3702_v27 = vpack.c.bf16 %v12906_v11, %v12919_v16 }
 0x5fd   : > { %v12930_v21 = vpop.eup %9305  ;;  %9327 = vpow2.f32 %v3488_v54  ;;  %3872 = vmatprep.mubr.bf16.mxu1 %v3703_v52  ;;  %v3437_v20 = vsub.f32 %v17213_v41, %v3408_v50  ;;  %v4080_v54 = vsel %vm2990_vm1, %v17214_v14, 0  ;;  %v3544_v58 = vmul.f32 1.442695, %v3518_v10  ;;  %v17215_v14 = vld [vmem:[#allocation96_spill] sm:$0xff]  ;;  %v17216_v10 = vld [vmem:[#allocation97_spill] sm:$0xff] }
 0x5fe   : > { %9329 = vpow2.f32 %v3490_v18  ;;  %v3705_v28 = vpack.c.bf16 %v12930_v21, %v12923_v38  ;;  %v3520_v52 = vsub.f32 %v17205_v24, %v3408_v50  ;;  %v3592_v18 = vmul.f32 1.442695, %v3566_v45 }
 0x5ff   : > { %9331 = vpow2.f32 %v3546_v32  ;;  %v3492_v41 = vmul.f32 1.442695, %v3436_v53  ;;  %v3438_v59 = vsub.f32 %v12636_v25, %v3409_v13  ;;  %v3410_v23 = vmax.f32 %v3394_v8, %v12658_v43 }
 0x600   : > { %v12939_v5 = vpop.eup %9307  ;;  %9333 = vpow2.f32 %v3594_v60  ;;  %v3494_v24 = vmul.f32 1.442695, %v3437_v20  ;;  %v3439_v60 = vsub.f32 %v17216_v10, %v3409_v13  ;;  %v3604_v12 = vadd.f32 %v12885_v30, %v12882_v56  ;;  %v3194_v56 = vld [vmem:[%s16679_s5] sm:$0x1] }
 0x601   : > { %v12944_v63 = vpop.eup %9309  ;;  %9335 = vpow2.f32 %v3484_v0  ;;  %v3548_v0 = vmul.f32 1.442695, %v3520_v52  ;;  %v3521_v25 = vsub.f32 %v17209_v57, %v3409_v13  ;;  %v4077_v53 = vsel %vm2990_vm1, %v12654_v15, 0 }
 0x602   : > { %3873 = vmatmul.mubr.bf16.gmra.mxu1 %v3702_v27  ;;  %v12951_v32 = vpop.eup %9311  ;;  %9337 = vpow2.f32 %v3486_v17  ;;  %v3596_v8 = vmul.f32 1.442695, %v3568_v26  ;;  %v3569_v27 = vsub.f32 %v17211_v37, %v3409_v13  ;;  %v3496_v17 = vmul.f32 1.442695, %v3438_v59 }
 0x603   : > { %8619 = vmatpush3.bf16.xpose.msra.mxu1 %v4080_v54  ;;  %3880 = vmatprep.mubr.bf16.mxu1 %v3705_v28  ;;  %v12956_v50 = vpop.eup %9313  ;;  %9339 = vpow2.f32 %v3544_v58  ;;  %v3440_v57 = vsub.f32 %v12645_v46, %v3410_v23  ;;  %v3704_v20 = vpack.c.bf16 %v12939_v5, %v12951_v32  ;;  %v3498_v15 = vmul.f32 1.442695, %v3439_v60 }
 0x604   : > { %9026 = vmatprep.subr.msk.bf16.mxu1 %vm2990_vm1, %v17215_v14  ;;  %v12959_v45 = vpop.eup %9315  ;;  %9341 = vpow2.f32 %v3592_v18  ;;  %v3441_v54 = vsub.f32 %v12650_v51, %v3410_v23  ;;  %v3550_v58 = vmul.f32 1.442695, %v3521_v25  ;;  %v3522_v52 = vsub.f32 %v17212_v55, %v3410_v23  ;;  %v17217_v14 = vld [vmem:[#allocation100_spill] sm:$0xff] }
 0x605   : > { %v12967_v30 = vpop.eup %9317  ;;  %9343 = vpow2.f32 %v3492_v41  ;;  %v3707_v37 = vpack.c.bf16 %v12959_v45, %v12956_v50  ;;  %v3195_v18 = vunpack.c.l.bf16 %v3194_v56  ;;  %v3598_v46 = vmul.f32 1.442695, %v3569_v27 }
 0x606   : > { %v9320_v28 = vpop.eup %9319  ;;  %9345 = vpow2.f32 %v3494_v24  ;;  %v3570_v41 = vsub.f32 %v12658_v43, %v3410_v23  ;;  %v3500_v51 = vmul.f32 1.442695, %v3440_v57  ;;  %v3502_v55 = vmul.f32 1.442695, %v3441_v54 }
 0x607   : > { %v9322_v13 = vpop.eup %9321  ;;  %9347 = vpow2.f32 %v3548_v0  ;;  %v3552_v60 = vmul.f32 1.442695, %v3522_v52  ;;  %v12990_v25 = vrot.slane %v3195_v18, %v17179_v47  ;;  %v13000_v56 = vadd.f32 %v12919_v16, %v12911_v4 }
 0x608   : > { %v12976_v26 = vpop.eup %9323  ;;  %9349 = vpow2.f32 %v3596_v8  ;;  %v3600_v43 = vmul.f32 1.442695, %v3570_v41  ;;  %v3706_v23 = vpack.c.bf16 %v12944_v63, %v9322_v13  ;;  %v13018_v4 = vadd.f32 %v12915_v3, %v12906_v11 }
 0x609   : > { %v9326_v59 = vpop.eup %9325  ;;  %9351 = vpow2.f32 %v3496_v17  ;;  %17220 = vst [vmem:[#allocation79_spill] sm:$0xff] %v13000_v56  ;;  %v13021_v16 = vadd.f32 %v9322_v13, %v12956_v50  ;;  %v13042_v3 = vadd.f32 %v12959_v45, %v12944_v63  ;;  %v3708_v45 = vpack.c.bf16 %v12967_v30, %v12976_v26 }
 0x60a   : > { %3881 = vmatmul.mubr.bf16.gmra.mxu1 %v3704_v20  ;;  %v12981_v24 = vpop.eup %9327  ;;  %9353 = vpow2.f32 %v3498_v15  ;;  %v3709_v8 = vpack.c.bf16 %v9320_v28, %v9326_v59  ;;  %v13008_v20 = vadd.f32 %v12893_v1, %v12889_v19  ;;  %v13012_v15 = vadd.f32 %v12951_v32, %v12923_v38  ;;  %17224 = vst [vmem:[#allocation76_spill] sm:$0xff] %v13018_v4  ;;  %v17230_v32 = vld [vmem:[#allocation104_spill] sm:$0xff] }
 0x60b   : > { %8621 = vmatpush3.bf16.xpose.msra.mxu1 %v4077_v53  ;;  %3888 = vmatprep.mubr.bf16.mxu1 %v3707_v37  ;;  %v9330_v10 = vpop.eup %9329  ;;  %9355 = vpow2.f32 %v3550_v58  ;;  %v17223_v37 = vld [vmem:[#allocation101_spill] sm:$0xff]  ;;  %17225 = vst [vmem:[#allocation75_spill] sm:$0xff] %v13021_v16  ;;  %v13027_v38 = vadd.f32 %v12939_v5, %v12930_v21  ;;  %v13030_v19 = vadd.f32 %v9326_v59, %v12976_v26  ;;  %17231 = vst [vmem:[#allocation37_spill] sm:$0xff] %v13042_v3  ;;  %v17280_v16 = vld [vmem:[#allocation126_spill] sm:$0xff] }
 0x60c   : > { %9027 = vmatprep.subr.msk.bf16.mxu1 %vm2990_vm1, %v17217_v14  ;;  %v12986_v0 = vpop.eup %9331  ;;  %9357 = vpow2.f32 %v3598_v46  ;;  %17221 = vst [vmem:[#allocation47_spill] sm:$0xff] %v13008_v20  ;;  %17222 = vst [vmem:[#allocation43_spill] sm:$0xff] %v13012_v15  ;;  %v4074_v58 = vsel %vm2990_vm1, %v17223_v37, 0  ;;  %v13047_v21 = vadd.f32 %v9320_v28, %v12967_v30  ;;  %v17242_v37 = vld [vmem:[#allocation106_spill] sm:$0xff]  ;;  %v5182_v4 = vsel %vm2990_vm1, %v17280_v16, 0 }
 0x60d   : > { %3605 = vadd.xlane.f32.xlu0 %v3604_v12  ;;  %v12984_v12 = vrot.slane %v3195_v18, %v11914_v48  ;;  %17218 = vst [vmem:[#allocation69_spill] sm:$0xff] %v12986_v0  ;;  %v12992_v53 = vpop.eup %9333  ;;  %9359 = vpow2.f32 %v3500_v51  ;;  %17227 = vst [vmem:[#allocation85_spill] sm:$0xff] %v13027_v38  ;;  %v13054_v18 = vadd.f32 %v9330_v10, %v12981_v24 }
 0x60e   : > { %17219 = vst [vmem:[#allocation78_spill] sm:$0xff] %v12992_v53  ;;  %v9336_v17 = vpop.eup %9335  ;;  %9361 = vpow2.f32 %v3502_v55  ;;  %v13004_v57 = vmul.f32 %v12992_v53, %v12990_v25  ;;  %17228 = vst [vmem:[#allocation84_spill] sm:$0xff] %v13030_v19 }
 0x60f   : > { %v12996_v27 = vmul.f32 %v12986_v0, %v12984_v12  ;;  %v9338_v54 = vpop.eup %9337  ;;  %9363 = vpow2.f32 %v3552_v60  ;;  %17233 = vst [vmem:[#allocation89_spill] sm:$0xff] %v13047_v21  ;;  %17234 = vst [vmem:[#allocation49_spill] sm:$0xff] %v13054_v18  ;;  %v17246_v0 = vld [vmem:[#allocation103_spill] sm:$0xff]  ;;  %v17266_v18 = vld [vmem:[#allocation118_spill] sm:$0xff] }
 0x610   : > { %v13023_v52 = vpop.eup %9339  ;;  %9365 = vpow2.f32 %v3600_v43  ;;  %v13044_v50 = vadd.f32 %v9338_v54, %v9336_v17  ;;  %v3711_v14 = vpack.c.bf16 %v9330_v10, %v9338_v54  ;;  %v17238_v43 = vld [vmem:[#allocation102_spill] sm:$0xff] }
 0x611   : > { %17226 = vst [vmem:[#allocation48_spill] sm:$0xff] %v13023_v52  ;;  %v13032_v1 = vpop.eup %9341  ;;  %v13038_v11 = vmul.f32 %v13023_v52, %v12984_v12 }
 0x612   : > { %3889 = vmatmul.mubr.bf16.gmra.mxu1 %v3706_v23  ;;  %17229 = vst [vmem:[#allocation86_spill] sm:$0xff] %v13032_v1  ;;  %17232 = vst [vmem:[#allocation91_spill] sm:$0xff] %v13044_v50  ;;  %v9344_v5 = vpop.eup %9343  ;;  %v13051_v13 = vmul.f32 %v13032_v1, %v12990_v25  ;;  %v4071_v23 = vsel %vm2990_vm1, %v17238_v43, 0  ;;  %v17248_v1 = vld [vmem:[#allocation99_spill] sm:$0xff] }
 0x613   : > { %8623 = vmatpush3.bf16.xpose.msra.mxu1 %v4074_v58  ;;  %3896 = vmatprep.mubr.bf16.mxu1 %v3709_v8  ;;  %v9346_v46 = vpop.eup %9345  ;;  %v17270_v50 = vld [vmem:[#allocation123_spill] sm:$0xff] }
 0x614   : > { %9028 = vmatprep.subr.msk.bf16.mxu1 %vm2990_vm1, %v17230_v32  ;;  %v13056_v41 = vpop.eup %9347  ;;  %v13058_v59 = vadd.f32 %v9346_v46, %v9344_v5 }
 0x615   : > { %17235 = vst [vmem:[#allocation92_spill] sm:$0xff] %v13056_v41  ;;  %v13060_v63 = vpop.eup %9349  ;;  %v13066_v28 = vmul.f32 %v13056_v41, %v12984_v12 }
 0x616   : > { %17236 = vst [vmem:[#allocation90_spill] sm:$0xff] %v13058_v59  ;;  %17237 = vst [vmem:[#allocation96_spill] sm:$0xff] %v13060_v63  ;;  %v9352_v51 = vpop.eup %9351  ;;  %v13070_v55 = vmul.f32 %v13060_v63, %v12990_v25  ;;  %v4068_v63 = vsel %vm2990_vm1, %v17246_v0, 0 }
 0x617   : > { %v9354_v60 = vpop.eup %9353  ;;  %v3712_v52 = vpack.c.bf16 %v9352_v51, %v9344_v5 }
 0x618   : > { %v13074_v8 = vpop.eup %9355  ;;  %v13076_v30 = vadd.f32 %v9354_v60, %v9352_v51  ;;  %v3713_v53 = vpack.c.bf16 %v9354_v60, %v9346_v46 }
 0x619   : > { %17239 = vst [vmem:[#allocation97_spill] sm:$0xff] %v13074_v8  ;;  %v13078_v26 = vpop.eup %9357  ;;  %v13084_v10 = vmul.f32 %v13074_v8, %v12984_v12 }
 0x61a   : > { %3897 = vmatmul.mubr.bf16.gmra.mxu1 %v3708_v45  ;;  %17240 = vst [vmem:[#allocation100_spill] sm:$0xff] %v13076_v30  ;;  %17241 = vst [vmem:[#allocation101_spill] sm:$0xff] %v13078_v26  ;;  %v9360_v54 = vpop.eup %9359  ;;  %v13088_v58 = vmul.f32 %v13078_v26, %v12990_v25 }
 0x61b   : > { %8625 = vmatpush3.bf16.xpose.msra.mxu1 %v4071_v23  ;;  %3904 = vmatprep.mubr.bf16.mxu1 %v3711_v14  ;;  %v9362_v32 = vpop.eup %9361  ;;  %v13092_v14 = vpop.permute.xlu0 %5109 }
 0x61c   : > { %9029 = vmatprep.subr.msk.bf16.mxu1 %vm2990_vm1, %v17242_v37  ;;  %v13090_v45 = vpop.eup %9363  ;;  %v13094_v43 = vadd.f32 %v9362_v32, %v9360_v54  ;;  %v3710_v37 = vpack.c.bf16 %v12981_v24, %v9336_v17  ;;  %v17247_v24 = vld [vmem:[#allocation38_spill] sm:$0xff] }
 0x61d   : > { %17243 = vst [vmem:[#allocation104_spill] sm:$0xff] %v13090_v45  ;;  %v13096_v23 = vpop.eup %9365  ;;  %v13101_v8 = vmul.f32 %v13090_v45, %v12984_v12 }
 0x61e   : > { %17244 = vst [vmem:[#allocation102_spill] sm:$0xff] %v13094_v43  ;;  %17245 = vst [vmem:[#allocation106_spill] sm:$0xff] %v13096_v23  ;;  %v13105_v26 = vmul.f32 %v13096_v23, %v12990_v25  ;;  %v17264_v43 = vld [vmem:[#allocation116_spill] sm:$0xff] }
 0x622   : > { %3905 = vmatmul.mubr.bf16.gmra.mxu1 %v3710_v37 }
 0x623   : > { %8627 = vmatpush3.bf16.xpose.msra.mxu1 %v4068_v63  ;;  %3912 = vmatprep.mubr.bf16.mxu1 %v3713_v53  ;;  %v17249_v53 = vld [vmem:[#allocation105_spill] sm:$0xff] }
 0x624   : > { %9030 = vmatprep.subr.msk.bf16.mxu1 %vm2990_vm1, %v12683_v49  ;;  %v4065_v37 = vsel %vm2990_vm1, %v17249_v53, 0 }
 0x629   : > { %v3379_v41 = vpop.xlane.xlu0 %3378 }
 0x62a   : > { %v3395_v17 = vmax.f32 %v3379_v41, %v17247_v24  ;;  %3913 = vmatmul.mubr.bf16.gmra.mxu1 %v3712_v52 }
 0x62b   : > { %8629 = vmatpush3.bf16.xpose.msra.mxu1 %v4065_v37 }
 0x62c   : > { %v3411_v45 = vmax.f32 %v3395_v17, %v17248_v1  ;;  %9031 = vmatprep.subr.msk.bf16.mxu1 %vm2990_vm1, %v12690_v2 }
 0x62d   : > { %v13113_v46 = vpop.permute.xlu0 %6275 }
 0x62e   : > { %v3442_v60 = vsub.f32 %v12709_v6, %v3411_v45  ;;  %v3443_v23 = vsub.f32 %v12712_v22, %v3411_v45  ;;  %v3523_v0 = vsub.f32 %v17247_v24, %v3411_v45  ;;  %v3571_v63 = vsub.f32 %v17248_v1, %v3411_v45  ;;  %v17250_v1 = vld [vmem:[#allocation108_spill] sm:$0xff] }
 0x62f   : > { %v4062_v22 = vsel %vm2990_vm1, %v12681_v39, 0 }
 0x630   : > { %v3504_v49 = vmul.f32 1.442695, %v3442_v60  ;;  %v3506_v30 = vmul.f32 1.442695, %v3443_v23  ;;  %v3554_v41 = vmul.f32 1.442695, %v3523_v0 }
 0x631   : > { %v3602_v17 = vmul.f32 1.442695, %v3571_v63  ;;  %v13121_v5 = vpop.permute.xlu0 %6257 }
 0x632   : > { %9367 = vpow2.f32 %v3504_v49  ;;  %v5203_v49 = vsel %vm2990_vm1, %v12699_v9, 0  ;;  %v17255_v9 = vld [vmem:[#allocation111_spill] sm:$0xff] }
 0x633   : > { %9369 = vpow2.f32 %v3506_v30  ;;  %8631 = vmatpush3.bf16.xpose.msra.mxu1 %v4062_v22  ;;  %v5200_v22 = vsel %vm2990_vm1, %v12714_v35, 0  ;;  %v17258_v35 = vld [vmem:[#allocation115_spill] sm:$0xff] }
 0x634   : > { %9371 = vpow2.f32 %v3554_v41  ;;  %9032 = vmatprep.subr.msk.bf16.mxu1 %vm2990_vm1, %v17250_v1 }
 0x635   : > { %9373 = vpow2.f32 %v3602_v17  ;;  %v13125_v6 = vpop.permute.xlu0 %5113 }
 0x639   : > { %v13129_v52 = vpop.permute.xlu0 %6271 }
 0x63d   : > { %v13133_v51 = vpop.permute.xlu0 %6253 }
 0x63f   : > { %v9368_v45 = vpop.eup %9367 }
 0x640   : > { %v9370_v23 = vpop.eup %9369  ;;  %v3714_v2 = vpack.c.bf16 %v9368_v45, %v9360_v54  ;;  %v17254_v54 = vld [vmem:[#allocation107_spill] sm:$0xff] }
 0x641   : > { %v13135_v24 = vpop.eup %9371  ;;  %v13137_v30 = vpop.permute.xlu0 %5117  ;;  %v3715_v60 = vpack.c.bf16 %v9370_v23, %v9362_v32  ;;  %v13139_v0 = vadd.f32 %v9370_v23, %v9368_v45  ;;  %v17256_v45 = vld [vmem:[#allocation112_spill] sm:$0xff] }
 0x642   : > { %17251 = vst [vmem:[#allocation103_spill] sm:$0xff] %v13135_v24  ;;  %v13141_v63 = vpop.eup %9373  ;;  %v13145_v39 = vmul.f32 %v13135_v24, %v12984_v12  ;;  %v17263_v24 = vld [vmem:[#allocation18_spill] sm:$0xff] }
 0x643   : > { %17252 = vst [vmem:[#allocation38_spill] sm:$0xff] %v13139_v0  ;;  %17253 = vst [vmem:[#allocation99_spill] sm:$0xff] %v13141_v63  ;;  %3920 = vmatprep.mubr.bf16.mxu1 %v3715_v60  ;;  %v13149_v53 = vmul.f32 %v13141_v63, %v12990_v25  ;;  %v17259_v60 = vld [vmem:[#allocation117_spill] sm:$0xff] }
 0x644   : > { %3921 = vmatmul.mubr.bf16.gmra.mxu1 %v3714_v2 }
 0x645   : > { %8632 = vmatprep.mubr.msk.bf16.mxu1 %vm2990_vm1, %v17254_v54  ;;  %v13153_v37 = vpop.permute.xlu0 %6267 }
 0x649   : > { %v13155_v32 = vpop.permute.xlu0 %6249 }
 0x64c   : > { %8633 = vmatmul.mubr.msk.bf16.vlgmr.msra.gmra.mxu1 %vm2990_vm1, %v17254_v54 }
 0x64d   : > { %8713 = vmatpush3.bf16.xpose.msra.mxu1 %v5203_v49  ;;  %8634 = vmatprep.mubr.msk.bf16.mxu1 %vm2990_vm1, %v12716_v34  ;;  %v13163_v41 = vpop.permute.xlu0 %5121  ;;  %v17260_v49 = vld [vmem:[#allocation16_spill] sm:$0xff] }
 0x64e   : > { %9033 = vmatprep.subr.msk.bf16.mxu1 %vm2990_vm1, %v12726_v31  ;;  %v17257_v31 = vld [vmem:[#allocation113_spill] sm:$0xff] }
 0x64f   : > { %v5197_v2 = vsel %vm2990_vm1, %v17257_v31, 0  ;;  %v17262_v31 = vld [vmem:[#allocation114_spill] sm:$0xff] }
 0x651   : > { %v13167_v17 = vpop.permute.xlu0 %6263 }
 0x654   : > { %8635 = vmatmul.mubr.msk.bf16.gmra.mxu1 %vm2990_vm1, %v12716_v34 }
 0x655   : > { %8715 = vmatpush3.bf16.xpose.msra.mxu1 %v5200_v22  ;;  %8636 = vmatprep.mubr.msk.bf16.mxu1 %vm2990_vm1, %v17255_v9  ;;  %v13175_v1 = vpop.permute.xlu0 %6245 }
 0x656   : > { %9034 = vmatprep.subr.msk.bf16.mxu1 %vm2990_vm1, %v17256_v45  ;;  %v17261_v45 = vld [vmem:[#allocation17_spill] sm:$0xff] }
 0x659   : > { %v13179_v23 = vpop.permute.xlu0 %6229 }
 0x65c   : > { %8637 = vmatmul.mubr.msk.bf16.gmra.mxu1 %vm2990_vm1, %v17255_v9  ;;  %v8290_v9 = vld [vmem:[%s16678_s4 + $0x2] sm:$0x1] }
 0x65d   : > { %8717 = vmatpush3.bf16.xpose.msra.mxu1 %v5197_v2  ;;  %8638 = vmatprep.mubr.msk.bf16.mxu1 %vm2990_vm1, %v17258_v35  ;;  %v9226_v34 = vpop.permute.xlu0 %9225  ;;  %v5194_v2 = vsel %vm2990_vm1, %v17262_v31, 0 }
 0x65e   : > { %9035 = vmatprep.subr.msk.bf16.mxu1 %vm2990_vm1, %v17259_v60  ;;  %v13189_v54 = vunpack.i.l.bf16 %v9226_v34  ;;  %v13202_v60 = vunpack.i.h.bf16 %v9226_v34  ;;  %v5344_v34 = vunpack.c.l.bf16 %v8290_v9 }
 0x660   : > { %v4236_v22 = vmul.f32 %v13189_v54, %v17260_v49  ;;  %v4239_v63 = vmul.f32 %v13189_v54, %v17261_v45  ;;  %v4237_v0 = vmul.f32 %v13189_v54, %v17263_v24  ;;  %v5487_v59 = vrot.slane %v5344_v34, %v17179_v47 }
 0x661   : > { %v4373_v9 = vmul.f32 %v13202_v60, %v17263_v24 }
 0x662   : > { %4268 = vrot.lane.b32.xlu1 %v4236_v22, %s10083_s27  ;;  %4274 = vrot.lane.b32.xlu0 %v4239_v63, %s10083_s27  ;;  %v17265_v63 = vld [vmem:[#allocation23_spill] sm:$0xff] }
 0x663   : > { %v4242_v22 = vmul.f32 %v13189_v54, %v17265_v63  ;;  %v4378_v31 = vmul.f32 %v13202_v60, %v17265_v63 }
 0x664   : > { %8639 = vmatmul.mubr.msk.bf16.gmra.mxu1 %vm2990_vm1, %v17258_v35  ;;  %v4372_v35 = vmul.f32 %v13202_v60, %v17260_v49 }
 0x665   : > { %8719 = vmatpush3.bf16.xpose.msra.mxu1 %v5194_v2  ;;  %8640 = vmatprep.mubr.msk.bf16.mxu1 %vm2990_vm1, %v17264_v43  ;;  %v5351_v2 = vrot.slane %v5344_v34, %v11914_v48 }
 0x666   : > { %9036 = vmatprep.subr.msk.bf16.mxu1 %vm2990_vm1, %v17266_v18  ;;  %4270 = vrot.lane.b32.xlu1 %v4237_v0, %s10083_s27  ;;  %v17267_v18 = vld [vmem:[#allocation119_spill] sm:$0xff] }
 0x667   : > { %4280 = vrot.lane.b32.xlu0 %v4242_v22, %s10083_s27  ;;  %v5191_v0 = vsel %vm2990_vm1, %v17267_v18, 0  ;;  %v17268_v22 = vld [vmem:[#allocation121_spill] sm:$0xff]  ;;  %v9229_v34 = vpack.i.bf16 %v5487_v59, %v5351_v2  ;;  %v17274_v2 = vld [vmem:[#allocation27_spill] sm:$0xff] }
 0x66a   : > { %4404 = vrot.lane.b32.xlu1 %v4372_v35, %s10083_s27  ;;  %v17269_v35 = vld [vmem:[#allocation25_spill] sm:$0xff] }
 0x66b   : > { %4416 = vrot.lane.b32.xlu0 %v4378_v31, %s10083_s27  ;;  %v4244_v21 = vmul.f32 %v13189_v54, %v17269_v35  ;;  %v5142_v31 = vpop.permute.xlu1 %5141 }
 0x66c   : > { %8641 = vmatmul.mubr.msk.bf16.gmra.mxu1 %vm2990_vm1, %v17264_v43  ;;  %v4380_v43 = vmul.f32 %v13202_v60, %v17269_v35 }
 0x66d   : > { %8721 = vmatpush3.bf16.xpose.msra.mxu1 %v5191_v0  ;;  %8642 = vmatprep.mubr.msk.bf16.mxu1 %vm2990_vm1, %v17268_v22  ;;  %v17271_v0 = vld [vmem:[#allocation120_spill] sm:$0xff] }
 0x66e   : > { %9037 = vmatprep.subr.msk.bf16.mxu1 %vm2990_vm1, %v17270_v50  ;;  %4406 = vrot.lane.b32.xlu1 %v4373_v9, %s10083_s27  ;;  %v5188_v3 = vsel %vm2990_vm1, %v17271_v0, 0  ;;  %v17272_v50 = vld [vmem:[#allocation15_spill] sm:$0xff]  ;;  %v4246_v9 = vmul.f32 %v13189_v54, %v17274_v2  ;;  %v17276_v0 = vld [vmem:[#allocation125_spill] sm:$0xff] }
 0x66f   : > { %4284 = vrot.lane.b32.xlu0 %v4244_v21, %s10083_s27  ;;  %v6260_v18 = vpop.permute.xlu1 %6259  ;;  %v4238_v59 = vmul.f32 %v13189_v54, %v17272_v50  ;;  %v17273_v21 = vld [vmem:[#allocation122_spill] sm:$0xff]  ;;  %v5185_v19 = vsel %vm2990_vm1, %v17276_v0, 0 }
 0x672   : > { %9230 = vrot.lane.b32.xlu1 %v9229_v34, %s10084_s11  ;;  %v17275_v34 = vld [vmem:[#allocation124_spill] sm:$0xff] }
 0x673   : > { %4420 = vrot.lane.b32.xlu0 %v4380_v43, %s10083_s27  ;;  %v4382_v43 = vmul.f32 %v13202_v60, %v17274_v2 }
 0x674   : > { %8643 = vmatmul.mubr.msk.bf16.gmra.mxu1 %vm2990_vm1, %v17268_v22  ;;  %v4374_v22 = vmul.f32 %v13202_v60, %v17272_v50 }
 0x675   : > { %8723 = vmatpush3.bf16.xpose.msra.mxu1 %v5188_v3  ;;  %8644 = vmatprep.mubr.msk.bf16.mxu1 %vm2990_vm1, %v17273_v21  ;;  %v5112_v3 = vpop.permute.xlu1 %5111 }
 0x676   : > { %9038 = vmatprep.subr.msk.bf16.mxu1 %vm2990_vm1, %v17275_v34  ;;  %4272 = vrot.lane.b32.xlu1 %v4238_v59, %s10083_s27  ;;  %v4375_v59 = vmul.f32 %v13202_v60, %v17261_v45  ;;  %v17278_v34 = vld [vmem:[#allocation29_spill] sm:$0xff] }
 0x677   : > { %4288 = vrot.lane.b32.xlu0 %v4246_v9, %s10083_s27  ;;  %v17277_v9 = vld [vmem:[#allocation127_spill] sm:$0xff]  ;;  %v4248_v38 = vmul.f32 %v13189_v54, %v17278_v34  ;;  %v4384_v0 = vmul.f32 %v13202_v60, %v17278_v34 }
 0x67a   : > { %4408 = vrot.lane.b32.xlu1 %v4374_v22, %s10083_s27  ;;  %v6274_v22 = vpop.permute.xlu1 %6273 }
 0x67b   : > { %4424 = vrot.lane.b32.xlu0 %v4382_v43, %s10083_s27  ;;  %v17279_v43 = vld [vmem:[#allocation20_spill] sm:$0xff] }
 0x67c   : > { %8645 = vmatmul.mubr.msk.bf16.gmra.mxu1 %vm2990_vm1, %v17273_v21  ;;  %v4240_v21 = vmul.f32 %v13189_v54, %v17279_v43  ;;  %v4376_v16 = vmul.f32 %v13202_v60, %v17279_v43 }
 0x67d   : > { %8725 = vmatpush3.bf16.xpose.msra.mxu1 %v5185_v19  ;;  %8646 = vmatprep.mubr.msk.bf16.mxu1 %vm2990_vm1, %v17277_v9 }
 0x67e   : > { %4410 = vrot.lane.b32.xlu1 %v4375_v59, %s10083_s27  ;;  %9039 = vmatprep.subr.msk.bf16.mxu1 %vm2990_vm1, %v5142_v31  ;;  %v6256_v19 = vpop.permute.xlu1 %6255  ;;  %v17281_v31 = vld [vmem:[#allocation19_spill] sm:$0xff] }
 0x67f   : > { %4292 = vrot.lane.b32.xlu0 %v4248_v38, %s10083_s27  ;;  %v4241_v38 = vmul.f32 %v13189_v54, %v17281_v31  ;;  %v17282_v59 = vld [vmem:[#allocation31_spill] sm:$0xff] }
 0x680   : > { %v4250_v15 = vmul.f32 %v13189_v54, %v17282_v59 }
 0x682   : > { %4276 = vrot.lane.b32.xlu1 %v4240_v21, %s10083_s27  ;;  %v6323_v21 = vsel %vm2990_vm1, %v6260_v18, 0 }
 0x683   : > { %4428 = vrot.lane.b32.xlu0 %v4384_v0, %s10083_s27  ;;  %v17283_v0 = vld [vmem:[#allocation21_spill] sm:$0xff] }
 0x684   : > { %8647 = vmatmul.mubr.msk.bf16.gmra.mxu1 %vm2990_vm1, %v17277_v9  ;;  %v4386_v9 = vmul.f32 %v13202_v60, %v17282_v59  ;;  %v4243_v18 = vmul.f32 %v13189_v54, %v17283_v0  ;;  %v17366_v59 = vld [vmem:[#allocation71_spill] sm:$0xff] }
 0x685   : > { %8727 = vmatpush3.bf16.xpose.msra.mxu1 %v5182_v4  ;;  %8728 = vmatprep.mubr.msk.bf16.mxu1 %vm2990_vm1, %v13092_v14  ;;  %v5116_v4 = vpop.permute.xlu1 %5115 }
 0x686   : > { %9040 = vmatprep.subr.msk.bf16.mxu1 %vm2990_vm1, %v13113_v46  ;;  %4278 = vrot.lane.b32.xlu1 %v4241_v38, %s10083_s27  ;;  %v4377_v46 = vmul.f32 %v13202_v60, %v17281_v31 }
 0x687   : > { %4296 = vrot.lane.b32.xlu0 %v4250_v15, %s10083_s27 }
 0x689   : > { %v6270_v15 = vpop.permute.xlu1 %6269 }
 0x68a   : > { %4412 = vrot.lane.b32.xlu1 %v4376_v16, %s10083_s27  ;;  %v4379_v16 = vmul.f32 %v13202_v60, %v17283_v0 }
 0x68b   : > { %4432 = vrot.lane.b32.xlu0 %v4386_v9, %s10083_s27 }
 0x68c   : > { %8729 = vmatmul.mubr.msk.bf16.vlgmr.msra.gmra.mxu1 %vm2990_vm1, %v13092_v14  ;;  %v6320_v14 = vsel %vm2990_vm1, %v13121_v5, 0  ;;  %v6317_v5 = vsel %vm2990_vm1, %v6256_v19, 0  ;;  %v17285_v19 = vld [vmem:[#allocation26_spill] sm:$0xff] }
 0x68d   : > { %8809 = vmatpush3.bf16.xpose.msra.mxu1 %v6323_v21  ;;  %8730 = vmatprep.mubr.msk.bf16.mxu1 %vm2990_vm1, %v5112_v3  ;;  %v6252_v38 = vpop.permute.xlu1 %6251 }
 0x68e   : > { %4414 = vrot.lane.b32.xlu1 %v4377_v46, %s10083_s27  ;;  %9041 = vmatprep.subr.msk.bf16.mxu1 %vm2990_vm1, %v6274_v22  ;;  %v17284_v22 = vld [vmem:[#allocation24_spill] sm:$0xff]  ;;  %v3508_v46 = vsub.f32 %v12268_v40, %v12802_v7  ;;  %v6314_v40 = vsel %vm2990_vm1, %v13133_v51, 0 }
 0x68f   : > { %v4245_v9 = vmul.f32 %v13189_v54, %v17284_v22 }
 0x691   : > { %v5120_v21 = vpop.permute.xlu1 %5119 }
 0x692   : > { %4282 = vrot.lane.b32.xlu1 %v4243_v18, %s10083_s27  ;;  %v4247_v18 = vmul.f32 %v13189_v54, %v17285_v19 }
 0x694   : > { %8731 = vmatmul.mubr.msk.bf16.gmra.mxu1 %vm2990_vm1, %v5112_v3  ;;  %v4381_v3 = vmul.f32 %v13202_v60, %v17284_v22 }
 0x695   : > { %8811 = vmatpush3.bf16.xpose.msra.mxu1 %v6320_v14  ;;  %8732 = vmatprep.mubr.msk.bf16.mxu1 %vm2990_vm1, %v13125_v6  ;;  %v3524_v14 = vmul.f32 1.442695, %v3508_v46 }
 0x696   : > { %9042 = vmatprep.subr.msk.bf16.mxu1 %vm2990_vm1, %v13129_v52  ;;  %4418 = vrot.lane.b32.xlu1 %v4379_v16, %s10083_s27  ;;  %v6266_v52 = vpop.permute.xlu1 %6265  ;;  %v13342_v16 = vpop.permute.xlu0 %6235 }
 0x697   : > { %9375 = vpow2.f32 %v3524_v14 }
 0x69a   : > { %4286 = vrot.lane.b32.xlu1 %v4245_v9, %s10083_s27  ;;  %v13354_v51 = vpop.permute.xlu0 %6239 }
 0x69c   : > { %8733 = vmatmul.mubr.msk.bf16.gmra.mxu1 %vm2990_vm1, %v13125_v6  ;;  %v3556_v6 = vsub.f32 %v12324_v61, %v12802_v7  ;;  %v17286_v61 = vld [vmem:[#allocation28_spill] sm:$0xff] }
 0x69d   : > { %8813 = vmatpush3.bf16.xpose.msra.mxu1 %v6317_v5  ;;  %8734 = vmatprep.mubr.msk.bf16.mxu1 %vm2990_vm1, %v5116_v4  ;;  %v6248_v5 = vpop.permute.xlu1 %6247  ;;  %v4249_v7 = vmul.f32 %v13189_v54, %v17286_v61 }
 0x69e   : > { %4422 = vrot.lane.b32.xlu1 %v4381_v3, %s10083_s27  ;;  %9043 = vmatprep.subr.msk.bf16.mxu1 %vm2990_vm1, %v6270_v15  ;;  %v4383_v15 = vmul.f32 %v13202_v60, %v17285_v19  ;;  %v3572_v9 = vmul.f32 1.442695, %v3556_v6  ;;  %v3606_v46 = vpop.xlane.xlu0 %3605 }
 0x6a0   : > { %9377 = vpow2.f32 %v3572_v9 }
 0x6a1   : > { %v13358_v3 = vpop.permute.xlu1 %5123 }
 0x6a2   : > { %4290 = vrot.lane.b32.xlu1 %v4247_v18, %s10083_s27  ;;  %v17287_v18 = vld [vmem:[#allocation30_spill] sm:$0xff] }
 0x6a3   : > { %v4251_v14 = vmul.f32 %v13189_v54, %v17287_v18 }
 0x6a4   : > { %8735 = vmatmul.mubr.msk.bf16.gmra.mxu1 %vm2990_vm1, %v5116_v4  ;;  %v6311_v4 = vsel %vm2990_vm1, %v6252_v38, 0  ;;  %v3509_v38 = vsub.f32 %v12274_v33, %v12807_v42  ;;  %v4387_v33 = vmul.f32 %v13202_v60, %v17287_v18 }
 0x6a5   : > { %8815 = vmatpush3.bf16.xpose.msra.mxu1 %v6314_v40  ;;  %8736 = vmatprep.mubr.msk.bf16.mxu1 %vm2990_vm1, %v13137_v30  ;;  %v6262_v6 = vpop.permute.xlu1 %6261  ;;  %v9376_v40 = vpop.eup %9375 }
 0x6a6   : > { %9044 = vmatprep.subr.msk.bf16.mxu1 %vm2990_vm1, %v13153_v37  ;;  %4426 = vrot.lane.b32.xlu1 %v4383_v15, %s10083_s27  ;;  %v4385_v37 = vmul.f32 %v13202_v60, %v17286_v61  ;;  %v3510_v15 = vsub.f32 %v12203_v44, %v12825_v62  ;;  %v3526_v9 = vmul.f32 1.442695, %v3509_v38 }
 0x6a8   : > { %9379 = vpow2.f32 %v3526_v9 }
 0x6aa   : > { %4294 = vrot.lane.b32.xlu1 %v4249_v7, %s10083_s27  ;;  %v3652_v7 = vadd.f32 %v9376_v40, %v3606_v46 }
 0x6ac   : > { %8737 = vmatmul.mubr.msk.bf16.gmra.mxu1 %vm2990_vm1, %v13137_v30  ;;  %v3557_v30 = vsub.f32 %v12225_v29, %v12807_v42  ;;  %v3558_v29 = vsub.f32 %v12344_v36, %v12825_v62  ;;  %v3528_v42 = vmul.f32 1.442695, %v3510_v15  ;;  %v17290_v36 = vld [vmem:[#allocation39_spill] sm:$0xff] }
 0x6ad   : > { %8817 = vmatpush3.bf16.xpose.msra.mxu1 %v6311_v4  ;;  %8738 = vmatprep.mubr.msk.bf16.mxu1 %vm2990_vm1, %v5120_v21  ;;  %v9378_v44 = vpop.eup %9377 }
 0x6ae   : > { %4430 = vrot.lane.b32.xlu1 %v4385_v37, %s10083_s27  ;;  %9045 = vmatprep.subr.msk.bf16.mxu1 %vm2990_vm1, %v6266_v52  ;;  %v6308_v52 = vsel %vm2990_vm1, %v13155_v32, 0  ;;  %v3574_v54 = vmul.f32 1.442695, %v3557_v30  ;;  %v17288_v32 = vld [vmem:[#allocation128_spill] sm:$0xff]  ;;  %v3668_v60 = vadd.f32 %v9378_v44, %v3652_v7  ;;  %v13390_v37 = vpop.permute.xlu1 %6231  ;;  %v3576_v38 = vmul.f32 1.442695, %v3558_v29 }
 0x6af   : > { %v3559_v62 = vsub.f32 %v17290_v36, %v17288_v32  ;;  %v17292_v30 = vld [vmem:[#allocation44_spill] sm:$0xff]  ;;  %v17295_v29 = vld [vmem:[#allocation33_spill] sm:$0xff] }
 0x6b0   : > { %9381 = vpow2.f32 %v3574_v54  ;;  %v17293_v7 = vld [vmem:[#allocation52_spill] sm:$0xff]  ;;  %v17294_v54 = vld [vmem:[#allocation130_spill] sm:$0xff] }
 0x6b1   : > { %9383 = vpow2.f32 %v3528_v42  ;;  %v3578_v9 = vmul.f32 1.442695, %v3559_v62  ;;  %v3513_v42 = vsub.f32 %v17295_v29, %v17294_v54  ;;  %v17297_v62 = vld [vmem:[#allocation63_spill] sm:$0xff] }
 0x6b2   : > { %4298 = vrot.lane.b32.xlu1 %v4251_v14, %s10083_s27  ;;  %v17291_v14 = vld [vmem:[#allocation129_spill] sm:$0xff]  ;;  %9385 = vrcp.f32 %v3668_v60 }
 0x6b3   : > { %v3512_v15 = vsub.f32 %v17292_v30, %v17291_v14  ;;  %9387 = vpow2.f32 %v3576_v38  ;;  %v3534_v60 = vmul.f32 1.442695, %v3513_v42  ;;  %v17298_v38 = vld [vmem:[#allocation45_spill] sm:$0xff]  ;;  %v3720_v30 = vmul.f32 %v9376_v40, %v12984_v12 }
 0x6b4   : > { %8739 = vmatmul.mubr.msk.bf16.gmra.mxu1 %vm2990_vm1, %v5120_v21  ;;  %v17289_v21 = vld [vmem:[#allocation32_spill] sm:$0xff]  ;;  %v3933_v40 = vmul.f32 %v9378_v44, %v12990_v25 }
 0x6b5   : > { %8819 = vmatpush3.bf16.xpose.msra.mxu1 %v6308_v52  ;;  %8740 = vmatprep.mubr.msk.bf16.mxu1 %vm2990_vm1, %v13163_v41  ;;  %v3511_v4 = vsub.f32 %v17289_v21, %v17288_v32  ;;  %v3560_v52 = vsub.f32 %v17293_v7, %v17291_v14  ;;  %v3514_v14 = vsub.f32 %v17298_v38, %v17297_v62  ;;  %v17305_v38 = vld [vmem:[#allocation41_spill] sm:$0xff] }
 0x6b6   : > { %9046 = vmatprep.subr.msk.bf16.mxu1 %vm2990_vm1, %v13167_v17  ;;  %4434 = vrot.lane.b32.xlu1 %v4387_v33, %s10083_s27  ;;  %v6305_v17 = vsel %vm2990_vm1, %v6248_v5, 0  ;;  %v13403_v33 = vpop.permute.xlu1 %6233  ;;  %v3532_v5 = vmul.f32 1.442695, %v3512_v15  ;;  %v6302_v15 = vsel %vm2990_vm1, %v13175_v1, 0  ;;  %v17303_v1 = vld [vmem:[#allocation34_spill] sm:$0xff] }
 0x6b7   : > { %v3530_v46 = vmul.f32 1.442695, %v3511_v4  ;;  %v3580_v4 = vmul.f32 1.442695, %v3560_v52 }
 0x6b9   : > { %9389 = vpow2.f32 %v3530_v46 }
 0x6ba   : > { %v8568_v21 = vpop.f32.mrf.mxu1  ;;  %9391 = vpow2.f32 %v3578_v9  ;;  %v13413_v7 = vpop.permute.xlu1 %6237  ;;  %v17300_v9 = vld [vmem:[#allocation60_spill] sm:$0xff] }
 0x6bb   : > { %9393 = vpow2.f32 %v3532_v5  ;;  %v3562_v52 = vsub.f32 %v17300_v9, %v17297_v62  ;;  %v17302_v5 = vld [vmem:[#allocation131_spill] sm:$0xff] }
 0x6bc   : > { %8741 = vmatmul.mubr.msk.bf16.gmra.mxu1 %vm2990_vm1, %v13163_v41  ;;  %v17296_v41 = vld [vmem:[#allocation40_spill] sm:$0xff]  ;;  %v8569_v36 = vpop.f32.mrf.mxu1  ;;  %9395 = vpow2.f32 %v3580_v4 }
 0x6bd   : > { %8821 = vmatpush3.bf16.xpose.msra.mxu1 %v6305_v17  ;;  %8742 = vmatprep.mubr.msk.bf16.mxu1 %vm2990_vm1, %v13358_v3  ;;  %v3561_v32 = vsub.f32 %v17296_v41, %v17294_v54  ;;  %v8570_v17 = vadd.f32 %v8569_v36, %v8568_v21  ;;  %9397 = vpow2.f32 %v3534_v60  ;;  %v3515_v41 = vsub.f32 %v17303_v1, %v17302_v5 }
 0x6be   : > { %9047 = vmatprep.subr.msk.bf16.mxu1 %vm2990_vm1, %v6262_v6  ;;  %v13415_v6 = vpop.eup %9379  ;;  %v8571_v54 = vpop.f32.mrf.mxu1 }
 0x6bf   : > { %17299 = vst [vmem:[#allocation105_spill] sm:$0xff] %v13415_v6  ;;  %v3582_v46 = vmul.f32 1.442695, %v3561_v32  ;;  %v3867_v29 = vadd.f32 %v8570_v17, %v3720_v30  ;;  %v13426_v42 = vpop.eup %9381  ;;  %v3721_v36 = vmul.f32 %v13415_v6, %v12984_v12  ;;  %v3563_v30 = vsub.f32 %v17305_v38, %v17302_v5  ;;  %v13440_v20 = vpop.permute.xlu1 %6241 }
 0x6c0   : > { %17301 = vst [vmem:[#allocation108_spill] sm:$0xff] %v13426_v42  ;;  %v8572_v32 = vpop.f32.mrf.mxu1  ;;  %v13430_v21 = vpop.eup %9383  ;;  %v3934_v1 = vmul.f32 %v13426_v42, %v12990_v25 }
 0x6c1   : > { %17304 = vst [vmem:[#allocation107_spill] sm:$0xff] %v13430_v21  ;;  %v3949_v4 = vadd.f32 %v3933_v40, %v3867_v29  ;;  %v8573_v62 = vadd.f32 %v8572_v32, %v8571_v54  ;;  %v9386_v44 = vpop.eup %9385  ;;  %9399 = vpow2.f32 %v3582_v46  ;;  %v3538_v29 = vmul.f32 1.442695, %v3515_v41  ;;  %v17308_v40 = vld [vmem:[#allocation36_spill] sm:$0xff]  ;;  %v17309_v54 = vld [vmem:[#allocation46_spill] sm:$0xff] }
 0x6c2   : > { %v8574_v17 = vpop.f32.mrf.mxu1  ;;  %v3516_v32 = vsub.f32 %v17309_v54, %v17308_v40  ;;  %v17312_v41 = vld [vmem:[#allocation68_spill] sm:$0xff] }
 0x6c3   : > { %v13436_v60 = vmul.f32 %v9386_v44, %v3949_v4  ;;  %v3870_v9 = vadd.f32 %v8573_v62, %v3721_v36  ;;  %v3586_v36 = vmul.f32 1.442695, %v3563_v30  ;;  %v3564_v44 = vsub.f32 %v17312_v41, %v17308_v40  ;;  %v17315_v30 = vld [vmem:[#allocation35_spill] sm:$0xff]  ;;  %v17318_v41 = vld [vmem:[#allocation42_spill] sm:$0xff] }
 0x6c4   : > { %8743 = vmatmul.mubr.msk.bf16.gmra.mxu1 %vm2990_vm1, %v13358_v3  ;;  %v3536_v3 = vmul.f32 1.442695, %v3514_v14  ;;  %v13442_v14 = vpop.eup %9387  ;;  %v8575_v46 = vpop.f32.mrf.mxu1 }
 0x6c5   : > { %8823 = vmatpush3.bf16.xpose.msra.mxu1 %v6302_v15  ;;  %8824 = vmatprep.mubr.msk.bf16.mxu1 %vm2990_vm1, %v13179_v23  ;;  %v3584_v15 = vmul.f32 1.442695, %v3562_v52  ;;  %17306 = vst [vmem:[#allocation111_spill] sm:$0xff] %v13436_v60  ;;  %17307 = vst [vmem:[#allocation112_spill] sm:$0xff] %v13442_v14  ;;  %v13446_v6 = vadd.f32 %v3934_v1, %v3870_v9  ;;  %v3722_v52 = vmul.f32 %v13430_v21, %v12984_v12  ;;  %v17351_v21 = vld [vmem:[#allocation56_spill] sm:$0xff] }
 0x6c6   : > { %9401 = vpow2.f32 %v3536_v3  ;;  %v8576_v5 = vadd.f32 %v8575_v46, %v8574_v17  ;;  %v13450_v4 = vpop.eup %9389  ;;  %v8577_v62 = vpop.f32.mrf.mxu1  ;;  %v3935_v3 = vmul.f32 %v13442_v14, %v12990_v25  ;;  %v17314_v17 = vld [vmem:[#allocation66_spill] sm:$0xff]  ;;  %v3540_v46 = vmul.f32 1.442695, %v3516_v32 }
 0x6c7   : > { %17310 = vst [vmem:[#allocation113_spill] sm:$0xff] %v13446_v6  ;;  %17311 = vst [vmem:[#allocation115_spill] sm:$0xff] %v13450_v4  ;;  %9403 = vpow2.f32 %v3584_v15  ;;  %v13460_v9 = vpop.eup %9391  ;;  %v3517_v1 = vsub.f32 %v17315_v30, %v17314_v17  ;;  %v3723_v15 = vmul.f32 %v13450_v4, %v12984_v12  ;;  %v3565_v60 = vsub.f32 %v17318_v41, %v17314_v17  ;;  %v17349_v4 = vld [vmem:[#allocation51_spill] sm:$0xff] }
 0x6c8   : > { %v3875_v38 = vadd.f32 %v8576_v5, %v3722_v52  ;;  %17313 = vst [vmem:[#allocation117_spill] sm:$0xff] %v13460_v9  ;;  %9405 = vpow2.f32 %v3538_v29  ;;  %v8578_v54 = vpop.f32.mrf.mxu1  ;;  %v13468_v52 = vpop.permute.xlu1 %6243  ;;  %v3588_v29 = vmul.f32 1.442695, %v3564_v44  ;;  %v3936_v32 = vmul.f32 %v13460_v9, %v12990_v25 }
 0x6c9   : > { %v8579_v40 = vadd.f32 %v8578_v54, %v8577_v62  ;;  %v13470_v5 = vpop.eup %9393  ;;  %9407 = vpow2.f32 %v3586_v36  ;;  %v3590_v44 = vmul.f32 1.442695, %v3565_v60 }
 0x6ca   : > { %17317 = vst [vmem:[#allocation116_spill] sm:$0xff] %v13470_v5  ;;  %v8580_v6 = vpop.f32.mrf.mxu1  ;;  %9409 = vpow2.f32 %v3540_v46  ;;  %v3724_v54 = vmul.f32 %v13470_v5, %v12984_v12 }
 0x6cb   : > { %v3878_v42 = vadd.f32 %v8579_v40, %v3723_v15  ;;  %9411 = vpow2.f32 %v3588_v29 }
 0x6cc   : > { %8825 = vmatmul.mubr.msk.bf16.vlgmr.msra.gmra.mxu1 %vm2990_vm1, %v13179_v23  ;;  %v13464_v23 = vadd.f32 %v3935_v3, %v3875_v38  ;;  %v13476_v38 = vpop.eup %9395  ;;  %v3542_v3 = vmul.f32 1.442695, %v3517_v1  ;;  %v8581_v30 = vpop.f32.mrf.mxu1 }
 0x6cd   : > { %8826 = vmatprep.mubr.msk.bf16.mxu1 %vm2990_vm1, %v13390_v37  ;;  %17319 = vst [vmem:[#allocation118_spill] sm:$0xff] %v13476_v38  ;;  %v13480_v62 = vadd.f32 %v3936_v32, %v3878_v42  ;;  %v8582_v17 = vadd.f32 %v8581_v30, %v8580_v6  ;;  %v3937_v1 = vmul.f32 %v13476_v38, %v12990_v25  ;;  %v17350_v38 = vld [vmem:[#allocation58_spill] sm:$0xff] }
 0x6ce   : > { %17316 = vst [vmem:[#allocation114_spill] sm:$0xff] %v13464_v23  ;;  %v13478_v23 = vpop.eup %9397  ;;  %v8583_v41 = vpop.f32.mrf.mxu1  ;;  %9413 = vpow2.f32 %v3542_v3 }
 0x6cf   : > { %17320 = vst [vmem:[#allocation119_spill] sm:$0xff] %v13478_v23  ;;  %17321 = vst [vmem:[#allocation121_spill] sm:$0xff] %v13480_v62  ;;  %v13486_v36 = vpop.eup %9399  ;;  %v3883_v15 = vadd.f32 %v8582_v17, %v3724_v54  ;;  %9415 = vpow2.f32 %v3590_v44 }
 0x6d0   : > { %17322 = vst [vmem:[#allocation123_spill] sm:$0xff] %v13486_v36  ;;  %v8584_v46 = vpop.f32.mrf.mxu1  ;;  %v3938_v54 = vmul.f32 %v13486_v36, %v12990_v25 }
 0x6d1   : > { %v13493_v6 = vadd.f32 %v3937_v1, %v3883_v15  ;;  %v8585_v32 = vadd.f32 %v8584_v46, %v8583_v41 }
 0x6d2   : > { %v8586_v29 = vpop.f32.mrf.mxu1 }
 0x6d3   : > { %17323 = vst [vmem:[#allocation120_spill] sm:$0xff] %v13493_v6  ;;  %v13497_v60 = vpop.eup %9401 }
 0x6d4   : > { %8827 = vmatmul.mubr.msk.bf16.gmra.mxu1 %vm2990_vm1, %v13390_v37  ;;  %v4269_v42 = vpop.permute.xlu1 %4268  ;;  %v3725_v37 = vmul.f32 %v13478_v23, %v12984_v12  ;;  %17324 = vst [vmem:[#allocation122_spill] sm:$0xff] %v13497_v60  ;;  %v13501_v62 = vpop.eup %9403  ;;  %v3726_v41 = vmul.f32 %v13497_v60, %v12984_v12 }
 0x6d5   : > { %8828 = vmatprep.mubr.msk.bf16.mxu1 %vm2990_vm1, %v13403_v33  ;;  %v4316_v40 = vsel %vm2990_vm1, %v4269_v42, 0.0  ;;  %17325 = vst [vmem:[#allocation124_spill] sm:$0xff] %v13501_v62  ;;  %v8587_v42 = vpop.f32.mrf.mxu1  ;;  %v13504_v15 = vpop.eup %9405 }
 0x6d6   : > { %4317 = vadd.xlane.f32.xlu0 %v4316_v40  ;;  %v3886_v30 = vadd.f32 %v8585_v32, %v3725_v37  ;;  %17326 = vst [vmem:[#allocation125_spill] sm:$0xff] %v13504_v15  ;;  %v8588_v46 = vadd.f32 %v8587_v42, %v8586_v29  ;;  %v3939_v37 = vmul.f32 %v13501_v62, %v12990_v25  ;;  %v17348_v62 = vld [vmem:[#allocation50_spill] sm:$0xff] }
 0x6d7   : > { %v8589_v44 = vpop.f32.mrf.mxu1  ;;  %v3727_v29 = vmul.f32 %v13504_v15, %v12984_v12 }
 0x6d8   : > { %v4271_v17 = vpop.permute.xlu1 %4270  ;;  %v13506_v1 = vadd.f32 %v3938_v54, %v3886_v30  ;;  %v3891_v40 = vadd.f32 %v8588_v46, %v3726_v41 }
 0x6d9   : > { %v4319_v3 = vsel %vm2990_vm1, %v4271_v17, 0.0  ;;  %v13516_v17 = vpop.eup %9407  ;;  %v8590_v30 = vpop.f32.mrf.mxu1 }
 0x6da   : > { %17327 = vst [vmem:[#allocation127_spill] sm:$0xff] %v13506_v1  ;;  %4320 = vadd.xlane.f32.xlu1 %v4319_v3  ;;  %17328 = vst [vmem:[#allocation126_spill] sm:$0xff] %v13516_v17  ;;  %v13519_v1 = vadd.f32 %v3939_v37, %v3891_v40  ;;  %v8591_v42 = vadd.f32 %v8590_v30, %v8589_v44  ;;  %v3940_v46 = vmul.f32 %v13516_v17, %v12990_v25 }
 0x6db   : > { %v8592_v3 = vpop.f32.mrf.mxu1 }
 0x6dc   : > { %8829 = vmatmul.mubr.msk.bf16.gmra.mxu1 %vm2990_vm1, %v13403_v33  ;;  %v4405_v32 = vpop.permute.xlu1 %4404  ;;  %17329 = vst [vmem:[#allocation128_spill] sm:$0xff] %v13519_v1  ;;  %v13523_v33 = vpop.eup %9409  ;;  %v3894_v41 = vadd.f32 %v8591_v42, %v3727_v29 }
 0x6dd   : > { %8830 = vmatprep.mubr.msk.bf16.mxu1 %vm2990_vm1, %v13342_v16  ;;  %v4452_v54 = vsel %vm2990_vm1, %v4405_v32, 0.0  ;;  %17330 = vst [vmem:[#allocation32_spill] sm:$0xff] %v13523_v33  ;;  %v13527_v36 = vpop.eup %9411  ;;  %v8593_v23 = vpop.f32.mrf.mxu1  ;;  %v3728_v37 = vmul.f32 %v13523_v33, %v12984_v12 }
 0x6de   : > { %4453 = vadd.xlane.f32.xlu1 %v4452_v54  ;;  %17331 = vst [vmem:[#allocation39_spill] sm:$0xff] %v13527_v36  ;;  %v13530_v40 = vadd.f32 %v3940_v46, %v3894_v41  ;;  %v8594_v44 = vadd.f32 %v8593_v23, %v8592_v3  ;;  %v13534_v30 = vpop.eup %9413  ;;  %v3941_v42 = vmul.f32 %v13527_v36, %v12990_v25 }
 0x6df   : > { %17333 = vst [vmem:[#allocation44_spill] sm:$0xff] %v13534_v30  ;;  %v8595_v54 = vpop.f32.mrf.mxu1  ;;  %v3729_v23 = vmul.f32 %v13534_v30, %v12984_v12 }
 0x6e0   : > { %v4407_v6 = vpop.permute.xlu1 %4406  ;;  %17332 = vst [vmem:[#allocation129_spill] sm:$0xff] %v13530_v40  ;;  %v3899_v29 = vadd.f32 %v8594_v44, %v3728_v37 }
 0x6e1   : > { %v4455_v32 = vsel %vm2990_vm1, %v4407_v6, 0.0  ;;  %v13542_v6 = vpop.eup %9415  ;;  %v8596_v41 = vpop.f32.mrf.mxu1 }
 0x6e2   : > { %4456 = vadd.xlane.f32.xlu0 %v4455_v32  ;;  %17334 = vst [vmem:[#allocation52_spill] sm:$0xff] %v13542_v6  ;;  %v13544_v46 = vadd.f32 %v3941_v42, %v3899_v29  ;;  %v8597_v3 = vadd.f32 %v8596_v41, %v8595_v54 }
 0x6e3   : > { %v8598_v32 = vpop.f32.mrf.mxu1 }
 0x6e4   : > { %8831 = vmatmul.mubr.msk.bf16.gmra.mxu1 %vm2990_vm1, %v13342_v16  ;;  %17335 = vst [vmem:[#allocation130_spill] sm:$0xff] %v13544_v46  ;;  %v3902_v40 = vadd.f32 %v8597_v3, %v3729_v23  ;;  %v3942_v16 = vmul.f32 %v13542_v6, %v12990_v25  ;;  %v9231_v42 = vpop.permute.xlu1 %9230  ;;  %v9937_v23 = vld [vmem:[#allocation2 + $0x170] ss:$12 sps:$4 sm:$0xff]   ;;  %v17346_v46 = vld [vmem:[#allocation54_spill] sm:$0xff] }
 0x6e5   : > { %8832 = vmatprep.mubr.msk.bf16.mxu1 %vm2990_vm1, %v13413_v7  ;;  %v8599_v37 = vpop.f32.mrf.mxu1  ;;  %v13557_v54 = vunpack.i.l.bf16 %v9231_v42 }
 0x6e6   : > { %v13550_v44 = vadd.f32 %v3942_v16, %v3902_v40  ;;  %v8600_v1 = vadd.f32 %v8599_v37, %v8598_v32 }
 0x6e7   : > { %v8601_v17 = vpop.f32.mrf.mxu1 }
 0x6e8   : > { %17336 = vst [vmem:[#allocation33_spill] sm:$0xff] %v13550_v44  ;;  %v3907_v29 = vadd.f32 %v8600_v1, %v13038_v11  ;;  %v5357_v11 = vmul.f32 %v13557_v54, %v17263_v24 }
 0x6e9   : > { %v8602_v12 = vpop.f32.mrf.mxu1 }
 0x6ea   : > { %v13560_v41 = vadd.f32 %v13051_v13, %v3907_v29  ;;  %v8603_v25 = vadd.f32 %v8602_v12, %v8601_v17  ;;  %v5356_v29 = vmul.f32 %v13557_v54, %v17260_v49  ;;  %v9938_v12 = vld [vmem:[#allocation2 + $0xb0] ss:$12 sps:$4 sm:$0xff]  }
 0x6eb   : > { %v8604_v40 = vpop.f32.mrf.mxu1 }
 0x6ec   : > { %8833 = vmatmul.mubr.msk.bf16.gmra.mxu1 %vm2990_vm1, %v13413_v7  ;;  %17337 = vst [vmem:[#allocation40_spill] sm:$0xff] %v13560_v41  ;;  %v3910_v3 = vadd.f32 %v8603_v25, %v12996_v27  ;;  %v13575_v27 = vunpack.i.h.bf16 %v9231_v42 }
 0x6ed   : > { %8834 = vmatprep.mubr.msk.bf16.mxu1 %vm2990_vm1, %v13354_v51  ;;  %v8605_v7 = vpop.f32.mrf.mxu1 }
 0x6ee   : > { %v13567_v1 = vadd.f32 %v13004_v57, %v3910_v3  ;;  %v8606_v32 = vadd.f32 %v8605_v7, %v8604_v40 }
 0x6ef   : > { %4934 = vrot.lane.b32.xlu1 %v9937_v23, %s10083_s27  ;;  %v8607_v16 = vpop.f32.mrf.mxu1 }
 0x6f0   : > { %17338 = vst [vmem:[#allocation63_spill] sm:$0xff] %v13567_v1  ;;  %v3915_v13 = vadd.f32 %v8606_v32, %v13066_v28  ;;  %v5493_v28 = vmul.f32 %v13575_v27, %v17263_v24 }
 0x6f1   : > { %v8608_v17 = vpop.f32.mrf.mxu1 }
 0x6f2   : > { %v13578_v37 = vadd.f32 %v13070_v55, %v3915_v13  ;;  %v8609_v57 = vadd.f32 %v8608_v17, %v8607_v16  ;;  %v5492_v55 = vmul.f32 %v13575_v27, %v17260_v49 }
 0x6f3   : > { %5390 = vrot.lane.b32.xlu1 %v5357_v11, %s10084_s11 }
 0x6f4   : > { %8835 = vmatmul.mubr.msk.bf16.gmra.mxu1 %vm2990_vm1, %v13354_v51  ;;  %17339 = vst [vmem:[#allocation45_spill] sm:$0xff] %v13578_v37  ;;  %v3918_v51 = vadd.f32 %v8609_v57, %v13084_v10  ;;  %v4273_v10 = vpop.permute.xlu1 %4272 }
 0x6f5   : > { %8836 = vmatprep.mubr.msk.bf16.mxu1 %vm2990_vm1, %v13440_v20 }
 0x6f6   : > { %v13588_v42 = vadd.f32 %v13088_v58, %v3918_v51 }
 0x6f7   : > { %4918 = vrot.lane.b32.xlu1 %v9938_v12, %s10083_s27  ;;  %v4275_v12 = vpop.permute.xlu0 %4274 }
 0x6f8   : > { %5388 = vrot.lane.b32.xlu0 %v5356_v29, %s10084_s11  ;;  %17340 = vst [vmem:[#allocation60_spill] sm:$0xff] %v13588_v42  ;;  %v4409_v58 = vpop.permute.xlu1 %4408  ;;  %v4322_v29 = vsel %vm2990_vm1, %v4273_v10, 0.0 }
 0x6fb   : > { %5526 = vrot.lane.b32.xlu1 %v5493_v28, %s10084_s11  ;;  %v13668_v41 = vpop.permute.xlu0 %4280 }
 0x6fc   : > { %8837 = vmatmul.mubr.msk.bf16.gmra.mxu1 %vm2990_vm1, %v13440_v20  ;;  %5524 = vrot.lane.b32.xlu0 %v5492_v55, %s10084_s11  ;;  %v4411_v16 = vpop.permute.xlu1 %4410 }
 0x6fd   : > { %8838 = vmatprep.mubr.msk.bf16.mxu1 %vm2990_vm1, %v13468_v52 }
 0x700   : > { %v13608_v57 = vpop.permute.xlu1 %4276 }
 0x701   : > { %v4328_v14 = vsel %vm2990_vm1, %v13608_v57, 0.0 }
 0x704   : > { %v8610_v25 = vpop.f32.mrf.mxu1  ;;  %8839 = vmatmul.mubr.msk.bf16.gmra.mxu1 %vm2990_vm1, %v13468_v52  ;;  %v13610_v52 = vpop.permute.xlu1 %4278 }
 0x705   : > { %v4331_v15 = vsel %vm2990_vm1, %v13610_v52, 0.0 }
 0x706   : > { %v8611_v40 = vpop.f32.mrf.mxu1 }
 0x707   : > { %v8612_v23 = vadd.f32 %v8611_v40, %v8610_v25 }
 0x708   : > { %v8613_v3 = vpop.f32.mrf.mxu1 }
 0x709   : > { %v3923_v7 = vadd.f32 %v8612_v23, %v13101_v8  ;;  %v13613_v8 = vpop.permute.xlu1 %4412  ;;  %v9939_v23 = vld [vmem:[#allocation2 + $0x158] ss:$12 sps:$4 sm:$0xff]  }
 0x70a   : > { %v8614_v11 = vpop.f32.mrf.mxu1 }
 0x70b   : > { %v13602_v20 = vadd.f32 %v13105_v26, %v3923_v7  ;;  %v8615_v32 = vadd.f32 %v8614_v11, %v8613_v3  ;;  %v4325_v26 = vsel %vm2990_vm1, %v4275_v12, 0.0 }
 0x70d   : > { %17341 = vst [vmem:[#allocation131_spill] sm:$0xff] %v13602_v20  ;;  %v3926_v13 = vadd.f32 %v8615_v32, %v13145_v39  ;;  %v8300_v39 = vld [vmem:[%s16678_s4 + $0x3] sm:$0x1]  ;;  %v13619_v51 = vpop.permute.xlu1 %4414 }
 0x70f   : > { %v13606_v17 = vadd.f32 %v13149_v53, %v3926_v13  ;;  %v6464_v53 = vunpack.c.l.bf16 %v8300_v39 }
 0x711   : > { %17342 = vst [vmem:[#allocation34_spill] sm:$0xff] %v13606_v17  ;;  %v13621_v28 = vpop.permute.xlu1 %4282  ;;  %v6471_v55 = vrot.slane %v6464_v53, %v11914_v48  ;;  %v6607_v10 = vrot.slane %v6464_v53, %v17179_v47  ;;  %v17355_v48 = vld [vmem:[#allocation59_spill] sm:$0xff] }
 0x713   : > { %v9234_v25 = vpack.i.bf16 %v6607_v10, %v6471_v55  ;;  %v9940_v10 = vld [vmem:[#allocation2 + $0x98] ss:$12 sps:$4 sm:$0xff]  }
 0x715   : > { %v13625_v40 = vpop.permute.xlu1 %4418 }
 0x719   : > { %v13629_v3 = vpop.permute.xlu1 %4286 }
 0x71b   : > { %4323 = vadd.xlane.f32.xlu0 %v4322_v29  ;;  %v4461_v29 = vsel %vm2990_vm1, %v4411_v16, 0.0  ;;  %v5358_v16 = vmul.f32 %v13557_v54, %v17272_v50 }
 0x71d   : > { %v13631_v7 = vpop.permute.xlu1 %4422 }
 0x71f   : > { %4326 = vadd.xlane.f32.xlu1 %v4325_v26  ;;  %v4458_v26 = vsel %vm2990_vm1, %v4409_v58, 0.0  ;;  %v9942_v58 = vld [vmem:[#allocation2 + $0x80] ss:$12 sps:$4 sm:$0xff]  }
 0x721   : > { %v13633_v11 = vpop.permute.xlu1 %4290 }
 0x725   : > { %v13635_v32 = vpop.permute.xlu1 %4426 }
 0x729   : > { %v13637_v13 = vpop.permute.xlu1 %4294 }
 0x72d   : > { %v13640_v12 = vpop.permute.xlu1 %4430 }
 0x730   : > { %4932 = vrot.lane.b32.xlu1 %v9939_v23, %s10083_s27 }
 0x731   : > { %9235 = vrot.lane.b32.xlu0 %v9234_v25, %s10083_s27  ;;  %v13643_v39 = vpop.permute.xlu1 %4298  ;;  %v9941_v25 = vld [vmem:[#allocation2 + $0x140] ss:$12 sps:$4 sm:$0xff]  }
 0x735   : > { %v13645_v53 = vpop.permute.xlu1 %4434 }
 0x750   : > { %4462 = vadd.xlane.f32.xlu0 %v4461_v29  ;;  %v5359_v29 = vmul.f32 %v13557_v54, %v17261_v45 }
 0x754   : > { %4459 = vadd.xlane.f32.xlu1 %v4458_v26  ;;  %v4143_v26 = vpop.f32.mrf.mxu1 }
 0x763   : > { %v13647_v55 = vpop.xlane.xlu1 %4320 }
 0x764   : > { %17343 = vst [vmem:[#allocation41_spill] sm:$0xff] %v13647_v55 }
 0x765   : > { %4916 = vrot.lane.b32.xlu1 %v9940_v10, %s10083_s27  ;;  %v5495_v10 = vmul.f32 %v13575_v27, %v17261_v45  ;;  %v17353_v45 = vld [vmem:[#allocation57_spill] sm:$0xff] }
 0x766   : > { %4930 = vrot.lane.b32.xlu0 %v9941_v25, %s10083_s27  ;;  %v5494_v25 = vmul.f32 %v13575_v27, %v17272_v50 }
 0x767   : > { %v13651_v23 = vpop.xlane.xlu1 %4453 }
 0x768   : > { %17344 = vst [vmem:[#allocation36_spill] sm:$0xff] %v13651_v23 }
 0x769   : > { %5392 = vrot.lane.b32.xlu1 %v5358_v16, %s10084_s11  ;;  %v4145_v16 = vpop.f32.mrf.mxu1 }
 0x76a   : > { %4914 = vrot.lane.b32.xlu0 %v9942_v58, %s10083_s27  ;;  %v13673_v6 = vadd.f32 %v4145_v16, %v17346_v46 }
 0x76b   : > { %v4935_v17 = vpop.permute.xlu1 %4934  ;;  %v4147_v58 = vpop.f32.mrf.mxu1 }
 0x76c   : > { %8648 = vmatprep.subr.bf16.mxu0 %v4935_v17  ;;  %v13688_v16 = vadd.f32 %v4147_v58, %v17349_v4  ;;  %v17352_v58 = vld [vmem:[#allocation55_spill] sm:$0xff] }
 0x76d   : > { %5394 = vrot.lane.b32.xlu1 %v5359_v29, %s10084_s11  ;;  %v4149_v1 = vpop.f32.mrf.mxu1  ;;  %v13670_v29 = vpop.permute.xlu0 %4416  ;;  %v17365_v4 = vld [vmem:[#allocation67_spill] sm:$0xff] }
 0x76e   : > { %5530 = vrot.lane.b32.xlu0 %v5495_v10, %s10084_s11  ;;  %v13685_v9 = vadd.f32 %v4149_v1, %v17348_v62 }
 0x76f   : > { %v13665_v42 = vpop.permute.xlu1 %5390  ;;  %v4153_v37 = vpop.f32.mrf.mxu1 }
 0x770   : > { %17345 = vst [vmem:[#allocation46_spill] sm:$0xff] %v13665_v42  ;;  %v4503_v52 = vmax.f32 %v13688_v16, %v13685_v9  ;;  %v13700_v1 = vadd.f32 %v4153_v37, %v17351_v21  ;;  %v17354_v37 = vld [vmem:[#allocation64_spill] sm:$0xff] }
 0x771   : > { %5528 = vrot.lane.b32.xlu1 %v5494_v25, %s10084_s11  ;;  %v4155_v44 = vpop.f32.mrf.mxu1  ;;  %v17347_v25 = vld [vmem:[#allocation53_spill] sm:$0xff] }
 0x772   : > { %v13678_v36 = vadd.f32 %v4143_v26, %v17347_v25  ;;  %v13693_v26 = vadd.f32 %v4155_v44, %v17350_v38  ;;  %v4464_v44 = vsel %vm2990_vm1, %v13613_v8, 0.0  ;;  %v4467_v38 = vsel %vm2990_vm1, %v13619_v51, 0.0  ;;  %v17356_v8 = vld [vmem:[#allocation61_spill] sm:$0xff] }
 0x773   : > { %v4919_v20 = vpop.permute.xlu1 %4918  ;;  %v4157_v17 = vpop.f32.mrf.mxu1 }
 0x774   : > { %8649 = vmatpush3.bf16.msra.mxu0 %v4919_v20  ;;  %v13680_v20 = vpop.permute.xlu0 %4284  ;;  %v4500_v33 = vmax.f32 %v13678_v36, %v13673_v6  ;;  %v13710_v47 = vadd.f32 %v4157_v17, %v17353_v45  ;;  %v17357_v17 = vld [vmem:[#allocation62_spill] sm:$0xff] }
 0x775   : > { %v4159_v10 = vpop.f32.mrf.mxu1 }
 0x776   : > { %v13705_v56 = vadd.f32 %v4159_v10, %v17352_v58  ;;  %v5497_v58 = vmul.f32 %v13575_v27, %v17281_v31 }
 0x777   : > { %v4163_v30 = vpop.f32.mrf.mxu1 }
 0x778   : > { %v13725_v21 = vadd.f32 %v4163_v30, %v17356_v8  ;;  %v9943_v8 = vld [vmem:[#allocation2 + $0x68] ss:$12 sps:$4 sm:$0xff]  }
 0x779   : > { %v4165_v60 = vpop.f32.mrf.mxu1 }
 0x77b   : > { %v4167_v5 = vpop.f32.mrf.mxu1 }
 0x77d   : > { %v4169_v50 = vpop.f32.mrf.mxu1 }
 0x77e   : > { %v13720_v10 = vadd.f32 %v4169_v50, %v17355_v48  ;;  %v13736_v50 = vpop.permute.xlu1 %5526  ;;  %v5496_v48 = vmul.f32 %v13575_v27, %v17279_v43 }
 0x77f   : > { %17358 = vst [vmem:[#allocation68_spill] sm:$0xff] %v13736_v50 }
 0x78d   : > { %4332 = vadd.xlane.f32.xlu0 %v4331_v15  ;;  %v13695_v15 = vpop.permute.xlu0 %4420 }
 0x791   : > { %4501 = vmax.xlane.f32.xlu0 %v4500_v33  ;;  %v4506_v33 = vmax.f32 %v13700_v1, %v13693_v26  ;;  %v13712_v57 = vpop.permute.xlu0 %4288 }
 0x795   : > { %4329 = vadd.xlane.f32.xlu1 %v4328_v14  ;;  %4504 = vmax.xlane.f32.xlu0 %v4503_v52  ;;  %v4509_v14 = vmax.f32 %v13710_v47, %v13705_v56  ;;  %v13717_v52 = vadd.f32 %v4165_v60, %v17354_v37  ;;  %v13734_v37 = vpop.permute.xlu0 %4424 }
 0x799   : > { %4465 = vadd.xlane.f32.xlu1 %v4464_v44  ;;  %4507 = vmax.xlane.f32.xlu0 %v4506_v33  ;;  %v13728_v44 = vadd.f32 %v4167_v5, %v17357_v17  ;;  %v4512_v33 = vmax.f32 %v13725_v21, %v13717_v52  ;;  %v13738_v51 = vpop.permute.xlu0 %4292  ;;  %v5361_v17 = vmul.f32 %v13557_v54, %v17281_v31 }
 0x79b   : > { %v4515_v60 = vmax.f32 %v13728_v44, %v13720_v10 }
 0x79d   : > { %4468 = vadd.xlane.f32.xlu1 %v4467_v38  ;;  %4510 = vmax.xlane.f32.xlu0 %v4509_v14  ;;  %v13742_v5 = vpop.permute.xlu0 %4428 }
 0x7a1   : > { %4516 = vmax.xlane.f32.xlu1 %v4515_v60  ;;  %4513 = vmax.xlane.f32.xlu0 %v4512_v33  ;;  %v13744_v14 = vpop.permute.xlu0 %4296  ;;  %v9944_v33 = vld [vmem:[#allocation2 + $0x128] ss:$12 sps:$4 sm:$0xff]  }
 0x7a5   : > { %v13751_v60 = vpop.permute.xlu0 %4432 }
 0x7a8   : > { %v13740_v30 = vpop.xlane.xlu1 %4326 }
 0x7a9   : > { %v13757_v45 = vpop.xlane.xlu0 %4317 }
 0x7aa   : > { %17359 = vst [vmem:[#allocation66_spill] sm:$0xff] %v13757_v45 }
 0x7ac   : > { %v4933_v38 = vpop.permute.xlu1 %4932 }
 0x7ad   : > { %8650 = vmatprep.subr.bf16.mxu0 %v4933_v38  ;;  %v9945_v38 = vld [vmem:[#allocation2 + $0x110] ss:$12 sps:$4 sm:$0xff]  }
 0x7b2   : > { %4912 = vrot.lane.b32.xlu1 %v9943_v8, %s10083_s27  ;;  %v5360_v8 = vmul.f32 %v13557_v54, %v17279_v43 }
 0x7b6   : > { %5398 = vrot.lane.b32.xlu1 %v5361_v17, %s10084_s11  ;;  %v13762_v17 = vpop.xlane.xlu0 %4456 }
 0x7b7   : > { %4928 = vrot.lane.b32.xlu0 %v9944_v33, %s10083_s27  ;;  %17360 = vst [vmem:[#allocation35_spill] sm:$0xff] %v13762_v17  ;;  %v9946_v33 = vld [vmem:[#allocation2 + $0x50] ss:$12 sps:$4 sm:$0xff]  }
 0x7ba   : > { %5532 = vrot.lane.b32.xlu1 %v5496_v48, %s10084_s11  ;;  %v13767_v24 = vpop.permute.xlu0 %5388 }
 0x7bb   : > { %4926 = vrot.lane.b32.xlu0 %v9945_v38, %s10083_s27  ;;  %17361 = vst [vmem:[#allocation42_spill] sm:$0xff] %v13767_v24  ;;  %v4173_v38 = vpop.f32.mrf.mxu1 }
 0x7bd   : > { %v4175_v43 = vpop.f32.mrf.mxu1 }
 0x7be   : > { %v13770_v48 = vpop.permute.xlu0 %5524 }
 0x7bf   : > { %5396 = vrot.lane.b32.xlu0 %v5360_v8, %s10084_s11  ;;  %17362 = vst [vmem:[#allocation132_spill] sm:$0xff] %v13770_v48  ;;  %v4177_v25 = vpop.f32.mrf.mxu1 }
 0x7c0   : > { %v13786_v48 = vadd.f32 %v4177_v25, %v17365_v4  ;;  %v17367_v25 = vld [vmem:[#allocation70_spill] sm:$0xff] }
 0x7c1   : > { %v4179_v50 = vpop.f32.mrf.mxu1  ;;  %v13798_v4 = vadd.f32 %v4173_v38, %v17367_v25  ;;  %v5498_v38 = vmul.f32 %v13575_v27, %v17265_v63 }
 0x7c2   : > { %v13772_v49 = vpop.xlane.xlu0 %4323 }
 0x7c3   : > { %4910 = vrot.lane.b32.xlu0 %v9946_v33, %s10083_s27  ;;  %v17364_v33 = vld [vmem:[#allocation65_spill] sm:$0xff] }
 0x7c4   : > { %v13779_v46 = vadd.f32 %v4179_v50, %v17364_v33  ;;  %v13791_v50 = vadd.f32 %v4175_v43, %v17366_v59  ;;  %v4470_v33 = vsel %vm2990_vm1, %v13670_v29, 0.0  ;;  %v4473_v43 = vsel %vm2990_vm1, %v13625_v40, 0.0  ;;  %v9948_v29 = vld [vmem:[#allocation2 + $0xf8] ss:$12 sps:$4 sm:$0xff]  }
 0x7c5   : > { %v5362_v40 = vmul.f32 %v13557_v54, %v17265_v63 }
 0x7c6   : > { %v13774_v8 = vpop.permute.xlu0 %9235  ;;  %v4521_v24 = vmax.f32 %v13786_v48, %v13779_v46 }
 0x7c7   : > { %5534 = vrot.lane.b32.xlu0 %v5497_v58, %s10084_s11  ;;  %17363 = vst [vmem:[#allocation133_spill] sm:$0xff] %v13774_v8  ;;  %v4334_v58 = vsel %vm2990_vm1, %v13668_v41, 0.0  ;;  %v4337_v41 = vsel %vm2990_vm1, %v13621_v28, 0.0  ;;  %v5363_v28 = vmul.f32 %v13557_v54, %v17283_v0 }
 0x7d9   : > { %v13776_v42 = vpop.xlane.xlu0 %4462 }
 0x7dd   : > { %v13781_v31 = vpop.xlane.xlu1 %4459  ;;  %v4931_v62 = vpop.permute.xlu0 %4930 }
 0x7de   : > { %4335 = vadd.xlane.f32.xlu1 %v4334_v58 }
 0x7e1   : > { %v4917_v8 = vpop.permute.xlu1 %4916  ;;  %v4915_v58 = vpop.permute.xlu0 %4914 }
 0x7e2   : > { %4522 = vmax.xlane.f32.xlu1 %v4521_v24  ;;  %8651 = vmatpush3.bf16.msra.mxu0 %v4917_v8  ;;  %v4518_v24 = vmax.f32 %v13798_v4, %v13791_v50  ;;  %v9949_v8 = vld [vmem:[#allocation2 + $0xe0] ss:$12 sps:$4 sm:$0xff]  }
 0x7e3   : > { %8652 = vmatprep.subr.bf16.mxu0 %v4931_v62  ;;  %v9947_v62 = vld [vmem:[#allocation2 + $0x38] ss:$12 sps:$4 sm:$0xff]  }
 0x7e6   : > { %4471 = vadd.xlane.f32.xlu1 %v4470_v33  ;;  %4338 = vadd.xlane.f32.xlu0 %v4337_v41  ;;  %v9950_v33 = vld [vmem:[#allocation2 + $0x20] ss:$12 sps:$4 sm:$0xff]   ;;  %v13817_v41 = vpop.permute.xlu1 %5392 }
 0x7e7   : > { %8653 = vmatpush3.bf16.msra.mxu0 %v4915_v58  ;;  %17368 = vst [vmem:[#allocation134_spill] sm:$0xff] %v13817_v41  ;;  %v5499_v58 = vmul.f32 %v13575_v27, %v17283_v0 }
 0x7ea   : > { %4474 = vadd.xlane.f32.xlu1 %v4473_v43  ;;  %4519 = vmax.xlane.f32.xlu0 %v4518_v24  ;;  %v13822_v24 = vpop.permute.xlu0 %5530  ;;  %v13824_v43 = vpop.permute.xlu1 %5394 }
 0x7eb   : > { %17369 = vst [vmem:[#allocation135_spill] sm:$0xff] %v13822_v24  ;;  %17370 = vst [vmem:[#allocation136_spill] sm:$0xff] %v13824_v43 }
 0x7fb   : > { %4908 = vrot.lane.b32.xlu1 %v9947_v62, %s10083_s27  ;;  %v4183_v62 = vpop.f32.mrf.mxu1 }
 0x7ff   : > { %5402 = vrot.lane.b32.xlu1 %v5363_v28, %s10084_s11 }
 0x800   : > { %4924 = vrot.lane.b32.xlu0 %v9948_v29, %s10083_s27  ;;  %v4185_v29 = vpop.f32.mrf.mxu1 }
 0x803   : > { %5536 = vrot.lane.b32.xlu1 %v5498_v38, %s10084_s11  ;;  %v13828_v38 = vpop.permute.xlu1 %5528 }
 0x804   : > { %4922 = vrot.lane.b32.xlu0 %v9949_v8, %s10083_s27  ;;  %17372 = vst [vmem:[#allocation138_spill] sm:$0xff] %v13828_v38 }
 0x808   : > { %5400 = vrot.lane.b32.xlu0 %v5362_v40, %s10084_s11 }
 0x80c   : > { %4906 = vrot.lane.b32.xlu0 %v9950_v33, %s10083_s27  ;;  %v4187_v33 = vpop.f32.mrf.mxu1 }
 0x80e   : > { %v4189_v43 = vpop.f32.mrf.mxu1 }
 0x810   : > { %5538 = vrot.lane.b32.xlu0 %v5499_v58, %s10084_s11 }
 0x816   : > { %v13826_v28 = vpop.xlane.xlu0 %4332 }
 0x817   : > { %17371 = vst [vmem:[#allocation137_spill] sm:$0xff] %v13826_v28 }
 0x81a   : > { %v4502_v8 = vpop.xlane.xlu0 %4501 }
 0x81b   : > { %v4548_v40 = vmax.f32 %v4502_v8, %v13757_v45 }
 0x81d   : > { %v13832_v63 = vmax.f32 %v4548_v40, %v13651_v23 }
 0x81e   : > { %v13834_v0 = vpop.xlane.xlu1 %4329  ;;  %v4505_v58 = vpop.xlane.xlu0 %4504 }
 0x81f   : > { %17373 = vst [vmem:[#allocation139_spill] sm:$0xff] %v13832_v63  ;;  %v4580_v25 = vsub.f32 %v13678_v36, %v13832_v63  ;;  %v4581_v59 = vsub.f32 %v13673_v6, %v13832_v63  ;;  %v4549_v24 = vmax.f32 %v4505_v58, %v13647_v55  ;;  %v17375_v63 = vld [vmem:[#allocation73_spill] sm:$0xff] }
 0x820   : > { %v13852_v58 = vadd.f32 %v4189_v43, %v17375_v63 }
 0x821   : > { %v4612_v38 = vmul.f32 1.442695, %v4580_v25  ;;  %v4614_v41 = vmul.f32 1.442695, %v4581_v59  ;;  %v13842_v8 = vmax.f32 %v4549_v24, %v13762_v17 }
 0x822   : > { %v13844_v45 = vpop.xlane.xlu1 %4465  ;;  %v4508_v40 = vpop.xlane.xlu0 %4507 }
 0x823   : > { %17374 = vst [vmem:[#allocation140_spill] sm:$0xff] %v13844_v45  ;;  %v4550_v23 = vmax.f32 %v4508_v40, %v13772_v49  ;;  %9417 = vpow2.f32 %v4612_v38  ;;  %v4582_v36 = vsub.f32 %v13688_v16, %v13842_v8  ;;  %v4583_v6 = vsub.f32 %v13685_v9, %v13842_v8  ;;  %v17377_v40 = vld [vmem:[#allocation72_spill] sm:$0xff] }
 0x824   : > { %9419 = vpow2.f32 %v4614_v41  ;;  %v4340_v38 = vsel %vm2990_vm1, %v13680_v20, 0.0  ;;  %v13862_v16 = vadd.f32 %v4187_v33, %v17377_v40 }
 0x825   : > { %v13855_v59 = vmax.f32 %v4550_v23, %v13781_v31  ;;  %v4616_v25 = vmul.f32 1.442695, %v4582_v36  ;;  %v4618_v24 = vmul.f32 1.442695, %v4583_v6 }
 0x826   : > { %v13857_v17 = vpop.xlane.xlu1 %4468  ;;  %v4511_v55 = vpop.xlane.xlu0 %4510  ;;  %v4527_v43 = vmax.f32 %v13862_v16, %v13852_v58 }
 0x827   : > { %17376 = vst [vmem:[#allocation141_spill] sm:$0xff] %v13857_v17  ;;  %v4584_v9 = vsub.f32 %v13700_v1, %v13855_v59  ;;  %v4585_v41 = vsub.f32 %v13693_v26, %v13855_v59  ;;  %4341 = vadd.xlane.f32.xlu1 %v4340_v38  ;;  %9421 = vpow2.f32 %v4616_v25  ;;  %v4551_v23 = vmax.f32 %v4511_v55, %v13740_v30  ;;  %v17378_v26 = vld [vmem:[#allocation74_spill] sm:$0xff] }
 0x828   : > { %9423 = vpow2.f32 %v4618_v24  ;;  %v13877_v25 = vadd.f32 %v4185_v29, %v17378_v26 }
 0x829   : > { %v4620_v36 = vmul.f32 1.442695, %v4584_v9  ;;  %v4622_v6 = vmul.f32 1.442695, %v4585_v41  ;;  %v13872_v20 = vmax.f32 %v4551_v23, %v13776_v42  ;;  %v17380_v41 = vld [vmem:[#allocation77_spill] sm:$0xff] }
 0x82a   : > { %v4517_v33 = vpop.xlane.xlu1 %4516  ;;  %v4514_v40 = vpop.xlane.xlu0 %4513  ;;  %v13892_v29 = vadd.f32 %v4183_v62, %v17380_v41 }
 0x82b   : > { %v4553_v1 = vmax.f32 %v4517_v33, %v13826_v28  ;;  %v4552_v63 = vmax.f32 %v4514_v40, %v13834_v0  ;;  %4528 = vmax.xlane.f32.xlu1 %v4527_v43  ;;  %9425 = vpow2.f32 %v4620_v36  ;;  %v4586_v55 = vsub.f32 %v13710_v47, %v13872_v20 }
 0x82c   : > { %v4587_v24 = vsub.f32 %v13705_v56, %v13872_v20  ;;  %9427 = vpow2.f32 %v4622_v6  ;;  %v4476_v40 = vsel %vm2990_vm1, %v13695_v15, 0.0  ;;  %v4343_v56 = vsel %vm2990_vm1, %v13629_v3, 0.0 }
 0x82d   : > { %v13884_v38 = vmax.f32 %v4553_v1, %v13857_v17  ;;  %v13887_v9 = vmax.f32 %v4552_v63, %v13844_v45  ;;  %v4624_v23 = vmul.f32 1.442695, %v4586_v55  ;;  %v4524_v15 = vmax.f32 %v13892_v29, %v13877_v25 }
 0x82e   : > { %v4626_v43 = vmul.f32 1.442695, %v4587_v24  ;;  %v4913_v36 = vpop.permute.xlu1 %4912  ;;  %v4929_v47 = vpop.permute.xlu0 %4928  ;;  %v4479_v24 = vsel %vm2990_vm1, %v13631_v7, 0.0 }
 0x82f   : > { %17379 = vst [vmem:[#allocation142_spill] sm:$0xff] %v13884_v38  ;;  %v4590_v6 = vsub.f32 %v13728_v44, %v13884_v38  ;;  %v4591_v63 = vsub.f32 %v13720_v10, %v13884_v38  ;;  %4477 = vadd.xlane.f32.xlu1 %v4476_v40  ;;  %4344 = vadd.xlane.f32.xlu0 %v4343_v56  ;;  %9429 = vpow2.f32 %v4624_v23 }
 0x830   : > { %v4588_v62 = vsub.f32 %v13725_v21, %v13887_v9  ;;  %8654 = vmatprep.subr.bf16.mxu0 %v4929_v47  ;;  %v13904_v33 = vpop.eup %9417  ;;  %9431 = vpow2.f32 %v4626_v43  ;;  %v4589_v44 = vsub.f32 %v13717_v52, %v13887_v9 }
 0x831   : > { %v4632_v3 = vmul.f32 1.442695, %v4590_v6  ;;  %v4634_v1 = vmul.f32 1.442695, %v4591_v63  ;;  %8655 = vmatpush3.bf16.msra.mxu0 %v4913_v36  ;;  %v9420_v10 = vpop.eup %9419  ;;  %v9952_v36 = vld [vmem:[#allocation2 + $0xc8] ss:$12 sps:$4 sm:$0xff]  }
 0x832   : > { %v4927_v55 = vpop.permute.xlu0 %4926  ;;  %v4628_v40 = vmul.f32 1.442695, %v4588_v62  ;;  %v4630_v23 = vmul.f32 1.442695, %v4589_v44  ;;  %v13913_v43 = vadd.f32 %v9420_v10, %v13904_v33 }
 0x833   : > { %4480 = vadd.xlane.f32.xlu1 %v4479_v24  ;;  %4525 = vmax.xlane.f32.xlu0 %v4524_v15  ;;  %9433 = vpow2.f32 %v4632_v3 }
 0x834   : > { %8656 = vmatprep.subr.bf16.mxu0 %v4927_v55  ;;  %v13910_v21 = vpop.eup %9421  ;;  %9435 = vpow2.f32 %v4634_v1  ;;  %17381 = vst [vmem:[#allocation143_spill] sm:$0xff] %v13913_v43 }
 0x835   : > { %v9424_v47 = vpop.eup %9423  ;;  %9437 = vpow2.f32 %v4628_v40  ;;  %v9951_v40 = vld [vmem:[#allocation2 + $0x8] ss:$12 sps:$4 sm:$0xff]  }
 0x836   : > { %v13915_v52 = vpop.permute.xlu0 %5396  ;;  %v4869_v56 = vpack.c.bf16 %v9424_v47, %v9420_v10  ;;  %v13920_v7 = vadd.f32 %v9424_v47, %v13910_v21  ;;  %9439 = vpow2.f32 %v4630_v23 }
 0x837   : > { %17382 = vst [vmem:[#allocation144_spill] sm:$0xff] %v13915_v52 }
 0x838   : > { %17383 = vst [vmem:[#allocation145_spill] sm:$0xff] %v13920_v7  ;;  %v13922_v6 = vpop.eup %9425  ;;  %4984 = vmatprep.mubr.bf16.mxu0 %v4869_v56  ;;  %v5500_v56 = vmul.f32 %v13575_v27, %v17269_v35 }
 0x839   : > { %v13924_v63 = vpop.eup %9427 }
 0x83a   : > { %v4911_v15 = vpop.permute.xlu0 %4910  ;;  %v13928_v62 = vadd.f32 %v13924_v63, %v13922_v6 }
 0x83b   : > { %8657 = vmatpush3.bf16.msra.mxu0 %v4911_v15 }
 0x83c   : > { %17384 = vst [vmem:[#allocation146_spill] sm:$0xff] %v13928_v62  ;;  %v13930_v3 = vpop.eup %9429  ;;  %v5501_v62 = vmul.f32 %v13575_v27, %v17284_v22 }
 0x83d   : > { %v13932_v1 = vpop.eup %9431 }
 0x83e   : > { %v13936_v44 = vadd.f32 %v13932_v1, %v13930_v3  ;;  %v13977_v26 = vpop.permute.xlu0 %5534 }
 0x83f   : > { %17391 = vst [vmem:[#allocation152_spill] sm:$0xff] %v13977_v26 }
 0x840   : > { %17385 = vst [vmem:[#allocation147_spill] sm:$0xff] %v13936_v44  ;;  %v13938_v10 = vpop.eup %9433 }
 0x841   : > { %v13940_v55 = vpop.eup %9435 }
 0x842   : > { %v13944_v24 = vadd.f32 %v13940_v55, %v13938_v10  ;;  %v13947_v23 = vpop.eup %9437 }
 0x843   : > { %v13949_v47 = vpop.eup %9439 }
 0x844   : > { %17386 = vst [vmem:[#allocation148_spill] sm:$0xff] %v13944_v24  ;;  %4904 = vrot.lane.b32.xlu1 %v9951_v40, %s10083_s27  ;;  %v13955_v15 = vadd.f32 %v13949_v47, %v13947_v23  ;;  %v5364_v24 = vmul.f32 %v13557_v54, %v17269_v35  ;;  %v5365_v40 = vmul.f32 %v13557_v54, %v17284_v22  ;;  %v4346_v22 = vsel %vm2990_vm1, %v13712_v57, 0.0 }
 0x846   : > { %17387 = vst [vmem:[#allocation149_spill] sm:$0xff] %v13955_v15  ;;  %v4193_v15 = vpop.f32.mrf.mxu1 }
 0x848   : > { %5540 = vrot.lane.b32.xlu1 %v5500_v56, %s10084_s11  ;;  %v13968_v56 = vpop.permute.xlu1 %5398  ;;  %v4195_v43 = vpop.f32.mrf.mxu1 }
 0x849   : > { %4920 = vrot.lane.b32.xlu0 %v9952_v36, %s10083_s27  ;;  %17388 = vst [vmem:[#allocation150_spill] sm:$0xff] %v13968_v56 }
 0x84a   : > { %v4197_v36 = vpop.f32.mrf.mxu1 }
 0x84c   : > { %v13970_v44 = vpop.permute.xlu1 %5532  ;;  %v4199_v7 = vpop.f32.mrf.mxu1 }
 0x84d   : > { %5404 = vrot.lane.b32.xlu0 %v5364_v24, %s10084_s11  ;;  %17389 = vst [vmem:[#allocation151_spill] sm:$0xff] %v13970_v44  ;;  %v17390_v24 = vld [vmem:[#allocation83_spill] sm:$0xff] }
 0x84e   : > { %v13975_v41 = vadd.f32 %v4199_v7, %v17390_v24  ;;  %v17394_v7 = vld [vmem:[#allocation80_spill] sm:$0xff] }
 0x84f   : > { %v13991_v24 = vadd.f32 %v4195_v43, %v17394_v7 }
 0x851   : > { %5406 = vrot.lane.b32.xlu0 %v5365_v40, %s10084_s11 }
 0x855   : > { %5542 = vrot.lane.b32.xlu0 %v5501_v62, %s10084_s11  ;;  %v17392_v62 = vld [vmem:[#allocation82_spill] sm:$0xff] }
 0x856   : > { %v13982_v52 = vadd.f32 %v4197_v36, %v17392_v62  ;;  %v4485_v36 = vsel %vm2990_vm1, %v13635_v32, 0.0  ;;  %v17396_v62 = vld [vmem:[#allocation81_spill] sm:$0xff] }
 0x857   : > { %v14001_v38 = vadd.f32 %v4193_v15, %v17396_v62 }
 0x858   : > { %v4533_v56 = vmax.f32 %v13982_v52, %v13975_v41 }
 0x867   : > { %v13972_v35 = vpop.xlane.xlu1 %4335 }
 0x86b   : > { %v4523_v40 = vpop.xlane.xlu1 %4522 }
 0x86c   : > { %4347 = vadd.xlane.f32.xlu1 %v4346_v22  ;;  %v4349_v22 = vsel %vm2990_vm1, %v13633_v11, 0.0 }
 0x86f   : > { %v13986_v44 = vpop.xlane.xlu1 %4471  ;;  %v13988_v17 = vpop.xlane.xlu0 %4338 }
 0x870   : > { %17393 = vst [vmem:[#allocation153_spill] sm:$0xff] %v13988_v17  ;;  %4534 = vmax.xlane.f32.xlu1 %v4533_v56  ;;  %v4555_v26 = vmax.f32 %v4523_v40, %v13988_v17  ;;  %v4530_v56 = vmax.f32 %v14001_v38, %v13991_v24 }
 0x873   : > { %v13994_v28 = vpop.xlane.xlu1 %4474  ;;  %v4520_v57 = vpop.xlane.xlu0 %4519 }
 0x874   : > { %17395 = vst [vmem:[#allocation154_spill] sm:$0xff] %v13994_v28  ;;  %v14004_v45 = vmax.f32 %v4555_v26, %v13994_v28  ;;  %v4554_v43 = vmax.f32 %v4520_v57, %v13972_v35  ;;  %4486 = vadd.xlane.f32.xlu1 %v4485_v36  ;;  %4350 = vadd.xlane.f32.xlu0 %v4349_v22 }
 0x876   : > { %v4594_v40 = vsub.f32 %v13786_v48, %v14004_v45  ;;  %v4595_v32 = vsub.f32 %v13779_v46, %v14004_v45  ;;  %v14014_v11 = vmax.f32 %v4554_v43, %v13986_v44  ;;  %v4482_v43 = vsel %vm2990_vm1, %v13734_v37, 0.0 }
 0x877   : > { %v4909_v15 = vpop.permute.xlu1 %4908  ;;  %v4925_v62 = vpop.permute.xlu0 %4924 }
 0x878   : > { %v4640_v26 = vmul.f32 1.442695, %v4594_v40  ;;  %v4642_v7 = vmul.f32 1.442695, %v4595_v32  ;;  %4531 = vmax.xlane.f32.xlu0 %v4530_v56  ;;  %8658 = vmatprep.subr.bf16.mxu0 %v4925_v62  ;;  %v4592_v57 = vsub.f32 %v13798_v4, %v14014_v11  ;;  %v4593_v36 = vsub.f32 %v13791_v50, %v14014_v11 }
 0x879   : > { %8659 = vmatpush3.bf16.msra.mxu0 %v4909_v15  ;;  %v5367_v4 = vmul.f32 %v13557_v54, %v17285_v19 }
 0x87a   : > { %9441 = vpow2.f32 %v4640_v26  ;;  %v4636_v48 = vmul.f32 1.442695, %v4592_v57  ;;  %v4638_v46 = vmul.f32 1.442695, %v4593_v36  ;;  %v5366_v57 = vmul.f32 %v13557_v54, %v17274_v2 }
 0x87b   : > { %9443 = vpow2.f32 %v4642_v7  ;;  %v4923_v22 = vpop.permute.xlu0 %4922  ;;  %v5502_v7 = vmul.f32 %v13575_v27, %v17274_v2  ;;  %v5503_v36 = vmul.f32 %v13575_v27, %v17285_v19 }
 0x87c   : > { %4483 = vadd.xlane.f32.xlu0 %v4482_v43  ;;  %8660 = vmatprep.subr.bf16.mxu0 %v4923_v22  ;;  %9445 = vpow2.f32 %v4636_v48  ;;  %v4203_v48 = vpop.f32.mrf.mxu1  ;;  %v14052_v43 = vpop.permute.xlu1 %5402 }
 0x87d   : > { %9447 = vpow2.f32 %v4638_v46  ;;  %17400 = vst [vmem:[#allocation158_spill] sm:$0xff] %v14052_v43  ;;  %v17404_v43 = vld [vmem:[#allocation88_spill] sm:$0xff] }
 0x87e   : > { %v4205_v46 = vpop.f32.mrf.mxu1 }
 0x87f   : > { %v14022_v62 = vpop.permute.xlu0 %5400 }
 0x880   : > { %17397 = vst [vmem:[#allocation155_spill] sm:$0xff] %v14022_v62  ;;  %v4207_v22 = vpop.f32.mrf.mxu1  ;;  %v14069_v62 = vadd.f32 %v4205_v46, %v17404_v43 }
 0x883   : > { %v4907_v56 = vpop.permute.xlu0 %4906 }
 0x884   : > { %8661 = vmatpush3.bf16.msra.mxu0 %v4907_v56  ;;  %v4209_v56 = vpop.f32.mrf.mxu1 }
 0x885   : > { %5410 = vrot.lane.b32.xlu1 %v5367_v4, %s10084_s11  ;;  %v17401_v4 = vld [vmem:[#allocation94_spill] sm:$0xff] }
 0x887   : > { %v14027_v50 = vpop.eup %9441 }
 0x888   : > { %v14031_v40 = vpop.eup %9443 }
 0x889   : > { %5544 = vrot.lane.b32.xlu1 %v5502_v7, %s10084_s11  ;;  %v14036_v37 = vadd.f32 %v14031_v40, %v14027_v50  ;;  %v14038_v32 = vpop.eup %9445  ;;  %v14055_v7 = vadd.f32 %v4209_v56, %v17401_v4  ;;  %v14071_v56 = vpop.permute.xlu0 %5538 }
 0x88a   : > { %v14040_v15 = vpop.eup %9447  ;;  %17405 = vst [vmem:[#allocation160_spill] sm:$0xff] %v14071_v56 }
 0x88b   : > { %17398 = vst [vmem:[#allocation156_spill] sm:$0xff] %v14036_v37  ;;  %v14044_v26 = vadd.f32 %v14040_v15, %v14038_v32  ;;  %v4352_v37 = vsel %vm2990_vm1, %v13738_v51, 0.0  ;;  %v4355_v51 = vsel %vm2990_vm1, %v13637_v13, 0.0  ;;  %v4488_v13 = vsel %vm2990_vm1, %v13742_v5, 0.0 }
 0x88d   : > { %17399 = vst [vmem:[#allocation157_spill] sm:$0xff] %v14044_v26  ;;  %v14057_v26 = vpop.permute.xlu1 %5536 }
 0x88e   : > { %17402 = vst [vmem:[#allocation159_spill] sm:$0xff] %v14057_v26  ;;  %v4491_v26 = vsel %vm2990_vm1, %v13640_v12, 0.0 }
 0x892   : > { %5408 = vrot.lane.b32.xlu0 %v5366_v57, %s10084_s11  ;;  %v17403_v57 = vld [vmem:[#allocation93_spill] sm:$0xff] }
 0x893   : > { %v14062_v2 = vadd.f32 %v4207_v22, %v17403_v57  ;;  %v17406_v22 = vld [vmem:[#allocation87_spill] sm:$0xff] }
 0x896   : > { %5546 = vrot.lane.b32.xlu0 %v5503_v36, %s10084_s11  ;;  %v4539_v36 = vmax.f32 %v14062_v2, %v14055_v7 }
 0x8ad   : > { %4353 = vadd.xlane.f32.xlu1 %v4352_v37  ;;  %v14078_v37 = vadd.f32 %v4203_v48, %v17406_v22 }
 0x8b0   : > { %v14066_v19 = vpop.xlane.xlu1 %4341 }
 0x8b1   : > { %4540 = vmax.xlane.f32.xlu1 %v4539_v36  ;;  %v4536_v36 = vmax.f32 %v14078_v37, %v14069_v62 }
 0x8b4   : > { %v4529_v4 = vpop.xlane.xlu1 %4528 }
 0x8b5   : > { %4492 = vadd.xlane.f32.xlu1 %v4491_v26  ;;  %4356 = vadd.xlane.f32.xlu0 %v4355_v51 }
 0x8b8   : > { %v14082_v57 = vpop.xlane.xlu1 %4477  ;;  %v14084_v46 = vpop.xlane.xlu0 %4344 }
 0x8b9   : > { %17407 = vst [vmem:[#allocation161_spill] sm:$0xff] %v14084_v46  ;;  %4537 = vmax.xlane.f32.xlu0 %v4536_v36  ;;  %v4557_v43 = vmax.f32 %v4529_v4, %v14084_v46 }
 0x8bc   : > { %v14087_v56 = vpop.xlane.xlu1 %4480  ;;  %v4526_v12 = vpop.xlane.xlu0 %4525 }
 0x8bd   : > { %v14092_v48 = vmax.f32 %v4557_v43, %v14087_v56  ;;  %v4556_v26 = vmax.f32 %v4526_v12, %v14066_v19  ;;  %4489 = vadd.xlane.f32.xlu0 %v4488_v13  ;;  %v4871_v13 = vpack.c.bf16 %v13932_v1, %v13924_v63  ;;  %v4872_v1 = vpack.c.bf16 %v13938_v10, %v13947_v23 }
 0x8bf   : > { %v4598_v51 = vsub.f32 %v13862_v16, %v14092_v48  ;;  %v4599_v36 = vsub.f32 %v13852_v58, %v14092_v48  ;;  %v14100_v4 = vmax.f32 %v4556_v26, %v14082_v57  ;;  %v5369_v16 = vmul.f32 %v13557_v54, %v17286_v61 }
 0x8c0   : > { %v4905_v22 = vpop.permute.xlu1 %4904  ;;  %v4921_v46 = vpop.permute.xlu0 %4920  ;;  %v4874_v26 = vpack.c.bf16 %v14027_v50, %v14038_v32 }
 0x8c1   : > { %v4648_v28 = vmul.f32 1.442695, %v4598_v51  ;;  %v4650_v17 = vmul.f32 1.442695, %v4599_v36  ;;  %8662 = vmatprep.subr.bf16.mxu0 %v4921_v46  ;;  %v4596_v5 = vsub.f32 %v13892_v29, %v14100_v4  ;;  %v4597_v43 = vsub.f32 %v13877_v25, %v14100_v4  ;;  %v4213_v36 = vpop.f32.mrf.mxu1 }
 0x8c2   : > { %8663 = vmatpush3.bf16.msra.mxu0 %v4905_v22  ;;  %v17408_v46 = vpack.c.bf16 %v13910_v21, %v13904_v33  ;;  %v4873_v25 = vpack.c.bf16 %v13940_v55, %v13949_v47  ;;  %v5368_v21 = vmul.f32 %v13557_v54, %v17278_v34  ;;  %v5505_v55 = vmul.f32 %v13575_v27, %v17286_v61  ;;  %v17437_v61 = vld [vmem:[#allocation66_spill] sm:$0xff] }
 0x8c3   : > { %9449 = vpow2.f32 %v4648_v28  ;;  %v4644_v58 = vmul.f32 1.442695, %v4596_v5  ;;  %v4646_v12 = vmul.f32 1.442695, %v4597_v43  ;;  %v5504_v28 = vmul.f32 %v13575_v27, %v17278_v34  ;;  %v4215_v10 = vpop.f32.mrf.mxu1  ;;  %v17411_v5 = vld [vmem:[#allocation110_spill] sm:$0xff] }
 0x8c4   : > { %9451 = vpow2.f32 %v4650_v17  ;;  %v4870_v17 = vpack.c.bf16 %v13930_v3, %v13922_v6  ;;  %v4875_v6 = vpack.c.bf16 %v14031_v40, %v14040_v15  ;;  %v14149_v32 = vpop.permute.xlu1 %5540 }
 0x8c5   : > { %4985 = vmatmul.mubr.bf16.vlgmr.msra.gmra.mxu0 %v17408_v46  ;;  %9453 = vpow2.f32 %v4644_v58  ;;  %v4217_v40 = vpop.f32.mrf.mxu1  ;;  %v4358_v58 = vsel %vm2990_vm1, %v13744_v14, 0.0  ;;  %v4497_v14 = vsel %vm2990_vm1, %v13645_v53, 0.0  ;;  %v4494_v53 = vsel %vm2990_vm1, %v13751_v60, 0.0 }
 0x8c6   : > { %5414 = vrot.lane.b32.xlu1 %v5369_v16, %s10084_s11  ;;  %4992 = vmatprep.mubr.bf16.mxu0 %v4871_v13  ;;  %9455 = vpow2.f32 %v4646_v12  ;;  %v14140_v16 = vpop.permute.xlu0 %5404  ;;  %v17412_v12 = vld [vmem:[#allocation109_spill] sm:$0xff] }
 0x8c7   : > { %v4219_v15 = vpop.f32.mrf.mxu1  ;;  %v14145_v13 = vadd.f32 %v4217_v40, %v17412_v12 }
 0x8c8   : > { %v14138_v43 = vadd.f32 %v4219_v15, %v17411_v5 }
 0x8ca   : > { %5548 = vrot.lane.b32.xlu1 %v5504_v28, %s10084_s11  ;;  %v4545_v50 = vmax.f32 %v14145_v13, %v14138_v43  ;;  %v14151_v46 = vpop.permute.xlu0 %5406  ;;  %v17413_v28 = vld [vmem:[#allocation98_spill] sm:$0xff] }
 0x8cd   : > { %4993 = vmatmul.mubr.bf16.gmra.mxu0 %v4870_v17  ;;  %v14154_v17 = vadd.f32 %v4215_v10, %v17413_v28 }
 0x8ce   : > { %5000 = vmatprep.mubr.bf16.mxu0 %v4873_v25 }
 0x8d0   : > { %v9450_v29 = vpop.eup %9449 }
 0x8d1   : > { %v9452_v33 = vpop.eup %9451 }
 0x8d2   : > { %v14123_v63 = vadd.f32 %v9452_v33, %v9450_v29  ;;  %v9454_v22 = vpop.eup %9453 }
 0x8d3   : > { %5412 = vrot.lane.b32.xlu0 %v5368_v21, %s10084_s11  ;;  %v9456_v3 = vpop.eup %9455  ;;  %v4876_v23 = vpack.c.bf16 %v9450_v29, %v9454_v22  ;;  %v4361_v29 = vsel %vm2990_vm1, %v13643_v39, 0.0 }
 0x8d4   : > { %17409 = vst [vmem:[#allocation162_spill] sm:$0xff] %v14123_v63  ;;  %v14132_v47 = vadd.f32 %v9456_v3, %v9454_v22  ;;  %v4877_v51 = vpack.c.bf16 %v9452_v33, %v9456_v3  ;;  %v17414_v33 = vld [vmem:[#allocation95_spill] sm:$0xff]  ;;  %v14167_v22 = vpop.permute.xlu0 %5542 }
 0x8d5   : > { %5001 = vmatmul.mubr.bf16.gmra.mxu0 %v4872_v1  ;;  %v14163_v21 = vadd.f32 %v4213_v36, %v17414_v33  ;;  %v17431_v33 = vld [vmem:[#allocation16_spill] sm:$0xff] }
 0x8d6   : > { %5008 = vmatprep.mubr.bf16.mxu0 %v4875_v6  ;;  %17410 = vst [vmem:[#allocation163_spill] sm:$0xff] %v14132_v47 }
 0x8d7   : > { %5550 = vrot.lane.b32.xlu0 %v5505_v55, %s10084_s11  ;;  %v4542_v1 = vmax.f32 %v14163_v21, %v14154_v17 }
 0x8dd   : > { %5009 = vmatmul.mubr.bf16.gmra.mxu0 %v4874_v26 }
 0x8de   : > { %5016 = vmatprep.mubr.bf16.mxu0 %v4877_v51 }
 0x8e5   : > { %5017 = vmatmul.mubr.bf16.gmra.mxu0 %v4876_v23 }
 0x8ee   : > { %4359 = vadd.xlane.f32.xlu1 %v4358_v58  ;;  %v5371_v58 = vmul.f32 %v13557_v54, %v17287_v18 }
 0x8f2   : > { %4546 = vmax.xlane.f32.xlu1 %v4545_v50 }
 0x8f5   : > { %v14156_v25 = vpop.xlane.xlu1 %4347 }
 0x8f6   : > { %4498 = vadd.xlane.f32.xlu1 %v4497_v14  ;;  %4362 = vadd.xlane.f32.xlu0 %v4361_v29  ;;  %v17415_v14 = vld [vmem:[#allocation31_spill] sm:$0xff] }
 0x8f7   : > { %v5506_v29 = vmul.f32 %v13575_v27, %v17415_v14 }
 0x8f9   : > { %v4535_v6 = vpop.xlane.xlu1 %4534 }
 0x8fa   : > { %4543 = vmax.xlane.f32.xlu0 %v4542_v1 }
 0x8fd   : > { %v14169_v3 = vpop.xlane.xlu0 %4350  ;;  %v14174_v39 = vpop.xlane.xlu1 %4486 }
 0x8fe   : > { %v4559_v55 = vmax.f32 %v4535_v6, %v14169_v3  ;;  %4495 = vadd.xlane.f32.xlu0 %v4494_v53  ;;  %v5370_v53 = vmul.f32 %v13557_v54, %v17415_v14 }
 0x900   : > { %v14177_v26 = vmax.f32 %v4559_v55, %v14174_v39 }
 0x901   : > { %v4532_v51 = vpop.xlane.xlu0 %4531 }
 0x902   : > { %v4602_v36 = vsub.f32 %v13982_v52, %v14177_v26  ;;  %v4603_v10 = vsub.f32 %v13975_v41, %v14177_v26  ;;  %v4558_v15 = vmax.f32 %v4532_v51, %v14156_v25 }
 0x904   : > { %v4656_v23 = vmul.f32 1.442695, %v4602_v36  ;;  %v4658_v40 = vmul.f32 1.442695, %v4603_v10 }
 0x905   : > { %v14184_v60 = vpop.xlane.xlu0 %4483 }
 0x906   : > { %9457 = vpow2.f32 %v4656_v23  ;;  %v14189_v50 = vmax.f32 %v4558_v15, %v14184_v60 }
 0x907   : > { %9459 = vpow2.f32 %v4658_v40  ;;  %5418 = vrot.lane.b32.xlu1 %v5371_v58, %s10084_s11  ;;  %v5263_v58 = vpop.f32.mrf.mxu1 }
 0x908   : > { %v4600_v52 = vsub.f32 %v14001_v38, %v14189_v50  ;;  %v4601_v41 = vsub.f32 %v13991_v24, %v14189_v50  ;;  %v5507_v24 = vmul.f32 %v13575_v27, %v17287_v18  ;;  %v17420_v27 = vld [vmem:[#allocation42_spill] sm:$0xff] }
 0x909   : > { %v5265_v54 = vpop.f32.mrf.mxu1 }
 0x90a   : > { %v4652_v1 = vmul.f32 1.442695, %v4600_v52  ;;  %v4654_v6 = vmul.f32 1.442695, %v4601_v41 }
 0x90b   : > { %5552 = vrot.lane.b32.xlu1 %v5506_v29, %s10084_s11  ;;  %v5267_v52 = vpop.f32.mrf.mxu1  ;;  %v14209_v29 = vpop.permute.xlu1 %5410 }
 0x90c   : > { %9461 = vpow2.f32 %v4652_v1  ;;  %17418 = vst [vmem:[#allocation166_spill] sm:$0xff] %v14209_v29  ;;  %v17419_v1 = vld [vmem:[#allocation50_spill] sm:$0xff] }
 0x90d   : > { %9463 = vpow2.f32 %v4654_v6  ;;  %v5269_v41 = vpop.f32.mrf.mxu1 }
 0x90e   : > { %v14212_v6 = vadd.f32 %v5269_v41, %v17419_v1  ;;  %v17425_v41 = vld [vmem:[#allocation46_spill] sm:$0xff] }
 0x913   : > { %v9458_v55 = vpop.eup %9457 }
 0x914   : > { %v9460_v51 = vpop.eup %9459  ;;  %5416 = vrot.lane.b32.xlu0 %v5370_v53, %s10084_s11  ;;  %v5436_v53 = vsel %vm2990_vm1, %v17420_v27, 0.0  ;;  %v5439_v27 = vsel %vm2990_vm1, %v17425_v41, 0.0 }
 0x915   : > { %v14202_v38 = vadd.f32 %v9460_v51, %v9458_v55 }
 0x917   : > { %17416 = vst [vmem:[#allocation164_spill] sm:$0xff] %v14202_v38 }
 0x918   : > { %5554 = vrot.lane.b32.xlu0 %v5507_v24, %s10084_s11  ;;  %v17421_v24 = vld [vmem:[#allocation51_spill] sm:$0xff] }
 0x919   : > { %v9462_v36 = vpop.eup %9461  ;;  %v14217_v47 = vadd.f32 %v5267_v52, %v17421_v24  ;;  %v17429_v24 = vld [vmem:[#allocation132_spill] sm:$0xff] }
 0x91a   : > { %v9464_v10 = vpop.eup %9463  ;;  %v4878_v23 = vpack.c.bf16 %v9458_v55, %v9462_v36  ;;  %v5572_v41 = vsel %vm2990_vm1, %v17429_v24, 0.0 }
 0x91b   : > { %v4879_v40 = vpack.c.bf16 %v9460_v51, %v9464_v10  ;;  %v14207_v15 = vadd.f32 %v9464_v10, %v9462_v36  ;;  %v5623_v55 = vmax.f32 %v14217_v47, %v14212_v6  ;;  %v14221_v51 = vpop.permute.xlu1 %5544  ;;  %v14223_v36 = vpop.permute.xlu0 %5408  ;;  %v17424_v10 = vld [vmem:[#allocation54_spill] sm:$0xff] }
 0x91c   : > { %17422 = vst [vmem:[#allocation42_spill] sm:$0xff] %v14221_v51  ;;  %17423 = vst [vmem:[#allocation167_spill] sm:$0xff] %v14223_v36  ;;  %v17444_v36 = vld [vmem:[#allocation35_spill] sm:$0xff] }
 0x91d   : > { %17417 = vst [vmem:[#allocation165_spill] sm:$0xff] %v14207_v15  ;;  %5024 = vmatprep.mubr.bf16.mxu0 %v4879_v40  ;;  %v17426_v15 = vld [vmem:[#allocation68_spill] sm:$0xff] }
 0x91e   : > { %5025 = vmatmul.mubr.bf16.gmra.mxu0 %v4878_v23  ;;  %v14226_v23 = vadd.f32 %v5265_v54, %v17424_v10  ;;  %v5575_v52 = vsel %vm2990_vm1, %v17426_v15, 0.0 }
 0x91f   : > { %v14239_v63 = vpop.permute.xlu0 %5546 }
 0x920   : > { %17428 = vst [vmem:[#allocation46_spill] sm:$0xff] %v14239_v63  ;;  %v17438_v63 = vld [vmem:[#allocation36_spill] sm:$0xff] }
 0x92f   : > { %5437 = vadd.xlane.f32.xlu1 %v5436_v53  ;;  %v17427_v53 = vld [vmem:[#allocation53_spill] sm:$0xff] }
 0x930   : > { %v14235_v38 = vadd.f32 %v5263_v58, %v17427_v53 }
 0x933   : > { %5624 = vmax.xlane.f32.xlu1 %v5623_v55  ;;  %v5620_v55 = vmax.f32 %v14235_v38, %v14226_v23 }
 0x936   : > { %v14228_v40 = vpop.xlane.xlu1 %4353 }
 0x937   : > { %5440 = vadd.xlane.f32.xlu0 %v5439_v27  ;;  %5576 = vadd.xlane.f32.xlu1 %v5575_v52  ;;  %v17430_v27 = vld [vmem:[#allocation133_spill] sm:$0xff] }
 0x938   : > { %v14252_v52 = vunpack.i.l.bf16 %v17430_v27 }
 0x93a   : > { %v4541_v54 = vpop.xlane.xlu1 %4540 }
 0x93b   : > { %5621 = vmax.xlane.f32.xlu0 %v5620_v55 }
 0x93e   : > { %v14241_v10 = vpop.xlane.xlu0 %4356  ;;  %v14246_v15 = vpop.xlane.xlu1 %4492 }
 0x93f   : > { %v4561_v1 = vmax.f32 %v4541_v54, %v14241_v10  ;;  %5573 = vadd.xlane.f32.xlu0 %v5572_v41 }
 0x941   : > { %v14249_v58 = vmax.f32 %v4561_v1, %v14246_v15  ;;  %v6476_v1 = vmul.f32 %v14252_v52, %v17431_v33 }
 0x942   : > { %v4538_v53 = vpop.xlane.xlu0 %4537 }
 0x943   : > { %v4606_v55 = vsub.f32 %v14062_v2, %v14249_v58  ;;  %v4607_v14 = vsub.f32 %v14055_v7, %v14249_v58  ;;  %v4560_v54 = vmax.f32 %v4538_v53, %v14228_v40  ;;  %v17432_v53 = vld [vmem:[#allocation18_spill] sm:$0xff] }
 0x945   : > { %v4664_v18 = vmul.f32 1.442695, %v4606_v55  ;;  %v4666_v24 = vmul.f32 1.442695, %v4607_v14  ;;  %v14272_v14 = vunpack.i.h.bf16 %v17430_v27  ;;  %v6477_v55 = vmul.f32 %v14252_v52, %v17432_v53 }
 0x946   : > { %v14259_v41 = vpop.xlane.xlu0 %4489 }
 0x947   : > { %9465 = vpow2.f32 %v4664_v18  ;;  %v14264_v28 = vmax.f32 %v4560_v54, %v14259_v41 }
 0x948   : > { %9467 = vpow2.f32 %v4666_v24  ;;  %6508 = vrot.lane.b32.xlu1 %v6476_v1, %s10086_s21  ;;  %v6612_v24 = vmul.f32 %v14272_v14, %v17431_v33  ;;  %v9954_v1 = vld [vmem:[#allocation2 + $0xb0] ss:$12 sps:$4 sm:$0xff]  }
 0x949   : > { %v4604_v2 = vsub.f32 %v14078_v37, %v14264_v28  ;;  %v4605_v7 = vsub.f32 %v14069_v62, %v14264_v28  ;;  %v9953_v62 = vld [vmem:[#allocation2 + $0x170] ss:$12 sps:$4 sm:$0xff]  }
 0x94b   : > { %v4660_v12 = vmul.f32 1.442695, %v4604_v2  ;;  %v4662_v18 = vmul.f32 1.442695, %v4605_v7 }
 0x94c   : > { %6510 = vrot.lane.b32.xlu1 %v6477_v55, %s10086_s21 }
 0x94d   : > { %9469 = vpow2.f32 %v4660_v12  ;;  %v6613_v12 = vmul.f32 %v14272_v14, %v17432_v53 }
 0x94e   : > { %9471 = vpow2.f32 %v4662_v18 }
 0x950   : > { %6644 = vrot.lane.b32.xlu1 %v6612_v24, %s10086_s21  ;;  %v5273_v24 = vpop.f32.mrf.mxu1 }
 0x954   : > { %v9466_v37 = vpop.eup %9465 }
 0x955   : > { %v9468_v54 = vpop.eup %9467  ;;  %6054 = vrot.lane.b32.xlu0 %v9953_v62, %s10084_s11  ;;  %v5275_v62 = vpop.f32.mrf.mxu1 }
 0x956   : > { %v14281_v27 = vadd.f32 %v9468_v54, %v9466_v37 }
 0x957   : > { %v5277_v5 = vpop.f32.mrf.mxu1 }
 0x958   : > { %17433 = vst [vmem:[#allocation68_spill] sm:$0xff] %v14281_v27  ;;  %v14289_v27 = vpop.permute.xlu1 %5414 }
 0x959   : > { %6038 = vrot.lane.b32.xlu0 %v9954_v1, %s10084_s11  ;;  %17435 = vst [vmem:[#allocation133_spill] sm:$0xff] %v14289_v27  ;;  %v5279_v34 = vpop.f32.mrf.mxu1  ;;  %v17436_v1 = vld [vmem:[#allocation139_spill] sm:$0xff]  ;;  %v17443_v27 = vld [vmem:[#allocation41_spill] sm:$0xff] }
 0x95a   : > { %v9470_v2 = vpop.eup %9469  ;;  %v4676_v51 = vsub.f32 %v17437_v61, %v17436_v1  ;;  %v4724_v53 = vsub.f32 %v17438_v63, %v17436_v1  ;;  %v4677_v29 = vsub.f32 %v17443_v27, %v13842_v8  ;;  %v4725_v63 = vsub.f32 %v17444_v36, %v13842_v8  ;;  %v14309_v1 = vpop.permute.xlu0 %5412  ;;  %v17447_v36 = vld [vmem:[#allocation58_spill] sm:$0xff] }
 0x95b   : > { %v9472_v7 = vpop.eup %9471  ;;  %v4880_v55 = vpack.c.bf16 %v9466_v37, %v9470_v2  ;;  %v17439_v37 = vld [vmem:[#allocation55_spill] sm:$0xff]  ;;  %17445 = vst [vmem:[#allocation18_spill] sm:$0xff] %v14309_v1  ;;  %v4726_v27 = vsub.f32 %v13781_v31, %v13855_v59 }
 0x95c   : > { %v4881_v18 = vpack.c.bf16 %v9468_v54, %v9472_v7  ;;  %v14286_v33 = vadd.f32 %v9472_v7, %v9470_v2  ;;  %v14296_v54 = vadd.f32 %v5279_v34, %v17439_v37  ;;  %v14298_v2 = vpop.permute.xlu1 %5548  ;;  %v17441_v7 = vld [vmem:[#allocation134_spill] sm:$0xff]  ;;  %v4740_v61 = vmul.f32 1.442695, %v4724_v53  ;;  %v17446_v53 = vld [vmem:[#allocation56_spill] sm:$0xff] }
 0x95d   : > { %6646 = vrot.lane.b32.xlu0 %v6613_v12, %s10086_s21  ;;  %17440 = vst [vmem:[#allocation16_spill] sm:$0xff] %v14298_v2  ;;  %v5442_v12 = vsel %vm2990_vm1, %v17441_v7, 0.0  ;;  %v4678_v7 = vsub.f32 %v13772_v49, %v13855_v59  ;;  %v14320_v8 = vadd.f32 %v5273_v24, %v17446_v53  ;;  %v4679_v49 = vsub.f32 %v13740_v30, %v13872_v20  ;;  %v8281_v30 = vld [vmem:[%s16679_s5 + $0x1] sm:$0x1] }
 0x95e   : > { %17434 = vst [vmem:[#allocation132_spill] sm:$0xff] %v14286_v33  ;;  %5032 = vmatprep.mubr.bf16.mxu0 %v4881_v18  ;;  %v4692_v33 = vmul.f32 1.442695, %v4676_v51  ;;  %v4742_v51 = vmul.f32 1.442695, %v4725_v63  ;;  %v14327_v2 = vpop.permute.xlu0 %5550  ;;  %v17450_v63 = vld [vmem:[#allocation138_spill] sm:$0xff]  ;;  %v4727_v59 = vsub.f32 %v13776_v42, %v13872_v20  ;;  %v4227_v42 = vunpack.c.l.bf16 %v8281_v30 }
 0x95f   : > { %5033 = vmatmul.mubr.bf16.gmra.mxu0 %v4880_v55  ;;  %v17442_v55 = vld [vmem:[#allocation57_spill] sm:$0xff]  ;;  %17448 = vst [vmem:[#allocation139_spill] sm:$0xff] %v14327_v2  ;;  %v4744_v31 = vmul.f32 1.442695, %v4726_v27  ;;  %v17453_v53 = vld [vmem:[#allocation142_spill] sm:$0xff] }
 0x960   : > { %v14303_v18 = vadd.f32 %v5277_v5, %v17442_v55  ;;  %9473 = vpow2.f32 %v4692_v33  ;;  %v4694_v5 = vmul.f32 1.442695, %v4677_v29  ;;  %v4696_v55 = vmul.f32 1.442695, %v4678_v7  ;;  %v17449_v29 = vld [vmem:[#allocation136_spill] sm:$0xff] }
 0x961   : > { %9475 = vpow2.f32 %v4740_v61  ;;  %v5445_v61 = vsel %vm2990_vm1, %v17449_v29, 0.0  ;;  %v4680_v7 = vsub.f32 %v13834_v0, %v13887_v9  ;;  %v17451_v29 = vld [vmem:[#allocation135_spill] sm:$0xff]  ;;  %v4746_v20 = vmul.f32 1.442695, %v4727_v59  ;;  %v17455_v59 = vld [vmem:[#allocation14_spill] sm:$0xff] }
 0x962   : > { %v5629_v34 = vmax.f32 %v14303_v18, %v14296_v54  ;;  %9477 = vpow2.f32 %v4694_v5  ;;  %v14361_v30 = vrot.slane %v4227_v42, %v17455_v59 }
 0x963   : > { %9479 = vpow2.f32 %v4742_v51  ;;  %v5581_v51 = vsel %vm2990_vm1, %v17451_v29, 0.0  ;;  %v4700_v0 = vmul.f32 1.442695, %v4680_v7  ;;  %v17454_v29 = vld [vmem:[#allocation137_spill] sm:$0xff] }
 0x964   : > { %9481 = vpow2.f32 %v4696_v55  ;;  %v17452_v55 = vld [vmem:[#allocation140_spill] sm:$0xff] }
 0x965   : > { %9483 = vpow2.f32 %v4744_v31 }
 0x974   : > { %5443 = vadd.xlane.f32.xlu1 %v5442_v12  ;;  %v14323_v12 = vadd.f32 %v5275_v62, %v17447_v36  ;;  %v4698_v62 = vmul.f32 1.442695, %v4679_v49  ;;  %v4728_v49 = vsub.f32 %v17452_v55, %v13887_v9  ;;  %v4681_v36 = vsub.f32 %v17454_v29, %v17453_v53  ;;  %v17457_v9 = vld [vmem:[#allocation141_spill] sm:$0xff] }
 0x976   : > { %v5626_v24 = vmax.f32 %v14320_v8, %v14323_v12  ;;  %9485 = vpow2.f32 %v4698_v62  ;;  %v4729_v62 = vsub.f32 %v17457_v9, %v17453_v53  ;;  %v4748_v29 = vmul.f32 1.442695, %v4728_v49 }
 0x977   : > { %v14315_v37 = vpop.xlane.xlu1 %4359  ;;  %9487 = vpow2.f32 %v4746_v20  ;;  %v4702_v20 = vmul.f32 1.442695, %v4681_v36 }
 0x978   : > { %5630 = vmax.xlane.f32.xlu1 %v5629_v34  ;;  %v5578_v34 = vsel %vm2990_vm1, %v17450_v63, 0.0  ;;  %9489 = vpow2.f32 %v4700_v0  ;;  %v4750_v49 = vmul.f32 1.442695, %v4729_v62 }
 0x97b   : > { %v4547_v33 = vpop.xlane.xlu1 %4546 }
 0x97c   : > { %5446 = vadd.xlane.f32.xlu0 %v5445_v61  ;;  %5579 = vadd.xlane.f32.xlu1 %v5578_v34 }
 0x97f   : > { %v14342_v5 = vpop.xlane.xlu0 %4362  ;;  %v14347_v61 = vpop.xlane.xlu1 %4498 }
 0x980   : > { %v4563_v27 = vmax.f32 %v4547_v33, %v14342_v5  ;;  %5627 = vmax.xlane.f32.xlu0 %v5626_v24  ;;  %5582 = vadd.xlane.f32.xlu1 %v5581_v51  ;;  %v14363_v24 = vpop.eup %9473  ;;  %v17458_v51 = vld [vmem:[#allocation22_spill] sm:$0xff] }
 0x981   : > { %17456 = vst [vmem:[#allocation66_spill] sm:$0xff] %v14363_v24  ;;  %v14370_v55 = vpop.eup %9475  ;;  %v4888_v53 = vmul.f32 %v14363_v24, %v14361_v30 }
 0x982   : > { %v14352_v63 = vmax.f32 %v4563_v27, %v14347_v61  ;;  %v14368_v27 = vrot.slane %v4227_v42, %v17458_v51  ;;  %17459 = vst [vmem:[#allocation36_spill] sm:$0xff] %v14370_v55  ;;  %v14379_v51 = vpop.eup %9477 }
 0x983   : > { %v4544_v34 = vpop.xlane.xlu0 %4543  ;;  %17460 = vst [vmem:[#allocation134_spill] sm:$0xff] %v14379_v51 }
 0x984   : > { %v4610_v33 = vsub.f32 %v14145_v13, %v14352_v63  ;;  %v4611_v31 = vsub.f32 %v14138_v43, %v14352_v63  ;;  %v4682_v13 = vsub.f32 %v13972_v35, %v14014_v11  ;;  %v4562_v59 = vmax.f32 %v4544_v34, %v14315_v37 }
 0x985   : > { %v8664_v7 = vpop.f32.mrf.mxu0  ;;  %v5053_v35 = vmul.f32 %v14370_v55, %v14368_v27 }
 0x986   : > { %v4672_v43 = vmul.f32 1.442695, %v4610_v33  ;;  %v4674_v2 = vmul.f32 1.442695, %v4611_v31  ;;  %v14386_v33 = vpop.eup %9479  ;;  %v4704_v36 = vmul.f32 1.442695, %v4682_v13 }
 0x987   : > { %v8665_v1 = vpop.f32.mrf.mxu0  ;;  %v14377_v42 = vpop.xlane.xlu0 %4495  ;;  %17461 = vst [vmem:[#allocation41_spill] sm:$0xff] %v14386_v33 }
 0x988   : > { %9491 = vpow2.f32 %v4672_v43  ;;  %v8666_v9 = vadd.f32 %v8665_v1, %v8664_v7  ;;  %v14384_v0 = vmax.f32 %v4562_v59, %v14377_v42  ;;  %v4730_v1 = vsub.f32 %v13986_v44, %v14014_v11  ;;  %v17462_v7 = vld [vmem:[#allocation153_spill] sm:$0xff]  ;;  %v14396_v55 = vpop.eup %9481 }
 0x989   : > { %9493 = vpow2.f32 %v4674_v2  ;;  %v8667_v34 = vpop.f32.mrf.mxu0  ;;  %v4683_v43 = vsub.f32 %v17462_v7, %v14004_v45  ;;  %17463 = vst [vmem:[#allocation35_spill] sm:$0xff] %v14396_v55 }
 0x98a   : > { %9495 = vpow2.f32 %v4748_v29  ;;  %v4987_v31 = vadd.f32 %v8666_v9, %v4888_v53  ;;  %v4608_v2 = vsub.f32 %v14163_v21, %v14384_v0  ;;  %v4609_v62 = vsub.f32 %v14154_v17, %v14384_v0  ;;  %v14404_v9 = vpop.eup %9483  ;;  %v17466_v17 = vld [vmem:[#allocation154_spill] sm:$0xff] }
 0x98b   : > { %v8668_v59 = vpop.f32.mrf.mxu0  ;;  %9497 = vpow2.f32 %v4702_v20  ;;  %v4889_v29 = vmul.f32 %v14379_v51, %v14361_v30  ;;  %v5054_v53 = vmul.f32 %v14386_v33, %v14368_v27  ;;  %17465 = vst [vmem:[#allocation138_spill] sm:$0xff] %v14404_v9  ;;  %v4731_v7 = vsub.f32 %v17466_v17, %v14004_v45  ;;  %v17524_v33 = vld [vmem:[#allocation67_spill] sm:$0xff] }
 0x98c   : > { %v14398_v24 = vadd.f32 %v5053_v35, %v4987_v31  ;;  %v8669_v44 = vadd.f32 %v8668_v59, %v8667_v34  ;;  %9499 = vpow2.f32 %v4750_v49  ;;  %v4668_v11 = vmul.f32 1.442695, %v4608_v2  ;;  %v14410_v2 = vpop.eup %9485 }
 0x98d   : > { %v4670_v13 = vmul.f32 1.442695, %v4609_v62  ;;  %v8670_v21 = vpop.f32.mrf.mxu0  ;;  %9501 = vpow2.f32 %v4704_v36  ;;  %v4752_v20 = vmul.f32 1.442695, %v4730_v1  ;;  %v4706_v31 = vmul.f32 1.442695, %v4683_v43  ;;  %v14419_v43 = vpop.eup %9487 }
 0x98e   : > { %17464 = vst [vmem:[#allocation136_spill] sm:$0xff] %v14398_v24  ;;  %v4990_v35 = vadd.f32 %v8669_v44, %v4889_v29  ;;  %9503 = vpow2.f32 %v4668_v11  ;;  %v4890_v34 = vmul.f32 %v14396_v55, %v14361_v30  ;;  %17467 = vst [vmem:[#allocation135_spill] sm:$0xff] %v14410_v2  ;;  %v4684_v62 = vsub.f32 %v14066_v19, %v14100_v4  ;;  %v9955_v1 = vld [vmem:[#allocation2 + $0x98] ss:$12 sps:$4 sm:$0xff]   ;;  %v14427_v17 = vpop.eup %9489 }
 0x98f   : > { %v8671_v49 = vpop.f32.mrf.mxu0  ;;  %9505 = vpow2.f32 %v4670_v13  ;;  %v5055_v45 = vmul.f32 %v14404_v9, %v14368_v27  ;;  %17469 = vst [vmem:[#allocation142_spill] sm:$0xff] %v14419_v43  ;;  %v4754_v29 = vmul.f32 1.442695, %v4731_v7  ;;  %v4732_v44 = vsub.f32 %v14082_v57, %v14100_v4  ;;  %17471 = vst [vmem:[#allocation137_spill] sm:$0xff] %v14427_v17  ;;  %v9956_v55 = vld [vmem:[#allocation2 + $0x158] ss:$12 sps:$4 sm:$0xff]  }
 0x990   : > { %v14414_v59 = vadd.f32 %v5054_v53, %v4990_v35  ;;  %v8672_v24 = vadd.f32 %v8671_v49, %v8670_v21  ;;  %9507 = vpow2.f32 %v4752_v20  ;;  %v4891_v19 = vmul.f32 %v14410_v2, %v14361_v30  ;;  %v17470_v53 = vld [vmem:[#allocation17_spill] sm:$0xff] }
 0x991   : > { %v8673_v36 = vpop.f32.mrf.mxu0  ;;  %6036 = vrot.lane.b32.xlu1 %v9955_v1, %s10084_s11  ;;  %9509 = vpow2.f32 %v4706_v31  ;;  %v6479_v21 = vmul.f32 %v14252_v52, %v17470_v53  ;;  %v17472_v35 = vld [vmem:[#allocation161_spill] sm:$0xff]  ;;  %v4708_v1 = vmul.f32 1.442695, %v4684_v62  ;;  %v5056_v57 = vmul.f32 %v14419_v43, %v14368_v27 }
 0x992   : > { %17468 = vst [vmem:[#allocation140_spill] sm:$0xff] %v14414_v59  ;;  %v4995_v11 = vadd.f32 %v8672_v24, %v4890_v34  ;;  %v4685_v49 = vsub.f32 %v17472_v35, %v14092_v48  ;;  %9511 = vpow2.f32 %v4754_v29  ;;  %v4733_v31 = vsub.f32 %v14087_v56, %v14092_v48 }
 0x993   : > { %v8674_v13 = vpop.f32.mrf.mxu0  ;;  %v4756_v34 = vmul.f32 1.442695, %v4732_v44  ;;  %9513 = vpow2.f32 %v4708_v1 }
 0x994   : > { %v14431_v7 = vadd.f32 %v5055_v45, %v4995_v11  ;;  %v8675_v20 = vadd.f32 %v8674_v13, %v8673_v36  ;;  %v4892_v45 = vmul.f32 %v14427_v17, %v14361_v30  ;;  %v17475_v11 = vld [vmem:[#allocation15_spill] sm:$0xff]  ;;  %v4710_v29 = vmul.f32 1.442695, %v4685_v49 }
 0x995   : > { %v9492_v59 = vpop.eup %9491  ;;  %v8676_v4 = vpop.f32.mrf.mxu0  ;;  %6514 = vrot.lane.b32.xlu1 %v6479_v21, %s10086_s21  ;;  %v6614_v13 = vmul.f32 %v14272_v14, %v17475_v11  ;;  %9515 = vpow2.f32 %v4756_v34  ;;  %v6478_v1 = vmul.f32 %v14252_v52, %v17475_v11 }
 0x996   : > { %17473 = vst [vmem:[#allocation141_spill] sm:$0xff] %v14431_v7  ;;  %v9494_v24 = vpop.eup %9493  ;;  %v4998_v9 = vadd.f32 %v8675_v20, %v4891_v19  ;;  %6052 = vrot.lane.b32.xlu0 %v9956_v55, %s10084_s11  ;;  %v4758_v19 = vmul.f32 1.442695, %v4733_v31  ;;  %v9957_v7 = vld [vmem:[#allocation2 + $0x140] ss:$12 sps:$4 sm:$0xff]   ;;  %9517 = vpow2.f32 %v4710_v29 }
 0x997   : > { %v14439_v62 = vpop.eup %9495  ;;  %v8677_v36 = vpop.f32.mrf.mxu0  ;;  %v14445_v21 = vadd.f32 %v9494_v24, %v9492_v59 }
 0x998   : > { %17474 = vst [vmem:[#allocation153_spill] sm:$0xff] %v14439_v62  ;;  %v14447_v35 = vadd.f32 %v5056_v57, %v4998_v9  ;;  %v8678_v56 = vadd.f32 %v8677_v36, %v8676_v4  ;;  %v14449_v48 = vpop.eup %9497  ;;  %v5057_v17 = vmul.f32 %v14439_v62, %v14368_v27  ;;  %9519 = vpow2.f32 %v4758_v19 }
 0x999   : > { %17476 = vst [vmem:[#allocation154_spill] sm:$0xff] %v14445_v21  ;;  %17478 = vst [vmem:[#allocation161_spill] sm:$0xff] %v14449_v48  ;;  %v8679_v44 = vpop.f32.mrf.mxu0  ;;  %6648 = vrot.lane.b32.xlu1 %v6614_v13, %s10086_s21  ;;  %v14452_v55 = vpop.eup %9499  ;;  %v4893_v31 = vmul.f32 %v14449_v48, %v14361_v30  ;;  %v17504_v48 = vld [vmem:[#allocation61_spill] sm:$0xff] }
 0x99a   : > { %17477 = vst [vmem:[#allocation17_spill] sm:$0xff] %v14447_v35  ;;  %17479 = vst [vmem:[#allocation15_spill] sm:$0xff] %v14452_v55  ;;  %v5003_v20 = vadd.f32 %v8678_v56, %v4892_v45  ;;  %6050 = vrot.lane.b32.xlu0 %v9957_v7, %s10084_s11  ;;  %v14457_v49 = vpop.eup %9501  ;;  %v5058_v36 = vmul.f32 %v14452_v55, %v14368_v27 }
 0x99b   : > { %17480 = vst [vmem:[#allocation168_spill] sm:$0xff] %v14457_v49  ;;  %v8680_v9 = vpop.f32.mrf.mxu0  ;;  %v9504_v57 = vpop.eup %9503 }
 0x99c   : > { %v14461_v4 = vadd.f32 %v5057_v17, %v5003_v20  ;;  %v8681_v34 = vadd.f32 %v8680_v9, %v8679_v44  ;;  %v9506_v45 = vpop.eup %9505  ;;  %v4882_v7 = vpack.c.bf16 %v9492_v59, %v9504_v57  ;;  %v4894_v44 = vmul.f32 %v14457_v49, %v14361_v30 }
 0x99d   : > { %v8682_v13 = vpop.f32.mrf.mxu0  ;;  %v4883_v62 = vpack.c.bf16 %v9494_v24, %v9506_v45  ;;  %v14468_v11 = vadd.f32 %v9506_v45, %v9504_v57  ;;  %v14470_v29 = vpop.eup %9507 }
 0x99e   : > { %17481 = vst [vmem:[#allocation169_spill] sm:$0xff] %v14461_v4  ;;  %v5006_v56 = vadd.f32 %v8681_v34, %v4893_v31  ;;  %6512 = vrot.lane.b32.xlu0 %v6478_v1, %s10086_s21  ;;  %17483 = vst [vmem:[#allocation171_spill] sm:$0xff] %v14470_v29  ;;  %v14472_v20 = vpop.eup %9509  ;;  %v5059_v24 = vmul.f32 %v14470_v29, %v14368_v27  ;;  %v9958_v1 = vld [vmem:[#allocation2 + $0x80] ss:$12 sps:$4 sm:$0xff]   ;;  %v14518_v29 = vpop.permute.xlu0 %5416 }
 0x99f   : > { %17482 = vst [vmem:[#allocation170_spill] sm:$0xff] %v14468_v11  ;;  %v8683_v17 = vpop.f32.mrf.mxu0  ;;  %17484 = vst [vmem:[#allocation172_spill] sm:$0xff] %v14472_v20  ;;  %5040 = vmatprep.mubr.bf16.mxu0 %v4883_v62  ;;  %v14481_v57 = vpop.eup %9511  ;;  %v4895_v62 = vmul.f32 %v14472_v20, %v14361_v30 }
 0x9a0   : > { %v14474_v4 = vadd.f32 %v5058_v36, %v5006_v56  ;;  %v8684_v9 = vadd.f32 %v8683_v17, %v8682_v13  ;;  %5041 = vmatmul.mubr.bf16.gmra.mxu0 %v4882_v7  ;;  %17486 = vst [vmem:[#allocation174_spill] sm:$0xff] %v14481_v57  ;;  %v6615_v36 = vmul.f32 %v14272_v14, %v17470_v53  ;;  %v14489_v13 = vpop.eup %9513 }
 0x9a1   : > { %v8685_v59 = vpop.f32.mrf.mxu0  ;;  %17488 = vst [vmem:[#allocation176_spill] sm:$0xff] %v14489_v13  ;;  %v5060_v17 = vmul.f32 %v14481_v57, %v14368_v27  ;;  %v17501_v57 = vld [vmem:[#allocation64_spill] sm:$0xff] }
 0x9a2   : > { %17485 = vst [vmem:[#allocation173_spill] sm:$0xff] %v14474_v4  ;;  %v5011_v19 = vadd.f32 %v8684_v9, %v4894_v44  ;;  %6034 = vrot.lane.b32.xlu0 %v9958_v1, %s10084_s11  ;;  %v14494_v44 = vpop.eup %9515 }
 0x9a3   : > { %v8686_v31 = vpop.f32.mrf.mxu0  ;;  %17489 = vst [vmem:[#allocation177_spill] sm:$0xff] %v14494_v44  ;;  %v14500_v1 = vpop.eup %9517 }
 0x9a4   : > { %v14483_v34 = vadd.f32 %v5059_v24, %v5011_v19  ;;  %v8687_v45 = vadd.f32 %v8686_v31, %v8685_v59  ;;  %v4896_v59 = vmul.f32 %v14489_v13, %v14361_v30  ;;  %17491 = vst [vmem:[#allocation179_spill] sm:$0xff] %v14500_v1 }
 0x9a5   : > { %v8688_v7 = vpop.f32.mrf.mxu0 }
 0x9a6   : > { %17487 = vst [vmem:[#allocation175_spill] sm:$0xff] %v14483_v34  ;;  %v5014_v56 = vadd.f32 %v8687_v45, %v4895_v62  ;;  %6650 = vrot.lane.b32.xlu0 %v6615_v36, %s10086_s21  ;;  %v5061_v62 = vmul.f32 %v14494_v44, %v14368_v27  ;;  %v14504_v45 = vpop.eup %9519  ;;  %v5283_v36 = vpop.f32.mrf.mxu1 }
 0x9a7   : > { %v8689_v9 = vpop.f32.mrf.mxu0  ;;  %17492 = vst [vmem:[#allocation180_spill] sm:$0xff] %v14504_v45  ;;  %v14548_v35 = vadd.f32 %v5283_v36, %v17504_v48 }
 0x9a8   : > { %v14496_v19 = vadd.f32 %v5060_v17, %v5014_v56  ;;  %v8690_v24 = vadd.f32 %v8689_v9, %v8688_v7  ;;  %v4897_v56 = vmul.f32 %v14500_v1, %v14361_v30  ;;  %v5062_v9 = vmul.f32 %v14504_v45, %v14368_v27  ;;  %v17498_v45 = vld [vmem:[#allocation62_spill] sm:$0xff] }
 0x9a9   : > { %v8691_v53 = vpop.f32.mrf.mxu0 }
 0x9aa   : > { %17490 = vst [vmem:[#allocation178_spill] sm:$0xff] %v14496_v19  ;;  %v5019_v31 = vadd.f32 %v8690_v24, %v4896_v59  ;;  %v14510_v19 = vpop.permute.xlu1 %5418  ;;  %v5285_v59 = vpop.f32.mrf.mxu1 }
 0x9ab   : > { %v8692_v34 = vpop.f32.mrf.mxu0  ;;  %v14540_v20 = vadd.f32 %v5285_v59, %v17501_v57 }
 0x9ac   : > { %v14506_v4 = vadd.f32 %v5061_v62, %v5019_v31  ;;  %v8693_v17 = vadd.f32 %v8692_v34, %v8691_v53  ;;  %v5287_v44 = vpop.f32.mrf.mxu1  ;;  %v14525_v34 = vpop.permute.xlu0 %5554 }
 0x9ae   : > { %17493 = vst [vmem:[#allocation181_spill] sm:$0xff] %v14506_v4  ;;  %v5022_v7 = vadd.f32 %v8693_v17, %v4897_v56  ;;  %v14516_v13 = vpop.permute.xlu1 %5552  ;;  %v5289_v31 = vpop.f32.mrf.mxu1  ;;  %v17496_v4 = vld [vmem:[#allocation59_spill] sm:$0xff]  ;;  %v17497_v56 = vld [vmem:[#allocation144_spill] sm:$0xff] }
 0x9af   : > { %v14523_v1 = vadd.f32 %v5289_v31, %v17496_v4  ;;  %v5448_v17 = vsel %vm2990_vm1, %v17497_v56, 0.0 }
 0x9b0   : > { %v14514_v24 = vadd.f32 %v5062_v9, %v5022_v7  ;;  %v14530_v7 = vadd.f32 %v5287_v44, %v17498_v45  ;;  %v17503_v44 = vld [vmem:[#allocation150_spill] sm:$0xff] }
 0x9b2   : > { %17494 = vst [vmem:[#allocation182_spill] sm:$0xff] %v14514_v24  ;;  %v5635_v9 = vmax.f32 %v14530_v7, %v14523_v1 }
 0x9b8   : > { %v14520_v62 = vpop.xlane.xlu1 %5437 }
 0x9b9   : > { %17495 = vst [vmem:[#allocation183_spill] sm:$0xff] %v14520_v62 }
 0x9bc   : > { %v5625_v53 = vpop.xlane.xlu1 %5624 }
 0x9bd   : > { %5449 = vadd.xlane.f32.xlu1 %v5448_v17  ;;  %v5451_v17 = vsel %vm2990_vm1, %v17503_v44, 0.0 }
 0x9c0   : > { %v14534_v24 = vpop.xlane.xlu0 %5440  ;;  %v14537_v31 = vpop.xlane.xlu1 %5576 }
 0x9c1   : > { %17499 = vst [vmem:[#allocation59_spill] sm:$0xff] %v14534_v24  ;;  %v5669_v49 = vmax.f32 %v5625_v53, %v14534_v24  ;;  %5636 = vmax.xlane.f32.xlu1 %v5635_v9  ;;  %17500 = vst [vmem:[#allocation144_spill] sm:$0xff] %v14537_v31  ;;  %v17505_v9 = vld [vmem:[#allocation151_spill] sm:$0xff] }
 0x9c2   : > { %v5584_v59 = vsel %vm2990_vm1, %v17505_v9, 0.0 }
 0x9c3   : > { %v14543_v55 = vmax.f32 %v5669_v49, %v14537_v31  ;;  %v5632_v49 = vmax.f32 %v14548_v35, %v14540_v20 }
 0x9c4   : > { %v5622_v56 = vpop.xlane.xlu0 %5621 }
 0x9c5   : > { %17502 = vst [vmem:[#allocation62_spill] sm:$0xff] %v14543_v55  ;;  %v5702_v11 = vsub.f32 %v14217_v47, %v14543_v55  ;;  %v5703_v53 = vsub.f32 %v14212_v6, %v14543_v55  ;;  %5452 = vadd.xlane.f32.xlu0 %v5451_v17  ;;  %5585 = vadd.xlane.f32.xlu1 %v5584_v59  ;;  %v17508_v17 = vld [vmem:[#allocation152_spill] sm:$0xff] }
 0x9c6   : > { %v5668_v44 = vmax.f32 %v5622_v56, %v14520_v62  ;;  %v4686_v47 = vsub.f32 %v14156_v25, %v14189_v50  ;;  %v5587_v9 = vsel %vm2990_vm1, %v17508_v17, 0.0 }
 0x9c7   : > { %v5736_v21 = vmul.f32 1.442695, %v5702_v11  ;;  %v5738_v43 = vmul.f32 1.442695, %v5703_v53  ;;  %v4734_v11 = vsub.f32 %v14184_v60, %v14189_v50 }
 0x9c8   : > { %v14559_v36 = vpop.xlane.xlu0 %5573  ;;  %v4712_v59 = vmul.f32 1.442695, %v4686_v47 }
 0x9c9   : > { %17506 = vst [vmem:[#allocation64_spill] sm:$0xff] %v14559_v36  ;;  %9521 = vpow2.f32 %v5736_v21  ;;  %v14564_v6 = vmax.f32 %v5668_v44, %v14559_v36  ;;  %5633 = vmax.xlane.f32.xlu0 %v5632_v49  ;;  %5588 = vadd.xlane.f32.xlu1 %v5587_v9  ;;  %v4687_v21 = vsub.f32 %v14169_v3, %v14177_v26  ;;  %v4760_v17 = vmul.f32 1.442695, %v4734_v11  ;;  %v9959_v9 = vld [vmem:[#allocation2 + $0x68] ss:$12 sps:$4 sm:$0xff]  }
 0x9ca   : > { %9523 = vpow2.f32 %v5738_v43  ;;  %v4735_v43 = vsub.f32 %v14174_v39, %v14177_v26  ;;  %v17510_v11 = vld [vmem:[#allocation19_spill] sm:$0xff]  ;;  %v4688_v36 = vsub.f32 %v14228_v40, %v14264_v28 }
 0x9cb   : > { %17507 = vst [vmem:[#allocation150_spill] sm:$0xff] %v14564_v6  ;;  %v5700_v56 = vsub.f32 %v14235_v38, %v14564_v6  ;;  %v5701_v53 = vsub.f32 %v14226_v23, %v14564_v6  ;;  %v4714_v50 = vmul.f32 1.442695, %v4687_v21  ;;  %v4736_v6 = vsub.f32 %v14259_v41, %v14264_v28 }
 0x9cc   : > { %v6055_v25 = vpop.permute.xlu0 %6054  ;;  %v4762_v38 = vmul.f32 1.442695, %v4735_v43  ;;  %v4689_v28 = vsub.f32 %v14241_v10, %v14249_v58  ;;  %v17531_v10 = vld [vmem:[#allocation70_spill] sm:$0xff] }
 0x9cd   : > { %v5732_v49 = vmul.f32 1.442695, %v5700_v56  ;;  %v5734_v44 = vmul.f32 1.442695, %v5701_v53  ;;  %8744 = vmatprep.subr.bf16.mxu0 %v6055_v25  ;;  %v6481_v56 = vmul.f32 %v14252_v52, %v17510_v11  ;;  %v4764_v41 = vmul.f32 1.442695, %v4736_v6 }
 0x9cf   : > { %9525 = vpow2.f32 %v5732_v49 }
 0x9d0   : > { %9527 = vpow2.f32 %v5734_v44  ;;  %v6039_v60 = vpop.permute.xlu0 %6038  ;;  %v9960_v44 = vld [vmem:[#allocation2 + $0x128] ss:$12 sps:$4 sm:$0xff]  }
 0x9d1   : > { %9529 = vpow2.f32 %v4712_v59  ;;  %8745 = vmatpush3.bf16.msra.mxu0 %v6039_v60 }
 0x9d2   : > { %9531 = vpow2.f32 %v4760_v17 }
 0x9d3   : > { %9533 = vpow2.f32 %v4714_v50 }
 0x9d4   : > { %9535 = vpow2.f32 %v4762_v38  ;;  %v17514_v38 = vld [vmem:[#allocation20_spill] sm:$0xff] }
 0x9d6   : > { %v14578_v23 = vpop.eup %9521 }
 0x9d7   : > { %v9524_v3 = vpop.eup %9523 }
 0x9d8   : > { %v14581_v47 = vadd.f32 %v9524_v3, %v14578_v23 }
 0x9da   : > { %17509 = vst [vmem:[#allocation61_spill] sm:$0xff] %v14581_v47  ;;  %6032 = vrot.lane.b32.xlu1 %v9959_v9, %s10084_s11  ;;  %v6616_v9 = vmul.f32 %v14272_v14, %v17514_v38  ;;  %v4691_v47 = vsub.f32 %v14342_v5, %v14352_v63 }
 0x9dc   : > { %v14584_v39 = vpop.eup %9525 }
 0x9dd   : > { %v9528_v26 = vpop.eup %9527 }
 0x9de   : > { %v14590_v25 = vpop.eup %9529  ;;  %v8694_v21 = vpop.f32.mrf.mxu0  ;;  %v5989_v59 = vpack.c.bf16 %v9524_v3, %v9528_v26  ;;  %v14593_v49 = vadd.f32 %v9528_v26, %v14584_v39  ;;  %6518 = vrot.lane.b32.xlu1 %v6481_v56, %s10086_s21 }
 0x9df   : > { %17511 = vst [vmem:[#allocation151_spill] sm:$0xff] %v14590_v25  ;;  %6048 = vrot.lane.b32.xlu0 %v9960_v44, %s10084_s11  ;;  %v14597_v43 = vpop.eup %9531  ;;  %v4898_v60 = vmul.f32 %v14590_v25, %v14361_v30  ;;  %v9961_v44 = vld [vmem:[#allocation2 + $0x110] ss:$12 sps:$4 sm:$0xff]  }
 0x9e0   : > { %17512 = vst [vmem:[#allocation152_spill] sm:$0xff] %v14593_v49  ;;  %17513 = vst [vmem:[#allocation19_spill] sm:$0xff] %v14597_v43  ;;  %v8695_v17 = vpop.f32.mrf.mxu0  ;;  %6104 = vmatprep.mubr.bf16.mxu0 %v5989_v59  ;;  %v14603_v3 = vpop.eup %9533  ;;  %v5063_v56 = vmul.f32 %v14597_v43, %v14368_v27 }
 0x9e1   : > { %v8696_v50 = vadd.f32 %v8695_v17, %v8694_v21  ;;  %17515 = vst [vmem:[#allocation20_spill] sm:$0xff] %v14603_v3  ;;  %v14609_v59 = vpop.eup %9535  ;;  %v4899_v21 = vmul.f32 %v14603_v3, %v14361_v30 }
 0x9e2   : > { %v8697_v26 = vpop.f32.mrf.mxu0  ;;  %6652 = vrot.lane.b32.xlu1 %v6616_v9, %s10086_s21  ;;  %17516 = vst [vmem:[#allocation184_spill] sm:$0xff] %v14609_v59  ;;  %v5064_v43 = vmul.f32 %v14609_v59, %v14368_v27 }
 0x9e3   : > { %v5027_v53 = vadd.f32 %v8696_v50, %v4898_v60  ;;  %6046 = vrot.lane.b32.xlu0 %v9961_v44, %s10084_s11  ;;  %v6480_v60 = vmul.f32 %v14252_v52, %v17514_v38  ;;  %v9962_v44 = vld [vmem:[#allocation2 + $0x50] ss:$12 sps:$4 sm:$0xff]   ;;  %v5293_v38 = vpop.f32.mrf.mxu1 }
 0x9e4   : > { %v8698_v2 = vpop.f32.mrf.mxu0  ;;  %v14682_v6 = vadd.f32 %v5293_v38, %v17531_v10  ;;  %v17532_v38 = vld [vmem:[#allocation160_spill] sm:$0xff] }
 0x9e5   : > { %v14611_v25 = vadd.f32 %v5063_v56, %v5027_v53  ;;  %v8699_v17 = vadd.f32 %v8698_v2, %v8697_v26  ;;  %v14623_v53 = vpop.permute.xlu1 %6508  ;;  %v6617_v56 = vmul.f32 %v14272_v14, %v17510_v11 }
 0x9e7   : > { %17517 = vst [vmem:[#allocation185_spill] sm:$0xff] %v14611_v25  ;;  %v5030_v50 = vadd.f32 %v8699_v17, %v4899_v21  ;;  %6516 = vrot.lane.b32.xlu0 %v6480_v60, %s10086_s21  ;;  %v5295_v21 = vpop.f32.mrf.mxu1  ;;  %v14634_v60 = vpop.permute.xlu0 %6646  ;;  %v17520_v25 = vld [vmem:[#allocation65_spill] sm:$0xff] }
 0x9e9   : > { %v14620_v9 = vadd.f32 %v5064_v43, %v5030_v50  ;;  %v14628_v2 = vpop.permute.xlu1 %6510  ;;  %v5297_v43 = vpop.f32.mrf.mxu1 }
 0x9ea   : > { %v14646_v51 = vadd.f32 %v5297_v43, %v17524_v33  ;;  %v17595_v33 = vld [vmem:[#allocation16_spill] sm:$0xff] }
 0x9eb   : > { %17518 = vst [vmem:[#allocation186_spill] sm:$0xff] %v14620_v9  ;;  %6030 = vrot.lane.b32.xlu0 %v9962_v44, %s10084_s11  ;;  %v5299_v44 = vpop.f32.mrf.mxu1 }
 0x9ec   : > { %v14637_v9 = vadd.f32 %v5299_v44, %v17520_v25 }
 0x9ed   : > { %v14630_v26 = vpop.permute.xlu1 %6644 }
 0x9ee   : > { %v5641_v44 = vmax.f32 %v14646_v51, %v14637_v9 }
 0x9ef   : > { %6654 = vrot.lane.b32.xlu0 %v6617_v56, %s10086_s21  ;;  %v17523_v56 = vld [vmem:[#allocation155_spill] sm:$0xff] }
 0x9f0   : > { %v5454_v3 = vsel %vm2990_vm1, %v17523_v56, 0.0 }
 0x9fd   : > { %v14632_v17 = vpop.xlane.xlu1 %5443 }
 0x9fe   : > { %17519 = vst [vmem:[#allocation187_spill] sm:$0xff] %v14632_v17 }
 0xa01   : > { %v5631_v50 = vpop.xlane.xlu1 %5630 }
 0xa05   : > { %v14639_v59 = vpop.xlane.xlu0 %5446  ;;  %v14641_v11 = vpop.xlane.xlu1 %5579 }
 0xa06   : > { %17521 = vst [vmem:[#allocation65_spill] sm:$0xff] %v14639_v59  ;;  %17522 = vst [vmem:[#allocation188_spill] sm:$0xff] %v14641_v11  ;;  %5455 = vadd.xlane.f32.xlu1 %v5454_v3  ;;  %v5671_v62 = vmax.f32 %v5631_v50, %v14639_v59  ;;  %v4716_v3 = vmul.f32 1.442695, %v4688_v36  ;;  %v17528_v59 = vld [vmem:[#allocation71_spill] sm:$0xff] }
 0xa07   : > { %v14667_v55 = vadd.f32 %v5295_v21, %v17528_v59  ;;  %v17530_v21 = vld [vmem:[#allocation159_spill] sm:$0xff] }
 0xa08   : > { %9537 = vpow2.f32 %v4716_v3 }
 0xa09   : > { %v5628_v31 = vpop.xlane.xlu0 %5627  ;;  %v14655_v24 = vpop.xlane.xlu1 %5582  ;;  %9539 = vpow2.f32 %v4764_v41 }
 0xa0a   : > { %17525 = vst [vmem:[#allocation155_spill] sm:$0xff] %v14655_v24  ;;  %v5670_v56 = vmax.f32 %v5628_v31, %v14632_v17  ;;  %v14659_v43 = vmax.f32 %v5671_v62, %v14655_v24  ;;  %5642 = vmax.xlane.f32.xlu1 %v5641_v44  ;;  %v17529_v17 = vld [vmem:[#allocation158_spill] sm:$0xff] }
 0xa0b   : > { %v5457_v62 = vsel %vm2990_vm1, %v17529_v17, 0.0 }
 0xa0c   : > { %17526 = vst [vmem:[#allocation189_spill] sm:$0xff] %v14659_v43  ;;  %v14662_v40 = vmax.f32 %v5670_v56, %v14641_v11  ;;  %v5706_v50 = vsub.f32 %v14303_v18, %v14659_v43  ;;  %v5707_v18 = vsub.f32 %v14296_v54, %v14659_v43  ;;  %v5590_v56 = vsel %vm2990_vm1, %v17530_v21, 0.0 }
 0xa0d   : > { %v6053_v49 = vpop.permute.xlu0 %6052  ;;  %v6037_v31 = vpop.permute.xlu1 %6036  ;;  %v4737_v11 = vsub.f32 %v14246_v15, %v14249_v58  ;;  %v5638_v54 = vmax.f32 %v14682_v6, %v14667_v55  ;;  %v5460_v43 = vsel %vm2990_vm1, %v14140_v16, 0.0 }
 0xa0e   : > { %17527 = vst [vmem:[#allocation190_spill] sm:$0xff] %v14662_v40  ;;  %v5704_v36 = vsub.f32 %v14320_v8, %v14662_v40  ;;  %v5705_v44 = vsub.f32 %v14323_v12, %v14662_v40  ;;  %8746 = vmatprep.subr.bf16.mxu0 %v6053_v49  ;;  %5458 = vadd.xlane.f32.xlu0 %v5457_v62  ;;  %v5744_v24 = vmul.f32 1.442695, %v5706_v50  ;;  %v4718_v12 = vmul.f32 1.442695, %v4689_v28 }
 0xa0f   : > { %5591 = vadd.xlane.f32.xlu1 %v5590_v56  ;;  %8747 = vmatpush3.bf16.msra.mxu0 %v6037_v31  ;;  %v5746_v21 = vmul.f32 1.442695, %v5707_v18  ;;  %v5593_v40 = vsel %vm2990_vm1, %v17532_v38, 0.0  ;;  %v4766_v15 = vmul.f32 1.442695, %v4737_v11 }
 0xa10   : > { %v5740_v8 = vmul.f32 1.442695, %v5704_v36  ;;  %v5742_v17 = vmul.f32 1.442695, %v5705_v44 }
 0xa11   : > { %v6051_v49 = vpop.permute.xlu0 %6050 }
 0xa12   : > { %9541 = vpow2.f32 %v5740_v8  ;;  %8748 = vmatprep.subr.bf16.mxu0 %v6051_v49  ;;  %5639 = vmax.xlane.f32.xlu0 %v5638_v54 }
 0xa13   : > { %9543 = vpow2.f32 %v5742_v17  ;;  %5594 = vadd.xlane.f32.xlu1 %v5593_v40 }
 0xa14   : > { %9545 = vpow2.f32 %v5744_v24 }
 0xa15   : > { %9547 = vpow2.f32 %v4718_v12  ;;  %v14690_v58 = vpop.permute.xlu0 %6512  ;;  %v14692_v50 = vpop.eup %9537  ;;  %v9963_v12 = vld [vmem:[#allocation2 + $0x38] ss:$12 sps:$4 sm:$0xff]  }
 0xa16   : > { %9549 = vpow2.f32 %v5746_v21  ;;  %17533 = vst [vmem:[#allocation158_spill] sm:$0xff] %v14692_v50  ;;  %v14694_v28 = vpop.eup %9539  ;;  %v4900_v44 = vmul.f32 %v14692_v50, %v14361_v30 }
 0xa17   : > { %9551 = vpow2.f32 %v4766_v15  ;;  %17534 = vst [vmem:[#allocation159_spill] sm:$0xff] %v14694_v28  ;;  %v5065_v54 = vmul.f32 %v14694_v28, %v14368_v27  ;;  %v9964_v28 = vld [vmem:[#allocation2 + $0xf8] ss:$12 sps:$4 sm:$0xff]  }
 0xa19   : > { %v6035_v3 = vpop.permute.xlu0 %6034 }
 0xa1a   : > { %8749 = vmatpush3.bf16.msra.mxu0 %v6035_v3 }
 0xa1f   : > { %v14696_v41 = vpop.eup %9541  ;;  %v8700_v31 = vpop.f32.mrf.mxu0 }
 0xa20   : > { %v14698_v62 = vpop.eup %9543 }
 0xa21   : > { %v14700_v36 = vpop.eup %9545  ;;  %v8701_v11 = vpop.f32.mrf.mxu0  ;;  %v14704_v24 = vadd.f32 %v14698_v62, %v14696_v41 }
 0xa22   : > { %v14706_v40 = vpop.eup %9547  ;;  %v8702_v18 = vadd.f32 %v8701_v11, %v8700_v31  ;;  %v17540_v11 = vld [vmem:[#allocation21_spill] sm:$0xff] }
 0xa23   : > { %17535 = vst [vmem:[#allocation160_spill] sm:$0xff] %v14704_v24  ;;  %17536 = vst [vmem:[#allocation191_spill] sm:$0xff] %v14706_v40  ;;  %v14710_v56 = vpop.eup %9549  ;;  %v8703_v8 = vpop.f32.mrf.mxu0  ;;  %v4901_v3 = vmul.f32 %v14706_v40, %v14361_v30  ;;  %v17547_v24 = vld [vmem:[#allocation72_spill] sm:$0xff] }
 0xa24   : > { %v5035_v17 = vadd.f32 %v8702_v18, %v4900_v44  ;;  %6028 = vrot.lane.b32.xlu1 %v9963_v12, %s10084_s11  ;;  %v14717_v49 = vadd.f32 %v14710_v56, %v14700_v36  ;;  %v14719_v21 = vpop.eup %9551  ;;  %v6483_v44 = vmul.f32 %v14252_v52, %v17540_v11 }
 0xa25   : > { %17538 = vst [vmem:[#allocation193_spill] sm:$0xff] %v14719_v21  ;;  %v8704_v38 = vpop.f32.mrf.mxu0  ;;  %v5066_v12 = vmul.f32 %v14719_v21, %v14368_v27 }
 0xa26   : > { %17537 = vst [vmem:[#allocation192_spill] sm:$0xff] %v14717_v49  ;;  %v14721_v15 = vadd.f32 %v5065_v54, %v5035_v17  ;;  %v8705_v31 = vadd.f32 %v8704_v38, %v8703_v8  ;;  %v17542_v17 = vld [vmem:[#allocation23_spill] sm:$0xff] }
 0xa27   : > { %v6618_v54 = vmul.f32 %v14272_v14, %v17542_v17  ;;  %v9965_v8 = vld [vmem:[#allocation2 + $0xe0] ss:$12 sps:$4 sm:$0xff]   ;;  %v6482_v38 = vmul.f32 %v14252_v52, %v17542_v17  ;;  %v14750_v17 = vpop.permute.xlu0 %6650 }
 0xa28   : > { %17539 = vst [vmem:[#allocation194_spill] sm:$0xff] %v14721_v15  ;;  %v5038_v18 = vadd.f32 %v8705_v31, %v4901_v3  ;;  %6522 = vrot.lane.b32.xlu1 %v6483_v44, %s10086_s21  ;;  %6044 = vrot.lane.b32.xlu0 %v9964_v28, %s10084_s11  ;;  %v9966_v3 = vld [vmem:[#allocation2 + $0x20] ss:$12 sps:$4 sm:$0xff]   ;;  %v6619_v28 = vmul.f32 %v14272_v14, %v17540_v11  ;;  %v14744_v31 = vpop.permute.xlu1 %6514  ;;  %v5303_v44 = vpop.f32.mrf.mxu1 }
 0xa2a   : > { %v14731_v50 = vadd.f32 %v5066_v12, %v5038_v18  ;;  %v5305_v12 = vpop.f32.mrf.mxu1 }
 0xa2c   : > { %17541 = vst [vmem:[#allocation21_spill] sm:$0xff] %v14731_v50  ;;  %6656 = vrot.lane.b32.xlu1 %v6618_v54, %s10086_s21  ;;  %6042 = vrot.lane.b32.xlu0 %v9965_v8, %s10084_s11  ;;  %v14746_v18 = vpop.permute.xlu1 %6648  ;;  %v5307_v8 = vpop.f32.mrf.mxu1  ;;  %v17544_v50 = vld [vmem:[#allocation73_spill] sm:$0xff] }
 0xa2d   : > { %v14766_v49 = vadd.f32 %v5307_v8, %v17547_v24  ;;  %v4722_v8 = vmul.f32 1.442695, %v4691_v47  ;;  %v5596_v47 = vsel %vm2990_vm1, %v14149_v32, 0.0 }
 0xa2e   : > { %v5309_v15 = vpop.f32.mrf.mxu1 }
 0xa2f   : > { %v14755_v11 = vadd.f32 %v5309_v15, %v17544_v50 }
 0xa30   : > { %6520 = vrot.lane.b32.xlu0 %v6482_v38, %s10086_s21 }
 0xa31   : > { %v5647_v15 = vmax.f32 %v14766_v49, %v14755_v11 }
 0xa34   : > { %6026 = vrot.lane.b32.xlu0 %v9966_v3, %s10084_s11  ;;  %v4690_v3 = vsub.f32 %v14315_v37, %v14384_v0 }
 0xa36   : > { %v4720_v37 = vmul.f32 1.442695, %v4690_v3 }
 0xa38   : > { %6658 = vrot.lane.b32.xlu0 %v6619_v28, %s10086_s21  ;;  %v4738_v28 = vsub.f32 %v14377_v42, %v14384_v0  ;;  %v4739_v42 = vsub.f32 %v14347_v61, %v14352_v63  ;;  %9553 = vpow2.f32 %v4720_v37  ;;  %v5463_v37 = vsel %vm2990_vm1, %v14151_v46, 0.0 }
 0xa39   : > { %v5599_v46 = vsel %vm2990_vm1, %v14167_v22, 0.0 }
 0xa3a   : > { %v4768_v0 = vmul.f32 1.442695, %v4738_v28  ;;  %v4770_v61 = vmul.f32 1.442695, %v4739_v42 }
 0xa3c   : > { %9555 = vpow2.f32 %v4768_v0 }
 0xa3d   : > { %9557 = vpow2.f32 %v4722_v8 }
 0xa3e   : > { %9559 = vpow2.f32 %v4770_v61 }
 0xa46   : > { %v14748_v54 = vpop.xlane.xlu1 %5449 }
 0xa47   : > { %17543 = vst [vmem:[#allocation23_spill] sm:$0xff] %v14748_v54 }
 0xa4a   : > { %v5637_v38 = vpop.xlane.xlu1 %5636 }
 0xa4e   : > { %v14759_v21 = vpop.xlane.xlu0 %5452  ;;  %v14761_v40 = vpop.xlane.xlu1 %5585 }
 0xa4f   : > { %17545 = vst [vmem:[#allocation195_spill] sm:$0xff] %v14759_v21  ;;  %17546 = vst [vmem:[#allocation196_spill] sm:$0xff] %v14761_v40  ;;  %v5673_v50 = vmax.f32 %v5637_v38, %v14759_v21 }
 0xa50   : > { %5461 = vadd.xlane.f32.xlu1 %v5460_v43  ;;  %v17550_v43 = vld [vmem:[#allocation74_spill] sm:$0xff] }
 0xa51   : > { %v14782_v3 = vadd.f32 %v5305_v12, %v17550_v43  ;;  %v17589_v43 = vld [vmem:[#allocation133_spill] sm:$0xff] }
 0xa52   : > { %v5634_v10 = vpop.xlane.xlu0 %5633  ;;  %v14776_v59 = vpop.xlane.xlu1 %5588 }
 0xa53   : > { %v5672_v16 = vmax.f32 %v5634_v10, %v14748_v54  ;;  %17548 = vst [vmem:[#allocation197_spill] sm:$0xff] %v14776_v59  ;;  %v14779_v5 = vmax.f32 %v5673_v50, %v14776_v59 }
 0xa54   : > { %5648 = vmax.xlane.f32.xlu1 %v5647_v15  ;;  %v17552_v15 = vld [vmem:[#allocation77_spill] sm:$0xff] }
 0xa55   : > { %17549 = vst [vmem:[#allocation198_spill] sm:$0xff] %v14779_v5  ;;  %v14785_v24 = vmax.f32 %v5672_v16, %v14761_v40  ;;  %v5710_v63 = vsub.f32 %v14530_v7, %v14779_v5  ;;  %v5711_v12 = vsub.f32 %v14523_v1, %v14779_v5  ;;  %v14800_v7 = vadd.f32 %v5303_v44, %v17552_v15  ;;  %v14808_v16 = vpop.eup %9553 }
 0xa56   : > { %v6049_v10 = vpop.permute.xlu0 %6048  ;;  %v6033_v28 = vpop.permute.xlu1 %6032  ;;  %17553 = vst [vmem:[#allocation200_spill] sm:$0xff] %v14808_v16 }
 0xa57   : > { %17551 = vst [vmem:[#allocation199_spill] sm:$0xff] %v14785_v24  ;;  %v5708_v50 = vsub.f32 %v14548_v35, %v14785_v24  ;;  %v5709_v38 = vsub.f32 %v14540_v20, %v14785_v24  ;;  %8750 = vmatprep.subr.bf16.mxu0 %v6049_v10  ;;  %5464 = vadd.xlane.f32.xlu0 %v5463_v37  ;;  %v5752_v35 = vmul.f32 1.442695, %v5710_v63  ;;  %v5754_v0 = vmul.f32 1.442695, %v5711_v12  ;;  %v14810_v10 = vpop.eup %9555 }
 0xa58   : > { %5597 = vadd.xlane.f32.xlu1 %v5596_v47  ;;  %8751 = vmatpush3.bf16.msra.mxu0 %v6033_v28  ;;  %v5644_v20 = vmax.f32 %v14800_v7, %v14782_v3  ;;  %17554 = vst [vmem:[#allocation201_spill] sm:$0xff] %v14810_v10  ;;  %v4902_v47 = vmul.f32 %v14808_v16, %v14361_v30 }
 0xa59   : > { %v5748_v32 = vmul.f32 1.442695, %v5708_v50  ;;  %v5750_v42 = vmul.f32 1.442695, %v5709_v38  ;;  %v14814_v50 = vpop.eup %9557  ;;  %v5067_v28 = vmul.f32 %v14810_v10, %v14368_v27 }
 0xa5a   : > { %v6047_v1 = vpop.permute.xlu0 %6046  ;;  %17555 = vst [vmem:[#allocation202_spill] sm:$0xff] %v14814_v50  ;;  %v14818_v37 = vpop.eup %9559 }
 0xa5b   : > { %9561 = vpow2.f32 %v5748_v32  ;;  %8752 = vmatprep.subr.bf16.mxu0 %v6047_v1  ;;  %5645 = vmax.xlane.f32.xlu0 %v5644_v20  ;;  %17556 = vst [vmem:[#allocation203_spill] sm:$0xff] %v14818_v37  ;;  %v4903_v20 = vmul.f32 %v14814_v50, %v14361_v30 }
 0xa5c   : > { %9563 = vpow2.f32 %v5750_v42  ;;  %5600 = vadd.xlane.f32.xlu1 %v5599_v46 }
 0xa5d   : > { %9565 = vpow2.f32 %v5752_v35 }
 0xa5e   : > { %v14806_v44 = vpop.permute.xlu0 %6516  ;;  %9567 = vpow2.f32 %v5754_v0 }
 0xa60   : > { %v8706_v8 = vpop.f32.mrf.mxu0 }
 0xa62   : > { %v6031_v63 = vpop.permute.xlu0 %6030  ;;  %v8707_v61 = vpop.f32.mrf.mxu0 }
 0xa63   : > { %8753 = vmatpush3.bf16.msra.mxu0 %v6031_v63  ;;  %v8708_v22 = vadd.f32 %v8707_v61, %v8706_v8  ;;  %v5068_v63 = vmul.f32 %v14818_v37, %v14368_v27  ;;  %v9968_v27 = vld [vmem:[#allocation2 + $0xc8] ss:$12 sps:$4 sm:$0xff]  }
 0xa64   : > { %v8709_v38 = vpop.f32.mrf.mxu0  ;;  %v17565_v37 = vld [vmem:[#allocation167_spill] sm:$0xff] }
 0xa65   : > { %v5043_v12 = vadd.f32 %v8708_v22, %v4902_v47 }
 0xa66   : > { %v8710_v32 = vpop.f32.mrf.mxu0  ;;  %v14867_v16 = vpop.permute.xlu0 %6654 }
 0xa67   : > { %v14822_v35 = vadd.f32 %v5067_v28, %v5043_v12  ;;  %v8711_v1 = vadd.f32 %v8710_v32, %v8709_v38  ;;  %v9967_v12 = vld [vmem:[#allocation2 + $0x8] ss:$12 sps:$4 sm:$0xff]   ;;  %v17561_v38 = vld [vmem:[#allocation25_spill] sm:$0xff] }
 0xa68   : > { %v14820_v42 = vpop.eup %9561  ;;  %v6620_v28 = vmul.f32 %v14272_v14, %v17561_v38  ;;  %v6484_v32 = vmul.f32 %v14252_v52, %v17561_v38 }
 0xa69   : > { %17557 = vst [vmem:[#allocation204_spill] sm:$0xff] %v14822_v35  ;;  %v14826_v0 = vpop.eup %9563  ;;  %v5046_v8 = vadd.f32 %v8711_v1, %v4903_v20  ;;  %v17562_v20 = vld [vmem:[#allocation24_spill] sm:$0xff] }
 0xa6a   : > { %v14828_v46 = vpop.eup %9565  ;;  %v14834_v61 = vadd.f32 %v14826_v0, %v14820_v42  ;;  %v6485_v1 = vmul.f32 %v14252_v52, %v17562_v20 }
 0xa6b   : > { %v14836_v47 = vpop.eup %9567  ;;  %v14838_v22 = vadd.f32 %v5068_v63, %v5046_v8  ;;  %v6621_v8 = vmul.f32 %v14272_v14, %v17562_v20  ;;  %v5313_v63 = vpop.f32.mrf.mxu1  ;;  %v5466_v20 = vsel %vm2990_vm1, %v17565_v37, 0.0  ;;  %v17571_v37 = vld [vmem:[#allocation166_spill] sm:$0xff] }
 0xa6c   : > { %17558 = vst [vmem:[#allocation205_spill] sm:$0xff] %v14834_v61  ;;  %v14843_v30 = vadd.f32 %v14836_v47, %v14828_v46 }
 0xa6d   : > { %17559 = vst [vmem:[#allocation206_spill] sm:$0xff] %v14838_v22  ;;  %6024 = vrot.lane.b32.xlu1 %v9967_v12, %s10084_s11  ;;  %v14858_v12 = vpop.permute.xlu1 %6518 }
 0xa6e   : > { %17560 = vst [vmem:[#allocation207_spill] sm:$0xff] %v14843_v30 }
 0xa71   : > { %6660 = vrot.lane.b32.xlu1 %v6620_v28, %s10086_s21  ;;  %6040 = vrot.lane.b32.xlu0 %v9968_v27, %s10084_s11  ;;  %v5315_v28 = vpop.f32.mrf.mxu1  ;;  %v14860_v35 = vpop.permute.xlu1 %6652 }
 0xa73   : > { %v5317_v27 = vpop.f32.mrf.mxu1 }
 0xa75   : > { %6524 = vrot.lane.b32.xlu0 %v6484_v32, %s10086_s21  ;;  %v5319_v38 = vpop.f32.mrf.mxu1  ;;  %v17564_v32 = vld [vmem:[#allocation83_spill] sm:$0xff] }
 0xa76   : > { %v14865_v10 = vadd.f32 %v5319_v38, %v17564_v32  ;;  %v17569_v38 = vld [vmem:[#allocation80_spill] sm:$0xff] }
 0xa77   : > { %v14881_v59 = vadd.f32 %v5315_v28, %v17569_v38 }
 0xa79   : > { %6526 = vrot.lane.b32.xlu0 %v6485_v1, %s10086_s21 }
 0xa7d   : > { %6662 = vrot.lane.b32.xlu0 %v6621_v8, %s10086_s21  ;;  %v17566_v8 = vld [vmem:[#allocation82_spill] sm:$0xff] }
 0xa7e   : > { %v14872_v50 = vadd.f32 %v5317_v27, %v17566_v8  ;;  %v5469_v27 = vsel %vm2990_vm1, %v17571_v37, 0.0  ;;  %v17573_v8 = vld [vmem:[#allocation81_spill] sm:$0xff] }
 0xa7f   : > { %v14891_v32 = vadd.f32 %v5313_v63, %v17573_v8  ;;  %v17587_v8 = vld [vmem:[#allocation88_spill] sm:$0xff] }
 0xa80   : > { %v5653_v40 = vmax.f32 %v14872_v50, %v14865_v10 }
 0xa81   : > { %v5650_v28 = vmax.f32 %v14891_v32, %v14881_v59 }
 0xa8f   : > { %v14862_v22 = vpop.xlane.xlu1 %5455 }
 0xa90   : > { %17563 = vst [vmem:[#allocation25_spill] sm:$0xff] %v14862_v22 }
 0xa93   : > { %v5643_v1 = vpop.xlane.xlu1 %5642 }
 0xa95   : > { %5467 = vadd.xlane.f32.xlu1 %v5466_v20  ;;  %v17572_v20 = vld [vmem:[#allocation46_spill] sm:$0xff] }
 0xa96   : > { %v5605_v30 = vsel %vm2990_vm1, %v17572_v20, 0.0 }
 0xa97   : > { %v14876_v54 = vpop.xlane.xlu0 %5458 }
 0xa98   : > { %17567 = vst [vmem:[#allocation24_spill] sm:$0xff] %v14876_v54  ;;  %v14878_v24 = vpop.xlane.xlu1 %5591  ;;  %v5675_v21 = vmax.f32 %v5643_v1, %v14876_v54 }
 0xa99   : > { %17568 = vst [vmem:[#allocation167_spill] sm:$0xff] %v14878_v24  ;;  %5654 = vmax.xlane.f32.xlu1 %v5653_v40 }
 0xa9b   : > { %v5640_v5 = vpop.xlane.xlu0 %5639 }
 0xa9c   : > { %v14884_v61 = vpop.xlane.xlu1 %5594  ;;  %v5674_v15 = vmax.f32 %v5640_v5, %v14862_v22  ;;  %5470 = vadd.xlane.f32.xlu0 %v5469_v27  ;;  %v17576_v22 = vld [vmem:[#allocation42_spill] sm:$0xff] }
 0xa9d   : > { %17570 = vst [vmem:[#allocation208_spill] sm:$0xff] %v14884_v61  ;;  %v14895_v40 = vmax.f32 %v5675_v21, %v14884_v61  ;;  %5606 = vadd.xlane.f32.xlu1 %v5605_v30 }
 0xa9e   : > { %v14900_v1 = vmax.f32 %v5674_v15, %v14878_v24 }
 0xa9f   : > { %17574 = vst [vmem:[#allocation166_spill] sm:$0xff] %v14895_v40  ;;  %v5714_v37 = vsub.f32 %v14646_v51, %v14895_v40  ;;  %v6045_v20 = vpop.permute.xlu0 %6044  ;;  %v5715_v5 = vsub.f32 %v14637_v9, %v14895_v40  ;;  %v5602_v51 = vsel %vm2990_vm1, %v17576_v22, 0.0 }
 0xaa0   : > { %17575 = vst [vmem:[#allocation46_spill] sm:$0xff] %v14900_v1  ;;  %v6029_v54 = vpop.permute.xlu1 %6028  ;;  %v5712_v63 = vsub.f32 %v14682_v6, %v14900_v1  ;;  %v5713_v21 = vsub.f32 %v14667_v55, %v14900_v1  ;;  %5651 = vmax.xlane.f32.xlu0 %v5650_v28  ;;  %8754 = vmatprep.subr.bf16.mxu0 %v6045_v20  ;;  %v17577_v6 = vld [vmem:[#allocation26_spill] sm:$0xff] }
 0xaa1   : > { %v5760_v15 = vmul.f32 1.442695, %v5714_v37  ;;  %8755 = vmatpush3.bf16.msra.mxu0 %v6029_v54  ;;  %v5762_v61 = vmul.f32 1.442695, %v5715_v5  ;;  %v6487_v28 = vmul.f32 %v14252_v52, %v17577_v6  ;;  %v17578_v54 = vld [vmem:[#allocation27_spill] sm:$0xff] }
 0xaa2   : > { %v5756_v30 = vmul.f32 1.442695, %v5712_v63  ;;  %v5758_v27 = vmul.f32 1.442695, %v5713_v21  ;;  %v6622_v37 = vmul.f32 %v14272_v14, %v17578_v54  ;;  %v6486_v5 = vmul.f32 %v14252_v52, %v17578_v54 }
 0xaa3   : > { %v6043_v24 = vpop.permute.xlu0 %6042 }
 0xaa4   : > { %9569 = vpow2.f32 %v5756_v30  ;;  %5603 = vadd.xlane.f32.xlu0 %v5602_v51  ;;  %8756 = vmatprep.subr.bf16.mxu0 %v6043_v24  ;;  %v6623_v30 = vmul.f32 %v14272_v14, %v17577_v6 }
 0xaa5   : > { %9571 = vpow2.f32 %v5758_v27  ;;  %v5323_v27 = vpop.f32.mrf.mxu1 }
 0xaa6   : > { %9573 = vpow2.f32 %v5760_v15 }
 0xaa7   : > { %v14912_v55 = vpop.permute.xlu0 %6520  ;;  %9575 = vpow2.f32 %v5762_v61  ;;  %v5325_v15 = vpop.f32.mrf.mxu1 }
 0xaa8   : > { %v14959_v38 = vadd.f32 %v5325_v15, %v17587_v8 }
 0xaa9   : > { %v5327_v51 = vpop.f32.mrf.mxu1 }
 0xaab   : > { %v6027_v9 = vpop.permute.xlu0 %6026 }
 0xaac   : > { %8757 = vmatpush3.bf16.msra.mxu0 %v6027_v9  ;;  %v14942_v9 = vpop.permute.xlu1 %6522 }
 0xaad   : > { %17581 = vst [vmem:[#allocation27_spill] sm:$0xff] %v14942_v9 }
 0xaae   : > { %6530 = vrot.lane.b32.xlu1 %v6487_v28, %s10086_s21  ;;  %v5329_v28 = vpop.f32.mrf.mxu1 }
 0xab0   : > { %v14947_v40 = vpop.permute.xlu1 %6656 }
 0xab1   : > { %v14919_v22 = vpop.eup %9569  ;;  %17583 = vst [vmem:[#allocation209_spill] sm:$0xff] %v14947_v40  ;;  %v5475_v40 = vsel %vm2990_vm1, %v17589_v43, 0.0 }
 0xab2   : > { %6664 = vrot.lane.b32.xlu1 %v6622_v37, %s10086_s21  ;;  %v14922_v24 = vpop.eup %9571  ;;  %v17582_v37 = vld [vmem:[#allocation94_spill] sm:$0xff] }
 0xab3   : > { %v14924_v20 = vpop.eup %9573  ;;  %v14928_v61 = vadd.f32 %v14922_v24, %v14919_v22  ;;  %v14945_v1 = vadd.f32 %v5329_v28, %v17582_v37  ;;  %v14961_v28 = vpop.permute.xlu0 %6658 }
 0xab4   : > { %v14930_v63 = vpop.eup %9575  ;;  %17588 = vst [vmem:[#allocation210_spill] sm:$0xff] %v14961_v28 }
 0xab5   : > { %17579 = vst [vmem:[#allocation42_spill] sm:$0xff] %v14928_v61  ;;  %v14934_v21 = vadd.f32 %v14930_v63, %v14924_v20  ;;  %v17584_v61 = vld [vmem:[#allocation18_spill] sm:$0xff] }
 0xab6   : > { %v5472_v54 = vsel %vm2990_vm1, %v17584_v61, 0.0  ;;  %v17590_v61 = vld [vmem:[#allocation139_spill] sm:$0xff] }
 0xab7   : > { %17580 = vst [vmem:[#allocation26_spill] sm:$0xff] %v14934_v21 }
 0xaba   : > { %6528 = vrot.lane.b32.xlu0 %v6486_v5, %s10086_s21  ;;  %v17585_v5 = vld [vmem:[#allocation93_spill] sm:$0xff] }
 0xabb   : > { %v14952_v21 = vadd.f32 %v5327_v51, %v17585_v5  ;;  %v5611_v51 = vsel %vm2990_vm1, %v17590_v61, 0.0  ;;  %v17591_v5 = vld [vmem:[#allocation87_spill] sm:$0xff]  ;;  %v5608_v61 = vsel %vm2990_vm1, %v17595_v33, 0.0 }
 0xabd   : > { %v5659_v6 = vmax.f32 %v14952_v21, %v14945_v1 }
 0xabe   : > { %6666 = vrot.lane.b32.xlu0 %v6623_v30, %s10086_s21 }
 0xad6   : > { %5473 = vadd.xlane.f32.xlu1 %v5472_v54  ;;  %v14968_v54 = vadd.f32 %v5323_v27, %v17591_v5 }
 0xad9   : > { %v14956_v30 = vpop.xlane.xlu1 %5461 }
 0xada   : > { %17586 = vst [vmem:[#allocation18_spill] sm:$0xff] %v14956_v30  ;;  %5660 = vmax.xlane.f32.xlu1 %v5659_v6  ;;  %v5656_v6 = vmax.f32 %v14968_v54, %v14959_v38 }
 0xadd   : > { %v5649_v37 = vpop.xlane.xlu1 %5648  ;;  %5476 = vadd.xlane.f32.xlu0 %v5475_v40 }
 0xade   : > { %5612 = vadd.xlane.f32.xlu1 %v5611_v51 }
 0xae0   : > { %v14972_v9 = vpop.xlane.xlu0 %5464 }
 0xae1   : > { %17592 = vst [vmem:[#allocation133_spill] sm:$0xff] %v14972_v9  ;;  %v14974_v15 = vpop.xlane.xlu1 %5597  ;;  %5657 = vmax.xlane.f32.xlu0 %v5656_v6  ;;  %v5677_v8 = vmax.f32 %v5649_v37, %v14972_v9 }
 0xae2   : > { %17593 = vst [vmem:[#allocation139_spill] sm:$0xff] %v14974_v15 }
 0xae4   : > { %v5646_v28 = vpop.xlane.xlu0 %5645 }
 0xae5   : > { %v14977_v43 = vpop.xlane.xlu1 %5600  ;;  %v5676_v27 = vmax.f32 %v5646_v28, %v14956_v30  ;;  %5609 = vadd.xlane.f32.xlu0 %v5608_v61 }
 0xae6   : > { %17594 = vst [vmem:[#allocation211_spill] sm:$0xff] %v14977_v43  ;;  %v14983_v40 = vmax.f32 %v5677_v8, %v14977_v43 }
 0xae7   : > { %v14986_v51 = vmax.f32 %v5676_v27, %v14974_v15  ;;  %v17598_v15 = vld [vmem:[#allocation28_spill] sm:$0xff] }
 0xae8   : > { %17596 = vst [vmem:[#allocation16_spill] sm:$0xff] %v14983_v40  ;;  %v5718_v6 = vsub.f32 %v14766_v49, %v14983_v40  ;;  %v6041_v5 = vpop.permute.xlu0 %6040  ;;  %v5719_v28 = vsub.f32 %v14755_v11, %v14983_v40  ;;  %v6489_v30 = vmul.f32 %v14252_v52, %v17598_v15  ;;  %v5991_v49 = vpack.c.bf16 %v14710_v56, %v14698_v62  ;;  %v17600_v11 = vld [vmem:[#allocation29_spill] sm:$0xff] }
 0xae9   : > { %17597 = vst [vmem:[#allocation212_spill] sm:$0xff] %v14986_v51  ;;  %v6025_v37 = vpop.permute.xlu1 %6024  ;;  %v5716_v9 = vsub.f32 %v14800_v7, %v14986_v51  ;;  %v5717_v33 = vsub.f32 %v14782_v3, %v14986_v51  ;;  %8758 = vmatprep.subr.bf16.mxu0 %v6041_v5  ;;  %v17599_v7 = vpack.c.bf16 %v14578_v23, %v14584_v39  ;;  %v9974_v51 = vld [vmem:[#allocation2 + $0x80] ss:$12 sps:$4 sm:$0xff]  }
 0xaea   : > { %8759 = vmatpush3.bf16.msra.mxu0 %v6025_v37  ;;  %v5768_v27 = vmul.f32 1.442695, %v5718_v6  ;;  %v5770_v43 = vmul.f32 1.442695, %v5719_v28  ;;  %v6624_v3 = vmul.f32 %v14272_v14, %v17600_v11  ;;  %v5990_v62 = vpack.c.bf16 %v14700_v36, %v14696_v41  ;;  %v17603_v28 = vld [vmem:[#allocation110_spill] sm:$0xff] }
 0xaeb   : > { %v5764_v8 = vmul.f32 1.442695, %v5716_v9  ;;  %v5766_v61 = vmul.f32 1.442695, %v5717_v33  ;;  %v5993_v56 = vpack.c.bf16 %v14836_v47, %v14826_v0  ;;  %v6488_v23 = vmul.f32 %v14252_v52, %v17600_v11  ;;  %v17605_v11 = vld [vmem:[#allocation98_spill] sm:$0xff] }
 0xaec   : > { %v5992_v5 = vpack.c.bf16 %v14828_v46, %v14820_v42  ;;  %v6625_v36 = vmul.f32 %v14272_v14, %v17598_v15  ;;  %v5994_v6 = vpack.c.bf16 %v14924_v20, %v14919_v22  ;;  %v5333_v46 = vpop.f32.mrf.mxu1 }
 0xaed   : > { %9577 = vpow2.f32 %v5764_v8  ;;  %6105 = vmatmul.mubr.bf16.vlgmr.msra.gmra.mxu0 %v17599_v7  ;;  %v15030_v8 = vpop.permute.xlu0 %6524  ;;  %v15039_v20 = vpop.permute.xlu1 %6660 }
 0xaee   : > { %9579 = vpow2.f32 %v5766_v61  ;;  %6112 = vmatprep.mubr.bf16.mxu0 %v5991_v49  ;;  %v5478_v61 = vsel %vm2990_vm1, %v14518_v29, 0.0  ;;  %v5481_v29 = vsel %vm2990_vm1, %v14510_v19, 0.0  ;;  %v5614_v19 = vsel %vm2990_vm1, %v14516_v13, 0.0 }
 0xaef   : > { %6534 = vrot.lane.b32.xlu1 %v6489_v30, %s10086_s21  ;;  %9581 = vpow2.f32 %v5768_v27  ;;  %v17604_v27 = vld [vmem:[#allocation109_spill] sm:$0xff] }
 0xaf0   : > { %9583 = vpow2.f32 %v5770_v43  ;;  %v5995_v43 = vpack.c.bf16 %v14930_v63, %v14922_v24  ;;  %v5335_v24 = vpop.f32.mrf.mxu1 }
 0xaf1   : > { %v15041_v7 = vpop.permute.xlu0 %6526 }
 0xaf2   : > { %v5337_v37 = vpop.f32.mrf.mxu1 }
 0xaf3   : > { %6668 = vrot.lane.b32.xlu1 %v6624_v3, %s10086_s21  ;;  %v15035_v49 = vadd.f32 %v5337_v37, %v17604_v27  ;;  %v15044_v3 = vadd.f32 %v5335_v24, %v17605_v11 }
 0xaf4   : > { %v5339_v33 = vpop.f32.mrf.mxu1 }
 0xaf5   : > { %6113 = vmatmul.mubr.bf16.gmra.mxu0 %v5990_v62  ;;  %v15028_v15 = vadd.f32 %v5339_v33, %v17603_v28  ;;  %v17612_v33 = vld [vmem:[#allocation30_spill] sm:$0xff] }
 0xaf6   : > { %6120 = vmatprep.mubr.bf16.mxu0 %v5993_v56  ;;  %v5617_v56 = vsel %vm2990_vm1, %v14525_v34, 0.0 }
 0xaf7   : > { %v5665_v22 = vmax.f32 %v15035_v49, %v15028_v15 }
 0xafa   : > { %v9578_v39 = vpop.eup %9577 }
 0xafb   : > { %v9580_v9 = vpop.eup %9579  ;;  %6532 = vrot.lane.b32.xlu0 %v6488_v23, %s10086_s21  ;;  %v17607_v23 = vld [vmem:[#allocation95_spill] sm:$0xff] }
 0xafc   : > { %v9582_v30 = vpop.eup %9581  ;;  %v15018_v41 = vadd.f32 %v9580_v9, %v9578_v39 }
 0xafd   : > { %6121 = vmatmul.mubr.bf16.gmra.mxu0 %v5992_v5  ;;  %v9584_v0 = vpop.eup %9583  ;;  %v5996_v63 = vpack.c.bf16 %v9582_v30, %v9578_v39  ;;  %v15053_v39 = vadd.f32 %v5333_v46, %v17607_v23  ;;  %v15057_v5 = vpop.permute.xlu0 %6662 }
 0xafe   : > { %17601 = vst [vmem:[#allocation28_spill] sm:$0xff] %v15018_v41  ;;  %6128 = vmatprep.mubr.bf16.mxu0 %v5995_v43  ;;  %v15023_v47 = vadd.f32 %v9584_v0, %v9582_v30  ;;  %v5997_v42 = vpack.c.bf16 %v9584_v0, %v9580_v9 }
 0xaff   : > { %6670 = vrot.lane.b32.xlu0 %v6625_v36, %s10086_s21  ;;  %v5662_v9 = vmax.f32 %v15053_v39, %v15044_v3 }
 0xb00   : > { %17602 = vst [vmem:[#allocation29_spill] sm:$0xff] %v15023_v47  ;;  %v17677_v47 = vld [vmem:[#allocation73_spill] sm:$0xff] }
 0xb05   : > { %6129 = vmatmul.mubr.bf16.gmra.mxu0 %v5994_v6 }
 0xb06   : > { %6136 = vmatprep.mubr.bf16.mxu0 %v5997_v42 }
 0xb0d   : > { %6137 = vmatmul.mubr.bf16.gmra.mxu0 %v5996_v63 }
 0xb17   : > { %5479 = vadd.xlane.f32.xlu1 %v5478_v61  ;;  %v6491_v61 = vmul.f32 %v14252_v52, %v17612_v33 }
 0xb1b   : > { %5666 = vmax.xlane.f32.xlu1 %v5665_v22 }
 0xb1e   : > { %v15046_v62 = vpop.xlane.xlu1 %5467  ;;  %5482 = vadd.xlane.f32.xlu0 %v5481_v29  ;;  %v17614_v29 = vld [vmem:[#allocation31_spill] sm:$0xff] }
 0xb1f   : > { %17606 = vst [vmem:[#allocation110_spill] sm:$0xff] %v15046_v62  ;;  %5618 = vadd.xlane.f32.xlu1 %v5617_v56  ;;  %v6626_v56 = vmul.f32 %v14272_v14, %v17614_v29 }
 0xb22   : > { %v5655_v30 = vpop.xlane.xlu1 %5654  ;;  %5663 = vmax.xlane.f32.xlu0 %v5662_v9 }
 0xb25   : > { %v15059_v43 = vpop.xlane.xlu0 %5470 }
 0xb26   : > { %17608 = vst [vmem:[#allocation109_spill] sm:$0xff] %v15059_v43  ;;  %v5679_v36 = vmax.f32 %v5655_v30, %v15059_v43  ;;  %5615 = vadd.xlane.f32.xlu0 %v5614_v19  ;;  %v15064_v34 = vpop.xlane.xlu1 %5606  ;;  %v6490_v19 = vmul.f32 %v14252_v52, %v17614_v29 }
 0xb27   : > { %17609 = vst [vmem:[#allocation98_spill] sm:$0xff] %v15064_v34 }
 0xb28   : > { %v15067_v0 = vmax.f32 %v5679_v36, %v15064_v34 }
 0xb29   : > { %v5652_v6 = vpop.xlane.xlu0 %5651 }
 0xb2a   : > { %17610 = vst [vmem:[#allocation95_spill] sm:$0xff] %v15067_v0  ;;  %v5722_v42 = vsub.f32 %v14872_v50, %v15067_v0  ;;  %v5723_v46 = vsub.f32 %v14865_v10, %v15067_v0  ;;  %v5678_v37 = vmax.f32 %v5652_v6, %v15046_v62  ;;  %v15099_v29 = vpop.permute.xlu1 %6530 }
 0xb2c   : > { %v5776_v24 = vmul.f32 1.442695, %v5722_v42  ;;  %v5778_v63 = vmul.f32 1.442695, %v5723_v46 }
 0xb2d   : > { %v15074_v13 = vpop.xlane.xlu0 %5603 }
 0xb2e   : > { %17611 = vst [vmem:[#allocation213_spill] sm:$0xff] %v15074_v13  ;;  %9585 = vpow2.f32 %v5776_v24  ;;  %v15079_v22 = vmax.f32 %v5678_v37, %v15074_v13  ;;  %v17627_v13 = vld [vmem:[#allocation57_spill] sm:$0xff] }
 0xb2f   : > { %9587 = vpow2.f32 %v5778_v63 }
 0xb30   : > { %17613 = vst [vmem:[#allocation30_spill] sm:$0xff] %v15079_v22  ;;  %6538 = vrot.lane.b32.xlu1 %v6491_v61, %s10086_s21  ;;  %v5720_v50 = vsub.f32 %v14891_v32, %v15079_v22  ;;  %v5721_v10 = vsub.f32 %v14881_v59, %v15079_v22  ;;  %v6627_v59 = vmul.f32 %v14272_v14, %v17612_v33  ;;  %v6383_v61 = vpop.f32.mrf.mxu1  ;;  %v6556_v14 = vsel %vm2990_vm1, %v14623_v53, 0.0  ;;  %v17618_v33 = vld [vmem:[#allocation51_spill] sm:$0xff] }
 0xb31   : > { %v6695_v53 = vsel %vm2990_vm1, %v14634_v60, 0.0  ;;  %v6692_v60 = vsel %vm2990_vm1, %v14630_v26, 0.0 }
 0xb32   : > { %v5772_v9 = vmul.f32 1.442695, %v5720_v50  ;;  %v5774_v30 = vmul.f32 1.442695, %v5721_v10  ;;  %v6385_v52 = vpop.f32.mrf.mxu1 }
 0xb34   : > { %6672 = vrot.lane.b32.xlu1 %v6626_v56, %s10086_s21  ;;  %9589 = vpow2.f32 %v5772_v9  ;;  %v6387_v50 = vpop.f32.mrf.mxu1  ;;  %v17617_v56 = vld [vmem:[#allocation50_spill] sm:$0xff] }
 0xb35   : > { %9591 = vpow2.f32 %v5774_v30  ;;  %v15107_v30 = vadd.f32 %v6387_v50, %v17618_v33 }
 0xb36   : > { %v6389_v10 = vpop.f32.mrf.mxu1 }
 0xb37   : > { %v15102_v9 = vadd.f32 %v6389_v10, %v17617_v56 }
 0xb3b   : > { %v9586_v36 = vpop.eup %9585 }
 0xb3c   : > { %v9588_v6 = vpop.eup %9587  ;;  %6536 = vrot.lane.b32.xlu0 %v6490_v19, %s10086_s21  ;;  %v6743_v19 = vmax.f32 %v15107_v30, %v15102_v9 }
 0xb3d   : > { %v15092_v32 = vadd.f32 %v9588_v6, %v9586_v36 }
 0xb3f   : > { %17615 = vst [vmem:[#allocation31_spill] sm:$0xff] %v15092_v32 }
 0xb40   : > { %6674 = vrot.lane.b32.xlu0 %v6627_v59, %s10086_s21  ;;  %v17619_v59 = vld [vmem:[#allocation54_spill] sm:$0xff] }
 0xb41   : > { %v9590_v42 = vpop.eup %9589 }
 0xb42   : > { %v9592_v46 = vpop.eup %9591  ;;  %v5998_v24 = vpack.c.bf16 %v9586_v36, %v9590_v42  ;;  %v15111_v36 = vpop.permute.xlu1 %6664 }
 0xb43   : > { %v5999_v63 = vpack.c.bf16 %v9588_v6, %v9592_v46  ;;  %v15097_v37 = vadd.f32 %v9592_v46, %v9590_v42  ;;  %v15113_v6 = vpop.permute.xlu0 %6528  ;;  %v15116_v42 = vadd.f32 %v6385_v52, %v17619_v59 }
 0xb45   : > { %17616 = vst [vmem:[#allocation214_spill] sm:$0xff] %v15097_v37  ;;  %6144 = vmatprep.mubr.bf16.mxu0 %v5999_v63  ;;  %v17620_v63 = vld [vmem:[#allocation53_spill] sm:$0xff] }
 0xb46   : > { %6145 = vmatmul.mubr.bf16.gmra.mxu0 %v5998_v24  ;;  %v6559_v24 = vsel %vm2990_vm1, %v14628_v2, 0.0  ;;  %v15125_v50 = vadd.f32 %v6383_v61, %v17620_v63 }
 0xb47   : > { %v15129_v56 = vpop.permute.xlu0 %6666 }
 0xb48   : > { %v6740_v10 = vmax.f32 %v15125_v50, %v15116_v42 }
 0xb58   : > { %6557 = vadd.xlane.f32.xlu1 %v6556_v14 }
 0xb5c   : > { %6744 = vmax.xlane.f32.xlu1 %v6743_v19 }
 0xb5f   : > { %v15118_v46 = vpop.xlane.xlu1 %5473  ;;  %6560 = vadd.xlane.f32.xlu0 %v6559_v24 }
 0xb60   : > { %6696 = vadd.xlane.f32.xlu1 %v6695_v53 }
 0xb63   : > { %v5661_v52 = vpop.xlane.xlu1 %5660  ;;  %6741 = vmax.xlane.f32.xlu0 %v6740_v10 }
 0xb66   : > { %v15131_v14 = vpop.xlane.xlu0 %5476 }
 0xb67   : > { %17621 = vst [vmem:[#allocation50_spill] sm:$0xff] %v15131_v14  ;;  %v5681_v33 = vmax.f32 %v5661_v52, %v15131_v14  ;;  %6693 = vadd.xlane.f32.xlu0 %v6692_v60  ;;  %v15136_v2 = vpop.xlane.xlu1 %5612  ;;  %v9969_v60 = vld [vmem:[#allocation2 + $0xb0] ss:$12 sps:$4 sm:$0xff]  }
 0xb68   : > { %17622 = vst [vmem:[#allocation51_spill] sm:$0xff] %v15136_v2 }
 0xb69   : > { %v15139_v61 = vmax.f32 %v5681_v33, %v15136_v2 }
 0xb6a   : > { %v5658_v19 = vpop.xlane.xlu0 %5657 }
 0xb6b   : > { %17623 = vst [vmem:[#allocation54_spill] sm:$0xff] %v15139_v61  ;;  %v5726_v59 = vsub.f32 %v14952_v21, %v15139_v61  ;;  %v5727_v53 = vsub.f32 %v14945_v1, %v15139_v61  ;;  %v5680_v10 = vmax.f32 %v5658_v19, %v15118_v46  ;;  %v15169_v22 = vpop.permute.xlu1 %6534 }
 0xb6d   : > { %v5784_v24 = vmul.f32 1.442695, %v5726_v59  ;;  %v5786_v63 = vmul.f32 1.442695, %v5727_v53 }
 0xb6e   : > { %v15146_v26 = vpop.xlane.xlu0 %5609 }
 0xb6f   : > { %9593 = vpow2.f32 %v5784_v24  ;;  %v15149_v52 = vmax.f32 %v5680_v10, %v15146_v26  ;;  %v9970_v24 = vld [vmem:[#allocation2 + $0x170] ss:$12 sps:$4 sm:$0xff]  }
 0xb70   : > { %9595 = vpow2.f32 %v5786_v63 }
 0xb71   : > { %7158 = vrot.lane.b32.xlu1 %v9969_v60, %s10086_s21  ;;  %v5724_v21 = vsub.f32 %v14968_v54, %v15149_v52  ;;  %v5725_v1 = vsub.f32 %v14959_v38, %v15149_v52  ;;  %v6393_v60 = vpop.f32.mrf.mxu1 }
 0xb73   : > { %v5780_v33 = vmul.f32 1.442695, %v5724_v21  ;;  %v5782_v59 = vmul.f32 1.442695, %v5725_v1  ;;  %v6395_v38 = vpop.f32.mrf.mxu1 }
 0xb75   : > { %9597 = vpow2.f32 %v5780_v33  ;;  %v6397_v21 = vpop.f32.mrf.mxu1  ;;  %v17626_v33 = vld [vmem:[#allocation55_spill] sm:$0xff] }
 0xb76   : > { %9599 = vpow2.f32 %v5782_v59  ;;  %v15167_v62 = vadd.f32 %v6397_v21, %v17627_v13  ;;  %v17629_v13 = vld [vmem:[#allocation56_spill] sm:$0xff]  ;;  %v15185_v21 = vpop.permute.xlu0 %6532 }
 0xb77   : > { %v6399_v1 = vpop.f32.mrf.mxu1 }
 0xb78   : > { %v15162_v59 = vadd.f32 %v6399_v1, %v17626_v33  ;;  %v6701_v33 = vsel %vm2990_vm1, %v14750_v17, 0.0 }
 0xb7c   : > { %v9594_v19 = vpop.eup %9593 }
 0xb7d   : > { %v9596_v53 = vpop.eup %9595  ;;  %7174 = vrot.lane.b32.xlu0 %v9970_v24, %s10086_s21  ;;  %v6562_v24 = vsel %vm2990_vm1, %v14690_v58, 0.0  ;;  %v6698_v58 = vsel %vm2990_vm1, %v14746_v18, 0.0 }
 0xb7e   : > { %v15157_v10 = vadd.f32 %v9596_v53, %v9594_v19 }
 0xb80   : > { %17624 = vst [vmem:[#allocation53_spill] sm:$0xff] %v15157_v10  ;;  %v5856_v10 = vsub.f32 %v15146_v26, %v15149_v52  ;;  %v8291_v26 = vld [vmem:[%s16679_s5 + $0x2] sm:$0x1] }
 0xb82   : > { %v9598_v63 = vpop.eup %9597 }
 0xb83   : > { %v9600_v2 = vpop.eup %9599  ;;  %v6000_v14 = vpack.c.bf16 %v9594_v19, %v9598_v63  ;;  %v15176_v19 = vpop.permute.xlu1 %6668 }
 0xb84   : > { %v6001_v61 = vpack.c.bf16 %v9596_v53, %v9600_v2  ;;  %v15159_v54 = vadd.f32 %v9600_v2, %v9598_v63  ;;  %v6749_v2 = vmax.f32 %v15167_v62, %v15162_v59  ;;  %v6565_v53 = vsel %vm2990_vm1, %v14744_v31, 0.0  ;;  %v15193_v31 = vpop.permute.xlu0 %6670 }
 0xb85   : > { %v15183_v63 = vadd.f32 %v6393_v60, %v17629_v13 }
 0xb86   : > { %17625 = vst [vmem:[#allocation215_spill] sm:$0xff] %v15159_v54  ;;  %6152 = vmatprep.mubr.bf16.mxu0 %v6001_v61  ;;  %v17628_v61 = vld [vmem:[#allocation58_spill] sm:$0xff] }
 0xb87   : > { %6153 = vmatmul.mubr.bf16.gmra.mxu0 %v6000_v14  ;;  %v15174_v14 = vadd.f32 %v6395_v38, %v17628_v61 }
 0xb89   : > { %v6746_v1 = vmax.f32 %v15183_v63, %v15174_v14 }
 0xb95   : > { %6563 = vadd.xlane.f32.xlu1 %v6562_v24 }
 0xb99   : > { %6750 = vmax.xlane.f32.xlu1 %v6749_v2 }
 0xb9c   : > { %6566 = vadd.xlane.f32.xlu0 %v6565_v53 }
 0xb9d   : > { %6699 = vadd.xlane.f32.xlu1 %v6698_v58 }
 0xba0   : > { %v15189_v38 = vpop.xlane.xlu1 %5479  ;;  %6747 = vmax.xlane.f32.xlu0 %v6746_v1 }
 0xba1   : > { %6702 = vadd.xlane.f32.xlu1 %v6701_v33 }
 0xba4   : > { %v5667_v18 = vpop.xlane.xlu1 %5666 }
 0xba7   : > { %v15195_v24 = vpop.xlane.xlu0 %5482 }
 0xba8   : > { %v5683_v60 = vmax.f32 %v5667_v18, %v15195_v24  ;;  %v15198_v2 = vpop.xlane.xlu1 %5618 }
 0xbaa   : > { %v15201_v61 = vmax.f32 %v5683_v60, %v15198_v2  ;;  %v9971_v60 = vld [vmem:[#allocation2 + $0x98] ss:$12 sps:$4 sm:$0xff]  }
 0xbab   : > { %v5664_v53 = vpop.xlane.xlu0 %5663 }
 0xbac   : > { %v5730_v58 = vsub.f32 %v15035_v49, %v15201_v61  ;;  %v5731_v17 = vsub.f32 %v15028_v15, %v15201_v61  ;;  %v5682_v33 = vmax.f32 %v5664_v53, %v15189_v38  ;;  %v9972_v53 = vld [vmem:[#allocation2 + $0x158] ss:$12 sps:$4 sm:$0xff]  }
 0xbae   : > { %v5792_v13 = vmul.f32 1.442695, %v5730_v58  ;;  %v5794_v1 = vmul.f32 1.442695, %v5731_v17 }
 0xbaf   : > { %v15208_v34 = vpop.xlane.xlu0 %5615 }
 0xbb0   : > { %9601 = vpow2.f32 %v5792_v13  ;;  %v15211_v18 = vmax.f32 %v5682_v33, %v15208_v34  ;;  %v9973_v13 = vld [vmem:[#allocation2 + $0x140] ss:$12 sps:$4 sm:$0xff]  }
 0xbb1   : > { %9603 = vpow2.f32 %v5794_v1 }
 0xbb2   : > { %7156 = vrot.lane.b32.xlu1 %v9971_v60, %s10086_s21  ;;  %v5728_v49 = vsub.f32 %v15053_v39, %v15211_v18  ;;  %v5729_v15 = vsub.f32 %v15044_v3, %v15211_v18  ;;  %v6403_v3 = vpop.f32.mrf.mxu1 }
 0xbb4   : > { %v5788_v58 = vmul.f32 1.442695, %v5728_v49  ;;  %v5790_v17 = vmul.f32 1.442695, %v5729_v15 }
 0xbb6   : > { %9605 = vpow2.f32 %v5788_v58  ;;  %7172 = vrot.lane.b32.xlu0 %v9972_v53, %s10086_s21  ;;  %v6405_v53 = vpop.f32.mrf.mxu1 }
 0xbb7   : > { %9607 = vpow2.f32 %v5790_v17 }
 0xbb8   : > { %v6407_v17 = vpop.f32.mrf.mxu1 }
 0xbb9   : > { %v15231_v40 = vadd.f32 %v6407_v17, %v17498_v45  ;;  %v15247_v45 = vadd.f32 %v6403_v3, %v17504_v48 }
 0xbba   : > { %7170 = vrot.lane.b32.xlu0 %v9973_v13, %s10086_s21  ;;  %v6409_v0 = vpop.f32.mrf.mxu1 }
 0xbbb   : > { %v15226_v13 = vadd.f32 %v6409_v0, %v17496_v4  ;;  %v6571_v4 = vsel %vm2990_vm1, %v14858_v12, 0.0  ;;  %v15249_v0 = vpop.permute.xlu0 %6536 }
 0xbbd   : > { %v9602_v1 = vpop.eup %9601 }
 0xbbe   : > { %v9604_v33 = vpop.eup %9603  ;;  %7154 = vrot.lane.b32.xlu0 %v9974_v51, %s10086_s21  ;;  %v6568_v51 = vsel %vm2990_vm1, %v14806_v44, 0.0  ;;  %v6704_v44 = vsel %vm2990_vm1, %v14860_v35, 0.0 }
 0xbbf   : > { %v15221_v60 = vadd.f32 %v9604_v33, %v9602_v1  ;;  %v15257_v12 = vpop.permute.xlu0 %6674 }
 0xbc1   : > { %17630 = vst [vmem:[#allocation55_spill] sm:$0xff] %v15221_v60  ;;  %v15233_v60 = vpop.permute.xlu1 %6538 }
 0xbc3   : > { %v9606_v39 = vpop.eup %9605 }
 0xbc4   : > { %v9608_v43 = vpop.eup %9607  ;;  %v6002_v49 = vpack.c.bf16 %v9602_v1, %v9606_v39  ;;  %v15238_v1 = vadd.f32 %v6405_v53, %v17501_v57  ;;  %v15264_v53 = vpop.f32.mrf.mxu0 }
 0xbc5   : > { %v6003_v15 = vpack.c.bf16 %v9604_v33, %v9608_v43  ;;  %v15223_v58 = vadd.f32 %v9608_v43, %v9606_v39  ;;  %v6755_v43 = vmax.f32 %v15231_v40, %v15226_v13  ;;  %v15240_v33 = vpop.permute.xlu1 %6672  ;;  %17635 = vst [vmem:[#allocation217_spill] sm:$0xff] %v15264_v53  ;;  %v17657_v53 = vld [vmem:[#allocation209_spill] sm:$0xff] }
 0xbc6   : > { %v6752_v39 = vmax.f32 %v15247_v45, %v15238_v1 }
 0xbc7   : > { %17631 = vst [vmem:[#allocation57_spill] sm:$0xff] %v15223_v58  ;;  %6160 = vmatprep.mubr.bf16.mxu0 %v6003_v15 }
 0xbc8   : > { %6161 = vmatmul.mubr.bf16.gmra.mxu0 %v6002_v49  ;;  %v6707_v49 = vsel %vm2990_vm1, %v14867_v16, 0.0 }
 0xbd6   : > { %6569 = vadd.xlane.f32.xlu1 %v6568_v51 }
 0xbda   : > { %6756 = vmax.xlane.f32.xlu1 %v6755_v43 }
 0xbdd   : > { %6572 = vadd.xlane.f32.xlu0 %v6571_v4  ;;  %v15273_v4 = vpop.f32.mrf.mxu0 }
 0xbde   : > { %6705 = vadd.xlane.f32.xlu1 %v6704_v44  ;;  %17637 = vst [vmem:[#allocation219_spill] sm:$0xff] %v15273_v4 }
 0xbe1   : > { %v15253_v57 = vpop.xlane.xlu1 %6557  ;;  %6753 = vmax.xlane.f32.xlu0 %v6752_v39 }
 0xbe2   : > { %17632 = vst [vmem:[#allocation58_spill] sm:$0xff] %v15253_v57  ;;  %6708 = vadd.xlane.f32.xlu1 %v6707_v49 }
 0xbe5   : > { %v6745_v35 = vpop.xlane.xlu1 %6744 }
 0xbe8   : > { %v15259_v15 = vpop.xlane.xlu0 %6560 }
 0xbe9   : > { %17633 = vst [vmem:[#allocation56_spill] sm:$0xff] %v15259_v15  ;;  %v6789_v48 = vmax.f32 %v6745_v35, %v15259_v15  ;;  %v15262_v3 = vpop.xlane.xlu1 %6696 }
 0xbea   : > { %17634 = vst [vmem:[#allocation216_spill] sm:$0xff] %v15262_v3 }
 0xbeb   : > { %v15267_v17 = vmax.f32 %v6789_v48, %v15262_v3  ;;  %v9975_v48 = vld [vmem:[#allocation2 + $0x68] ss:$12 sps:$4 sm:$0xff]  }
 0xbec   : > { %v6742_v51 = vpop.xlane.xlu0 %6741 }
 0xbed   : > { %17636 = vst [vmem:[#allocation218_spill] sm:$0xff] %v15267_v17  ;;  %v6822_v16 = vsub.f32 %v15107_v30, %v15267_v17  ;;  %v6823_v43 = vsub.f32 %v15102_v9, %v15267_v17  ;;  %v6788_v49 = vmax.f32 %v6742_v51, %v15253_v57  ;;  %v15282_v30 = vpop.f32.mrf.mxu0  ;;  %v7159_v51 = vpop.permute.xlu1 %7158 }
 0xbee   : > { %17640 = vst [vmem:[#allocation222_spill] sm:$0xff] %v15282_v30 }
 0xbef   : > { %v6856_v44 = vmul.f32 1.442695, %v6822_v16  ;;  %v6858_v39 = vmul.f32 1.442695, %v6823_v43 }
 0xbf0   : > { %v15276_v35 = vpop.xlane.xlu0 %6693 }
 0xbf1   : > { %17638 = vst [vmem:[#allocation220_spill] sm:$0xff] %v15276_v35  ;;  %9609 = vpow2.f32 %v6856_v44  ;;  %v15279_v15 = vmax.f32 %v6788_v49, %v15276_v35  ;;  %v15288_v44 = vpop.f32.mrf.mxu0 }
 0xbf2   : > { %9611 = vpow2.f32 %v6858_v39  ;;  %17641 = vst [vmem:[#allocation223_spill] sm:$0xff] %v15288_v44  ;;  %v9976_v39 = vld [vmem:[#allocation2 + $0x128] ss:$12 sps:$4 sm:$0xff]  }
 0xbf3   : > { %17639 = vst [vmem:[#allocation221_spill] sm:$0xff] %v15279_v15  ;;  %7152 = vrot.lane.b32.xlu1 %v9975_v48, %s10086_s21  ;;  %v6820_v9 = vsub.f32 %v15125_v50, %v15279_v15  ;;  %v6821_v16 = vsub.f32 %v15116_v42, %v15279_v15  ;;  %v15291_v49 = vpop.f32.mrf.mxu0  ;;  %v9977_v48 = vld [vmem:[#allocation2 + $0x110] ss:$12 sps:$4 sm:$0xff]  }
 0xbf4   : > { %v7175_v43 = vpop.permute.xlu0 %7174  ;;  %17642 = vst [vmem:[#allocation224_spill] sm:$0xff] %v15291_v49 }
 0xbf5   : > { %v6852_v3 = vmul.f32 1.442695, %v6820_v9  ;;  %v6854_v57 = vmul.f32 1.442695, %v6821_v16  ;;  %8840 = vmatprep.subr.bf16.mxu0 %v7175_v43  ;;  %v15296_v35 = vpop.f32.mrf.mxu0  ;;  %v9978_v9 = vld [vmem:[#allocation2 + $0x50] ss:$12 sps:$4 sm:$0xff]  }
 0xbf6   : > { %8841 = vmatpush3.bf16.msra.mxu0 %v7159_v51  ;;  %17644 = vst [vmem:[#allocation226_spill] sm:$0xff] %v15296_v35  ;;  %v6413_v51 = vpop.f32.mrf.mxu1 }
 0xbf7   : > { %9613 = vpow2.f32 %v6852_v3  ;;  %7168 = vrot.lane.b32.xlu0 %v9976_v39, %s10086_s21  ;;  %v15302_v3 = vpop.f32.mrf.mxu0 }
 0xbf8   : > { %9615 = vpow2.f32 %v6854_v57  ;;  %17645 = vst [vmem:[#allocation227_spill] sm:$0xff] %v15302_v3 }
 0xbf9   : > { %v15311_v17 = vpop.f32.mrf.mxu0 }
 0xbfa   : > { %17647 = vst [vmem:[#allocation229_spill] sm:$0xff] %v15311_v17  ;;  %v17654_v17 = vld [vmem:[#allocation71_spill] sm:$0xff] }
 0xbfb   : > { %7166 = vrot.lane.b32.xlu0 %v9977_v48, %s10086_s21  ;;  %v15313_v35 = vpop.f32.mrf.mxu0 }
 0xbfc   : > { %17648 = vst [vmem:[#allocation230_spill] sm:$0xff] %v15313_v35 }
 0xbfd   : > { %v15315_v44 = vpop.f32.mrf.mxu0 }
 0xbfe   : > { %v15294_v50 = vpop.eup %9609  ;;  %17649 = vst [vmem:[#allocation231_spill] sm:$0xff] %v15315_v44 }
 0xbff   : > { %17643 = vst [vmem:[#allocation225_spill] sm:$0xff] %v15294_v50  ;;  %v9612_v42 = vpop.eup %9611  ;;  %7150 = vrot.lane.b32.xlu0 %v9978_v9, %s10086_s21  ;;  %v6415_v9 = vpop.f32.mrf.mxu1 }
 0xc00   : > { %v15300_v16 = vadd.f32 %v9612_v42, %v15294_v50  ;;  %v15317_v30 = vpop.f32.mrf.mxu0 }
 0xc01   : > { %v6417_v49 = vpop.f32.mrf.mxu1  ;;  %17650 = vst [vmem:[#allocation232_spill] sm:$0xff] %v15317_v30  ;;  %v15334_v30 = vadd.f32 %v6415_v9, %v17654_v17  ;;  %v17661_v9 = vld [vmem:[#allocation210_spill] sm:$0xff] }
 0xc03   : > { %v6419_v3 = vpop.f32.mrf.mxu1  ;;  %17655 = vst [vmem:[#allocation71_spill] sm:$0xff] %v15334_v30 }
 0xc04   : > { %v15304_v43 = vpop.eup %9613  ;;  %v15320_v4 = vadd.f32 %v6419_v3, %v17520_v25  ;;  %v17656_v3 = vld [vmem:[#allocation27_spill] sm:$0xff] }
 0xc05   : > { %17646 = vst [vmem:[#allocation228_spill] sm:$0xff] %v15304_v43  ;;  %v9616_v57 = vpop.eup %9615 }
 0xc06   : > { %v7109_v48 = vpack.c.bf16 %v9612_v42, %v9616_v57  ;;  %v15309_v15 = vadd.f32 %v9616_v57, %v15304_v43  ;;  %v6574_v42 = vsel %vm2990_vm1, %v14912_v55, 0.0  ;;  %v17651_v57 = vld [vmem:[#allocation67_spill] sm:$0xff]  ;;  %v6577_v55 = vsel %vm2990_vm1, %v17656_v3, 0.0 }
 0xc07   : > { %v15325_v39 = vadd.f32 %v6417_v49, %v17651_v57  ;;  %v6710_v49 = vsel %vm2990_vm1, %v17657_v53, 0.0 }
 0xc08   : > { %7224 = vmatprep.mubr.bf16.mxu0 %v7109_v48  ;;  %v15327_v48 = vpop.f32.mrf.mxu0 }
 0xc09   : > { %17652 = vst [vmem:[#allocation67_spill] sm:$0xff] %v15327_v48  ;;  %v6761_v35 = vmax.f32 %v15325_v39, %v15320_v4 }
 0xc0a   : > { %v15331_v44 = vpop.f32.mrf.mxu0 }
 0xc0b   : > { %17653 = vst [vmem:[#allocation233_spill] sm:$0xff] %v15331_v44  ;;  %v6713_v44 = vsel %vm2990_vm1, %v17661_v9, 0.0 }
 0xc0c   : > { %v15345_v48 = vpop.f32.mrf.mxu0 }
 0xc0d   : > { %17660 = vst [vmem:[#allocation209_spill] sm:$0xff] %v15345_v48 }
 0xc0e   : > { %v15353_v3 = vpop.f32.mrf.mxu0 }
 0xc17   : > { %6575 = vadd.xlane.f32.xlu1 %v6574_v42  ;;  %v17658_v42 = vld [vmem:[#allocation70_spill] sm:$0xff] }
 0xc18   : > { %v15343_v57 = vadd.f32 %v6413_v51, %v17658_v42  ;;  %17662 = vst [vmem:[#allocation70_spill] sm:$0xff] %v15353_v3 }
 0xc1a   : > { %17659 = vst [vmem:[#allocation27_spill] sm:$0xff] %v15343_v57 }
 0xc1b   : > { %6762 = vmax.xlane.f32.xlu1 %v6761_v35  ;;  %v6758_v35 = vmax.f32 %v15343_v57, %v15334_v30  ;;  %v6580_v57 = vsel %vm2990_vm1, %v15030_v8, 0.0  ;;  %v17683_v8 = vld [vmem:[#allocation77_spill] sm:$0xff] }
 0xc1e   : > { %v15336_v25 = vpop.xlane.xlu1 %6563  ;;  %6578 = vadd.xlane.f32.xlu0 %v6577_v55  ;;  %v15359_v55 = vpop.f32.mrf.mxu0 }
 0xc1f   : > { %6711 = vadd.xlane.f32.xlu1 %v6710_v49  ;;  %17663 = vst [vmem:[#allocation210_spill] sm:$0xff] %v15359_v55  ;;  %v9979_v55 = vld [vmem:[#allocation2 + $0x38] ss:$12 sps:$4 sm:$0xff]  }
 0xc20   : > { %v15365_v48 = vpop.f32.mrf.mxu0 }
 0xc21   : > { %17664 = vst [vmem:[#allocation234_spill] sm:$0xff] %v15365_v48 }
 0xc22   : > { %v15349_v17 = vpop.xlane.xlu1 %6750  ;;  %6759 = vmax.xlane.f32.xlu0 %v6758_v35  ;;  %v15367_v9 = vpop.f32.mrf.mxu0  ;;  %v5808_v35 = vsub.f32 %v15118_v46, %v15149_v52  ;;  %v9981_v46 = vld [vmem:[#allocation2 + $0xe0] ss:$12 sps:$4 sm:$0xff]  }
 0xc23   : > { %6714 = vadd.xlane.f32.xlu1 %v6713_v44  ;;  %17665 = vst [vmem:[#allocation235_spill] sm:$0xff] %v15367_v9  ;;  %v5884_v9 = vmul.f32 1.442695, %v5856_v10  ;;  %v5347_v10 = vunpack.c.l.bf16 %v8291_v26 }
 0xc24   : > { %v15371_v3 = vpop.f32.mrf.mxu0  ;;  %v5836_v37 = vmul.f32 1.442695, %v5808_v35  ;;  %v6423_v35 = vpop.f32.mrf.mxu1 }
 0xc25   : > { %v15355_v53 = vpop.xlane.xlu0 %6566  ;;  %17666 = vst [vmem:[#allocation236_spill] sm:$0xff] %v15371_v3 }
 0xc26   : > { %v15357_v51 = vpop.xlane.xlu1 %6699  ;;  %9617 = vpow2.f32 %v5836_v37 }
 0xc27   : > { %9619 = vpow2.f32 %v5884_v9 }
 0xc29   : > { %v15361_v49 = vpop.xlane.xlu0 %6747 }
 0xc2a   : > { %v15363_v42 = vpop.xlane.xlu1 %6702 }
 0xc2d   : > { %v7173_v58 = vpop.permute.xlu0 %7172 }
 0xc2e   : > { %v7157_v54 = vpop.permute.xlu1 %7156  ;;  %8842 = vmatprep.subr.bf16.mxu0 %v7173_v58  ;;  %v15376_v58 = vpop.f32.mrf.mxu0 }
 0xc2f   : > { %8843 = vmatpush3.bf16.msra.mxu0 %v7157_v54  ;;  %17667 = vst [vmem:[#allocation237_spill] sm:$0xff] %v15376_v58  ;;  %v9980_v54 = vld [vmem:[#allocation2 + $0xf8] ss:$12 sps:$4 sm:$0xff]  }
 0xc30   : > { %v15379_v41 = vpop.f32.mrf.mxu0  ;;  %v17675_v58 = vld [vmem:[#allocation22_spill] sm:$0xff] }
 0xc31   : > { %v7171_v44 = vpop.permute.xlu0 %7170  ;;  %17668 = vst [vmem:[#allocation238_spill] sm:$0xff] %v15379_v41  ;;  %v15400_v3 = vrot.slane %v5347_v10, %v17675_v58 }
 0xc32   : > { %8844 = vmatprep.subr.bf16.mxu0 %v7171_v44  ;;  %v9982_v44 = vld [vmem:[#allocation2 + $0x20] ss:$12 sps:$4 sm:$0xff]  }
 0xc33   : > { %v15392_v37 = vpop.eup %9617 }
 0xc34   : > { %7148 = vrot.lane.b32.xlu1 %v9979_v55, %s10086_s21  ;;  %v15382_v55 = vpop.f32.mrf.mxu0  ;;  %17672 = vst [vmem:[#allocation242_spill] sm:$0xff] %v15392_v37 }
 0xc35   : > { %v7155_v48 = vpop.permute.xlu0 %7154  ;;  %17669 = vst [vmem:[#allocation239_spill] sm:$0xff] %v15382_v55  ;;  %v15397_v55 = vpop.eup %9619 }
 0xc36   : > { %8845 = vmatpush3.bf16.msra.mxu0 %v7155_v48  ;;  %v15388_v52 = vpop.f32.mrf.mxu0  ;;  %17674 = vst [vmem:[#allocation243_spill] sm:$0xff] %v15397_v55 }
 0xc37   : > { %17670 = vst [vmem:[#allocation240_spill] sm:$0xff] %v15388_v52 }
 0xc38   : > { %7164 = vrot.lane.b32.xlu0 %v9980_v54, %s10086_s21  ;;  %v15390_v48 = vpop.f32.mrf.mxu0  ;;  %v17673_v54 = vld [vmem:[#allocation14_spill] sm:$0xff] }
 0xc39   : > { %17671 = vst [vmem:[#allocation241_spill] sm:$0xff] %v15390_v48  ;;  %v6185_v48 = vmul.f32 %v15397_v55, %v15400_v3 }
 0xc3c   : > { %7162 = vrot.lane.b32.xlu0 %v9981_v46, %s10086_s21  ;;  %v15395_v46 = vrot.slane %v5347_v10, %v17673_v54  ;;  %v17679_v10 = vld [vmem:[#allocation72_spill] sm:$0xff] }
 0xc3e   : > { %v6020_v52 = vmul.f32 %v15392_v37, %v15395_v46 }
 0xc40   : > { %7146 = vrot.lane.b32.xlu0 %v9982_v44, %s10086_s21  ;;  %v6425_v44 = vpop.f32.mrf.mxu1 }
 0xc42   : > { %v6427_v50 = vpop.f32.mrf.mxu1 }
 0xc43   : > { %v15414_v58 = vadd.f32 %v6427_v50, %v17679_v10 }
 0xc44   : > { %v6429_v54 = vpop.f32.mrf.mxu1 }
 0xc45   : > { %v15409_v30 = vadd.f32 %v6429_v54, %v17677_v47  ;;  %17680 = vst [vmem:[#allocation72_spill] sm:$0xff] %v15414_v58  ;;  %v6583_v47 = vsel %vm2990_vm1, %v15041_v7, 0.0  ;;  %v15428_v54 = vadd.f32 %v6423_v35, %v17683_v8 }
 0xc47   : > { %v8796_v9 = vpop.f32.mrf.mxu0  ;;  %17678 = vst [vmem:[#allocation73_spill] sm:$0xff] %v15409_v30  ;;  %17684 = vst [vmem:[#allocation77_spill] sm:$0xff] %v15428_v54 }
 0xc49   : > { %v8797_v41 = vpop.f32.mrf.mxu0 }
 0xc4a   : > { %v8798_v26 = vadd.f32 %v8797_v41, %v8796_v9  ;;  %v6767_v41 = vmax.f32 %v15414_v58, %v15409_v30 }
 0xc4c   : > { %v6155_v43 = vadd.f32 %v8798_v26, %v6020_v52  ;;  %v17681_v52 = vld [vmem:[#allocation74_spill] sm:$0xff] }
 0xc4d   : > { %v15419_v9 = vadd.f32 %v6425_v44, %v17681_v52  ;;  %v6719_v44 = vsel %vm2990_vm1, %v15057_v5, 0.0  ;;  %v9983_v5 = vld [vmem:[#allocation2 + $0x8] ss:$12 sps:$4 sm:$0xff]  }
 0xc4e   : > { %v15406_v32 = vadd.f32 %v6185_v48, %v6155_v43  ;;  %v6716_v48 = vsel %vm2990_vm1, %v15039_v20, 0.0 }
 0xc4f   : > { %17682 = vst [vmem:[#allocation74_spill] sm:$0xff] %v15419_v9  ;;  %v6764_v50 = vmax.f32 %v15428_v54, %v15419_v9 }
 0xc50   : > { %17676 = vst [vmem:[#allocation244_spill] sm:$0xff] %v15406_v32  ;;  %v9984_v32 = vld [vmem:[#allocation2 + $0xc8] ss:$12 sps:$4 sm:$0xff]  }
 0xc58   : > { %6581 = vadd.xlane.f32.xlu1 %v6580_v57 }
 0xc5c   : > { %6768 = vmax.xlane.f32.xlu1 %v6767_v41 }
 0xc5f   : > { %v15421_v43 = vpop.xlane.xlu1 %6569  ;;  %6584 = vadd.xlane.f32.xlu0 %v6583_v47  ;;  %v5810_v47 = vsub.f32 %v15189_v38, %v15211_v18 }
 0xc60   : > { %6717 = vadd.xlane.f32.xlu1 %v6716_v48  ;;  %v5858_v48 = vsub.f32 %v15208_v34, %v15211_v18  ;;  %v15454_v18 = vpop.f32.mrf.mxu0 }
 0xc61   : > { %17685 = vst [vmem:[#allocation245_spill] sm:$0xff] %v15454_v18 }
 0xc63   : > { %v15432_v57 = vpop.xlane.xlu1 %6756  ;;  %6765 = vmax.xlane.f32.xlu0 %v6764_v50  ;;  %v5811_v50 = vsub.f32 %v15195_v24, %v15201_v61 }
 0xc64   : > { %6720 = vadd.xlane.f32.xlu1 %v6719_v44  ;;  %v5840_v44 = vmul.f32 1.442695, %v5810_v47  ;;  %v15456_v47 = vpop.f32.mrf.mxu0 }
 0xc65   : > { %v5842_v38 = vmul.f32 1.442695, %v5811_v50  ;;  %17686 = vst [vmem:[#allocation246_spill] sm:$0xff] %v15456_v47 }
 0xc66   : > { %v15436_v26 = vpop.xlane.xlu0 %6572  ;;  %9621 = vpow2.f32 %v5840_v44 }
 0xc67   : > { %v15438_v7 = vpop.xlane.xlu1 %6705 }
 0xc6a   : > { %v15440_v20 = vpop.xlane.xlu0 %6753 }
 0xc6b   : > { %v15442_v35 = vpop.xlane.xlu1 %6708 }
 0xc6e   : > { %v7169_v10 = vpop.permute.xlu0 %7168 }
 0xc6f   : > { %v7153_v41 = vpop.permute.xlu1 %7152  ;;  %8846 = vmatprep.subr.bf16.mxu0 %v7169_v10  ;;  %v5859_v10 = vsub.f32 %v15198_v2, %v15201_v61 }
 0xc70   : > { %8847 = vmatpush3.bf16.msra.mxu0 %v7153_v41  ;;  %v5888_v41 = vmul.f32 1.442695, %v5858_v48 }
 0xc72   : > { %v7167_v52 = vpop.permute.xlu0 %7166  ;;  %9623 = vpow2.f32 %v5888_v41 }
 0xc73   : > { %8848 = vmatprep.subr.bf16.mxu0 %v7167_v52  ;;  %v6433_v52 = vpop.f32.mrf.mxu1  ;;  %9625 = vpow2.f32 %v5842_v38 }
 0xc75   : > { %7144 = vrot.lane.b32.xlu1 %v9983_v5, %s10086_s21  ;;  %v5890_v5 = vmul.f32 1.442695, %v5859_v10  ;;  %v6435_v34 = vpop.f32.mrf.mxu1 }
 0xc76   : > { %v7151_v8 = vpop.permute.xlu0 %7150 }
 0xc77   : > { %8849 = vmatpush3.bf16.msra.mxu0 %v7151_v8  ;;  %9627 = vpow2.f32 %v5890_v5  ;;  %v6437_v24 = vpop.f32.mrf.mxu1  ;;  %v15458_v8 = vpop.eup %9621 }
 0xc78   : > { %17687 = vst [vmem:[#allocation247_spill] sm:$0xff] %v15458_v8  ;;  %v6022_v50 = vmul.f32 %v15458_v8, %v15395_v46 }
 0xc79   : > { %7160 = vrot.lane.b32.xlu0 %v9984_v32, %s10086_s21  ;;  %v6439_v2 = vpop.f32.mrf.mxu1 }
 0xc7b   : > { %v6443_v41 = vpop.f32.mrf.mxu1 }
 0xc7d   : > { %v6445_v54 = vpop.f32.mrf.mxu1 }
 0xc7f   : > { %v15460_v48 = vpop.eup %9623 }
 0xc80   : > { %17688 = vst [vmem:[#allocation248_spill] sm:$0xff] %v15460_v48  ;;  %v15464_v10 = vpop.eup %9625  ;;  %v6187_v18 = vmul.f32 %v15460_v48, %v15400_v3  ;;  %v6586_v48 = vsel %vm2990_vm1, %v15113_v6, 0.0 }
 0xc81   : > { %17689 = vst [vmem:[#allocation249_spill] sm:$0xff] %v15464_v10  ;;  %v6023_v30 = vmul.f32 %v15464_v10, %v15395_v46 }
 0xc84   : > { %v15468_v47 = vpop.eup %9627 }
 0xc85   : > { %17690 = vst [vmem:[#allocation250_spill] sm:$0xff] %v15468_v47 }
 0xc88   : > { %v8802_v61 = vpop.f32.mrf.mxu0 }
 0xc8a   : > { %v8803_v32 = vpop.f32.mrf.mxu0 }
 0xc8b   : > { %v8804_v44 = vadd.f32 %v8803_v32, %v8802_v61  ;;  %v6188_v61 = vmul.f32 %v15468_v47, %v15400_v3  ;;  %v17732_v47 = vld [vmem:[#allocation29_spill] sm:$0xff] }
 0xc8c   : > { %v8805_v38 = vpop.f32.mrf.mxu0 }
 0xc8d   : > { %v6163_v5 = vadd.f32 %v8804_v44, %v6022_v50  ;;  %v6447_v50 = vpop.f32.mrf.mxu1  ;;  %v17693_v44 = vld [vmem:[#allocation80_spill] sm:$0xff] }
 0xc8e   : > { %v8806_v55 = vpop.f32.mrf.mxu0  ;;  %v15479_v58 = vadd.f32 %v6435_v34, %v17693_v44  ;;  %v6725_v34 = vsel %vm2990_vm1, %v15129_v56, 0.0 }
 0xc8f   : > { %v15470_v37 = vadd.f32 %v6187_v18, %v6163_v5  ;;  %v8807_v9 = vadd.f32 %v8806_v55, %v8805_v38  ;;  %v6589_v18 = vsel %vm2990_vm1, %v15099_v29, 0.0  ;;  %v17694_v5 = vld [vmem:[#allocation81_spill] sm:$0xff]  ;;  %v6449_v55 = vpop.f32.mrf.mxu1  ;;  %v17696_v38 = vld [vmem:[#allocation82_spill] sm:$0xff] }
 0xc90   : > { %v15496_v6 = vadd.f32 %v6437_v24, %v17696_v38 }
 0xc91   : > { %17691 = vst [vmem:[#allocation251_spill] sm:$0xff] %v15470_v37  ;;  %v6166_v8 = vadd.f32 %v8807_v9, %v6023_v30  ;;  %v15486_v37 = vadd.f32 %v6433_v52, %v17694_v5  ;;  %v17695_v9 = vld [vmem:[#allocation83_spill] sm:$0xff]  ;;  %v17697_v52 = vld [vmem:[#allocation94_spill] sm:$0xff] }
 0xc93   : > { %v15476_v32 = vadd.f32 %v6188_v61, %v6166_v8  ;;  %v6770_v30 = vmax.f32 %v15486_v37, %v15479_v58  ;;  %v15491_v8 = vadd.f32 %v6439_v2, %v17695_v9  ;;  %v6453_v61 = vpop.f32.mrf.mxu1  ;;  %v6595_v2 = vsel %vm2990_vm1, %v15169_v22, 0.0 }
 0xc95   : > { %17692 = vst [vmem:[#allocation252_spill] sm:$0xff] %v15476_v32  ;;  %v6773_v29 = vmax.f32 %v15496_v6, %v15491_v8  ;;  %v6455_v56 = vpop.f32.mrf.mxu1 }
 0xc97   : > { %v6457_v9 = vpop.f32.mrf.mxu1 }
 0xc98   : > { %6587 = vadd.xlane.f32.xlu0 %v6586_v48  ;;  %v15501_v48 = vadd.f32 %v6449_v55, %v17697_v52  ;;  %v6722_v55 = vsel %vm2990_vm1, %v15111_v36, 0.0  ;;  %v6731_v52 = vsel %vm2990_vm1, %v15193_v31, 0.0  ;;  %v6791_v31 = vmax.f32 %v15349_v17, %v15355_v53 }
 0xc99   : > { %6590 = vadd.xlane.f32.xlu1 %v6589_v18  ;;  %v17698_v18 = vld [vmem:[#allocation93_spill] sm:$0xff]  ;;  %v6459_v36 = vpop.f32.mrf.mxu1 }
 0xc9a   : > { %v15508_v5 = vadd.f32 %v6447_v50, %v17698_v18 }
 0xc9c   : > { %6771 = vmax.xlane.f32.xlu0 %v6770_v30  ;;  %v6779_v24 = vmax.f32 %v15508_v5, %v15501_v48 }
 0xc9d   : > { %6726 = vadd.xlane.f32.xlu1 %v6725_v34  ;;  %v17699_v34 = vld [vmem:[#allocation88_spill] sm:$0xff] }
 0xc9e   : > { %v15517_v38 = vadd.f32 %v6445_v54, %v17699_v34 }
 0xca0   : > { %v15503_v44 = vpop.xlane.xlu1 %6575  ;;  %6774 = vmax.xlane.f32.xlu0 %v6773_v29  ;;  %v6592_v29 = vsel %vm2990_vm1, %v15185_v21, 0.0  ;;  %v6601_v21 = vsel %vm2990_vm1, %v15233_v60, 0.0  ;;  %v6790_v60 = vmax.f32 %v15361_v49, %v15336_v25  ;;  %v6737_v49 = vsel %vm2990_vm1, %v15257_v12, 0.0 }
 0xca1   : > { %6596 = vadd.xlane.f32.xlu1 %v6595_v2  ;;  %v17700_v2 = vld [vmem:[#allocation87_spill] sm:$0xff] }
 0xca2   : > { %v15528_v18 = vadd.f32 %v6443_v41, %v17700_v2  ;;  %v15544_v41 = vadd.f32 %v6457_v9, %v17604_v27  ;;  %v15556_v27 = vadd.f32 %v6455_v56, %v17605_v11  ;;  %v15570_v11 = vmax.f32 %v6790_v60, %v15357_v51  ;;  %v17703_v60 = vld [vmem:[#allocation143_spill] sm:$0xff] }
 0xca4   : > { %v15512_v30 = vpop.xlane.xlu1 %6762  ;;  %6723 = vadd.xlane.f32.xlu0 %v6722_v55  ;;  %v6776_v54 = vmax.f32 %v15528_v18, %v15517_v38  ;;  %v6825_v12 = vsub.f32 %v15174_v14, %v15570_v11 }
 0xca5   : > { %6780 = vmax.xlane.f32.xlu1 %v6779_v24  ;;  %v15533_v24 = vadd.f32 %v6459_v36, %v17603_v28  ;;  %v6728_v36 = vsel %vm2990_vm1, %v15176_v19, 0.0  ;;  %v6598_v19 = vsel %vm2990_vm1, %v15249_v0, 0.0  ;;  %v17701_v0 = vld [vmem:[#allocation145_spill] sm:$0xff] }
 0xca7   : > { %v15519_v22 = vpop.xlane.xlu0 %6578  ;;  %v6785_v28 = vmax.f32 %v15544_v41, %v15533_v24 }
 0xca8   : > { %v15521_v50 = vpop.xlane.xlu1 %6711  ;;  %6593 = vadd.xlane.f32.xlu0 %v6592_v29  ;;  %v15547_v29 = vmax.f32 %v6791_v31, %v15363_v42 }
 0xca9   : > { %6732 = vadd.xlane.f32.xlu1 %v6731_v52 }
 0xcaa   : > { %v6826_v17 = vsub.f32 %v15167_v62, %v15547_v29  ;;  %v6827_v9 = vsub.f32 %v15162_v59, %v15547_v29 }
 0xcab   : > { %v15535_v55 = vpop.xlane.xlu0 %6759 }
 0xcac   : > { %v15537_v34 = vpop.xlane.xlu1 %6714  ;;  %6777 = vmax.xlane.f32.xlu0 %v6776_v54  ;;  %v6864_v59 = vmul.f32 1.442695, %v6826_v17  ;;  %v6866_v56 = vmul.f32 1.442695, %v6827_v9  ;;  %v17705_v17 = vld [vmem:[#allocation146_spill] sm:$0xff]  ;;  %v6792_v9 = vmax.f32 %v15440_v20, %v15421_v43  ;;  %v6794_v20 = vmax.f32 %v15535_v55, %v15503_v44 }
 0xcad   : > { %6602 = vadd.xlane.f32.xlu1 %v6601_v21  ;;  %v15565_v21 = vadd.f32 %v6453_v61, %v17607_v23  ;;  %v6824_v23 = vsub.f32 %v15183_v63, %v15570_v11  ;;  %v6734_v61 = vsel %vm2990_vm1, %v15240_v33, 0.0  ;;  %v17704_v63 = vld [vmem:[#allocation61_spill] sm:$0xff]  ;;  %v6795_v33 = vmax.f32 %v15512_v30, %v15519_v22  ;;  %v17707_v30 = vld [vmem:[#allocation152_spill] sm:$0xff] }
 0xcae   : > { %9629 = vpow2.f32 %v6864_v59  ;;  %v15623_v55 = vmax.f32 %v6794_v20, %v15521_v50 }
 0xcaf   : > { %v7165_v52 = vpop.permute.xlu0 %7164  ;;  %v6782_v62 = vmax.f32 %v15565_v21, %v15556_v27  ;;  %9631 = vpow2.f32 %v6866_v56  ;;  %v15608_v56 = vmax.f32 %v6792_v9, %v15438_v7 }
 0xcb0   : > { %v7149_v2 = vpop.permute.xlu1 %7148  ;;  %6729 = vadd.xlane.f32.xlu0 %v6728_v36  ;;  %8850 = vmatprep.subr.bf16.mxu0 %v7165_v52  ;;  %v17702_v52 = vld [vmem:[#allocation147_spill] sm:$0xff]  ;;  %v6793_v36 = vmax.f32 %v15432_v57, %v15436_v26 }
 0xcb1   : > { %6786 = vmax.xlane.f32.xlu1 %v6785_v28  ;;  %8851 = vmatpush3.bf16.msra.mxu0 %v7149_v2  ;;  %v6860_v28 = vmul.f32 1.442695, %v6824_v23  ;;  %v6862_v2 = vmul.f32 1.442695, %v6825_v12  ;;  %v17708_v12 = vld [vmem:[#allocation160_spill] sm:$0xff] }
 0xcb2   : > { %v15587_v14 = vmax.f32 %v6793_v36, %v15442_v35 }
 0xcb3   : > { %v7163_v54 = vpop.permute.xlu0 %7162  ;;  %9633 = vpow2.f32 %v6860_v28 }
 0xcb4   : > { %6599 = vadd.xlane.f32.xlu0 %v6598_v19  ;;  %8852 = vmatprep.subr.bf16.mxu0 %v7163_v54  ;;  %9635 = vpow2.f32 %v6862_v2  ;;  %v17706_v54 = vld [vmem:[#allocation192_spill] sm:$0xff]  ;;  %v6830_v57 = vsub.f32 %v15231_v40, %v15587_v14  ;;  %v15598_v19 = vmax.f32 %v6795_v33, %v15537_v34  ;;  %v17711_v33 = vld [vmem:[#allocation71_spill] sm:$0xff] }
 0xcb5   : > { %6738 = vadd.xlane.f32.xlu1 %v6737_v49 }
 0xcb6   : > { %v6872_v40 = vmul.f32 1.442695, %v6830_v57  ;;  %v17713_v57 = vld [vmem:[#allocation149_spill] sm:$0xff] }
 0xcb7   : > { %v7147_v31 = vpop.permute.xlu0 %7146 }
 0xcb8   : > { %6783 = vmax.xlane.f32.xlu0 %v6782_v62  ;;  %8853 = vmatpush3.bf16.msra.mxu0 %v7147_v31  ;;  %v6831_v62 = vsub.f32 %v15226_v13, %v15587_v14  ;;  %v6834_v31 = vsub.f32 %v15325_v39, %v15598_v19  ;;  %v6835_v13 = vsub.f32 %v15320_v4, %v15598_v19  ;;  %9637 = vpow2.f32 %v6872_v40  ;;  %v17715_v40 = vld [vmem:[#allocation157_spill] sm:$0xff] }
 0xcb9   : > { %4776 = vadd.xlane.f32.xlu1 %v17701_v0  ;;  %v6829_v39 = vsub.f32 %v15238_v1, %v15608_v56 }
 0xcba   : > { %v6874_v23 = vmul.f32 1.442695, %v6831_v62  ;;  %v6880_v28 = vmul.f32 1.442695, %v6834_v31  ;;  %v17714_v62 = vld [vmem:[#allocation207_spill] sm:$0xff]  ;;  %v17716_v31 = vld [vmem:[#allocation26_spill] sm:$0xff] }
 0xcbb   : > { %v15600_v49 = vpop.eup %9629 }
 0xcbc   : > { %6735 = vadd.xlane.f32.xlu0 %v6734_v61  ;;  %v15604_v59 = vpop.eup %9631  ;;  %v6828_v61 = vsub.f32 %v15247_v45, %v15608_v56  ;;  %9639 = vpow2.f32 %v6874_v23  ;;  %v17709_v45 = vld [vmem:[#allocation27_spill] sm:$0xff] }
 0xcbd   : > { %4782 = vadd.xlane.f32.xlu1 %v17702_v52  ;;  %v7021_v0 = vadd.f32 %v15604_v59, %v15600_v49  ;;  %v6882_v52 = vmul.f32 1.442695, %v6835_v13  ;;  %v6832_v36 = vsub.f32 %v17709_v45, %v15623_v55  ;;  %9641 = vpow2.f32 %v6880_v28 }
 0xcbe   : > { %v6868_v2 = vmul.f32 1.442695, %v6828_v61 }
 0xcbf   : > { %9643 = vpow2.f32 %v6882_v52  ;;  %v6876_v9 = vmul.f32 1.442695, %v6832_v36 }
 0xcc0   : > { %4773 = vadd.xlane.f32.xlu0 %v17703_v60  ;;  %v17710_v60 = vld [vmem:[#allocation148_spill] sm:$0xff]  ;;  %9645 = vpow2.f32 %v6868_v2  ;;  %v17719_v2 = vld [vmem:[#allocation42_spill] sm:$0xff] }
 0xcc1   : > { %5896 = vadd.xlane.f32.xlu1 %v17704_v63  ;;  %v6870_v63 = vmul.f32 1.442695, %v6829_v39 }
 0xcc3   : > { %9647 = vpow2.f32 %v6870_v63 }
 0xcc4   : > { %4779 = vadd.xlane.f32.xlu0 %v17705_v17  ;;  %v6833_v17 = vsub.f32 %v17711_v33, %v15623_v55  ;;  %9649 = vpow2.f32 %v6876_v9 }
 0xcc5   : > { %5902 = vadd.xlane.f32.xlu1 %v17706_v54  ;;  %v17712_v54 = vld [vmem:[#allocation156_spill] sm:$0xff] }
 0xcc8   : > { %5893 = vadd.xlane.f32.xlu0 %v17707_v30 }
 0xcc9   : > { %7016 = vadd.xlane.f32.xlu1 %v15300_v16  ;;  %v15625_v16 = vpop.eup %9633 }
 0xcca   : > { %v15629_v4 = vpop.eup %9635 }
 0xccb   : > { %v7018_v1 = vadd.f32 %v15629_v4, %v15625_v16  ;;  %v15642_v30 = vpop.eup %9637 }
 0xccc   : > { %5899 = vadd.xlane.f32.xlu0 %v17708_v12  ;;  %v9640_v20 = vpop.eup %9639  ;;  %v17717_v12 = vld [vmem:[#allocation205_spill] sm:$0xff] }
 0xccd   : > { %7022 = vadd.xlane.f32.xlu1 %v7021_v0  ;;  %v15646_v23 = vpop.eup %9641  ;;  %v7027_v13 = vadd.f32 %v9640_v20, %v15642_v30 }
 0xcce   : > { %v15649_v0 = vpop.eup %9643 }
 0xccf   : > { %v9646_v39 = vpop.eup %9645  ;;  %v7033_v52 = vadd.f32 %v15649_v0, %v15646_v23 }
 0xcd0   : > { %7013 = vadd.xlane.f32.xlu0 %v15309_v15  ;;  %v6878_v15 = vmul.f32 1.442695, %v6833_v17  ;;  %v9648_v28 = vpop.eup %9647 }
 0xcd1   : > { %4788 = vadd.xlane.f32.xlu1 %v17710_v60  ;;  %v9650_v36 = vpop.eup %9649  ;;  %v7024_v60 = vadd.f32 %v9648_v28, %v9646_v39 }
 0xcd2   : > { %9651 = vpow2.f32 %v6878_v15 }
 0xcd4   : > { %7019 = vadd.xlane.f32.xlu0 %v7018_v1  ;;  %v17722_v1 = vld [vmem:[#allocation162_spill] sm:$0xff] }
 0xcd5   : > { %4794 = vadd.xlane.f32.xlu1 %v17712_v54 }
 0xcd8   : > { %4785 = vadd.xlane.f32.xlu0 %v17713_v57 }
 0xcd9   : > { %5908 = vadd.xlane.f32.xlu1 %v17714_v62 }
 0xcdc   : > { %4791 = vadd.xlane.f32.xlu0 %v17715_v40  ;;  %v17724_v40 = vld [vmem:[#allocation164_spill] sm:$0xff] }
 0xcdd   : > { %5914 = vadd.xlane.f32.xlu1 %v17716_v31 }
 0xcdf   : > { %v9652_v63 = vpop.eup %9651 }
 0xce0   : > { %5905 = vadd.xlane.f32.xlu0 %v17717_v12  ;;  %v7030_v9 = vadd.f32 %v9652_v63, %v9650_v36  ;;  %v17727_v12 = vld [vmem:[#allocation72_spill] sm:$0xff] }
 0xce1   : > { %v15652_v61 = vpop.xlane.xlu1 %6581  ;;  %7028 = vadd.xlane.f32.xlu1 %v7027_v13 }
 0xce2   : > { %17718 = vst [vmem:[#allocation80_spill] sm:$0xff] %v15652_v61 }
 0xce4   : > { %5911 = vadd.xlane.f32.xlu0 %v17719_v2 }
 0xce5   : > { %v6769_v45 = vpop.xlane.xlu1 %6768  ;;  %7034 = vadd.xlane.f32.xlu1 %v7033_v52 }
 0xce8   : > { %v15657_v33 = vpop.xlane.xlu0 %6584  ;;  %7025 = vadd.xlane.f32.xlu0 %v7024_v60  ;;  %v17728_v60 = vld [vmem:[#allocation163_spill] sm:$0xff] }
 0xce9   : > { %17720 = vst [vmem:[#allocation81_spill] sm:$0xff] %v15657_v33  ;;  %v15659_v17 = vpop.xlane.xlu1 %6717  ;;  %4800 = vadd.xlane.f32.xlu1 %v17722_v1  ;;  %v6797_v54 = vmax.f32 %v6769_v45, %v15657_v33  ;;  %v17729_v1 = vld [vmem:[#allocation77_spill] sm:$0xff]  ;;  %v17736_v33 = vld [vmem:[#allocation228_spill] sm:$0xff] }
 0xcea   : > { %17721 = vst [vmem:[#allocation83_spill] sm:$0xff] %v15659_v17 }
 0xcec   : > { %v6766_v15 = vpop.xlane.xlu0 %6765  ;;  %7031 = vadd.xlane.f32.xlu0 %v7030_v9 }
 0xced   : > { %v15663_v57 = vpop.xlane.xlu1 %6720  ;;  %v6796_v62 = vmax.f32 %v6766_v15, %v15652_v61  ;;  %4806 = vadd.xlane.f32.xlu1 %v17724_v40  ;;  %v17730_v15 = vld [vmem:[#allocation74_spill] sm:$0xff]  ;;  %v17731_v40 = vld [vmem:[#allocation73_spill] sm:$0xff]  ;;  %v17848_v61 = vld [vmem:[#allocation67_spill] sm:$0xff] }
 0xcee   : > { %17723 = vst [vmem:[#allocation82_spill] sm:$0xff] %v15663_v57  ;;  %v15668_v31 = vmax.f32 %v6797_v54, %v15663_v57 }
 0xcef   : > { %v15671_v13 = vmax.f32 %v6796_v62, %v15659_v17  ;;  %v17734_v17 = vld [vmem:[#allocation31_spill] sm:$0xff] }
 0xcf0   : > { %17725 = vst [vmem:[#allocation94_spill] sm:$0xff] %v15668_v31  ;;  %v6838_v52 = vsub.f32 %v17727_v12, %v15668_v31  ;;  %v7161_v2 = vpop.permute.xlu0 %7160  ;;  %4797 = vadd.xlane.f32.xlu0 %v17728_v60  ;;  %v6839_v54 = vsub.f32 %v17731_v40, %v15668_v31  ;;  %v17733_v12 = vld [vmem:[#allocation165_spill] sm:$0xff] }
 0xcf1   : > { %17726 = vst [vmem:[#allocation93_spill] sm:$0xff] %v15671_v13  ;;  %v7145_v45 = vpop.permute.xlu1 %7144  ;;  %v6836_v9 = vsub.f32 %v17729_v1, %v15671_v13  ;;  %v6837_v32 = vsub.f32 %v17730_v15, %v15671_v13  ;;  %5920 = vadd.xlane.f32.xlu1 %v17732_v47  ;;  %8854 = vmatprep.subr.bf16.mxu0 %v7161_v2  ;;  %v17735_v15 = vld [vmem:[#allocation225_spill] sm:$0xff]  ;;  %v17738_v47 = vld [vmem:[#allocation28_spill] sm:$0xff] }
 0xcf2   : > { %v6888_v57 = vmul.f32 1.442695, %v6838_v52  ;;  %8855 = vmatpush3.bf16.msra.mxu0 %v7145_v45  ;;  %v6890_v60 = vmul.f32 1.442695, %v6839_v54  ;;  %v7111_v1 = vpack.c.bf16 %v15604_v59, %v15629_v4  ;;  %v17737_v40 = vpack.c.bf16 %v17735_v15, %v17736_v33 }
 0xcf3   : > { %v6884_v62 = vmul.f32 1.442695, %v6836_v9  ;;  %v6886_v10 = vmul.f32 1.442695, %v6837_v32  ;;  %v17739_v32 = vld [vmem:[#allocation214_spill] sm:$0xff]  ;;  %v7110_v52 = vpack.c.bf16 %v15600_v49, %v15625_v16  ;;  %v7113_v2 = vpack.c.bf16 %v9640_v20, %v9648_v28 }
 0xcf4   : > { %4803 = vadd.xlane.f32.xlu0 %v17733_v12  ;;  %v7112_v33 = vpack.c.bf16 %v15642_v30, %v9646_v39  ;;  %v7114_v54 = vpack.c.bf16 %v15646_v23, %v9650_v36 }
 0xcf5   : > { %9653 = vpow2.f32 %v6884_v62  ;;  %5926 = vadd.xlane.f32.xlu1 %v17734_v17  ;;  %7225 = vmatmul.mubr.bf16.vlgmr.msra.gmra.mxu0 %v17737_v40 }
 0xcf6   : > { %9655 = vpow2.f32 %v6886_v10  ;;  %7232 = vmatprep.mubr.bf16.mxu0 %v7111_v1 }
 0xcf7   : > { %9657 = vpow2.f32 %v6888_v57  ;;  %v7115_v57 = vpack.c.bf16 %v15649_v0, %v9652_v63 }
 0xcf8   : > { %5917 = vadd.xlane.f32.xlu0 %v17738_v47  ;;  %9659 = vpow2.f32 %v6890_v60 }
 0xcfc   : > { %5923 = vadd.xlane.f32.xlu0 %v17739_v32 }
 0xcfd   : > { %7233 = vmatmul.mubr.bf16.gmra.mxu0 %v7110_v52 }
 0xcfe   : > { %7240 = vmatprep.mubr.bf16.mxu0 %v7113_v2 }
 0xd02   : > { %v9654_v17 = vpop.eup %9653 }
 0xd03   : > { %v9656_v59 = vpop.eup %9655 }
 0xd04   : > { %v9658_v10 = vpop.eup %9657  ;;  %v7036_v4 = vadd.f32 %v9656_v59, %v9654_v17 }
 0xd05   : > { %v9660_v45 = vpop.eup %9659  ;;  %7241 = vmatmul.mubr.bf16.gmra.mxu0 %v7112_v33  ;;  %v7116_v16 = vpack.c.bf16 %v9658_v10, %v9654_v17 }
 0xd06   : > { %7037 = vadd.xlane.f32.xlu0 %v7036_v4  ;;  %v7039_v9 = vadd.f32 %v9660_v45, %v9658_v10  ;;  %7248 = vmatprep.mubr.bf16.mxu0 %v7115_v57  ;;  %v7117_v49 = vpack.c.bf16 %v9660_v45, %v9656_v59  ;;  %v17750_v4 = vld [vmem:[#allocation59_spill] sm:$0xff]  ;;  %v17752_v57 = vld [vmem:[#allocation144_spill] sm:$0xff] }
 0xd08   : > { %7040 = vadd.xlane.f32.xlu1 %v7039_v9 }
 0xd0d   : > { %7249 = vmatmul.mubr.bf16.gmra.mxu0 %v7114_v54  ;;  %v17753_v54 = vld [vmem:[#allocation150_spill] sm:$0xff] }
 0xd0e   : > { %7256 = vmatprep.mubr.bf16.mxu0 %v7117_v49  ;;  %v17754_v49 = vld [vmem:[#allocation183_spill] sm:$0xff] }
 0xd15   : > { %7257 = vmatmul.mubr.bf16.gmra.mxu0 %v7116_v16 }
 0xd21   : > { %v15697_v20 = vpop.xlane.xlu0 %6587 }
 0xd22   : > { %17740 = vst [vmem:[#allocation88_spill] sm:$0xff] %v15697_v20  ;;  %v15699_v28 = vpop.xlane.xlu1 %6590 }
 0xd23   : > { %17741 = vst [vmem:[#allocation87_spill] sm:$0xff] %v15699_v28 }
 0xd25   : > { %v6772_v30 = vpop.xlane.xlu0 %6771 }
 0xd26   : > { %v15701_v39 = vpop.xlane.xlu1 %6726  ;;  %v6798_v23 = vmax.f32 %v6772_v30, %v15697_v20 }
 0xd27   : > { %17742 = vst [vmem:[#allocation145_spill] sm:$0xff] %v15701_v39 }
 0xd29   : > { %v6775_v0 = vpop.xlane.xlu0 %6774 }
 0xd2a   : > { %v15703_v63 = vpop.xlane.xlu1 %6596  ;;  %v6799_v62 = vmax.f32 %v6775_v0, %v15699_v28  ;;  %v17787_v28 = vld [vmem:[#allocation24_spill] sm:$0xff] }
 0xd2b   : > { %17743 = vst [vmem:[#allocation147_spill] sm:$0xff] %v15703_v63 }
 0xd2c   : > { %v15707_v12 = vmax.f32 %v6799_v62, %v15701_v39  ;;  %v17786_v39 = vld [vmem:[#allocation166_spill] sm:$0xff] }
 0xd2d   : > { %v15710_v36 = vpop.xlane.xlu0 %6723 }
 0xd2e   : > { %17744 = vst [vmem:[#allocation143_spill] sm:$0xff] %v15707_v12  ;;  %17745 = vst [vmem:[#allocation61_spill] sm:$0xff] %v15710_v36  ;;  %v6781_v60 = vpop.xlane.xlu1 %6780  ;;  %v6842_v1 = vsub.f32 %v15496_v6, %v15707_v12  ;;  %v6843_v15 = vsub.f32 %v15491_v8, %v15707_v12  ;;  %v15717_v40 = vmax.f32 %v6798_v23, %v15710_v36  ;;  %v17749_v6 = vld [vmem:[#allocation62_spill] sm:$0xff]  ;;  %v17770_v36 = vld [vmem:[#allocation41_spill] sm:$0xff] }
 0xd2f   : > { %v6801_v52 = vmax.f32 %v6781_v60, %v15703_v63  ;;  %v5797_v8 = vsub.f32 %v17750_v4, %v17749_v6  ;;  %v5845_v45 = vsub.f32 %v17752_v57, %v17749_v6  ;;  %v5803_v12 = vsub.f32 %v17787_v28, %v17786_v39  ;;  %v17791_v28 = vld [vmem:[#allocation215_spill] sm:$0xff] }
 0xd30   : > { %17746 = vst [vmem:[#allocation146_spill] sm:$0xff] %v15717_v40  ;;  %v6896_v47 = vmul.f32 1.442695, %v6842_v1  ;;  %v6898_v32 = vmul.f32 1.442695, %v6843_v15  ;;  %v6840_v2 = vsub.f32 %v15486_v37, %v15717_v40  ;;  %v6841_v17 = vsub.f32 %v15479_v58, %v15717_v40 }
 0xd31   : > { %v15724_v59 = vpop.xlane.xlu0 %6593  ;;  %v5796_v58 = vsub.f32 %v17754_v49, %v17753_v54  ;;  %v5814_v62 = vmul.f32 1.442695, %v5797_v8  ;;  %v5862_v60 = vmul.f32 1.442695, %v5845_v45 }
 0xd32   : > { %17747 = vst [vmem:[#allocation192_spill] sm:$0xff] %v15724_v59  ;;  %v15726_v10 = vpop.xlane.xlu1 %6732  ;;  %9661 = vpow2.f32 %v6896_v47  ;;  %v6892_v9 = vmul.f32 1.442695, %v6840_v2  ;;  %v6894_v37 = vmul.f32 1.442695, %v6841_v17  ;;  %v17758_v2 = vld [vmem:[#allocation65_spill] sm:$0xff] }
 0xd33   : > { %17748 = vst [vmem:[#allocation152_spill] sm:$0xff] %v15726_v10  ;;  %v15731_v33 = vmax.f32 %v6801_v52, %v15726_v10  ;;  %9663 = vpow2.f32 %v6898_v32  ;;  %v5812_v47 = vmul.f32 1.442695, %v5796_v58  ;;  %v17757_v52 = vld [vmem:[#allocation189_spill] sm:$0xff]  ;;  %v17802_v10 = vld [vmem:[#allocation222_spill] sm:$0xff] }
 0xd34   : > { %9665 = vpow2.f32 %v6892_v9  ;;  %v5799_v17 = vsub.f32 %v17758_v2, %v17757_v52  ;;  %v17762_v9 = vld [vmem:[#allocation187_spill] sm:$0xff] }
 0xd35   : > { %17751 = vst [vmem:[#allocation160_spill] sm:$0xff] %v15731_v33  ;;  %v6778_v30 = vpop.xlane.xlu0 %6777  ;;  %v6846_v23 = vsub.f32 %v15508_v5, %v15731_v33  ;;  %9667 = vpow2.f32 %v6894_v37  ;;  %v6847_v1 = vsub.f32 %v15501_v48, %v15731_v33  ;;  %v17760_v5 = vld [vmem:[#allocation64_spill] sm:$0xff]  ;;  %v17761_v48 = vld [vmem:[#allocation190_spill] sm:$0xff]  ;;  %v17807_v33 = vld [vmem:[#allocation15_spill] sm:$0xff] }
 0xd36   : > { %v15739_v0 = vpop.xlane.xlu1 %6602  ;;  %v6800_v15 = vmax.f32 %v6778_v30, %v15724_v59  ;;  %9669 = vpow2.f32 %v5814_v62  ;;  %v5844_v57 = vsub.f32 %v17760_v5, %v17753_v54  ;;  %v5798_v37 = vsub.f32 %v17762_v9, %v17761_v48  ;;  %v17763_v62 = vld [vmem:[#allocation155_spill] sm:$0xff] }
 0xd37   : > { %17755 = vst [vmem:[#allocation27_spill] sm:$0xff] %v15739_v0  ;;  %v6904_v6 = vmul.f32 1.442695, %v6846_v23  ;;  %9671 = vpow2.f32 %v5862_v60  ;;  %v6906_v45 = vmul.f32 1.442695, %v6847_v1  ;;  %v5847_v23 = vsub.f32 %v17763_v62, %v17757_v52 }
 0xd38   : > { %9673 = vpow2.f32 %v5812_v47  ;;  %v5860_v9 = vmul.f32 1.442695, %v5844_v57  ;;  %v17766_v47 = vld [vmem:[#allocation188_spill] sm:$0xff]  ;;  %v5816_v54 = vmul.f32 1.442695, %v5798_v37 }
 0xd39   : > { %v15746_v32 = vpop.xlane.xlu0 %6729  ;;  %9675 = vpow2.f32 %v6904_v6  ;;  %v5846_v30 = vsub.f32 %v17766_v47, %v17761_v48 }
 0xd3a   : > { %17756 = vst [vmem:[#allocation148_spill] sm:$0xff] %v15746_v32  ;;  %v15751_v4 = vmax.f32 %v6800_v15, %v15746_v32  ;;  %v6787_v8 = vpop.xlane.xlu1 %6786  ;;  %v5818_v15 = vmul.f32 1.442695, %v5799_v17  ;;  %9677 = vpow2.f32 %v6906_v45 }
 0xd3b   : > { %v6803_v60 = vmax.f32 %v6787_v8, %v15739_v0  ;;  %v5866_v8 = vmul.f32 1.442695, %v5847_v23  ;;  %v5864_v23 = vmul.f32 1.442695, %v5846_v30 }
 0xd3c   : > { %17759 = vst [vmem:[#allocation71_spill] sm:$0xff] %v15751_v4  ;;  %v6844_v49 = vsub.f32 %v15528_v18, %v15751_v4  ;;  %v6845_v58 = vsub.f32 %v15517_v38, %v15751_v4 }
 0xd3d   : > { %v15768_v1 = vpop.xlane.xlu0 %6599 }
 0xd3e   : > { %17764 = vst [vmem:[#allocation156_spill] sm:$0xff] %v15768_v1  ;;  %v6900_v18 = vmul.f32 1.442695, %v6844_v49  ;;  %v6902_v2 = vmul.f32 1.442695, %v6845_v58  ;;  %v15770_v5 = vpop.xlane.xlu1 %6738 }
 0xd3f   : > { %17765 = vst [vmem:[#allocation149_spill] sm:$0xff] %v15770_v5  ;;  %v9662_v38 = vpop.eup %9661  ;;  %v15775_v52 = vmax.f32 %v6803_v60, %v15770_v5  ;;  %v5826_v5 = vmul.f32 1.442695, %v5803_v12  ;;  %v17797_v12 = vld [vmem:[#allocation140_spill] sm:$0xff] }
 0xd40   : > { %v9664_v62 = vpop.eup %9663  ;;  %9679 = vpow2.f32 %v6900_v18 }
 0xd41   : > { %17767 = vst [vmem:[#allocation207_spill] sm:$0xff] %v15775_v52  ;;  %9681 = vpow2.f32 %v6902_v2  ;;  %v6850_v17 = vsub.f32 %v15544_v41, %v15775_v52  ;;  %v6784_v49 = vpop.xlane.xlu0 %6783  ;;  %v6851_v57 = vsub.f32 %v15533_v24, %v15775_v52  ;;  %v7045_v58 = vadd.f32 %v9664_v62, %v9662_v38  ;;  %v9666_v37 = vpop.eup %9665  ;;  %v17768_v2 = vld [vmem:[#allocation134_spill] sm:$0xff] }
 0xd42   : > { %9683 = vpow2.f32 %v5818_v15  ;;  %v4777_v48 = vpop.xlane.xlu1 %4776  ;;  %v9668_v60 = vpop.eup %9667  ;;  %v6802_v41 = vmax.f32 %v6784_v49, %v15768_v1  ;;  %v7118_v6 = vpack.c.bf16 %v9662_v38, %v9666_v37  ;;  %v17772_v49 = vld [vmem:[#allocation135_spill] sm:$0xff] }
 0xd43   : > { %9685 = vpow2.f32 %v5860_v9  ;;  %v6912_v18 = vmul.f32 1.442695, %v6850_v17  ;;  %v4821_v47 = vadd.f32 %v17768_v2, %v4777_v48  ;;  %7046 = vadd.xlane.f32.xlu1 %v7045_v58  ;;  %v7042_v15 = vadd.f32 %v9668_v60, %v9666_v37  ;;  %v15793_v17 = vpop.eup %9669  ;;  %v17774_v48 = vld [vmem:[#allocation142_spill] sm:$0xff] }
 0xd44   : > { %9687 = vpow2.f32 %v5816_v54  ;;  %v7119_v16 = vpack.c.bf16 %v9664_v62, %v9668_v60  ;;  %v6914_v45 = vmul.f32 1.442695, %v6851_v57  ;;  %v15796_v54 = vpop.eup %9671  ;;  %v17773_v57 = vld [vmem:[#allocation68_spill] sm:$0xff] }
 0xd45   : > { %v15787_v24 = vpop.xlane.xlu0 %6735  ;;  %9689 = vpow2.f32 %v5866_v8  ;;  %v4837_v20 = vadd.f32 %v17770_v36, %v4821_v47  ;;  %7043 = vadd.xlane.f32.xlu0 %v7042_v15 }
 0xd46   : > { %17769 = vst [vmem:[#allocation157_spill] sm:$0xff] %v15787_v24  ;;  %v15791_v9 = vmax.f32 %v6802_v41, %v15787_v24  ;;  %v4783_v30 = vpop.xlane.xlu1 %4782  ;;  %9691 = vpow2.f32 %v5864_v23  ;;  %7264 = vmatprep.mubr.bf16.mxu0 %v7119_v16  ;;  %v15808_v23 = vpop.eup %9673  ;;  %v17789_v24 = vld [vmem:[#allocation23_spill] sm:$0xff] }
 0xd47   : > { %v4823_v38 = vadd.f32 %v17772_v49, %v4783_v30  ;;  %9693 = vpow2.f32 %v6912_v18  ;;  %7265 = vmatmul.mubr.bf16.gmra.mxu0 %v7118_v6  ;;  %4812 = vadd.xlane.f32.xlu1 %v17773_v57  ;;  %v17775_v18 = vld [vmem:[#allocation66_spill] sm:$0xff]  ;;  %v9676_v2 = vpop.eup %9675  ;;  %v17776_v6 = vld [vmem:[#allocation132_spill] sm:$0xff] }
 0xd48   : > { %17771 = vst [vmem:[#allocation26_spill] sm:$0xff] %v15791_v9  ;;  %v6848_v62 = vsub.f32 %v15565_v21, %v15791_v9  ;;  %v6849_v36 = vsub.f32 %v15556_v27, %v15791_v9  ;;  %9695 = vrcp.f32 %v4837_v20  ;;  %v9678_v47 = vpop.eup %9677  ;;  %v17777_v20 = vld [vmem:[#allocation36_spill] sm:$0xff]  ;;  %v17778_v49 = vld [vmem:[#allocation154_spill] sm:$0xff] }
 0xd49   : > { %v4839_v58 = vadd.f32 %v17774_v48, %v4823_v38  ;;  %v4774_v37 = vpop.xlane.xlu0 %4773  ;;  %9697 = vpow2.f32 %v6914_v45  ;;  %4809 = vadd.xlane.f32.xlu0 %v17776_v6  ;;  %v17779_v45 = vld [vmem:[#allocation198_spill] sm:$0xff] }
 0xd4a   : > { %v6908_v21 = vmul.f32 1.442695, %v6848_v62  ;;  %v6910_v60 = vmul.f32 1.442695, %v6849_v36  ;;  %v4820_v27 = vadd.f32 %v17775_v18, %v4774_v37  ;;  %v5897_v41 = vpop.xlane.xlu1 %5896  ;;  %v17780_v62 = vld [vmem:[#allocation195_spill] sm:$0xff] }
 0xd4b   : > { %9699 = vrcp.f32 %v4839_v58  ;;  %v5941_v30 = vadd.f32 %v15793_v17, %v5897_v41  ;;  %4818 = vadd.xlane.f32.xlu1 %v17778_v49  ;;  %v5801_v36 = vsub.f32 %v17780_v62, %v17779_v45  ;;  %v17781_v37 = vld [vmem:[#allocation35_spill] sm:$0xff]  ;;  %v17784_v62 = vld [vmem:[#allocation138_spill] sm:$0xff] }
 0xd4c   : > { %9701 = vpow2.f32 %v6908_v21  ;;  %v4836_v15 = vadd.f32 %v17777_v20, %v4820_v27  ;;  %v17782_v27 = vld [vmem:[#allocation197_spill] sm:$0xff]  ;;  %v17783_v20 = vld [vmem:[#allocation170_spill] sm:$0xff] }
 0xd4d   : > { %v15815_v38 = vpop.eup %9679  ;;  %9703 = vpow2.f32 %v6910_v60  ;;  %v4780_v57 = vpop.xlane.xlu0 %4779  ;;  %v5849_v41 = vsub.f32 %v17782_v27, %v17779_v45  ;;  %4815 = vadd.xlane.f32.xlu0 %v17783_v20  ;;  %v5957_v60 = vadd.f32 %v15796_v54, %v5941_v30  ;;  %v5822_v40 = vmul.f32 1.442695, %v5801_v36  ;;  %v17788_v20 = vld [vmem:[#allocation199_spill] sm:$0xff]  ;;  %v17790_v36 = vld [vmem:[#allocation196_spill] sm:$0xff] }
 0xd4e   : > { %v9682_v48 = vpop.eup %9681  ;;  %v4822_v58 = vadd.f32 %v17781_v37, %v4780_v57  ;;  %v5903_v18 = vpop.xlane.xlu1 %5902  ;;  %v7120_v6 = vpack.c.bf16 %v9676_v2, %v15815_v38  ;;  %9705 = vrcp.f32 %v4836_v15  ;;  %v17785_v37 = vld [vmem:[#allocation53_spill] sm:$0xff]  ;;  %v5800_v9 = vsub.f32 %v17789_v24, %v17788_v20 }
 0xd4f   : > { %v15821_v21 = vpop.eup %9683  ;;  %v7121_v49 = vpack.c.bf16 %v9678_v47, %v9682_v48  ;;  %5932 = vadd.xlane.f32.xlu1 %v17785_v37  ;;  %v17792_v37 = vld [vmem:[#allocation208_spill] sm:$0xff] }
 0xd50   : > { %v15826_v16 = vpop.eup %9685  ;;  %v4838_v8 = vadd.f32 %v17784_v62, %v4822_v58  ;;  %v5943_v57 = vadd.f32 %v15821_v21, %v5903_v18  ;;  %v5848_v18 = vsub.f32 %v17790_v36, %v17788_v20  ;;  %v5870_v62 = vmul.f32 1.442695, %v5849_v41 }
 0xd51   : > { %7272 = vmatprep.mubr.bf16.mxu0 %v7121_v49  ;;  %v5894_v45 = vpop.xlane.xlu0 %5893  ;;  %v15834_v27 = vpop.eup %9687  ;;  %5929 = vadd.xlane.f32.xlu0 %v17791_v28  ;;  %v5851_v1 = vsub.f32 %v17792_v37, %v17786_v39  ;;  %v6009_v41 = vmul.f32 %v15793_v17, %v15395_v46  ;;  %v5820_v28 = vmul.f32 1.442695, %v5800_v9  ;;  %v17798_v9 = vld [vmem:[#allocation167_spill] sm:$0xff] }
 0xd52   : > { %9707 = vrcp.f32 %v4838_v8  ;;  %v5940_v15 = vadd.f32 %v15808_v23, %v5894_v45  ;;  %7273 = vmatmul.mubr.bf16.gmra.mxu0 %v7120_v6  ;;  %v15839_v30 = vpop.xlane.xlu1 %7016  ;;  %v15841_v58 = vpop.eup %9689  ;;  %v17793_v6 = vld [vmem:[#allocation55_spill] sm:$0xff]  ;;  %v5868_v37 = vmul.f32 1.442695, %v5848_v18 }
 0xd53   : > { %v15846_v49 = vpop.eup %9691  ;;  %9709 = vrcp.f32 %v5957_v60  ;;  %v5959_v24 = vadd.f32 %v15841_v58, %v5943_v57  ;;  %5938 = vadd.xlane.f32.xlu1 %v17793_v6  ;;  %v7051_v60 = vadd.f32 %v9678_v47, %v9676_v2  ;;  %v17795_v6 = vld [vmem:[#allocation25_spill] sm:$0xff]  ;;  %v5874_v4 = vmul.f32 1.442695, %v5851_v1  ;;  %v17800_v18 = vld [vmem:[#allocation219_spill] sm:$0xff] }
 0xd54   : > { %v5956_v8 = vadd.f32 %v15826_v16, %v5940_v15  ;;  %v9694_v45 = vpop.eup %9693  ;;  %9711 = vpow2.f32 %v5822_v40  ;;  %v17794_v15 = vld [vmem:[#allocation46_spill] sm:$0xff]  ;;  %v17796_v40 = vld [vmem:[#allocation57_spill] sm:$0xff] }
 0xd55   : > { %v5900_v20 = vpop.xlane.xlu0 %5899  ;;  %v9696_v36 = vpop.eup %9695  ;;  %v5802_v0 = vsub.f32 %v17795_v6, %v17794_v15  ;;  %5935 = vadd.xlane.f32.xlu0 %v17796_v40  ;;  %v17799_v47 = vld [vmem:[#allocation217_spill] sm:$0xff]  ;;  %v7048_v6 = vadd.f32 %v9682_v48, %v15815_v38 }
 0xd56   : > { %9713 = vrcp.f32 %v5956_v8  ;;  %v5942_v52 = vadd.f32 %v15834_v27, %v5900_v20  ;;  %v15856_v39 = vpop.xlane.xlu1 %7022  ;;  %v9698_v57 = vpop.eup %9697  ;;  %v15862_v32 = vmul.f32 %v9696_v36, %v17797_v12  ;;  %v5850_v8 = vsub.f32 %v17798_v9, %v17794_v15  ;;  %v17801_v36 = vld [vmem:[#allocation17_spill] sm:$0xff]  ;;  %v17803_v15 = vld [vmem:[#allocation223_spill] sm:$0xff] }
 0xd57   : > { %9715 = vpow2.f32 %v5870_v62  ;;  %7052 = vadd.xlane.f32.xlu1 %v7051_v60  ;;  %v8762_v62 = vadd.f32 %v17800_v18, %v17799_v47  ;;  %v8765_v1 = vadd.f32 %v17803_v15, %v17802_v10  ;;  %v17804_v9 = vld [vmem:[#allocation161_spill] sm:$0xff]  ;;  %v5824_v18 = vmul.f32 1.442695, %v5802_v0  ;;  %v17805_v15 = vld [vmem:[#allocation224_spill] sm:$0xff] }
 0xd58   : > { %v9700_v17 = vpop.eup %9699  ;;  %9717 = vrcp.f32 %v5959_v24  ;;  %v5958_v20 = vadd.f32 %v15846_v49, %v5942_v52  ;;  %v7057_v52 = vadd.f32 %v9698_v57, %v9694_v45  ;;  %v17810_v0 = vld [vmem:[#allocation229_spill] sm:$0xff] }
 0xd59   : > { %v9702_v2 = vpop.eup %9701  ;;  %9719 = vpow2.f32 %v5826_v5  ;;  %v15870_v40 = vpop.xlane.xlu0 %7013  ;;  %v15873_v12 = vmul.f32 %v9700_v17, %v17801_v36  ;;  %v6008_v5 = vmul.f32 %v15808_v23, %v15395_v46  ;;  %7049 = vadd.xlane.f32.xlu0 %v7048_v6  ;;  %v5872_v17 = vmul.f32 1.442695, %v5850_v8 }
 0xd5a   : > { %v9704_v59 = vpop.eup %9703  ;;  %9721 = vrcp.f32 %v5958_v20  ;;  %v4789_v24 = vpop.xlane.xlu1 %4788  ;;  %v7122_v60 = vpack.c.bf16 %v9694_v45, %v9702_v2  ;;  %v6174_v36 = vmul.f32 %v15796_v54, %v15400_v3  ;;  %v17806_v45 = vld [vmem:[#allocation226_spill] sm:$0xff]  ;;  %v17811_v54 = vld [vmem:[#allocation136_spill] sm:$0xff] }
 0xd5b   : > { %v4825_v47 = vadd.f32 %v17804_v9, %v4789_v24  ;;  %v7054_v38 = vadd.f32 %v9704_v59, %v9702_v2  ;;  %v7123_v48 = vpack.c.bf16 %v9698_v57, %v9704_v59  ;;  %9723 = vpow2.f32 %v5820_v28  ;;  %7058 = vadd.xlane.f32.xlu1 %v7057_v52  ;;  %v9706_v10 = vpop.eup %9705  ;;  %v17809_v28 = vld [vmem:[#allocation227_spill] sm:$0xff]  ;;  %v17812_v24 = vld [vmem:[#allocation172_spill] sm:$0xff]  ;;  %v17835_v52 = vld [vmem:[#allocation173_spill] sm:$0xff] }
 0xd5c   : > { %9725 = vpow2.f32 %v5874_v4  ;;  %v6107_v20 = vadd.f32 %v8762_v62, %v6008_v5  ;;  %v8768_v63 = vadd.f32 %v17806_v45, %v17805_v15  ;;  %v6110_v59 = vadd.f32 %v8765_v1, %v6009_v41  ;;  %v17813_v1 = vld [vmem:[#allocation79_spill] sm:$0xff] }
 0xd5d   : > { %v4841_v23 = vadd.f32 %v17807_v33, %v4825_v47  ;;  %7280 = vmatprep.mubr.bf16.mxu0 %v7123_v48  ;;  %v15885_v6 = vpop.xlane.xlu0 %7019  ;;  %9727 = vpow2.f32 %v5868_v37  ;;  %v8771_v57 = vadd.f32 %v17810_v0, %v17809_v28  ;;  %v15890_v2 = vmul.f32 %v9706_v10, %v17811_v54  ;;  %7055 = vadd.xlane.f32.xlu0 %v7054_v38  ;;  %v17815_v47 = vld [vmem:[#allocation174_spill] sm:$0xff]  ;;  %v17819_v54 = vld [vmem:[#allocation43_spill] sm:$0xff] }
 0xd5e   : > { %17808 = vst [vmem:[#allocation205_spill] sm:$0xff] %v15885_v6  ;;  %7281 = vmatmul.mubr.bf16.gmra.mxu0 %v7122_v60  ;;  %v4795_v8 = vpop.xlane.xlu1 %4794  ;;  %v6173_v62 = vmul.f32 %v15826_v16, %v15400_v3  ;;  %v6010_v33 = vmul.f32 %v15834_v27, %v15395_v46  ;;  %v6011_v41 = vmul.f32 %v15821_v21, %v15395_v46  ;;  %v17814_v60 = vld [vmem:[#allocation141_spill] sm:$0xff] }
 0xd5f   : > { %v9708_v4 = vpop.eup %9707  ;;  %9729 = vrcp.f32 %v4841_v23  ;;  %v4827_v37 = vadd.f32 %v17812_v24, %v4795_v8  ;;  %3611 = vadd.xlane.f32.xlu1 %v17813_v1  ;;  %v17816_v21 = vld [vmem:[#allocation137_spill] sm:$0xff]  ;;  %v6175_v8 = vmul.f32 %v15846_v49, %v15400_v3  ;;  %v17820_v49 = vld [vmem:[#allocation16_spill] sm:$0xff] }
 0xd60   : > { %9731 = vpow2.f32 %v5824_v18  ;;  %v15903_v5 = vmul.f32 %v9708_v4, %v17814_v60  ;;  %v9710_v16 = vpop.eup %9709  ;;  %v6189_v9 = vadd.f32 %v6173_v62, %v6107_v20  ;;  %v6115_v27 = vadd.f32 %v8768_v63, %v6010_v33  ;;  %v17821_v24 = vld [vmem:[#allocation133_spill] sm:$0xff] }
 0xd61   : > { %9733 = vpow2.f32 %v5872_v17  ;;  %v4843_v38 = vadd.f32 %v17815_v47, %v4827_v37  ;;  %v4786_v48 = vpop.xlane.xlu0 %4785  ;;  %v15906_v10 = vpop.eup %9711  ;;  %v6190_v18 = vadd.f32 %v6174_v36, %v6110_v59  ;;  %v6118_v15 = vadd.f32 %v8771_v57, %v6011_v41  ;;  %v17817_v17 = vld [vmem:[#allocation47_spill] sm:$0xff]  ;;  %v17818_v36 = vld [vmem:[#allocation153_spill] sm:$0xff]  ;;  %v17822_v47 = vld [vmem:[#allocation168_spill] sm:$0xff] }
 0xd62   : > { %v4824_v45 = vadd.f32 %v17816_v21, %v4786_v48  ;;  %v5909_v23 = vpop.xlane.xlu1 %5908  ;;  %v6176_v63 = vmul.f32 %v15841_v58, %v15400_v3  ;;  %3608 = vadd.xlane.f32.xlu0 %v17817_v17  ;;  %v5805_v37 = vsub.f32 %v17821_v24, %v17820_v49  ;;  %v6191_v58 = vadd.f32 %v6175_v8, %v6115_v27  ;;  %v17828_v24 = vld [vmem:[#allocation109_spill] sm:$0xff] }
 0xd63   : > { %v9714_v0 = vpop.eup %9713  ;;  %9735 = vrcp.f32 %v4843_v38  ;;  %v5945_v57 = vadd.f32 %v15906_v10, %v5909_v23  ;;  %3617 = vadd.xlane.f32.xlu1 %v17819_v54  ;;  %v15923_v62 = vmul.f32 %v9710_v16, %v6190_v18  ;;  %v17823_v16 = vld [vmem:[#allocation211_spill] sm:$0xff] }
 0xd64   : > { %v15916_v20 = vpop.eup %9715  ;;  %v4840_v59 = vadd.f32 %v17818_v36, %v4824_v45  ;;  %v15921_v4 = vmul.f32 %v9714_v0, %v6189_v9  ;;  %v6192_v60 = vadd.f32 %v6176_v63, %v6118_v15  ;;  %v5853_v18 = vsub.f32 %v17823_v16, %v17820_v49  ;;  %v17824_v45 = vld [vmem:[#allocation76_spill] sm:$0xff]  ;;  %v17825_v0 = vld [vmem:[#allocation171_spill] sm:$0xff] }
 0xd65   : > { %v9718_v33 = vpop.eup %9717  ;;  %v4792_v41 = vpop.xlane.xlu0 %4791  ;;  %v5961_v27 = vadd.f32 %v15916_v20, %v5945_v57  ;;  %v17826_v15 = vld [vmem:[#allocation75_spill] sm:$0xff] }
 0xd66   : > { %v15927_v1 = vpop.eup %9719  ;;  %9737 = vrcp.f32 %v4840_v59  ;;  %v4826_v38 = vadd.f32 %v17822_v47, %v4792_v41  ;;  %v5915_v48 = vpop.xlane.xlu1 %5914  ;;  %3614 = vadd.xlane.f32.xlu0 %v17824_v45  ;;  %v15941_v17 = vmul.f32 %v9718_v33, %v6192_v60  ;;  %v5830_v59 = vmul.f32 1.442695, %v5805_v37  ;;  %v17827_v54 = vld [vmem:[#allocation95_spill] sm:$0xff]  ;;  %v17832_v37 = vld [vmem:[#allocation85_spill] sm:$0xff] }
 0xd67   : > { %v9722_v9 = vpop.eup %9721  ;;  %v5947_v23 = vadd.f32 %v15927_v1, %v5915_v48  ;;  %3623 = vadd.xlane.f32.xlu1 %v17826_v15  ;;  %v5807_v41 = vsub.f32 %v17828_v24, %v17827_v54  ;;  %v5878_v24 = vmul.f32 1.442695, %v5853_v18 }
 0xd68   : > { %v4842_v8 = vadd.f32 %v17825_v0, %v4826_v38  ;;  %v15939_v63 = vmul.f32 %v9722_v9, %v6191_v58  ;;  %v9724_v36 = vpop.eup %9723  ;;  %v17830_v58 = vld [vmem:[#allocation212_spill] sm:$0xff]  ;;  %v17831_v9 = vld [vmem:[#allocation18_spill] sm:$0xff]  ;;  %v17833_v0 = vld [vmem:[#allocation139_spill] sm:$0xff] }
 0xd69   : > { %v5906_v49 = vpop.xlane.xlu0 %5905  ;;  %v15945_v47 = vpop.eup %9725  ;;  %v5804_v33 = vsub.f32 %v17831_v9, %v17830_v58  ;;  %v5852_v15 = vsub.f32 %v17833_v0, %v17830_v58  ;;  %v5834_v57 = vmul.f32 1.442695, %v5807_v41  ;;  %v17839_v41 = vld [vmem:[#allocation30_spill] sm:$0xff] }
 0xd6a   : > { %9739 = vrcp.f32 %v4842_v8  ;;  %v5944_v48 = vadd.f32 %v9724_v36, %v5906_v49  ;;  %v15947_v16 = vpop.xlane.xlu1 %7028  ;;  %v9728_v38 = vpop.eup %9727  ;;  %v5963_v60 = vadd.f32 %v15945_v47, %v5947_v23  ;;  %3620 = vadd.xlane.f32.xlu0 %v17832_v37  ;;  %v17834_v49 = vld [vmem:[#allocation84_spill] sm:$0xff]  ;;  %v17836_v23 = vld [vmem:[#allocation98_spill] sm:$0xff] }
 0xd6b   : > { %17829 = vst [vmem:[#allocation42_spill] sm:$0xff] %v15947_v16  ;;  %9741 = vrcp.f32 %v5961_v27  ;;  %3629 = vadd.xlane.f32.xlu1 %v17834_v49  ;;  %v5855_v37 = vsub.f32 %v17836_v23, %v17827_v54  ;;  %v5828_v18 = vmul.f32 1.442695, %v5804_v33  ;;  %v17838_v27 = vld [vmem:[#allocation37_spill] sm:$0xff]  ;;  %v17840_v0 = vld [vmem:[#allocation110_spill] sm:$0xff]  ;;  %v17841_v49 = vld [vmem:[#allocation91_spill] sm:$0xff] }
 0xd6c   : > { %v9730_v45 = vpop.eup %9729  ;;  %v5960_v8 = vadd.f32 %v9728_v38, %v5944_v48  ;;  %9743 = vpow2.f32 %v5830_v59  ;;  %v5876_v59 = vmul.f32 1.442695, %v5852_v15  ;;  %v17842_v54 = vld [vmem:[#allocation213_spill] sm:$0xff]  ;;  %v17844_v23 = vld [vmem:[#allocation231_spill] sm:$0xff] }
 0xd6d   : > { %v9732_v28 = vpop.eup %9731  ;;  %v5912_v21 = vpop.xlane.xlu0 %5911  ;;  %v15959_v16 = vmul.f32 %v9730_v45, %v17835_v52  ;;  %v5806_v52 = vsub.f32 %v17840_v0, %v17839_v41  ;;  %v5882_v15 = vmul.f32 1.442695, %v5855_v37  ;;  %v17852_v37 = vld [vmem:[#allocation169_spill] sm:$0xff] }
 0xd6e   : > { %v15961_v9 = vpop.eup %9733  ;;  %9745 = vrcp.f32 %v5960_v8  ;;  %v5946_v31 = vadd.f32 %v9732_v28, %v5912_v21  ;;  %v15965_v58 = vpop.xlane.xlu1 %7034  ;;  %3626 = vadd.xlane.f32.xlu0 %v17838_v27  ;;  %v5854_v21 = vsub.f32 %v17842_v54, %v17839_v41  ;;  %v17843_v8 = vld [vmem:[#allocation230_spill] sm:$0xff]  ;;  %v17850_v41 = vld [vmem:[#allocation179_spill] sm:$0xff] }
 0xd6f   : > { %17837 = vst [vmem:[#allocation162_spill] sm:$0xff] %v15965_v58  ;;  %9747 = vrcp.f32 %v5963_v60  ;;  %3635 = vadd.xlane.f32.xlu1 %v17841_v49  ;;  %v8774_v33 = vadd.f32 %v17844_v23, %v17843_v8  ;;  %v17846_v27 = vld [vmem:[#allocation178_spill] sm:$0xff]  ;;  %v17849_v49 = vld [vmem:[#allocation89_spill] sm:$0xff]  ;;  %v5832_v8 = vmul.f32 1.442695, %v5806_v52 }
 0xd70   : > { %v9736_v48 = vpop.eup %9735  ;;  %9749 = vpow2.f32 %v5878_v24  ;;  %v5962_v45 = vadd.f32 %v15961_v9, %v5946_v31  ;;  %v17847_v24 = vld [vmem:[#allocation232_spill] sm:$0xff]  ;;  %v17851_v23 = vld [vmem:[#allocation90_spill] sm:$0xff]  ;;  %v17856_v52 = vld [vmem:[#allocation233_spill] sm:$0xff] }
 0xd71   : > { %9751 = vpow2.f32 %v5834_v57  ;;  %v15976_v60 = vpop.xlane.xlu0 %7025  ;;  %v15979_v58 = vmul.f32 %v9736_v48, %v17846_v27  ;;  %v8777_v0 = vadd.f32 %v17848_v61, %v17847_v24  ;;  %v6012_v57 = vmul.f32 %v9724_v36, %v15395_v46  ;;  %v17853_v24 = vld [vmem:[#allocation70_spill] sm:$0xff]  ;;  %v17855_v36 = vld [vmem:[#allocation180_spill] sm:$0xff] }
 0xd72   : > { %17845 = vst [vmem:[#allocation164_spill] sm:$0xff] %v15976_v60  ;;  %9753 = vrcp.f32 %v5962_v45  ;;  %v4801_v31 = vpop.xlane.xlu1 %4800  ;;  %3632 = vadd.xlane.f32.xlu0 %v17849_v49  ;;  %v6013_v48 = vmul.f32 %v15906_v10, %v15395_v46  ;;  %v5880_v61 = vmul.f32 1.442695, %v5854_v21  ;;  %v6177_v21 = vmul.f32 %v9728_v38, %v15400_v3 }
 0xd73   : > { %v9738_v13 = vpop.eup %9737  ;;  %9755 = vpow2.f32 %v5828_v18  ;;  %v4829_v54 = vadd.f32 %v17850_v41, %v4801_v31  ;;  %3641 = vadd.xlane.f32.xlu1 %v17851_v23  ;;  %v6123_v45 = vadd.f32 %v8774_v33, %v6012_v57  ;;  %v17854_v18 = vld [vmem:[#allocation210_spill] sm:$0xff]  ;;  %v17857_v31 = vld [vmem:[#allocation209_spill] sm:$0xff]  ;;  %v6015_v33 = vmul.f32 %v15927_v1, %v15395_v46 }
 0xd74   : > { %9757 = vpow2.f32 %v5876_v59  ;;  %v15990_v27 = vmul.f32 %v9738_v13, %v17852_v37  ;;  %v8783_v60 = vadd.f32 %v17854_v18, %v17853_v24  ;;  %v6126_v59 = vadd.f32 %v8777_v0, %v6013_v48  ;;  %v17858_v57 = vld [vmem:[#allocation49_spill] sm:$0xff]  ;;  %v17860_v48 = vld [vmem:[#allocation102_spill] sm:$0xff]  ;;  %v17861_v24 = vld [vmem:[#allocation175_spill] sm:$0xff] }
 0xd75   : > { %v4845_v6 = vadd.f32 %v17855_v36, %v4829_v54  ;;  %v15995_v49 = vpop.xlane.xlu0 %7031  ;;  %9759 = vpow2.f32 %v5882_v15  ;;  %v8780_v41 = vadd.f32 %v17857_v31, %v17856_v52  ;;  %v17859_v54 = vld [vmem:[#allocation20_spill] sm:$0xff]  ;;  %v6178_v15 = vmul.f32 %v15916_v20, %v15400_v3 }
 0xd76   : > { %v4807_v10 = vpop.xlane.xlu1 %4806  ;;  %3638 = vadd.xlane.f32.xlu0 %v17858_v57  ;;  %v6014_v0 = vmul.f32 %v9732_v28, %v15395_v46  ;;  %v6193_v36 = vadd.f32 %v6177_v21, %v6123_v45  ;;  %v6134_v1 = vadd.f32 %v8783_v60, %v6015_v33  ;;  %v17864_v60 = vld [vmem:[#allocation100_spill] sm:$0xff]  ;;  %v17865_v21 = vld [vmem:[#allocation177_spill] sm:$0xff]  ;;  %v17867_v28 = vld [vmem:[#allocation38_spill] sm:$0xff] }
 0xd77   : > { %v9740_v13 = vpop.eup %9739  ;;  %9761 = vrcp.f32 %v4845_v6  ;;  %v4831_v37 = vadd.f32 %v17859_v54, %v4807_v10  ;;  %3647 = vadd.xlane.f32.xlu1 %v17860_v48  ;;  %v17862_v6 = vld [vmem:[#allocation184_spill] sm:$0xff]  ;;  %v6194_v10 = vadd.f32 %v6178_v15, %v6126_v59 }
 0xd78   : > { %9763 = vpow2.f32 %v5832_v8  ;;  %v16011_v18 = vmul.f32 %v9740_v13, %v17861_v24  ;;  %v9742_v38 = vpop.eup %9741  ;;  %v6131_v8 = vadd.f32 %v8780_v41, %v6014_v0  ;;  %v17863_v54 = vld [vmem:[#allocation176_spill] sm:$0xff]  ;;  %v6179_v13 = vmul.f32 %v15961_v9, %v15400_v3  ;;  %v17866_v9 = vld [vmem:[#allocation151_spill] sm:$0xff] }
 0xd79   : > { %9765 = vpow2.f32 %v5880_v61  ;;  %v4847_v52 = vadd.f32 %v17862_v6, %v4831_v37  ;;  %v4798_v31 = vpop.xlane.xlu0 %4797  ;;  %v9744_v57 = vpop.eup %9743  ;;  %v6180_v61 = vmul.f32 %v15945_v47, %v15400_v3  ;;  %v16025_v37 = vmul.f32 %v9742_v38, %v6194_v10  ;;  %v17868_v10 = vld [vmem:[#allocation19_spill] sm:$0xff] }
 0xd7a   : > { %v4828_v23 = vadd.f32 %v17863_v54, %v4798_v31  ;;  %v5921_v20 = vpop.xlane.xlu1 %5920  ;;  %3644 = vadd.xlane.f32.xlu0 %v17864_v60  ;;  %v6195_v31 = vadd.f32 %v6179_v13, %v6131_v8 }
 0xd7b   : > { %v9746_v48 = vpop.eup %9745  ;;  %9767 = vrcp.f32 %v4847_v52  ;;  %v5949_v41 = vadd.f32 %v9744_v57, %v5921_v20  ;;  %v6196_v0 = vadd.f32 %v6180_v61, %v6134_v1 }
 0xd7c   : > { %v9748_v45 = vpop.eup %9747  ;;  %v4844_v59 = vadd.f32 %v17865_v21, %v4828_v23  ;;  %v16023_v33 = vmul.f32 %v9746_v48, %v6193_v36  ;;  %v17875_v21 = vld [vmem:[#allocation236_spill] sm:$0xff] }
 0xd7d   : > { %v9750_v15 = vpop.eup %9749  ;;  %v4804_v24 = vpop.xlane.xlu0 %4803  ;;  %v16031_v23 = vmul.f32 %v9748_v45, %v6196_v0 }
 0xd7e   : > { %v9752_v6 = vpop.eup %9751  ;;  %9769 = vrcp.f32 %v4844_v59  ;;  %v4830_v54 = vadd.f32 %v17866_v9, %v4804_v24  ;;  %v5927_v47 = vpop.xlane.xlu1 %5926  ;;  %3650 = vadd.xlane.f32.xlu0 %v17867_v28  ;;  %v5965_v38 = vadd.f32 %v9750_v15, %v5949_v41  ;;  %v17870_v41 = vld [vmem:[#allocation182_spill] sm:$0xff] }
 0xd7f   : > { %v9754_v60 = vpop.eup %9753  ;;  %v5951_v1 = vadd.f32 %v9752_v6, %v5927_v47 }
 0xd80   : > { %v9756_v36 = vpop.eup %9755  ;;  %v4846_v20 = vadd.f32 %v17868_v10, %v4830_v54  ;;  %v16034_v48 = vmul.f32 %v9754_v60, %v6195_v31  ;;  %v17871_v10 = vld [vmem:[#allocation234_spill] sm:$0xff] }
 0xd81   : > { %v9758_v8 = vpop.eup %9757  ;;  %v5918_v13 = vpop.xlane.xlu0 %5917 }
 0xd82   : > { %17869 = vst [vmem:[#allocation72_spill] sm:$0xff] %v16034_v48  ;;  %9771 = vrcp.f32 %v4846_v20  ;;  %v5948_v61 = vadd.f32 %v9756_v36, %v5918_v13  ;;  %v9760_v59 = vpop.eup %9759  ;;  %v17872_v20 = vld [vmem:[#allocation235_spill] sm:$0xff] }
 0xd83   : > { %9773 = vrcp.f32 %v5965_v38  ;;  %v5967_v28 = vadd.f32 %v9760_v59, %v5951_v1  ;;  %v8786_v13 = vadd.f32 %v17872_v20, %v17871_v10  ;;  %v17873_v38 = vpack.c.bf16 %v15862_v32, %v15890_v2  ;;  %v17874_v1 = vld [vmem:[#allocation186_spill] sm:$0xff]  ;;  %v17880_v20 = vld [vmem:[#allocation239_spill] sm:$0xff] }
 0xd84   : > { %v9762_v24 = vpop.eup %9761  ;;  %v5964_v45 = vadd.f32 %v9758_v8, %v5948_v61  ;;  %v17878_v32 = vpack.c.bf16 %v15923_v62, %v15921_v4  ;;  %v6019_v4 = vmul.f32 %v9752_v6, %v15395_v46  ;;  %v17883_v62 = vld [vmem:[#allocation185_spill] sm:$0xff]  ;;  %v6184_v6 = vmul.f32 %v9760_v59, %v15400_v3 }
 0xd85   : > { %v9764_v0 = vpop.eup %9763  ;;  %v5924_v9 = vpop.xlane.xlu0 %5923  ;;  %v16039_v52 = vmul.f32 %v9762_v24, %v17870_v41  ;;  %v17876_v24 = vld [vmem:[#allocation237_spill] sm:$0xff] }
 0xd86   : > { %v9766_v54 = vpop.eup %9765  ;;  %9775 = vrcp.f32 %v5964_v45  ;;  %v5950_v31 = vadd.f32 %v9764_v0, %v5924_v9  ;;  %v8789_v41 = vadd.f32 %v17876_v24, %v17875_v21  ;;  %v6016_v9 = vmul.f32 %v9756_v36, %v15395_v46  ;;  %v17881_v21 = vld [vmem:[#allocation240_spill] sm:$0xff]  ;;  %v17888_v59 = vld [vmem:[#allocation221_spill] sm:$0xff] }
 0xd87   : > { %9777 = vrcp.f32 %v5967_v28  ;;  %v6017_v28 = vmul.f32 %v9744_v57, %v15395_v46  ;;  %v6181_v24 = vmul.f32 %v9758_v8, %v15400_v3 }
 0xd88   : > { %v9768_v47 = vpop.eup %9767  ;;  %v5966_v60 = vadd.f32 %v9766_v54, %v5950_v31  ;;  %7357 = vrot.lane.b32.xlu1 %v17873_v38, %s10086_s21  ;;  %v17877_v31 = vld [vmem:[#allocation181_spill] sm:$0xff]  ;;  %v6139_v10 = vadd.f32 %v8786_v13, %v6016_v9  ;;  %v6182_v13 = vmul.f32 %v9750_v15, %v15400_v3 }
 0xd89   : > { %v16048_v61 = vmul.f32 %v9768_v47, %v17874_v1  ;;  %v6142_v2 = vadd.f32 %v8789_v41, %v6017_v28  ;;  %v17879_v47 = vld [vmem:[#allocation238_spill] sm:$0xff] }
 0xd8a   : > { %9779 = vrcp.f32 %v5966_v60  ;;  %v8792_v38 = vadd.f32 %v17880_v20, %v17879_v47  ;;  %v17882_v60 = vld [vmem:[#allocation241_spill] sm:$0xff]  ;;  %v6197_v28 = vadd.f32 %v6181_v24, %v6139_v10 }
 0xd8b   : > { %v9770_v45 = vpop.eup %9769  ;;  %v8795_v1 = vadd.f32 %v17882_v60, %v17881_v21 }
 0xd8c   : > { %v16055_v48 = vmul.f32 %v9770_v45, %v17877_v31  ;;  %7381 = vrot.lane.b32.xlu1 %v17878_v32, %s10084_s11  ;;  %v6018_v45 = vmul.f32 %v9764_v0, %v15395_v46  ;;  %v17884_v31 = vpack.c.bf16 %v15941_v17, %v15939_v63  ;;  %v6198_v32 = vadd.f32 %v6182_v13, %v6142_v2  ;;  %v17886_v17 = vld [vmem:[#allocation218_spill] sm:$0xff]  ;;  %v17887_v2 = vld [vmem:[#allocation56_spill] sm:$0xff] }
 0xd8d   : > { %v6150_v20 = vadd.f32 %v8795_v1, %v6019_v4  ;;  %v6183_v0 = vmul.f32 %v9766_v54, %v15400_v3  ;;  %v17885_v63 = vpack.c.bf16 %v15873_v12, %v15903_v5  ;;  %v17889_v13 = vld [vmem:[#allocation58_spill] sm:$0xff]  ;;  %v17890_v12 = vld [vmem:[#allocation216_spill] sm:$0xff] }
 0xd8e   : > { %v5105_v36 = vpack.c.bf16 %v16039_v52, %v16055_v48  ;;  %v6147_v47 = vadd.f32 %v8792_v38, %v6018_v45  ;;  %v6917_v38 = vsub.f32 %v17887_v2, %v17886_v17  ;;  %v6916_v45 = vsub.f32 %v17889_v13, %v17888_v59 }
 0xd8f   : > { %v9772_v57 = vpop.eup %9771  ;;  %v6965_v5 = vsub.f32 %v17890_v12, %v17886_v17  ;;  %v6966_v2 = vsub.f32 %v15357_v51, %v15570_v11 }
 0xd90   : > { %v16072_v41 = vmul.f32 %v9772_v57, %v17883_v62  ;;  %v9774_v9 = vpop.eup %9773  ;;  %7383 = vrot.lane.b32.xlu1 %v17884_v31, %s10084_s11  ;;  %v6199_v1 = vadd.f32 %v6183_v0, %v6147_v47  ;;  %v6200_v57 = vadd.f32 %v6184_v6, %v6150_v20  ;;  %v6932_v31 = vmul.f32 1.442695, %v6916_v45 }
 0xd91   : > { %v16084_v60 = vmul.f32 %v9774_v9, %v6198_v32  ;;  %v6934_v9 = vmul.f32 1.442695, %v6917_v38  ;;  %v17891_v32 = vld [vmem:[#allocation220_spill] sm:$0xff]  ;;  %v6982_v20 = vmul.f32 1.442695, %v6965_v5  ;;  %v6918_v6 = vsub.f32 %v15336_v25, %v15570_v11  ;;  %v9279_v25 = vld [vmem:[%s16680_s6 + $0x38] sm:$0xff]  }
 0xd92   : > { %v5106_v15 = vpack.c.bf16 %v16048_v61, %v16072_v41  ;;  %v6964_v47 = vsub.f32 %v17891_v32, %v17888_v59  ;;  %8968 = vmatprep.subr.bf16.mxu1 %v9279_v25  ;;  %v9280_v11 = vld [vmem:[%s16680_s6 + $0x30] sm:$0xff]   ;;  %v8301_v5 = vld [vmem:[%s16679_s5 + $0x3] sm:$0x1]  ;;  %v17950_v41 = vld [vmem:[#allocation145_spill] sm:$0xff] }
 0xd93   : > { %v9776_v8 = vpop.eup %9775  ;;  %9781 = vpow2.f32 %v6934_v9  ;;  %v6936_v17 = vmul.f32 1.442695, %v6918_v6  ;;  %8969 = vmatpush3.bf16.msra.mxu1 %v9279_v25  ;;  %v9282_v9 = vld [vmem:[%s16680_s6 + $0x20] sm:$0xff]   ;;  %v17896_v25 = vld [vmem:[#allocation81_spill] sm:$0xff] }
 0xd94   : > { %v16082_v21 = vmul.f32 %v9776_v8, %v6197_v28  ;;  %v9778_v10 = vpop.eup %9777  ;;  %7359 = vrot.lane.b32.xlu0 %v17885_v63, %s10086_s21  ;;  %v6919_v8 = vsub.f32 %v15355_v53, %v15547_v29  ;;  %9783 = vpow2.f32 %v6932_v31  ;;  %v6980_v0 = vmul.f32 1.442695, %v6964_v47  ;;  %8970 = vmatprep.subr.bf16.mxu1 %v9280_v11 }
 0xd95   : > { %v16098_v62 = vmul.f32 %v9778_v10, %v6200_v57  ;;  %9785 = vpow2.f32 %v6982_v20  ;;  %v6967_v63 = vsub.f32 %v15363_v42, %v15547_v29  ;;  %v6921_v53 = vsub.f32 %v15436_v26, %v15587_v14 }
 0xd96   : > { %v6225_v54 = vpack.c.bf16 %v16084_v60, %v16082_v21  ;;  %v6938_v10 = vmul.f32 1.442695, %v6919_v8  ;;  %9787 = vpow2.f32 %v6980_v0  ;;  %v6920_v57 = vsub.f32 %v15421_v43, %v15608_v56  ;;  %v9281_v43 = vld [vmem:[%s16680_s6 + $0x28] sm:$0xff]   ;;  %v9283_v8 = vld [vmem:[%s16680_s6 + $0x18] sm:$0xff]   ;;  %v17946_v21 = vld [vmem:[#allocation246_spill] sm:$0xff] }
 0xd97   : > { %v9780_v24 = vpop.eup %9779  ;;  %v6986_v38 = vmul.f32 1.442695, %v6967_v63  ;;  %v6968_v42 = vsub.f32 %v15438_v7, %v15608_v56  ;;  %v6942_v29 = vmul.f32 1.442695, %v6921_v53  ;;  %v6969_v26 = vsub.f32 %v15442_v35, %v15587_v14  ;;  %8971 = vmatpush3.bf16.msra.mxu1 %v9280_v11  ;;  %v17895_v53 = vld [vmem:[#allocation94_spill] sm:$0xff] }
 0xd98   : > { %v16096_v4 = vmul.f32 %v9780_v24, %v6199_v1  ;;  %9789 = vpow2.f32 %v6938_v10  ;;  %v6984_v1 = vmul.f32 1.442695, %v6966_v2  ;;  %v6940_v59 = vmul.f32 1.442695, %v6920_v57  ;;  %8972 = vmatprep.subr.bf16.mxu1 %v9281_v43 }
 0xd99   : > { %9791 = vpow2.f32 %v6936_v17  ;;  %v6988_v13 = vmul.f32 1.442695, %v6968_v42  ;;  %v6990_v35 = vmul.f32 1.442695, %v6969_v26  ;;  %v6923_v14 = vsub.f32 %v15519_v22, %v15598_v19  ;;  %v17893_v17 = vld [vmem:[#allocation93_spill] sm:$0xff]  ;;  %v17897_v42 = vld [vmem:[#allocation14_spill] sm:$0xff] }
 0xd9a   : > { %v6226_v28 = vpack.c.bf16 %v16098_v62, %v16096_v4  ;;  %9793 = vpow2.f32 %v6986_v38  ;;  %v6970_v22 = vsub.f32 %v15521_v50, %v15623_v55  ;;  %v6971_v20 = vsub.f32 %v15537_v34, %v15598_v19  ;;  %v17894_v34 = vld [vmem:[#allocation80_spill] sm:$0xff] }
 0xd9b   : > { %9795 = vpow2.f32 %v6984_v1  ;;  %8973 = vmatpush3.bf16.msra.mxu1 %v9281_v43  ;;  %v6946_v47 = vmul.f32 1.442695, %v6923_v14  ;;  %v6924_v19 = vsub.f32 %v17894_v34, %v17893_v17  ;;  %v6925_v57 = vsub.f32 %v17896_v25, %v17895_v53  ;;  %v17902_v34 = vld [vmem:[#allocation164_spill] sm:$0xff] }
 0xd9c   : > { %9797 = vpow2.f32 %v6942_v29  ;;  %8974 = vmatprep.subr.bf16.mxu1 %v9282_v9  ;;  %v6992_v63 = vmul.f32 1.442695, %v6970_v22  ;;  %v6994_v1 = vmul.f32 1.442695, %v6971_v20  ;;  %v17956_v62 = vld [vmem:[#allocation204_spill] sm:$0xff] }
 0xd9d   : > { %9799 = vpow2.f32 %v6940_v59 }
 0xd9e   : > { %9801 = vpow2.f32 %v6988_v13  ;;  %v6948_v13 = vmul.f32 1.442695, %v6924_v19 }
 0xd9f   : > { %9803 = vpow2.f32 %v6990_v35  ;;  %8975 = vmatpush3.bf16.msra.mxu1 %v9282_v9  ;;  %v17898_v35 = vld [vmem:[#allocation83_spill] sm:$0xff]  ;;  %v17899_v9 = vld [vmem:[#allocation22_spill] sm:$0xff] }
 0xda0   : > { %v16123_v51 = vpop.eup %9781  ;;  %8976 = vmatprep.subr.bf16.mxu1 %v9283_v8  ;;  %v6972_v14 = vsub.f32 %v17898_v35, %v17893_v17  ;;  %v17904_v35 = vld [vmem:[#allocation50_spill] sm:$0xff] }
 0xda1   : > { %v9784_v24 = vpop.eup %9783  ;;  %v7061_v7 = vadd.f32 %v16123_v51, %v15839_v30  ;;  %v6922_v30 = vsub.f32 %v15503_v44, %v15623_v55  ;;  %v6467_v44 = vunpack.c.l.bf16 %v8301_v5  ;;  %v17892_v55 = vld [vmem:[#allocation205_spill] sm:$0xff]  ;;  %v6950_v5 = vmul.f32 1.442695, %v6925_v57 }
 0xda2   : > { %v7060_v56 = vadd.f32 %v9784_v24, %v15870_v40  ;;  %v16136_v45 = vpop.eup %9785  ;;  %v6996_v17 = vmul.f32 1.442695, %v6972_v14 }
 0xda3   : > { %v9788_v12 = vpop.eup %9787  ;;  %v7077_v40 = vadd.f32 %v16136_v45, %v7061_v7  ;;  %v6944_v6 = vmul.f32 1.442695, %v6922_v30  ;;  %v16171_v29 = vrot.slane %v6467_v44, %v17897_v42  ;;  %v16181_v30 = vrot.slane %v6467_v44, %v17899_v9  ;;  %8977 = vmatpush3.bf16.msra.mxu1 %v9283_v8  ;;  %v17901_v8 = vld [vmem:[#allocation42_spill] sm:$0xff]  ;;  %v17905_v9 = vld [vmem:[#allocation51_spill] sm:$0xff] }
 0xda4   : > { %v7076_v31 = vadd.f32 %v9788_v12, %v7060_v56 }
 0xda5   : > { %v16151_v32 = vpop.eup %9789  ;;  %9805 = vrcp.f32 %v7077_v40  ;;  %v7128_v7 = vmul.f32 %v9784_v24, %v16171_v29  ;;  %v9285_v24 = vld [vmem:[%s16680_s6 + $0x8] sm:$0xff]   ;;  %v7129_v44 = vmul.f32 %v16123_v51, %v16171_v29 }
 0xda6   : > { %v16158_v0 = vpop.eup %9791  ;;  %v7063_v50 = vadd.f32 %v16151_v32, %v15856_v39  ;;  %9807 = vrcp.f32 %v7076_v31  ;;  %v9284_v39 = vld [vmem:[%s16680_s6 + $0x10] sm:$0xff]   ;;  %v17900_v31 = vld [vmem:[#allocation82_spill] sm:$0xff] }
 0xda7   : > { %v7062_v10 = vadd.f32 %v16158_v0, %v17892_v55  ;;  %v16166_v38 = vpop.eup %9793  ;;  %9809 = vpow2.f32 %v6946_v47  ;;  %v6973_v22 = vsub.f32 %v17900_v31, %v17895_v53  ;;  %8978 = vmatprep.subr.bf16.mxu1 %v9284_v39 }
 0xda8   : > { %v9796_v26 = vpop.eup %9795  ;;  %9811 = vpow2.f32 %v6944_v6  ;;  %v7079_v11 = vadd.f32 %v16166_v38, %v7063_v50  ;;  %8979 = vmatpush3.bf16.msra.mxu1 %v9284_v39  ;;  %v7130_v39 = vmul.f32 %v16158_v0, %v16171_v29 }
 0xda9   : > { %v7078_v59 = vadd.f32 %v9796_v26, %v7062_v10  ;;  %9813 = vpow2.f32 %v6992_v63  ;;  %v16188_v20 = vpop.eup %9797  ;;  %v7293_v10 = vmul.f32 %v9788_v12, %v16181_v30  ;;  %v6998_v53 = vmul.f32 1.442695, %v6973_v22  ;;  %8980 = vmatprep.subr.bf16.mxu1 %v9285_v24  ;;  %v9286_v12 = vld [vmem:[%s16680_s6] sm:$0xff]  }
 0xdaa   : > { %9815 = vpow2.f32 %v6994_v1  ;;  %v16192_v50 = vpop.eup %9799  ;;  %v7065_v55 = vadd.f32 %v16188_v20, %v17901_v8  ;;  %v7295_v0 = vmul.f32 %v9796_v26, %v16181_v30  ;;  %v7131_v8 = vmul.f32 %v16151_v32, %v16171_v29 }
 0xdab   : > { %9817 = vrcp.f32 %v7079_v11  ;;  %v7064_v19 = vadd.f32 %v16192_v50, %v17902_v34  ;;  %v16201_v51 = vpop.eup %9801  ;;  %v7296_v32 = vmul.f32 %v16166_v38, %v16181_v30  ;;  %v7132_v38 = vmul.f32 %v16192_v50, %v16171_v29 }
 0xdac   : > { %9819 = vrcp.f32 %v7078_v59  ;;  %v16206_v42 = vpop.eup %9803  ;;  %8981 = vmatpush3.bf16.msra.mxu1 %v9285_v24 }
 0xdad   : > { %9821 = vpow2.f32 %v6948_v13  ;;  %v7081_v59 = vadd.f32 %v16206_v42, %v7065_v55  ;;  %v17903_v13 = vld [vmem:[#allocation54_spill] sm:$0xff]  ;;  %8982 = vmatprep.subr.bf16.mxu1 %v9286_v12 }
 0xdae   : > { %9823 = vpow2.f32 %v6950_v5  ;;  %v5809_v14 = vsub.f32 %v17904_v35, %v17903_v13  ;;  %v7080_v5 = vadd.f32 %v16201_v51, %v7064_v19 }
 0xdaf   : > { %9825 = vpow2.f32 %v6996_v17 }
 0xdb0   : > { %9827 = vpow2.f32 %v6998_v53  ;;  %v5838_v19 = vmul.f32 1.442695, %v5809_v14  ;;  %8983 = vmatpush3.bf16.msra.mxu1 %v9286_v12  ;;  %v7038_v12 = vpop.xlane.xlu0 %7037 }
 0xdb1   : > { %9829 = vrcp.f32 %v7081_v59  ;;  %v17908_v59 = vld [vmem:[#allocation147_spill] sm:$0xff] }
 0xdb2   : > { %9831 = vrcp.f32 %v7080_v5 }
 0xdb3   : > { %9833 = vpow2.f32 %v5838_v19 }
 0xdb5   : > { %v8856_v2 = vpop.f32.mrf.mxu0 }
 0xdb7   : > { %v8857_v43 = vpop.f32.mrf.mxu0 }
 0xdb8   : > { %v8858_v56 = vadd.f32 %v8857_v43, %v8856_v2  ;;  %v7294_v2 = vmul.f32 %v16136_v45, %v16181_v30  ;;  %v9806_v43 = vpop.eup %9805 }
 0xdb9   : > { %v8859_v40 = vpop.f32.mrf.mxu0 }
 0xdba   : > { %v7227_v47 = vadd.f32 %v8858_v56, %v7128_v7  ;;  %v9808_v56 = vpop.eup %9807 }
 0xdbb   : > { %v8860_v6 = vpop.f32.mrf.mxu0 }
 0xdbc   : > { %v8861_v63 = vadd.f32 %v8860_v6, %v8859_v40  ;;  %v7309_v25 = vadd.f32 %v7293_v10, %v7227_v47  ;;  %v5857_v40 = vsub.f32 %v17905_v9, %v17903_v13  ;;  %v16216_v6 = vpop.eup %9809 }
 0xdbd   : > { %v8862_v1 = vpop.f32.mrf.mxu0  ;;  %v9812_v10 = vpop.eup %9811 }
 0xdbe   : > { %v7230_v57 = vadd.f32 %v8861_v63, %v7129_v44  ;;  %v7325_v22 = vmul.f32 %v9808_v56, %v7309_v25  ;;  %v17906_v63 = vld [vmem:[#allocation162_spill] sm:$0xff]  ;;  %v9814_v53 = vpop.eup %9813  ;;  %v5886_v25 = vmul.f32 1.442695, %v5857_v40  ;;  %v7041_v56 = vpop.xlane.xlu1 %7040 }
 0xdbf   : > { %v8863_v11 = vpop.f32.mrf.mxu0  ;;  %v7067_v17 = vadd.f32 %v16216_v6, %v17906_v63 }
 0xdc0   : > { %v7310_v45 = vadd.f32 %v7294_v2, %v7230_v57  ;;  %v8864_v7 = vadd.f32 %v8863_v11, %v8862_v1  ;;  %v7066_v2 = vadd.f32 %v9812_v10, %v15995_v49  ;;  %v16227_v11 = vpop.eup %9815  ;;  %9835 = vpow2.f32 %v5886_v25 }
 0xdc1   : > { %v8865_v31 = vpop.f32.mrf.mxu0  ;;  %v7083_v49 = vadd.f32 %v16227_v11, %v7067_v17 }
 0xdc2   : > { %v7326_v47 = vmul.f32 %v9806_v43, %v7310_v45  ;;  %v7235_v44 = vadd.f32 %v8864_v7, %v7130_v39  ;;  %v17907_v43 = vld [vmem:[#allocation160_spill] sm:$0xff]  ;;  %v9818_v7 = vpop.eup %9817  ;;  %v7082_v9 = vadd.f32 %v9814_v53, %v7066_v2 }
 0xdc3   : > { %v8866_v55 = vpop.f32.mrf.mxu0  ;;  %v6929_v45 = vsub.f32 %v17908_v59, %v17907_v43  ;;  %v9820_v14 = vpop.eup %9819  ;;  %9837 = vrcp.f32 %v7083_v49  ;;  %v17915_v59 = vld [vmem:[#allocation148_spill] sm:$0xff]  ;;  %v7298_v49 = vmul.f32 %v16206_v42, %v16181_v30 }
 0xdc4   : > { %v8867_v34 = vadd.f32 %v8866_v55, %v8865_v31  ;;  %v7341_v24 = vpack.c.bf16 %v7326_v47, %v7325_v22  ;;  %v7311_v26 = vadd.f32 %v7295_v0, %v7235_v44  ;;  %v16234_v5 = vpop.eup %9821  ;;  %v17909_v47 = vpack.c.bf16 %v15959_v16, %v15990_v27  ;;  %v17910_v55 = vld [vmem:[#allocation152_spill] sm:$0xff] }
 0xdc5   : > { %v8868_v1 = vpop.f32.mrf.mxu0  ;;  %v7133_v44 = vmul.f32 %v16188_v20, %v16171_v29  ;;  %v16242_v0 = vpop.eup %9823  ;;  %v17911_v50 = vsub.f32 %v17910_v55, %v17907_v43  ;;  %v7068_v17 = vadd.f32 %v16234_v5, %v7038_v12  ;;  %v17913_v20 = vld [vmem:[#allocation71_spill] sm:$0xff]  ;;  %9839 = vrcp.f32 %v7082_v9 }
 0xdc6   : > { %v7238_v57 = vadd.f32 %v8867_v34, %v7131_v8  ;;  %7405 = vrot.lane.b32.xlu0 %v7341_v24, %s10083_s27  ;;  %v7327_v31 = vmul.f32 %v9820_v14, %v7311_v26  ;;  %v6958_v8 = vmul.f32 1.442695, %v6929_v45  ;;  %v7069_v19 = vadd.f32 %v16242_v0, %v7041_v56  ;;  %v16256_v43 = vpop.eup %9825 }
 0xdc7   : > { %v8869_v39 = vpop.f32.mrf.mxu0  ;;  %v7006_v63 = vmul.f32 1.442695, %v17911_v50  ;;  %v17916_v45 = vsub.f32 %v17915_v59, %v17913_v20  ;;  %v17917_v56 = vpack.c.bf16 %v16025_v37, %v16023_v33  ;;  %v16268_v12 = vpop.eup %9827  ;;  %v7134_v14 = vmul.f32 %v9812_v10, %v16171_v29  ;;  %v17918_v37 = vld [vmem:[#allocation191_spill] sm:$0xff] }
 0xdc8   : > { %v7312_v13 = vadd.f32 %v7296_v32, %v7238_v57  ;;  %v8870_v35 = vadd.f32 %v8869_v39, %v8868_v1  ;;  %v17912_v1 = vld [vmem:[#allocation192_spill] sm:$0xff]  ;;  %v7297_v57 = vmul.f32 %v16201_v51, %v16181_v30  ;;  %9841 = vpow2.f32 %v6958_v8  ;;  %v17919_v10 = vld [vmem:[#allocation27_spill] sm:$0xff] }
 0xdc9   : > { %v8871_v40 = vpop.f32.mrf.mxu0  ;;  %v17914_v25 = vsub.f32 %v17912_v1, %v17913_v20  ;;  %v7004_v39 = vmul.f32 1.442695, %v17916_v45  ;;  %v7084_v51 = vadd.f32 %v16256_v43, %v7068_v17  ;;  %9843 = vpow2.f32 %v7006_v63  ;;  %v17920_v50 = vld [vmem:[#allocation207_spill] sm:$0xff] }
 0xdca   : > { %v7328_v22 = vmul.f32 %v9818_v7, %v7312_v13  ;;  %7361 = vrot.lane.b32.xlu0 %v17909_v47, %s10086_s21  ;;  %v7243_v34 = vadd.f32 %v8870_v35, %v7132_v38  ;;  %v7085_v42 = vadd.f32 %v16268_v12, %v7069_v19  ;;  %v7299_v33 = vmul.f32 %v9814_v53, %v16181_v30 }
 0xdcb   : > { %v8872_v24 = vpop.f32.mrf.mxu0  ;;  %v6956_v26 = vmul.f32 1.442695, %v17914_v25  ;;  %v7135_v8 = vmul.f32 %v16216_v6, %v16171_v29  ;;  %v17921_v63 = vsub.f32 %v17919_v10, %v17920_v50  ;;  %v17924_v53 = vpack.c.bf16 %v15979_v58, %v16011_v18  ;;  %v17925_v6 = vld [vmem:[#allocation193_spill] sm:$0xff]  ;;  %v17936_v10 = vld [vmem:[#allocation203_spill] sm:$0xff] }
 0xdcc   : > { %v8873_v2 = vadd.f32 %v8872_v24, %v8871_v40  ;;  %v16249_v16 = vpop.xlane.xlu1 %7046  ;;  %v7342_v27 = vpack.c.bf16 %v7328_v22, %v7327_v31  ;;  %v7313_v13 = vadd.f32 %v7297_v57, %v7243_v34  ;;  %v9830_v22 = vpop.eup %9829  ;;  %v17922_v34 = vld [vmem:[#allocation149_spill] sm:$0xff]  ;;  %v17926_v57 = vld [vmem:[#allocation158_spill] sm:$0xff]  ;;  %v7300_v45 = vmul.f32 %v16227_v11, %v16181_v30  ;;  %v17932_v11 = vld [vmem:[#allocation72_spill] sm:$0xff] }
 0xdcd   : > { %v8874_v32 = vpop.f32.mrf.mxu0  ;;  %9845 = vpow2.f32 %v6956_v26  ;;  %v9832_v55 = vpop.eup %9831  ;;  %v6962_v17 = vmul.f32 1.442695, %v17921_v63  ;;  %v17923_v24 = vsub.f32 %v17922_v34, %v17920_v50  ;;  %v17937_v34 = vld [vmem:[#allocation200_spill] sm:$0xff] }
 0xdce   : > { %v7246_v7 = vadd.f32 %v8873_v2, %v7133_v44  ;;  %7407 = vrot.lane.b32.xlu1 %v7342_v27, %s10083_s27  ;;  %7385 = vrot.lane.b32.xlu0 %v17917_v56, %s10084_s11  ;;  %v16271_v35 = vpop.xlane.xlu0 %7043  ;;  %9847 = vpow2.f32 %v7004_v39  ;;  %v7329_v27 = vmul.f32 %v9832_v55, %v7313_v13  ;;  %v7136_v56 = vmul.f32 %v16234_v5, %v16171_v29  ;;  %v17928_v13 = vld [vmem:[#allocation156_spill] sm:$0xff] }
 0xdcf   : > { %v8875_v9 = vpop.f32.mrf.mxu0  ;;  %v7010_v19 = vmul.f32 1.442695, %v17923_v24  ;;  %9849 = vrcp.f32 %v7084_v51  ;;  %v16296_v51 = vpop.eup %9833 }
 0xdd0   : > { %v7314_v38 = vadd.f32 %v7298_v49, %v7246_v7  ;;  %v8876_v40 = vadd.f32 %v8875_v9, %v8874_v32  ;;  %v4813_v31 = vpop.xlane.xlu1 %4812  ;;  %9851 = vrcp.f32 %v7085_v42  ;;  %v17927_v7 = vld [vmem:[#allocation202_spill] sm:$0xff]  ;;  %v6021_v61 = vmul.f32 %v16296_v51, %v15395_v46 }
 0xdd1   : > { %v4833_v47 = vadd.f32 %v17918_v37, %v4813_v31  ;;  %v8877_v44 = vpop.f32.mrf.mxu0  ;;  %v16306_v37 = vpop.eup %9835  ;;  %v17954_v46 = vld [vmem:[#allocation206_spill] sm:$0xff] }
 0xdd2   : > { %v7330_v2 = vmul.f32 %v9830_v22, %v7314_v38  ;;  %7363 = vrot.lane.b32.xlu1 %v17924_v53, %s10086_s21  ;;  %v7251_v1 = vadd.f32 %v8876_v40, %v7134_v14  ;;  %v4810_v25 = vpop.xlane.xlu0 %4809  ;;  %v17929_v14 = vld [vmem:[#allocation26_spill] sm:$0xff]  ;;  %v17931_v38 = vld [vmem:[#allocation159_spill] sm:$0xff]  ;;  %v17933_v22 = vpack.c.bf16 %v16031_v23, %v17932_v11  ;;  %v9838_v53 = vpop.eup %9837 }
 0xdd3   : > { %v4849_v20 = vadd.f32 %v17925_v6, %v4833_v47  ;;  %v8878_v26 = vpop.f32.mrf.mxu0  ;;  %v4832_v32 = vadd.f32 %v17926_v57, %v4810_v25  ;;  %v17930_v9 = vsub.f32 %v17928_v13, %v17929_v14  ;;  %v17934_v47 = vld [vmem:[#allocation157_spill] sm:$0xff]  ;;  %v9840_v6 = vpop.eup %9839  ;;  %v7301_v57 = vmul.f32 %v16256_v43, %v16181_v30 }
 0xdd4   : > { %v8879_v59 = vadd.f32 %v8878_v26, %v8877_v44  ;;  %v4819_v39 = vpop.xlane.xlu1 %4818  ;;  %v7343_v18 = vpack.c.bf16 %v7330_v2, %v7329_v27  ;;  %v17935_v5 = vsub.f32 %v17934_v47, %v17929_v14  ;;  %v7315_v55 = vadd.f32 %v7299_v33, %v7251_v1  ;;  %v17938_v1 = vld [vmem:[#allocation201_spill] sm:$0xff] }
 0xdd5   : > { %9853 = vrcp.f32 %v4849_v20  ;;  %v4835_v49 = vadd.f32 %v17927_v7, %v4819_v39  ;;  %v8880_v58 = vpop.f32.mrf.mxu0  ;;  %v6960_v42 = vmul.f32 1.442695, %v17930_v9  ;;  %v4848_v40 = vadd.f32 %v17931_v38, %v4832_v32  ;;  %v16323_v39 = vpop.eup %9841  ;;  %v17939_v7 = vld [vmem:[#allocation242_spill] sm:$0xff]  ;;  %v17940_v14 = vld [vmem:[#allocation249_spill] sm:$0xff] }
 0xdd6   : > { %9855 = vpow2.f32 %v6962_v17  ;;  %v7254_v31 = vadd.f32 %v8879_v59, %v7135_v8  ;;  %7387 = vrot.lane.b32.xlu1 %v17933_v22, %s10084_s11  ;;  %v7008_v44 = vmul.f32 1.442695, %v17935_v5  ;;  %v4816_v63 = vpop.xlane.xlu0 %4815  ;;  %7409 = vrot.lane.b32.xlu0 %v7343_v18, %s10083_s27  ;;  %v7331_v26 = vmul.f32 %v9840_v6, %v7315_v55  ;;  %v16328_v43 = vpop.eup %9843  ;;  %v17943_v5 = vld [vmem:[#allocation247_spill] sm:$0xff] }
 0xdd7   : > { %9857 = vpow2.f32 %v7010_v19  ;;  %v4851_v50 = vadd.f32 %v17936_v10, %v4835_v49  ;;  %v8881_v17 = vpop.f32.mrf.mxu0  ;;  %v4834_v24 = vadd.f32 %v17937_v34, %v4816_v63  ;;  %v7302_v13 = vmul.f32 %v16268_v12, %v16181_v30  ;;  %v17944_v34 = vld [vmem:[#allocation248_spill] sm:$0xff] }
 0xdd8   : > { %9859 = vrcp.f32 %v4848_v40  ;;  %v7316_v8 = vadd.f32 %v7300_v45, %v7254_v31  ;;  %v8882_v23 = vadd.f32 %v8881_v17, %v8880_v58  ;;  %v5933_v2 = vpop.xlane.xlu1 %5932  ;;  %v7137_v58 = vmul.f32 %v16242_v0, %v16171_v29  ;;  %v17942_v0 = vld [vmem:[#allocation250_spill] sm:$0xff] }
 0xdd9   : > { %9861 = vrcp.f32 %v4851_v50  ;;  %v5953_v19 = vadd.f32 %v16296_v51, %v5933_v2  ;;  %v8883_v27 = vpop.f32.mrf.mxu0  ;;  %v4850_v20 = vadd.f32 %v17938_v1, %v4834_v24  ;;  %v17945_v2 = vld [vmem:[#allocation245_spill] sm:$0xff]  ;;  %v17949_v1 = vld [vmem:[#allocation87_spill] sm:$0xff] }
 0xdda   : > { %9863 = vpow2.f32 %v6960_v42  ;;  %v7332_v33 = vmul.f32 %v9838_v53, %v7316_v8  ;;  %v7259_v25 = vadd.f32 %v8882_v23, %v7136_v56  ;;  %v5930_v59 = vpop.xlane.xlu0 %5929  ;;  %7365 = vrot.lane.b32.xlu0 %v5105_v36, %s10086_s21  ;;  %v16333_v48 = vpop.eup %9845  ;;  %v17941_v42 = vld [vmem:[#allocation243_spill] sm:$0xff]  ;;  %v8801_v60 = vadd.f32 %v17946_v21, %v17945_v2 }
 0xddb   : > { %9865 = vpow2.f32 %v7008_v44  ;;  %v5969_v32 = vadd.f32 %v16306_v37, %v5953_v19  ;;  %v8884_v45 = vpop.f32.mrf.mxu0  ;;  %v5952_v49 = vadd.f32 %v17939_v7, %v5930_v59  ;;  %v16336_v31 = vpop.eup %9847  ;;  %v17947_v19 = vld [vmem:[#allocation21_spill] sm:$0xff] }
 0xddc   : > { %9867 = vrcp.f32 %v4850_v20  ;;  %v8885_v18 = vadd.f32 %v8884_v45, %v8883_v27  ;;  %v5939_v56 = vpop.xlane.xlu1 %5938  ;;  %v7344_v52 = vpack.c.bf16 %v7332_v33, %v7331_v26  ;;  %v7317_v36 = vadd.f32 %v7301_v57, %v7259_v25  ;;  %v9850_v12 = vpop.eup %9849  ;;  %v17948_v33 = vld [vmem:[#allocation143_spill] sm:$0xff] }
 0xddd   : > { %v5955_v9 = vadd.f32 %v17940_v14, %v5939_v56  ;;  %9869 = vrcp.f32 %v5969_v32  ;;  %v5968_v38 = vadd.f32 %v17941_v42, %v5952_v49  ;;  %v9852_v10 = vpop.eup %9851  ;;  %v6927_v20 = vsub.f32 %v17949_v1, %v17948_v33  ;;  %v17951_v49 = vld [vmem:[#allocation194_spill] sm:$0xff] }
 0xdde   : > { %v7262_v40 = vadd.f32 %v8885_v18, %v7137_v58  ;;  %v5936_v22 = vpop.xlane.xlu0 %5935  ;;  %7411 = vrot.lane.b32.xlu1 %v7344_v52, %s10083_s27  ;;  %7389 = vrot.lane.b32.xlu0 %v6225_v54, %s10084_s11  ;;  %v7333_v17 = vmul.f32 %v9850_v12, %v7317_v36  ;;  %v17952_v56 = vld [vmem:[#allocation146_spill] sm:$0xff]  ;;  %v6158_v42 = vadd.f32 %v8801_v60, %v6021_v61  ;;  %v17955_v12 = vld [vmem:[#allocation107_spill] sm:$0xff]  ;;  %v17964_v61 = vld [vmem:[#allocation252_spill] sm:$0xff] }
 0xddf   : > { %v5971_v11 = vadd.f32 %v17942_v0, %v5955_v9  ;;  %9871 = vrcp.f32 %v5968_v38  ;;  %v5954_v44 = vadd.f32 %v17943_v5, %v5936_v22  ;;  %v6954_v38 = vmul.f32 1.442695, %v6927_v20  ;;  %v17962_v20 = vld [vmem:[#allocation244_spill] sm:$0xff] }
 0xde0   : > { %v7318_v47 = vadd.f32 %v7302_v13, %v7262_v40  ;;  %v7053_v55 = vpop.xlane.xlu1 %7052  ;;  %v17953_v13 = vld [vmem:[#allocation88_spill] sm:$0xff]  ;;  %v6186_v5 = vmul.f32 %v16306_v37, %v15400_v3  ;;  %v17959_v3 = vld [vmem:[#allocation105_spill] sm:$0xff] }
 0xde1   : > { %9873 = vrcp.f32 %v5971_v11  ;;  %v7073_v50 = vadd.f32 %v16323_v39, %v7053_v55  ;;  %v5970_v24 = vadd.f32 %v17944_v34, %v5954_v44  ;;  %v6926_v14 = vsub.f32 %v17953_v13, %v17952_v56 }
 0xde2   : > { %v9854_v63 = vpop.eup %9853  ;;  %v7334_v8 = vmul.f32 %v9852_v10, %v7318_v47  ;;  %v7050_v53 = vpop.xlane.xlu0 %7049  ;;  %7367 = vrot.lane.b32.xlu1 %v5106_v15, %s10086_s21  ;;  %v6975_v15 = vsub.f32 %v17950_v41, %v17948_v33  ;;  %v17961_v33 = vld [vmem:[#allocation108_spill] sm:$0xff] }
 0xde3   : > { %v16347_v23 = vpop.eup %9855  ;;  %v16352_v54 = vadd.f32 %v16328_v43, %v7073_v50  ;;  %v5098_v27 = vmul.f32 %v9854_v63, %v17947_v19  ;;  %9875 = vrcp.f32 %v5970_v24  ;;  %v7072_v25 = vadd.f32 %v16333_v48, %v7050_v53  ;;  %v17957_v50 = vld [vmem:[#allocation61_spill] sm:$0xff]  ;;  %v17960_v53 = vld [vmem:[#allocation116_spill] sm:$0xff] }
 0xde4   : > { %v16359_v6 = vpop.eup %9857  ;;  %v7059_v26 = vpop.xlane.xlu1 %7058  ;;  %v7345_v57 = vpack.c.bf16 %v7334_v8, %v7333_v17  ;;  %v7002_v44 = vmul.f32 1.442695, %v6975_v15  ;;  %v6952_v10 = vmul.f32 1.442695, %v6926_v14  ;;  %v6974_v63 = vsub.f32 %v17957_v50, %v17952_v56  ;;  %v17958_v17 = vld [vmem:[#allocation112_spill] sm:$0xff]  ;;  %v17965_v15 = vld [vmem:[#allocation115_spill] sm:$0xff] }
 0xde5   : > { %v9860_v32 = vpop.eup %9859  ;;  %v7075_v59 = vadd.f32 %v16347_v23, %v7059_v26  ;;  %v16370_v7 = vadd.f32 %v16336_v31, %v7072_v25  ;;  %v6202_v24 = vadd.f32 %v6186_v5, %v6158_v42  ;;  %9877 = vpow2.f32 %v6954_v38  ;;  %v17966_v14 = vld [vmem:[#allocation122_spill] sm:$0xff]  ;;  %v17968_v38 = vld [vmem:[#allocation251_spill] sm:$0xff] }
 0xde6   : > { %v9862_v45 = vpop.eup %9861  ;;  %7413 = vrot.lane.b32.xlu0 %v7345_v57, %s10083_s27  ;;  %v5097_v58 = vmul.f32 %v9860_v32, %v17951_v49  ;;  %v7056_v52 = vpop.xlane.xlu0 %7055  ;;  %7391 = vrot.lane.b32.xlu1 %v6226_v28, %s10084_s11  ;;  %v7000_v57 = vmul.f32 1.442695, %v6974_v63  ;;  %v17963_v32 = vld [vmem:[#allocation118_spill] sm:$0xff]  ;;  %v17973_v63 = vld [vmem:[#allocation39_spill] sm:$0xff] }
 0xde7   : > { %v16374_v18 = vpop.eup %9863  ;;  %v16379_v9 = vadd.f32 %v16359_v6, %v7075_v59  ;;  %v16386_v51 = vmul.f32 %v9862_v45, %v17954_v46  ;;  %v17967_v46 = vld [vmem:[#allocation117_spill] sm:$0xff] }
 0xde8   : > { %v16388_v36 = vpop.eup %9865  ;;  %v7074_v40 = vadd.f32 %v16374_v18, %v7056_v52  ;;  %v3612_v0 = vpop.xlane.xlu1 %3611  ;;  %v5107_v11 = vpack.c.bf16 %v5098_v27, %v5097_v58 }
 0xde9   : > { %v9868_v22 = vpop.eup %9867  ;;  %v3654_v47 = vadd.f32 %v17955_v12, %v3612_v0  ;;  %v17969_v0 = vld [vmem:[#allocation124_spill] sm:$0xff]  ;;  %v17970_v12 = vld [vmem:[#allocation119_spill] sm:$0xff] }
 0xdea   : > { %v16395_v4 = vadd.f32 %v16388_v36, %v7074_v40  ;;  %7369 = vrot.lane.b32.xlu0 %v5107_v11, %s10086_s21  ;;  %v16399_v28 = vmul.f32 %v9868_v22, %v17956_v62  ;;  %v9870_v55 = vpop.eup %9869  ;;  %v17971_v62 = vld [vmem:[#allocation32_spill] sm:$0xff] }
 0xdeb   : > { %v3670_v8 = vadd.f32 %v17958_v17, %v3654_v47  ;;  %v3609_v34 = vpop.xlane.xlu0 %3608  ;;  %v6218_v26 = vmul.f32 %v9870_v55, %v6202_v24 }
 0xdec   : > { %v3653_v37 = vadd.f32 %v17959_v3, %v3609_v34  ;;  %v3618_v2 = vpop.xlane.xlu1 %3617  ;;  %v5108_v21 = vpack.c.bf16 %v16386_v51, %v16399_v28  ;;  %v9872_v60 = vpop.eup %9871  ;;  %v17974_v34 = vld [vmem:[#allocation125_spill] sm:$0xff]  ;;  %v7307_v28 = vmul.f32 %v16388_v36, %v16181_v30 }
 0xded   : > { %9879 = vrcp.f32 %v3670_v8  ;;  %v3656_v19 = vadd.f32 %v17960_v53, %v3618_v2  ;;  %v6217_v25 = vmul.f32 %v9872_v60, %v17962_v20  ;;  %v17975_v2 = vld [vmem:[#allocation48_spill] sm:$0xff]  ;;  %v17977_v20 = vld [vmem:[#allocation86_spill] sm:$0xff] }
 0xdee   : > { %v9874_v27 = vpop.eup %9873  ;;  %9881 = vpow2.f32 %v7002_v44  ;;  %v3669_v1 = vadd.f32 %v17961_v33, %v3653_v37 }
 0xdef   : > { %9883 = vpow2.f32 %v6952_v10  ;;  %v3672_v59 = vadd.f32 %v17963_v32, %v3656_v19  ;;  %v3615_v45 = vpop.xlane.xlu0 %3614  ;;  %v16412_v41 = vmul.f32 %v9874_v27, %v17964_v61  ;;  %v6227_v56 = vpack.c.bf16 %v6218_v26, %v6217_v25  ;;  %v17972_v10 = vld [vmem:[#allocation123_spill] sm:$0xff]  ;;  %v17976_v19 = vld [vmem:[#allocation126_spill] sm:$0xff] }
 0xdf0   : > { %9885 = vrcp.f32 %v3669_v1  ;;  %v3655_v49 = vadd.f32 %v17965_v15, %v3615_v45  ;;  %v3624_v58 = vpop.xlane.xlu1 %3623  ;;  %v9876_v13 = vpop.eup %9875  ;;  %v17979_v45 = vld [vmem:[#allocation44_spill] sm:$0xff] }
 0xdf1   : > { %9887 = vrcp.f32 %v3672_v59  ;;  %v3658_v52 = vadd.f32 %v17966_v14, %v3624_v58  ;;  %7393 = vrot.lane.b32.xlu0 %v6227_v56, %s10084_s11  ;;  %v16419_v40 = vmul.f32 %v9876_v13, %v17968_v38  ;;  %v17980_v58 = vld [vmem:[#allocation92_spill] sm:$0xff] }
 0xdf2   : > { %v3671_v42 = vadd.f32 %v17967_v46, %v3655_v49  ;;  %9889 = vpow2.f32 %v7000_v57  ;;  %v16429_v37 = vpop.eup %9877  ;;  %v17978_v57 = vld [vmem:[#allocation114_spill] sm:$0xff]  ;;  %v17982_v46 = vld [vmem:[#allocation113_spill] sm:$0xff] }
 0xdf3   : > { %v3674_v11 = vadd.f32 %v17969_v0, %v3658_v52  ;;  %v3621_v22 = vpop.xlane.xlu0 %3620  ;;  %v6228_v44 = vpack.c.bf16 %v16412_v41, %v16419_v40  ;;  %v7071_v1 = vadd.f32 %v16429_v37, %v16249_v16  ;;  %v17981_v52 = vld [vmem:[#allocation52_spill] sm:$0xff] }
 0xdf4   : > { %9891 = vrcp.f32 %v3671_v42  ;;  %v3657_v47 = vadd.f32 %v17970_v12, %v3621_v22  ;;  %v3630_v5 = vpop.xlane.xlu1 %3629  ;;  %v17983_v0 = vld [vmem:[#allocation96_spill] sm:$0xff] }
 0xdf5   : > { %9893 = vrcp.f32 %v3674_v11  ;;  %v3660_v55 = vadd.f32 %v17971_v62, %v3630_v5  ;;  %v17984_v12 = vld [vmem:[#allocation120_spill] sm:$0xff]  ;;  %v17985_v62 = vld [vmem:[#allocation69_spill] sm:$0xff] }
 0xdf6   : > { %v3673_v50 = vadd.f32 %v17972_v10, %v3657_v47 }
 0xdf7   : > { %v3676_v17 = vadd.f32 %v17973_v63, %v3660_v55  ;;  %v3627_v8 = vpop.xlane.xlu0 %3626 }
 0xdf8   : > { %9895 = vrcp.f32 %v3673_v50  ;;  %v3659_v24 = vadd.f32 %v17974_v34, %v3627_v8  ;;  %v3636_v3 = vpop.xlane.xlu1 %3635  ;;  %v17986_v50 = vld [vmem:[#allocation111_spill] sm:$0xff] }
 0xdf9   : > { %9897 = vrcp.f32 %v3676_v17  ;;  %v3662_v60 = vadd.f32 %v17975_v2, %v3636_v3  ;;  %v17987_v17 = vld [vmem:[#allocation104_spill] sm:$0xff]  ;;  %v17988_v3 = vld [vmem:[#allocation78_spill] sm:$0xff] }
 0xdfa   : > { %v9880_v53 = vpop.eup %9879  ;;  %v3675_v27 = vadd.f32 %v17976_v19, %v3659_v24  ;;  %v17990_v19 = vld [vmem:[#allocation106_spill] sm:$0xff] }
 0xdfb   : > { %v16433_v33 = vpop.eup %9881  ;;  %v3678_v25 = vadd.f32 %v17977_v20, %v3662_v60  ;;  %v3633_v26 = vpop.xlane.xlu0 %3632  ;;  %v16439_v32 = vmul.f32 %v9880_v53, %v17978_v57  ;;  %v17989_v60 = vld [vmem:[#allocation121_spill] sm:$0xff]  ;;  %v17991_v20 = vld [vmem:[#allocation128_spill] sm:$0xff] }
 0xdfc   : > { %v9884_v59 = vpop.eup %9883  ;;  %9899 = vrcp.f32 %v3675_v27  ;;  %v3661_v61 = vadd.f32 %v17979_v45, %v3633_v26  ;;  %v3642_v15 = vpop.xlane.xlu1 %3641  ;;  %v7087_v38 = vadd.f32 %v16433_v33, %v7071_v1  ;;  %v17992_v26 = vld [vmem:[#allocation97_spill] sm:$0xff] }
 0xdfd   : > { %v9886_v49 = vpop.eup %9885  ;;  %9901 = vrcp.f32 %v3678_v25  ;;  %v3664_v56 = vadd.f32 %v17980_v58, %v3642_v15  ;;  %v7070_v14 = vadd.f32 %v9884_v59, %v16271_v35 }
 0xdfe   : > { %v9888_v13 = vpop.eup %9887  ;;  %v3677_v16 = vadd.f32 %v17981_v52, %v3661_v61  ;;  %v16446_v42 = vmul.f32 %v9886_v49, %v17982_v46  ;;  %v17993_v49 = vld [vmem:[#allocation101_spill] sm:$0xff] }
 0xdff   : > { %v3680_v11 = vadd.f32 %v17983_v0, %v3664_v56  ;;  %v3639_v22 = vpop.xlane.xlu0 %3638  ;;  %v16451_v47 = vmul.f32 %v9888_v13, %v17984_v12  ;;  %v9890_v5 = vpop.eup %9889  ;;  %v17994_v56 = vld [vmem:[#allocation127_spill] sm:$0xff] }
 0xe00   : > { %9903 = vrcp.f32 %v3677_v16  ;;  %v3663_v55 = vadd.f32 %v17985_v62, %v3639_v22  ;;  %v3648_v10 = vpop.xlane.xlu1 %3647  ;;  %v3981_v35 = vpack.c.bf16 %v16446_v42, %v17986_v50  ;;  %v7086_v24 = vadd.f32 %v9890_v5, %v7070_v14  ;;  %v17995_v16 = vld [vmem:[#allocation130_spill] sm:$0xff] }
 0xe01   : > { %v9892_v63 = vpop.eup %9891  ;;  %9905 = vrcp.f32 %v3680_v11  ;;  %v3666_v8 = vadd.f32 %v17987_v17, %v3648_v10 }
 0xe02   : > { %v9894_v34 = vpop.eup %9893  ;;  %v3679_v2 = vadd.f32 %v17988_v3, %v3663_v55  ;;  %v16459_v53 = vmul.f32 %v9892_v63, %v17989_v60  ;;  %9907 = vrcp.f32 %v7087_v38  ;;  %v17996_v38 = vld [vmem:[#allocation103_spill] sm:$0xff]  ;;  %v7138_v63 = vmul.f32 %v9884_v59, %v16171_v29  ;;  %v17999_v3 = vld [vmem:[#allocation40_spill] sm:$0xff] }
 0xe03   : > { %v3682_v27 = vadd.f32 %v17990_v19, %v3666_v8  ;;  %v3645_v1 = vpop.xlane.xlu0 %3644  ;;  %v16463_v25 = vmul.f32 %v9894_v34, %v17991_v20  ;;  %v17997_v55 = vld [vmem:[#allocation99_spill] sm:$0xff]  ;;  %v17998_v8 = vld [vmem:[#allocation129_spill] sm:$0xff]  ;;  %v7303_v59 = vmul.f32 %v9890_v5, %v16181_v30 }
 0xe04   : > { %9909 = vrcp.f32 %v3679_v2  ;;  %v3665_v57 = vadd.f32 %v17992_v26, %v3645_v1  ;;  %v3982_v45 = vpack.c.bf16 %v16459_v53, %v16439_v32  ;;  %v7139_v26 = vmul.f32 %v16429_v37, %v16171_v29  ;;  %v7358_v36 = vpop.permute.xlu1 %7357 }
 0xe05   : > { %v9896_v61 = vpop.eup %9895  ;;  %9911 = vrcp.f32 %v3682_v27 }
 0xe06   : > { %v9898_v15 = vpop.eup %9897  ;;  %9913 = vrcp.f32 %v7086_v24  ;;  %v3681_v58 = vadd.f32 %v17993_v49, %v3665_v57  ;;  %v16470_v13 = vmul.f32 %v9896_v61, %v17994_v56  ;;  %v18000_v61 = vld [vmem:[#allocation33_spill] sm:$0xff] }
 0xe07   : > { %v3651_v14 = vpop.xlane.xlu0 %3650  ;;  %v8886_v52 = vpop.f32.mrf.mxu0  ;;  %v16473_v46 = vmul.f32 %v9898_v15, %v17995_v16  ;;  %v7304_v15 = vmul.f32 %v16433_v33, %v16181_v30  ;;  %v18001_v49 = vld [vmem:[#allocation45_spill] sm:$0xff]  ;;  %v7140_v33 = vmul.f32 %v16333_v48, %v16171_v29  ;;  %v7141_v48 = vmul.f32 %v16323_v39, %v16171_v29 }
 0xe08   : > { %9915 = vrcp.f32 %v3681_v58  ;;  %v3667_v0 = vadd.f32 %v17996_v38, %v3651_v14  ;;  %v3983_v11 = vpack.c.bf16 %v16470_v13, %v16451_v47 }
 0xe09   : > { %v9900_v22 = vpop.eup %9899  ;;  %v8887_v12 = vpop.f32.mrf.mxu0  ;;  %9917 = vrcp.f32 %v16370_v7 }
 0xe0a   : > { %v9902_v62 = vpop.eup %9901  ;;  %v3683_v10 = vadd.f32 %v17997_v55, %v3667_v0  ;;  %v8888_v17 = vadd.f32 %v8887_v12, %v8886_v52  ;;  %v16481_v34 = vmul.f32 %v9900_v22, %v17998_v8  ;;  %v18002_v22 = vld [vmem:[#allocation63_spill] sm:$0xff] }
 0xe0b   : > { %v8889_v24 = vpop.f32.mrf.mxu0  ;;  %v16485_v2 = vmul.f32 %v9902_v62, %v17999_v3 }
 0xe0c   : > { %9919 = vrcp.f32 %v3683_v10  ;;  %v7267_v60 = vadd.f32 %v8888_v17, %v7138_v63  ;;  %v3984_v19 = vpack.c.bf16 %v16481_v34, %v16463_v25  ;;  %v18003_v10 = vld [vmem:[#allocation131_spill] sm:$0xff] }
 0xe0d   : > { %v9904_v27 = vpop.eup %9903  ;;  %v8890_v1 = vpop.f32.mrf.mxu0  ;;  %9921 = vrcp.f32 %v16352_v54 }
 0xe0e   : > { %v9906_v20 = vpop.eup %9905  ;;  %v8891_v57 = vadd.f32 %v8890_v1, %v8889_v24  ;;  %v16493_v7 = vmul.f32 %v9904_v27, %v18000_v61  ;;  %v7319_v14 = vadd.f32 %v7303_v59, %v7267_v60  ;;  %v7305_v1 = vmul.f32 %v16336_v31, %v16181_v30  ;;  %v18004_v59 = vld [vmem:[#allocation60_spill] sm:$0xff] }
 0xe0f   : > { %v16498_v58 = vmul.f32 %v9906_v20, %v18001_v49  ;;  %v9908_v56 = vpop.eup %9907  ;;  %9923 = vrcp.f32 %v16395_v4 }
 0xe10   : > { %v7270_v52 = vadd.f32 %v8891_v57, %v7139_v26  ;;  %v3985_v5 = vpack.c.bf16 %v16493_v7, %v16473_v46  ;;  %9925 = vrcp.f32 %v16379_v9 }
 0xe11   : > { %v9910_v16 = vpop.eup %9909 }
 0xe12   : > { %v8892_v37 = vpop.f32.mrf.mxu0  ;;  %v9912_v38 = vpop.eup %9911  ;;  %v7320_v0 = vadd.f32 %v7304_v15, %v7270_v52  ;;  %v16504_v12 = vmul.f32 %v9910_v16, %v18002_v22  ;;  %v7306_v16 = vmul.f32 %v16328_v43, %v16181_v30  ;;  %v7142_v43 = vmul.f32 %v16374_v18, %v16171_v29 }
 0xe13   : > { %v9914_v62 = vpop.eup %9913  ;;  %v16509_v63 = vmul.f32 %v9912_v38, %v18003_v10  ;;  %v7308_v18 = vmul.f32 %v16359_v6, %v16181_v30 }
 0xe14   : > { %v8893_v55 = vpop.f32.mrf.mxu0  ;;  %v7335_v54 = vmul.f32 %v9914_v62, %v7319_v14  ;;  %v7336_v17 = vmul.f32 %v9908_v56, %v7320_v0  ;;  %v3986_v24 = vpack.c.bf16 %v16504_v12, %v16485_v2 }
 0xe15   : > { %v8894_v8 = vadd.f32 %v8893_v55, %v8892_v37  ;;  %v9916_v3 = vpop.eup %9915  ;;  %v18005_v37 = vld [vmem:[#allocation34_spill] sm:$0xff] }
 0xe16   : > { %v8895_v60 = vpop.f32.mrf.mxu0  ;;  %v7346_v20 = vpack.c.bf16 %v7336_v17, %v7335_v54  ;;  %v16516_v26 = vmul.f32 %v9916_v3, %v18004_v59  ;;  %v9918_v61 = vpop.eup %9917  ;;  %v7143_v17 = vmul.f32 %v16347_v23, %v16171_v29  ;;  %v7423_v29 = vsel %vm2990_vm1, %v3981_v35, %v7358_v36 }
 0xe17   : > { %v7275_v27 = vadd.f32 %v8894_v8, %v7140_v33  ;;  %v7382_v59 = vpop.permute.xlu1 %7381 }
 0xe18   : > { %v8896_v57 = vpop.f32.mrf.mxu0  ;;  %7415 = vrot.lane.b32.xlu1 %v7346_v20, %s10083_s27  ;;  %v3987_v56 = vpack.c.bf16 %v16516_v26, %v16498_v58  ;;  %v7360_v20 = vpop.permute.xlu0 %7359  ;;  %v7447_v23 = vsel %vm7445_vm4, %v7423_v29, %v7382_v59 }
 0xe19   : > { %v7321_v15 = vadd.f32 %v7305_v1, %v7275_v27  ;;  %v8897_v49 = vadd.f32 %v8896_v57, %v8895_v60  ;;  %v9920_v14 = vpop.eup %9919  ;;  %v7426_v57 = vsel %vm2990_vm1, %v3982_v45, %v7360_v20 }
 0xe1a   : > { %v16527_v38 = vmul.f32 %v9920_v14, %v18005_v37  ;;  %v9922_v0 = vpop.eup %9921 }
 0xe1b   : > { %v7337_v31 = vmul.f32 %v9918_v61, %v7321_v15  ;;  %v7278_v52 = vadd.f32 %v8897_v49, %v7141_v48  ;;  %v7384_v6 = vpop.permute.xlu1 %7383 }
 0xe1c   : > { %7371 = vrot.lane.b32.xlu1 %v5108_v21, %s10086_s21  ;;  %v3988_v4 = vpack.c.bf16 %v16527_v38, %v16509_v63  ;;  %v9924_v41 = vpop.eup %9923  ;;  %v7449_v15 = vsel %vm7445_vm4, %v7426_v57, %v7384_v6 }
 0xe1d   : > { %v7322_v39 = vadd.f32 %v7306_v16, %v7278_v52  ;;  %v9926_v60 = vpop.eup %9925 }
 0xe1e   : > { %v8898_v22 = vpop.f32.mrf.mxu0 }
 0xe1f   : > { %v7338_v62 = vmul.f32 %v9922_v0, %v7322_v39 }
 0xe20   : > { %v8899_v33 = vpop.f32.mrf.mxu0  ;;  %7395 = vrot.lane.b32.xlu1 %v6228_v44, %s10084_s11 }
 0xe21   : > { %v8900_v9 = vadd.f32 %v8899_v33, %v8898_v22  ;;  %v7347_v55 = vpack.c.bf16 %v7338_v62, %v7337_v31 }
 0xe22   : > { %v8901_v10 = vpop.f32.mrf.mxu0 }
 0xe23   : > { %v7283_v51 = vadd.f32 %v8900_v9, %v7142_v43  ;;  %7417 = vrot.lane.b32.xlu0 %v7347_v55, %s10083_s27 }
 0xe24   : > { %v8902_v21 = vpop.f32.mrf.mxu0 }
 0xe25   : > { %v7323_v54 = vadd.f32 %v7307_v28, %v7283_v51  ;;  %v8903_v8 = vadd.f32 %v8902_v21, %v8901_v10  ;;  %v8302_v21 = vld [vmem:[%s16681_s7] ss:$0 sm:$0xff] }
 0xe27   : > { %v7339_v40 = vmul.f32 %v9924_v41, %v7323_v54  ;;  %v7286_v44 = vadd.f32 %v8903_v8, %v7143_v17 }
 0xe29   : > { %v7324_v3 = vadd.f32 %v7308_v18, %v7286_v44 }
 0xe2b   : > { %v7340_v27 = vmul.f32 %v9926_v60, %v7324_v3 }
 0xe2d   : > { %v7348_v1 = vpack.c.bf16 %v7340_v27, %v7339_v40 }
 0xe2f   : > { %7419 = vrot.lane.b32.xlu1 %v7348_v1, %s10083_s27  ;;  %s9991_s27 = scalar_lea.vmem %s9990_s24, 2048 }
 0xe30   : > { %p9993_p5 = scmp.lt.s32.totalorder %s9991_s27, %s9985_s19 }
 0xe32   : > { %p9994_p6 = por %p9993_p5, %p9992_p4 }
 0xe34   : > { %p9995_p7 = pnand %p9994_p6, %p9988_p2 }
 0xe38   : > { %v7406_v48 = vpop.permute.xlu0 %7405 }
 0xe39   : > { %v7464_v30 = vsel %vm7462_vm5, %v7447_v23, %v7406_v48 }
 0xe3a   : > { %8984 = vmatprep.mubr.bf16.mxu1 %v7464_v30 }
 0xe3c   : > { %v7362_v61 = vpop.permute.xlu0 %7361 }
 0xe3d   : > { %v7429_v14 = vsel %vm2990_vm1, %v3983_v11, %v7362_v61 }
 0xe40   : > { %v7408_v49 = vpop.permute.xlu1 %7407  ;;  %v7386_v50 = vpop.permute.xlu0 %7385 }
 0xe41   : > { %v7467_v42 = vsel %vm7462_vm5, %v7449_v15, %v7408_v49  ;;  %v7451_v31 = vsel %vm7445_vm4, %v7429_v14, %v7386_v50 }
 0xe42   : > { %8985 = vmatmul.mubr.bf16.vlgmr.msra.gmra.mxu1 %v7467_v42 }
 0xe44   : > { %v7364_v35 = vpop.permute.xlu1 %7363 }
 0xe45   : > { %v7432_v16 = vsel %vm2990_vm1, %v3984_v19, %v7364_v35 }
 0xe48   : > { %v7410_v52 = vpop.permute.xlu0 %7409  ;;  %v7388_v53 = vpop.permute.xlu1 %7387 }
 0xe49   : > { %v7470_v32 = vsel %vm7462_vm5, %v7451_v31, %v7410_v52  ;;  %v7453_v37 = vsel %vm7445_vm4, %v7432_v16, %v7388_v53 }
 0xe4a   : > { %8988 = vmatprep.mubr.bf16.mxu1 %v7470_v32 }
 0xe4c   : > { %v7366_v45 = vpop.permute.xlu0 %7365 }
 0xe4d   : > { %v7435_v11 = vsel %vm2990_vm1, %v3985_v5, %v7366_v45 }
 0xe50   : > { %v7412_v39 = vpop.permute.xlu1 %7411  ;;  %v7390_v13 = vpop.permute.xlu0 %7389 }
 0xe51   : > { %v7473_v47 = vsel %vm7462_vm5, %v7453_v37, %v7412_v39  ;;  %v7455_v0 = vsel %vm7445_vm4, %v7435_v11, %v7390_v13 }
 0xe52   : > { %8989 = vmatmul.mubr.bf16.gmra.mxu1 %v7473_v47 }
 0xe54   : > { %v7368_v25 = vpop.permute.xlu1 %7367 }
 0xe55   : > { %v7438_v19 = vsel %vm2990_vm1, %v3986_v24, %v7368_v25 }
 0xe58   : > { %v7414_v22 = vpop.permute.xlu0 %7413  ;;  %v7392_v34 = vpop.permute.xlu1 %7391 }
 0xe59   : > { %v7476_v62 = vsel %vm7462_vm5, %v7455_v0, %v7414_v22  ;;  %v7457_v33 = vsel %vm7445_vm4, %v7438_v19, %v7392_v34 }
 0xe5a   : > { %8992 = vmatprep.mubr.bf16.mxu1 %v7476_v62 }
 0xe5c   : > { %v7370_v7 = vpop.permute.xlu0 %7369 }
 0xe5d   : > { %v7441_v9 = vsel %vm2990_vm1, %v3987_v56, %v7370_v7 }
 0xe63   : > { %v7394_v5 = vpop.permute.xlu0 %7393 }
 0xe64   : > { %v7459_v55 = vsel %vm7445_vm4, %v7441_v9, %v7394_v5 }
 0xe8a   : > { %v7416_v43 = vpop.permute.xlu1 %7415 }
 0xe8b   : > { %v7479_v46 = vsel %vm7462_vm5, %v7457_v33, %v7416_v43 }
 0xe8c   : > { %8993 = vmatmul.mubr.bf16.gmra.mxu1 %v7479_v46 }
 0xe8e   : > { %v7372_v12 = vpop.permute.xlu1 %7371 }
 0xe8f   : > { %v7444_v51 = vsel %vm2990_vm1, %v3988_v4, %v7372_v12 }
 0xe92   : > { %v7396_v24 = vpop.permute.xlu1 %7395 }
 0xe93   : > { %v7461_v28 = vsel %vm7445_vm4, %v7444_v51, %v7396_v24 }
 0xe95   : > { %v7418_v10 = vpop.permute.xlu0 %7417 }
 0xe96   : > { %v7482_v2 = vsel %vm7462_vm5, %v7459_v55, %v7418_v10 }
 0xe97   : > { %8996 = vmatprep.mubr.bf16.mxu1 %v7482_v2 }
 0xea1   : > { %v7420_v58 = vpop.permute.xlu1 %7419 }
 0xea2   : > { %v7485_v26 = vsel %vm7462_vm5, %v7461_v28, %v7420_v58 }
 0xea3   : > { %8997 = vmatmul.mubr.bf16.gmra.mxu1 %v7485_v26 }
 0xf02   : > { %v8986_v56 = vpop.f32.mrf.mxu1 }
 0xf03   : > { %v7601_v8 = vadd.f32 %v8986_v56, %v8302_v21 }
 0xf04   : > { %v7592_v54 = vpop.f32.mrf.mxu1 }
 0xf05   : > { %v7593_v38 = vadd.f32 %v8302_v21, %v7592_v54 }
 0xf06   : > { %v8987_v17 = vpop.f32.mrf.mxu1 }
 0xf07   : > { %v7604_v41 = vadd.f32 %v8987_v17, %v8302_v21 }
 0xf08   : > { %v7595_v63 = vpop.f32.mrf.mxu1 }
 0xf09   : > { %v8457_v4 = vpack.c.bf16 %v7604_v41, %v7601_v8  ;;  %v7596_v40 = vadd.f32 %v8302_v21, %v7595_v63 }
 0xf0b   : > { %8489 = vst [vmem:[%s10235_s13 + $0x8] sm:$0xff] %v8457_v4   ;;  %v8452_v44 = vpack.c.bf16 %v7596_v40, %v7593_v38 }
 0xf0d   : > { %8453 = vst [vmem:[%s10235_s13] sm:$0xff] %v8452_v44  }
 0xf12   : > { %v8990_v18 = vpop.f32.mrf.mxu1 }
 0xf13   : > { %v7617_v27 = vadd.f32 %v8990_v18, %v8302_v21 }
 0xf14   : > { %v7608_v3 = vpop.f32.mrf.mxu1 }
 0xf15   : > { %v7609_v20 = vadd.f32 %v8302_v21, %v7608_v3 }
 0xf16   : > { %v8991_v60 = vpop.f32.mrf.mxu1 }
 0xf17   : > { %v7620_v1 = vadd.f32 %v8991_v60, %v8302_v21 }
 0xf18   : > { %v7611_v36 = vpop.f32.mrf.mxu1 }
 0xf19   : > { %v8467_v59 = vpack.c.bf16 %v7620_v1, %v7617_v27  ;;  %v7612_v29 = vadd.f32 %v8302_v21, %v7611_v36 }
 0xf1b   : > { %8491 = vst [vmem:[%s10235_s13 + $0x18] sm:$0xff] %v8467_v59   ;;  %v8462_v23 = vpack.c.bf16 %v7612_v29, %v7609_v20 }
 0xf1d   : > { %8490 = vst [vmem:[%s10235_s13 + $0x10] sm:$0xff] %v8462_v23  }
 0xf4c   : > { %v8994_v48 = vpop.f32.mrf.mxu1 }
 0xf4d   : > { %v7633_v57 = vadd.f32 %v8994_v48, %v8302_v21 }
 0xf4e   : > { %v7624_v30 = vpop.f32.mrf.mxu1 }
 0xf4f   : > { %v7625_v49 = vadd.f32 %v8302_v21, %v7624_v30 }
 0xf50   : > { %v8995_v6 = vpop.f32.mrf.mxu1 }
 0xf51   : > { %v7636_v61 = vadd.f32 %v8995_v6, %v8302_v21 }
 0xf52   : > { %v7627_v15 = vpop.f32.mrf.mxu1 }
 0xf53   : > { %v8477_v42 = vpack.c.bf16 %v7636_v61, %v7633_v57  ;;  %v7628_v50 = vadd.f32 %v8302_v21, %v7627_v15 }
 0xf55   : > { %8493 = vst [vmem:[%s10235_s13 + $0x28] sm:$0xff] %v8477_v42   ;;  %v8472_v35 = vpack.c.bf16 %v7628_v50, %v7625_v49 }
 0xf57   : > { %8492 = vst [vmem:[%s10235_s13 + $0x20] sm:$0xff] %v8472_v35  }
 0xf63   : > { %v8998_v14 = vpop.f32.mrf.mxu1 }
 0xf64   : > { %v7649_v32 = vadd.f32 %v8998_v14, %v8302_v21 }
 0xf65   : > { %v7640_v31 = vpop.f32.mrf.mxu1 }
 0xf66   : > { %v7641_v16 = vadd.f32 %v8302_v21, %v7640_v31 }
 0xf67   : > { %v8999_v52 = vpop.f32.mrf.mxu1 }
 0xf68   : > { %v7652_v53 = vadd.f32 %v8999_v52, %v8302_v21 }
 0xf69   : > { %v7643_v45 = vpop.f32.mrf.mxu1 }
 0xf6a   : > { %v8487_v37 = vpack.c.bf16 %v7652_v53, %v7649_v32  ;;  %v7644_v39 = vadd.f32 %v8302_v21, %v7643_v45 }
 0xf6c   : > { %8495 = vst [vmem:[%s10235_s13 + $0x38] sm:$0xff] %v8487_v37   ;;  %v8482_v47 = vpack.c.bf16 %v7644_v39, %v7641_v16 }
 0xf6e   : > { %8494 = vst [vmem:[%s10235_s13 + $0x30] sm:$0xff] %v8482_v47  }
 0xf6f   : > { %9998 = shalt.err (!%p9995_p7)
}
 0xf70   : > { %s9999_s13 = scalar_lea.hbm %s16616_s30, 1024  ;;  %s10003_s22 = scalar_lea.hbm %s16682_s8, 4096 }
 0xf71   : > { %p10000_p9 = scmp.ne.s32.totalorder %s16616_s30, %s9999_s13  ;;  %p10004_p12 = scmp.lt.s32.totalorder %s16616_s30, %s16682_s8 }
 0xf72   : > { %p10005_p13 = scmp.lt.s32.totalorder %s10003_s22, %s9999_s13 }
 0xf73   : > { %p10001_p10 = pnand %p10000_p9, %p10195_p3 }
 0xf74   : > { %p10006_p0 = por %p10005_p13, %p10004_p12 }
 0xf75   : > { %p10002_p11 = pneg %p10001_p10 }
 0xf77   : > { %p10007_p1 = pnand %p10006_p0, %p10002_p11 }
 0xf79   : > { %10010 = shalt.err (!%p10007_p1)
}
 0xf7a   : > { %s10088_s18 = smov 4  }
 0xf7b   : > { %9048 = dma.vmem_to_hbm [thread:$0]  (%p10195_p3), %s16610_s29, 1024, %s16616_s30, %s16621_s15, %s10084_s11, %s10084_s11, %s10088_s18  }
 0xf7c PF: > { %s18006_s16 = sld [smem:[#allocation6_spill]]  ;;  %p9054_p2 = scmp.ge.s32.totalorder %s10077_s20, 2 }
 0xf7e   : > { %p9051_p4 = pnand %p9054_p2, %p10204_p8 }
 0xf80   : > { %p9052_p5 = pneg %p9051_p4 }
 0xf82   : > { %s7782_s19 = sand.u32 1, %s18006_s16  }
 0xf83   : > { %s7783_s23 = scalar_lea.sflag [#allocation4], %s7782_s19 }
 0xf84   : > { %10044 = dma.done.wait (%p9052_p5), %s7783_s23, 1024  }
 0xf85   : > { %10046 = vsyncadd (%p9052_p5), %s7783_s23, 4294966272  ;;  %s24_s20 = sadd.s32 1, %s10077_s20   ;;  %s18008_s26 = sld [smem:[#allocation7_spill]] }
 0xf86   : > { %p21_p6 = scmp.ge.s32.totalorder %s24_s20, 6   ;;  %s18009_s15 = sld [smem:[#allocation13_spill]] }
 0xf87   : > { %s18010_s16 = sld [smem:[#allocation8_spill]]  ;;  %s18014_s13 = smov %s10053_s14 }
 0xf88   : > { %s18011_s17 = sld [smem:[#allocation9_spill]]  ;;  %23 = sbr.rel (!%p21_p6) target bundleno = 5 (0x5), region = 128 }
 0xf89   : > { %s18012_s18 = sld [smem:[#allocation10_spill]] }
 0xf8a   : > { %s18013_s19 = sld [smem:[#allocation11_spill]] }
 0xf8b   : > { %s18015_s14 = smov %s18008_s26 }
 0xf8d   :  { %7804 = vsyncpa [#allocation4], 1 }
 0xf8e   :  { %7806 = vsyncpa [#allocation4 + $0x1], 1 }

</bundles_post_ra>
